<compile_context>
chip_gen: v7x
topology: tpu7x:2x2x1
jax: 0.10.0
libtpu: 0.0.40
codegen_flags: <defaults>
</compile_context>

<pallas_src>
import functools

import jax
import jax.numpy as jnp
from jax import lax
from jax.experimental import pallas as pl
from jax.experimental.pallas import tpu as pltpu


def _basic_block_kernel(xpad_ref, xres_ref, w1_ref, s1_ref, b1_ref,
                        w2_ref, s2_ref, b2_ref, out_ref,
                        slab_ref, mid_ref, *, H, W, CP, RP):
    """One batch element per grid step.  All channel dims padded to CP.

    xpad_ref : (1, H+2, W+2, CP) bf16   spatially zero-padded input (NHWC)
    xres_ref : (1, H,   W,   CP) f32    unpadded input (residual path)
    w1_ref   : (9*CP, CP) bf16          conv1 weights, im2col (tap-major rows)
    s1_ref   : (1, CP) f32              folded BN1 scale
    b1_ref   : (1, CP) f32              folded BN1 bias
    w2_ref/s2_ref/b2_ref : conv2 / BN2 analogues
    out_ref  : (1, H, W, CP) f32
    slab_ref : VMEM (H*W, 9*CP) bf16    im2col slab shared by both convs
    mid_ref  : VMEM (H+2, W+2, CP) bf16 padded intermediate (conv2 input)
    """
    Hp, Wp = H + 2, W + 2
    HW = H * W
    chunk = RP * W                 # matmul rows per chunk (multiple of W)
    n_chunks = HW // chunk

    # ---- zero only the 1-pixel halo of the intermediate; the interior is
    # fully overwritten below.  Done every step (cheap strips) so it is safe
    # regardless of how the parallel grid axis is sharded across cores. ----
    zrow = jnp.zeros((1, Wp, CP), jnp.bfloat16)
    zcol = jnp.zeros((Hp, 1, CP), jnp.bfloat16)
    mid_ref[0:1, :, :] = zrow
    mid_ref[Hp - 1:Hp, :, :] = zrow
    mid_ref[:, 0:1, :] = zcol
    mid_ref[:, Wp - 1:Wp, :] = zcol

    # ---- conv1: build (H*W, 9*CP) bf16 im2col slab (lane-aligned column
    # blocks of width CP=128), then one deep-K MXU matmul per row chunk. ----
    for dh in range(3):
        for dw in range(3):
            t = dh * 3 + dw
            win = xpad_ref[0, dh:dh + H, dw:dw + W, :]        # (H, W, CP) bf16
            slab_ref[:, t * CP:(t + 1) * CP] = win.reshape(HW, CP)

    def conv1_chunk(r, carry):
        acc = jnp.dot(slab_ref[pl.ds(r * chunk, chunk), :], w1_ref[...],
                      preferred_element_type=jnp.float32)      # (chunk, CP)
        y = jnp.maximum(acc * s1_ref[...] + b1_ref[...], 0.0)
        # bn1 + relu written straight into the interior of the halo'd scratch
        mid_ref[pl.ds(1 + r * RP, RP), 1:W + 1, :] = (
            y.reshape(RP, W, CP).astype(jnp.bfloat16))
        return carry

    lax.fori_loop(0, n_chunks, conv1_chunk, 0, unroll=True)

    # ---- conv2: rebuild the slab from the padded intermediate ----
    for dh in range(3):
        for dw in range(3):
            t = dh * 3 + dw
            win = mid_ref[dh:dh + H, dw:dw + W, :]             # (H, W, CP) bf16
            slab_ref[:, t * CP:(t + 1) * CP] = win.reshape(HW, CP)

    def conv2_chunk(r, carry):
        acc = jnp.dot(slab_ref[pl.ds(r * chunk, chunk), :], w2_ref[...],
                      preferred_element_type=jnp.float32)      # (chunk, CP)
        y = acc * s2_ref[...] + b2_ref[...]
        res = xres_ref[0, pl.ds(r * RP, RP), :, :].reshape(chunk, CP)
        out = jnp.maximum(y + res.astype(jnp.float32), 0.0)
        out_ref[0, pl.ds(r * RP, RP), :, :] = (
            out.reshape(RP, W, CP).astype(out_ref.dtype))
        return carry

    lax.fori_loop(0, n_chunks, conv2_chunk, 0, unroll=True)


def basic_block_forward(x_nchw, params, eps=1e-5):
    """BasicBlock forward. x_nchw: (N, C, H, W) float32 (PyTorch convention)."""
    w1, g1, be1, m1, v1, w2, g2, be2, m2, v2 = params
    N, C, H, W = x_nchw.shape
    Cout = w1.shape[0]
    assert Cout == C and w1.shape == (Cout, C, 3, 3)

    LANE = 128
    CP = ((C + LANE - 1) // LANE) * LANE          # lane-dense channel padding
    Hp, Wp = H + 2, W + 2

    # spatial rows per matmul chunk: ~128 matmul rows, must divide H
    RP = max(1, min(H, 128 // max(W, 1)))
    while H % RP:
        RP -= 1

    # ---- glue: layout changes, channel padding, BN folding, weight im2col ----
    x_nhwc = jnp.transpose(x_nchw, (0, 2, 3, 1))                      # NHWC
    x_res = jnp.pad(x_nhwc, ((0, 0), (0, 0), (0, 0), (0, CP - C)))    # f32
    x_pad = jnp.pad(x_res, ((0, 0), (1, 1), (1, 1), (0, 0))).astype(jnp.bfloat16)

    def prep_w(w):
        # (O, I, 3, 3) -> HWIO -> pad channels -> (9*CP, CP) bf16, tap-major
        w_hwio = jnp.transpose(w, (2, 3, 1, 0))
        w_hwio = jnp.pad(w_hwio, ((0, 0), (0, 0), (0, CP - C), (0, CP - Cout)))
        return w_hwio.reshape(9 * CP, CP).astype(jnp.bfloat16)

    def fold_bn(g, b, m, v):
        s = g / jnp.sqrt(v + eps)
        bias = b - m * s
        s = jnp.pad(s, (0, CP - Cout)).reshape(1, CP).astype(jnp.float32)
        bias = jnp.pad(bias, (0, CP - Cout)).reshape(1, CP).astype(jnp.float32)
        return s, bias

    w1_p, w2_p = prep_w(w1), prep_w(w2)
    s1, b1 = fold_bn(g1, be1, m1, v1)
    s2, b2 = fold_bn(g2, be2, m2, v2)

    kernel = functools.partial(_basic_block_kernel, H=H, W=W, CP=CP, RP=RP)

    out_nhwc = pl.pallas_call(
        kernel,
        out_shape=jax.ShapeDtypeStruct((N, H, W, CP), jnp.float32),
        grid_spec=pltpu.PrefetchScalarGridSpec(
            num_scalar_prefetch=0,
            grid=(N,),
            in_specs=[
                pl.BlockSpec((1, Hp, Wp, CP), lambda b: (b, 0, 0, 0)),
                pl.BlockSpec((1, H, W, CP), lambda b: (b, 0, 0, 0)),
                pl.BlockSpec((9 * CP, CP), lambda b: (0, 0)),
                pl.BlockSpec((1, CP), lambda b: (0, 0)),
                pl.BlockSpec((1, CP), lambda b: (0, 0)),
                pl.BlockSpec((9 * CP, CP), lambda b: (0, 0)),
                pl.BlockSpec((1, CP), lambda b: (0, 0)),
                pl.BlockSpec((1, CP), lambda b: (0, 0)),
            ],
            out_specs=pl.BlockSpec((1, H, W, CP), lambda b: (b, 0, 0, 0)),
            scratch_shapes=[
                pltpu.VMEM((H * W, 9 * CP), jnp.bfloat16),   # im2col slab
                pltpu.VMEM((Hp, Wp, CP), jnp.bfloat16),      # padded intermediate
            ],
        ),
        compiler_params=pltpu.CompilerParams(
            dimension_semantics=("parallel",),
            vmem_limit_bytes=32 * 1024 * 1024),
    )(x_pad, x_res, w1_p, s1, b1, w2_p, s2, b2)

    out = out_nhwc[..., :C]                        # drop channel padding
    return jnp.transpose(out, (0, 3, 1, 2))        # back to NCHW


def _reference_forward(x, params, eps=1e-5):
    """Pure-JAX reference (NCHW, matches PyTorch eval-mode BasicBlock)."""
    w1, g1, be1, m1, v1, w2, g2, be2, m2, v2 = params

    def conv(x, w):
        return jax.lax.conv_general_dilated(
            x, w, window_strides=(1, 1), padding="SAME",
            dimension_numbers=("NCHW", "OIHW", "NCHW"))

    def bn(x, g, b, m, v):
        sh = (1, -1, 1, 1)
        return (x - m.reshape(sh)) / jnp.sqrt(v.reshape(sh) + eps) \
            * g.reshape(sh) + b.reshape(sh)

    out = jax.nn.relu(bn(conv(x, w1), g1, be1, m1, v1))
    out = bn(conv(out, w2), g2, be2, m2, v2)
    return jax.nn.relu(out + x)


if __name__ == "__main__":
    # Small shapes: batch=2, channels=4, spatial=16 (inplanes == planes, stride=1)
    N, C, H, W = 2, 4, 16, 16
    key = jax.random.PRNGKey(0)
    ks = jax.random.split(key, 11)

    x = jax.random.normal(ks[0], (N, C, H, W), jnp.float32)

    w1 = jax.random.normal(ks[1], (C, C, 3, 3), jnp.float32) * 0.1
    g1 = 1.0 + 0.1 * jax.random.normal(ks[2], (C,), jnp.float32)
    be1 = 0.1 * jax.random.normal(ks[3], (C,), jnp.float32)
    m1 = 0.1 * jax.random.normal(ks[4], (C,), jnp.float32)
    v1 = 1.0 + 0.1 * jax.random.uniform(ks[5], (C,), jnp.float32)

    w2 = jax.random.normal(ks[6], (C, C, 3, 3), jnp.float32) * 0.1
    g2 = 1.0 + 0.1 * jax.random.normal(ks[7], (C,), jnp.float32)
    be2 = 0.1 * jax.random.normal(ks[8], (C,), jnp.float32)
    m2 = 0.1 * jax.random.normal(ks[9], (C,), jnp.float32)
    v2 = 1.0 + 0.1 * jax.random.uniform(ks[10], (C,), jnp.float32)

    params = (w1, g1, be1, m1, v1, w2, g2, be2, m2, v2)

    out = basic_block_forward(x, params)
    out = jax.block_until_ready(out)

    ref = _reference_forward(x, params)
    assert out.shape == (N, C, H, W)
    # bf16 MXU operands (f32 accumulation): tolerance relaxed vs. pure-f32.
    assert jnp.allclose(out, ref, atol=5e-2, rtol=5e-2), \
        f"max abs err {jnp.max(jnp.abs(out - ref))}"

    print("KERNEL_OK")
</pallas_src>

<mosaic_0001>
module attributes {stable_mosaic.version = 11 : i64} {
  func.func @_basic_block_kernel(%arg0: i32, %arg1: memref<1x18x18x128xbf16, #tpu.memory_space<vmem>>, %arg2: memref<1x16x16x128xf32, #tpu.memory_space<vmem>>, %arg3: memref<1152x128xbf16, #tpu.memory_space<vmem>>, %arg4: memref<1x128xf32, #tpu.memory_space<vmem>>, %arg5: memref<1x128xf32, #tpu.memory_space<vmem>>, %arg6: memref<1152x128xbf16, #tpu.memory_space<vmem>>, %arg7: memref<1x128xf32, #tpu.memory_space<vmem>>, %arg8: memref<1x128xf32, #tpu.memory_space<vmem>>, %arg9: memref<1x16x16x128xf32, #tpu.memory_space<vmem>>, %arg10: memref<256x1152xbf16, #tpu.memory_space<vmem>>, %arg11: memref<18x18x128xbf16, #tpu.memory_space<vmem>>) attributes {dimension_semantics = [#tpu.dimension_semantics<parallel>], iteration_bounds = array<i64: 2>, scalar_prefetch = 0 : i64, scratch_operands = 2 : i64, tpu.core_type = #tpu.core_type<tc>, window_params = [{transform_indices = @transform_0, window_bounds = array<i64: 1, 18, 18, 128>}, {transform_indices = @transform_1, window_bounds = array<i64: 1, 16, 16, 128>}, {pipeline_mode = #tpu.pipeline_mode<synchronous>, transform_indices = @transform_2, window_bounds = array<i64: 1152, 128>}, {pipeline_mode = #tpu.pipeline_mode<synchronous>, transform_indices = @transform_3, window_bounds = array<i64: 1, 128>}, {pipeline_mode = #tpu.pipeline_mode<synchronous>, transform_indices = @transform_4, window_bounds = array<i64: 1, 128>}, {pipeline_mode = #tpu.pipeline_mode<synchronous>, transform_indices = @transform_5, window_bounds = array<i64: 1152, 128>}, {pipeline_mode = #tpu.pipeline_mode<synchronous>, transform_indices = @transform_6, window_bounds = array<i64: 1, 128>}, {pipeline_mode = #tpu.pipeline_mode<synchronous>, transform_indices = @transform_7, window_bounds = array<i64: 1, 128>}, {transform_indices = @transform_8, window_bounds = array<i64: 1, 16, 16, 128>}]} {
    %cst = arith.constant 0.000000e+00 : bf16
    %0 = vector.broadcast %cst : bf16 to vector<1x18x128xbf16>
    %cst_0 = arith.constant 0.000000e+00 : bf16
    %1 = vector.broadcast %cst_0 : bf16 to vector<18x1x128xbf16>
    %c0 = arith.constant 0 : index
    %c0_1 = arith.constant 0 : index
    %c0_2 = arith.constant 0 : index
    %2 = vector.load %arg11[%c0, %c0_1, %c0_2] : memref<18x18x128xbf16, #tpu.memory_space<vmem>>, vector<1x18x128xbf16>
    tpu.vector_store %arg11[%c0, %c0_1, %c0_2], %0 {strides = array<i32>} : memref<18x18x128xbf16, #tpu.memory_space<vmem>>, vector<1x18x128xbf16>,
    %c17 = arith.constant 17 : index
    %c0_3 = arith.constant 0 : index
    %c0_4 = arith.constant 0 : index
    %3 = vector.load %arg11[%c17, %c0_3, %c0_4] : memref<18x18x128xbf16, #tpu.memory_space<vmem>>, vector<1x18x128xbf16>
    tpu.vector_store %arg11[%c17, %c0_3, %c0_4], %0 {strides = array<i32>} : memref<18x18x128xbf16, #tpu.memory_space<vmem>>, vector<1x18x128xbf16>,
    %c0_5 = arith.constant 0 : index
    %c0_6 = arith.constant 0 : index
    %c0_7 = arith.constant 0 : index
    %4 = vector.load %arg11[%c0_5, %c0_6, %c0_7] : memref<18x18x128xbf16, #tpu.memory_space<vmem>>, vector<18x1x128xbf16>
    tpu.vector_store %arg11[%c0_5, %c0_6, %c0_7], %1 {strides = array<i32>} : memref<18x18x128xbf16, #tpu.memory_space<vmem>>, vector<18x1x128xbf16>,
    %c0_8 = arith.constant 0 : index
    %c17_9 = arith.constant 17 : index
    %c0_10 = arith.constant 0 : index
    %5 = vector.load %arg11[%c0_8, %c17_9, %c0_10] : memref<18x18x128xbf16, #tpu.memory_space<vmem>>, vector<18x1x128xbf16>
    tpu.vector_store %arg11[%c0_8, %c17_9, %c0_10], %1 {strides = array<i32>} : memref<18x18x128xbf16, #tpu.memory_space<vmem>>, vector<18x1x128xbf16>,
    %c0_11 = arith.constant 0 : index
    %c0_12 = arith.constant 0 : index
    %c0_13 = arith.constant 0 : index
    %c0_14 = arith.constant 0 : index
    %6 = vector.load %arg1[%c0_11, %c0_12, %c0_13, %c0_14] : memref<1x18x18x128xbf16, #tpu.memory_space<vmem>>, vector<1x16x16x128xbf16>
    %7 = vector.shape_cast %6 : vector<1x16x16x128xbf16> to vector<16x16x128xbf16>
    %8 = vector.shape_cast %7 : vector<16x16x128xbf16> to vector<256x128xbf16>
    %c0_15 = arith.constant 0 : index
    %c0_16 = arith.constant 0 : index
    %9 = vector.load %arg10[%c0_15, %c0_16] : memref<256x1152xbf16, #tpu.memory_space<vmem>>, vector<256x128xbf16>
    tpu.vector_store %arg10[%c0_15, %c0_16], %8 {strides = array<i32>} : memref<256x1152xbf16, #tpu.memory_space<vmem>>, vector<256x128xbf16>,
    %c0_17 = arith.constant 0 : index
    %c0_18 = arith.constant 0 : index
    %c1 = arith.constant 1 : index
    %c0_19 = arith.constant 0 : index
    %10 = vector.load %arg1[%c0_17, %c0_18, %c1, %c0_19] : memref<1x18x18x128xbf16, #tpu.memory_space<vmem>>, vector<1x16x16x128xbf16>
    %11 = vector.shape_cast %10 : vector<1x16x16x128xbf16> to vector<16x16x128xbf16>
    %12 = vector.shape_cast %11 : vector<16x16x128xbf16> to vector<256x128xbf16>
    %c0_20 = arith.constant 0 : index
    %c128 = arith.constant 128 : index
    %13 = vector.load %arg10[%c0_20, %c128] : memref<256x1152xbf16, #tpu.memory_space<vmem>>, vector<256x128xbf16>
    tpu.vector_store %arg10[%c0_20, %c128], %12 {strides = array<i32>} : memref<256x1152xbf16, #tpu.memory_space<vmem>>, vector<256x128xbf16>,
    %c0_21 = arith.constant 0 : index
    %c0_22 = arith.constant 0 : index
    %c2 = arith.constant 2 : index
    %c0_23 = arith.constant 0 : index
    %14 = vector.load %arg1[%c0_21, %c0_22, %c2, %c0_23] : memref<1x18x18x128xbf16, #tpu.memory_space<vmem>>, vector<1x16x16x128xbf16>
    %15 = vector.shape_cast %14 : vector<1x16x16x128xbf16> to vector<16x16x128xbf16>
    %16 = vector.shape_cast %15 : vector<16x16x128xbf16> to vector<256x128xbf16>
    %c0_24 = arith.constant 0 : index
    %c256 = arith.constant 256 : index
    %17 = vector.load %arg10[%c0_24, %c256] : memref<256x1152xbf16, #tpu.memory_space<vmem>>, vector<256x128xbf16>
    tpu.vector_store %arg10[%c0_24, %c256], %16 {strides = array<i32>} : memref<256x1152xbf16, #tpu.memory_space<vmem>>, vector<256x128xbf16>,
    %c0_25 = arith.constant 0 : index
    %c1_26 = arith.constant 1 : index
    %c0_27 = arith.constant 0 : index
    %c0_28 = arith.constant 0 : index
    %18 = vector.load %arg1[%c0_25, %c1_26, %c0_27, %c0_28] : memref<1x18x18x128xbf16, #tpu.memory_space<vmem>>, vector<1x16x16x128xbf16>
    %19 = vector.shape_cast %18 : vector<1x16x16x128xbf16> to vector<16x16x128xbf16>
    %20 = vector.shape_cast %19 : vector<16x16x128xbf16> to vector<256x128xbf16>
    %c0_29 = arith.constant 0 : index
    %c384 = arith.constant 384 : index
    %21 = vector.load %arg10[%c0_29, %c384] : memref<256x1152xbf16, #tpu.memory_space<vmem>>, vector<256x128xbf16>
    tpu.vector_store %arg10[%c0_29, %c384], %20 {strides = array<i32>} : memref<256x1152xbf16, #tpu.memory_space<vmem>>, vector<256x128xbf16>,
    %c0_30 = arith.constant 0 : index
    %c1_31 = arith.constant 1 : index
    %c1_32 = arith.constant 1 : index
    %c0_33 = arith.constant 0 : index
    %22 = vector.load %arg1[%c0_30, %c1_31, %c1_32, %c0_33] : memref<1x18x18x128xbf16, #tpu.memory_space<vmem>>, vector<1x16x16x128xbf16>
    %23 = vector.shape_cast %22 : vector<1x16x16x128xbf16> to vector<16x16x128xbf16>
    %24 = vector.shape_cast %23 : vector<16x16x128xbf16> to vector<256x128xbf16>
    %c0_34 = arith.constant 0 : index
    %c512 = arith.constant 512 : index
    %25 = vector.load %arg10[%c0_34, %c512] : memref<256x1152xbf16, #tpu.memory_space<vmem>>, vector<256x128xbf16>
    tpu.vector_store %arg10[%c0_34, %c512], %24 {strides = array<i32>} : memref<256x1152xbf16, #tpu.memory_space<vmem>>, vector<256x128xbf16>,
    %c0_35 = arith.constant 0 : index
    %c1_36 = arith.constant 1 : index
    %c2_37 = arith.constant 2 : index
    %c0_38 = arith.constant 0 : index
    %26 = vector.load %arg1[%c0_35, %c1_36, %c2_37, %c0_38] : memref<1x18x18x128xbf16, #tpu.memory_space<vmem>>, vector<1x16x16x128xbf16>
    %27 = vector.shape_cast %26 : vector<1x16x16x128xbf16> to vector<16x16x128xbf16>
    %28 = vector.shape_cast %27 : vector<16x16x128xbf16> to vector<256x128xbf16>
    %c0_39 = arith.constant 0 : index
    %c640 = arith.constant 640 : index
    %29 = vector.load %arg10[%c0_39, %c640] : memref<256x1152xbf16, #tpu.memory_space<vmem>>, vector<256x128xbf16>
    tpu.vector_store %arg10[%c0_39, %c640], %28 {strides = array<i32>} : memref<256x1152xbf16, #tpu.memory_space<vmem>>, vector<256x128xbf16>,
    %c0_40 = arith.constant 0 : index
    %c2_41 = arith.constant 2 : index
    %c0_42 = arith.constant 0 : index
    %c0_43 = arith.constant 0 : index
    %30 = vector.load %arg1[%c0_40, %c2_41, %c0_42, %c0_43] : memref<1x18x18x128xbf16, #tpu.memory_space<vmem>>, vector<1x16x16x128xbf16>
    %31 = vector.shape_cast %30 : vector<1x16x16x128xbf16> to vector<16x16x128xbf16>
    %32 = vector.shape_cast %31 : vector<16x16x128xbf16> to vector<256x128xbf16>
    %c0_44 = arith.constant 0 : index
    %c768 = arith.constant 768 : index
    %33 = vector.load %arg10[%c0_44, %c768] : memref<256x1152xbf16, #tpu.memory_space<vmem>>, vector<256x128xbf16>
    tpu.vector_store %arg10[%c0_44, %c768], %32 {strides = array<i32>} : memref<256x1152xbf16, #tpu.memory_space<vmem>>, vector<256x128xbf16>,
    %c0_45 = arith.constant 0 : index
    %c2_46 = arith.constant 2 : index
    %c1_47 = arith.constant 1 : index
    %c0_48 = arith.constant 0 : index
    %34 = vector.load %arg1[%c0_45, %c2_46, %c1_47, %c0_48] : memref<1x18x18x128xbf16, #tpu.memory_space<vmem>>, vector<1x16x16x128xbf16>
    %35 = vector.shape_cast %34 : vector<1x16x16x128xbf16> to vector<16x16x128xbf16>
    %36 = vector.shape_cast %35 : vector<16x16x128xbf16> to vector<256x128xbf16>
    %c0_49 = arith.constant 0 : index
    %c896 = arith.constant 896 : index
    %37 = vector.load %arg10[%c0_49, %c896] : memref<256x1152xbf16, #tpu.memory_space<vmem>>, vector<256x128xbf16>
    tpu.vector_store %arg10[%c0_49, %c896], %36 {strides = array<i32>} : memref<256x1152xbf16, #tpu.memory_space<vmem>>, vector<256x128xbf16>,
    %c0_50 = arith.constant 0 : index
    %c2_51 = arith.constant 2 : index
    %c2_52 = arith.constant 2 : index
    %c0_53 = arith.constant 0 : index
    %38 = vector.load %arg1[%c0_50, %c2_51, %c2_52, %c0_53] : memref<1x18x18x128xbf16, #tpu.memory_space<vmem>>, vector<1x16x16x128xbf16>
    %39 = vector.shape_cast %38 : vector<1x16x16x128xbf16> to vector<16x16x128xbf16>
    %40 = vector.shape_cast %39 : vector<16x16x128xbf16> to vector<256x128xbf16>
    %c0_54 = arith.constant 0 : index
    %c1024 = arith.constant 1024 : index
    %41 = vector.load %arg10[%c0_54, %c1024] : memref<256x1152xbf16, #tpu.memory_space<vmem>>, vector<256x128xbf16>
    tpu.vector_store %arg10[%c0_54, %c1024], %40 {strides = array<i32>} : memref<256x1152xbf16, #tpu.memory_space<vmem>>, vector<256x128xbf16>,
    %c0_i32 = arith.constant 0 : i32
    %c128_i32 = arith.constant 128 : i32
    %42 = arith.muli %c0_i32, %c128_i32 : i32
    %43 = arith.index_cast %42 : i32 to index
    %c0_55 = arith.constant 0 : index
    %44 = vector.load %arg10[%43, %c0_55] : memref<256x1152xbf16, #tpu.memory_space<vmem>>, vector<128x1152xbf16>
    %c0_56 = arith.constant 0 : index
    %c0_57 = arith.constant 0 : index
    %45 = vector.load %arg3[%c0_56, %c0_57] : memref<1152x128xbf16, #tpu.memory_space<vmem>>, vector<1152x128xbf16>
    %cst_58 = arith.constant dense<0.000000e+00> : vector<128x128xf32>
    %46 = tpu.matmul %44, %45, %cst_58 {dimension_numbers = #tpu.dot_dimension_numbers<[1], [0], [0], [1], [0, 0, 1, 1], [], []>} : vector<128x1152xbf16>, vector<1152x128xbf16>, vector<128x128xf32> -> vector<128x128xf32>
    %c0_59 = arith.constant 0 : index
    %c0_60 = arith.constant 0 : index
    %47 = vector.load %arg4[%c0_59, %c0_60] : memref<1x128xf32, #tpu.memory_space<vmem>>, vector<1x128xf32>
    %48 = vector.broadcast %47 : vector<1x128xf32> to vector<128x128xf32>
    %49 = arith.mulf %46, %48 : vector<128x128xf32>
    %c0_61 = arith.constant 0 : index
    %c0_62 = arith.constant 0 : index
    %50 = vector.load %arg5[%c0_61, %c0_62] : memref<1x128xf32, #tpu.memory_space<vmem>>, vector<1x128xf32>
    %51 = vector.broadcast %50 : vector<1x128xf32> to vector<128x128xf32>
    %52 = arith.addf %49, %51 : vector<128x128xf32>
    %cst_63 = arith.constant 0.000000e+00 : f32
    %53 = vector.broadcast %cst_63 : f32 to vector<128x128xf32>
    %54 = arith.maximumf %52, %53 : vector<128x128xf32>
    %55 = vector.shape_cast %54 : vector<128x128xf32> to vector<8x16x128xf32>
    %56 = arith.truncf %55 : vector<8x16x128xf32> to vector<8x16x128xbf16>
    %c8_i32 = arith.constant 8 : i32
    %57 = arith.muli %c0_i32, %c8_i32 : i32
    %c1_i32 = arith.constant 1 : i32
    %58 = arith.addi %c1_i32, %57 : i32
    %59 = arith.index_cast %58 : i32 to index
    %c1_64 = arith.constant 1 : index
    %c0_65 = arith.constant 0 : index
    %60 = vector.load %arg11[%59, %c1_64, %c0_65] : memref<18x18x128xbf16, #tpu.memory_space<vmem>>, vector<8x16x128xbf16>
    tpu.vector_store %arg11[%59, %c1_64, %c0_65], %56 {strides = array<i32>} : memref<18x18x128xbf16, #tpu.memory_space<vmem>>, vector<8x16x128xbf16>,
    %c1_i32_66 = arith.constant 1 : i32
    %c128_i32_67 = arith.constant 128 : i32
    %61 = arith.muli %c1_i32_66, %c128_i32_67 : i32
    %62 = arith.index_cast %61 : i32 to index
    %c0_68 = arith.constant 0 : index
    %63 = vector.load %arg10[%62, %c0_68] : memref<256x1152xbf16, #tpu.memory_space<vmem>>, vector<128x1152xbf16>
    %c0_69 = arith.constant 0 : index
    %c0_70 = arith.constant 0 : index
    %64 = vector.load %arg3[%c0_69, %c0_70] : memref<1152x128xbf16, #tpu.memory_space<vmem>>, vector<1152x128xbf16>
    %cst_71 = arith.constant dense<0.000000e+00> : vector<128x128xf32>
    %65 = tpu.matmul %63, %64, %cst_71 {dimension_numbers = #tpu.dot_dimension_numbers<[1], [0], [0], [1], [0, 0, 1, 1], [], []>} : vector<128x1152xbf16>, vector<1152x128xbf16>, vector<128x128xf32> -> vector<128x128xf32>
    %c0_72 = arith.constant 0 : index
    %c0_73 = arith.constant 0 : index
    %66 = vector.load %arg4[%c0_72, %c0_73] : memref<1x128xf32, #tpu.memory_space<vmem>>, vector<1x128xf32>
    %67 = vector.broadcast %66 : vector<1x128xf32> to vector<128x128xf32>
    %68 = arith.mulf %65, %67 : vector<128x128xf32>
    %c0_74 = arith.constant 0 : index
    %c0_75 = arith.constant 0 : index
    %69 = vector.load %arg5[%c0_74, %c0_75] : memref<1x128xf32, #tpu.memory_space<vmem>>, vector<1x128xf32>
    %70 = vector.broadcast %69 : vector<1x128xf32> to vector<128x128xf32>
    %71 = arith.addf %68, %70 : vector<128x128xf32>
    %cst_76 = arith.constant 0.000000e+00 : f32
    %72 = vector.broadcast %cst_76 : f32 to vector<128x128xf32>
    %73 = arith.maximumf %71, %72 : vector<128x128xf32>
    %74 = vector.shape_cast %73 : vector<128x128xf32> to vector<8x16x128xf32>
    %75 = arith.truncf %74 : vector<8x16x128xf32> to vector<8x16x128xbf16>
    %c8_i32_77 = arith.constant 8 : i32
    %76 = arith.muli %c1_i32_66, %c8_i32_77 : i32
    %c1_i32_78 = arith.constant 1 : i32
    %77 = arith.addi %c1_i32_78, %76 : i32
    %78 = arith.index_cast %77 : i32 to index
    %c1_79 = arith.constant 1 : index
    %c0_80 = arith.constant 0 : index
    %79 = vector.load %arg11[%78, %c1_79, %c0_80] : memref<18x18x128xbf16, #tpu.memory_space<vmem>>, vector<8x16x128xbf16>
    tpu.vector_store %arg11[%78, %c1_79, %c0_80], %75 {strides = array<i32>} : memref<18x18x128xbf16, #tpu.memory_space<vmem>>, vector<8x16x128xbf16>,
    %c2_i32 = arith.constant 2 : i32
    %c0_81 = arith.constant 0 : index
    %c0_82 = arith.constant 0 : index
    %c0_83 = arith.constant 0 : index
    %80 = vector.load %arg11[%c0_81, %c0_82, %c0_83] : memref<18x18x128xbf16, #tpu.memory_space<vmem>>, vector<16x16x128xbf16>
    %81 = vector.shape_cast %80 : vector<16x16x128xbf16> to vector<256x128xbf16>
    %c0_84 = arith.constant 0 : index
    %c0_85 = arith.constant 0 : index
    %82 = vector.load %arg10[%c0_84, %c0_85] : memref<256x1152xbf16, #tpu.memory_space<vmem>>, vector<256x128xbf16>
    tpu.vector_store %arg10[%c0_84, %c0_85], %81 {strides = array<i32>} : memref<256x1152xbf16, #tpu.memory_space<vmem>>, vector<256x128xbf16>,
    %c0_86 = arith.constant 0 : index
    %c1_87 = arith.constant 1 : index
    %c0_88 = arith.constant 0 : index
    %83 = vector.load %arg11[%c0_86, %c1_87, %c0_88] : memref<18x18x128xbf16, #tpu.memory_space<vmem>>, vector<16x16x128xbf16>
    %84 = vector.shape_cast %83 : vector<16x16x128xbf16> to vector<256x128xbf16>
    %c0_89 = arith.constant 0 : index
    %c128_90 = arith.constant 128 : index
    %85 = vector.load %arg10[%c0_89, %c128_90] : memref<256x1152xbf16, #tpu.memory_space<vmem>>, vector<256x128xbf16>
    tpu.vector_store %arg10[%c0_89, %c128_90], %84 {strides = array<i32>} : memref<256x1152xbf16, #tpu.memory_space<vmem>>, vector<256x128xbf16>,
    %c0_91 = arith.constant 0 : index
    %c2_92 = arith.constant 2 : index
    %c0_93 = arith.constant 0 : index
    %86 = vector.load %arg11[%c0_91, %c2_92, %c0_93] : memref<18x18x128xbf16, #tpu.memory_space<vmem>>, vector<16x16x128xbf16>
    %87 = vector.shape_cast %86 : vector<16x16x128xbf16> to vector<256x128xbf16>
    %c0_94 = arith.constant 0 : index
    %c256_95 = arith.constant 256 : index
    %88 = vector.load %arg10[%c0_94, %c256_95] : memref<256x1152xbf16, #tpu.memory_space<vmem>>, vector<256x128xbf16>
    tpu.vector_store %arg10[%c0_94, %c256_95], %87 {strides = array<i32>} : memref<256x1152xbf16, #tpu.memory_space<vmem>>, vector<256x128xbf16>,
    %c1_96 = arith.constant 1 : index
    %c0_97 = arith.constant 0 : index
    %c0_98 = arith.constant 0 : index
    %89 = vector.load %arg11[%c1_96, %c0_97, %c0_98] : memref<18x18x128xbf16, #tpu.memory_space<vmem>>, vector<16x16x128xbf16>
    %90 = vector.shape_cast %89 : vector<16x16x128xbf16> to vector<256x128xbf16>
    %c0_99 = arith.constant 0 : index
    %c384_100 = arith.constant 384 : index
    %91 = vector.load %arg10[%c0_99, %c384_100] : memref<256x1152xbf16, #tpu.memory_space<vmem>>, vector<256x128xbf16>
    tpu.vector_store %arg10[%c0_99, %c384_100], %90 {strides = array<i32>} : memref<256x1152xbf16, #tpu.memory_space<vmem>>, vector<256x128xbf16>,
    %c1_101 = arith.constant 1 : index
    %c1_102 = arith.constant 1 : index
    %c0_103 = arith.constant 0 : index
    %92 = vector.load %arg11[%c1_101, %c1_102, %c0_103] : memref<18x18x128xbf16, #tpu.memory_space<vmem>>, vector<16x16x128xbf16>
    %93 = vector.shape_cast %92 : vector<16x16x128xbf16> to vector<256x128xbf16>
    %c0_104 = arith.constant 0 : index
    %c512_105 = arith.constant 512 : index
    %94 = vector.load %arg10[%c0_104, %c512_105] : memref<256x1152xbf16, #tpu.memory_space<vmem>>, vector<256x128xbf16>
    tpu.vector_store %arg10[%c0_104, %c512_105], %93 {strides = array<i32>} : memref<256x1152xbf16, #tpu.memory_space<vmem>>, vector<256x128xbf16>,
    %c1_106 = arith.constant 1 : index
    %c2_107 = arith.constant 2 : index
    %c0_108 = arith.constant 0 : index
    %95 = vector.load %arg11[%c1_106, %c2_107, %c0_108] : memref<18x18x128xbf16, #tpu.memory_space<vmem>>, vector<16x16x128xbf16>
    %96 = vector.shape_cast %95 : vector<16x16x128xbf16> to vector<256x128xbf16>
    %c0_109 = arith.constant 0 : index
    %c640_110 = arith.constant 640 : index
    %97 = vector.load %arg10[%c0_109, %c640_110] : memref<256x1152xbf16, #tpu.memory_space<vmem>>, vector<256x128xbf16>
    tpu.vector_store %arg10[%c0_109, %c640_110], %96 {strides = array<i32>} : memref<256x1152xbf16, #tpu.memory_space<vmem>>, vector<256x128xbf16>,
    %c2_111 = arith.constant 2 : index
    %c0_112 = arith.constant 0 : index
    %c0_113 = arith.constant 0 : index
    %98 = vector.load %arg11[%c2_111, %c0_112, %c0_113] : memref<18x18x128xbf16, #tpu.memory_space<vmem>>, vector<16x16x128xbf16>
    %99 = vector.shape_cast %98 : vector<16x16x128xbf16> to vector<256x128xbf16>
    %c0_114 = arith.constant 0 : index
    %c768_115 = arith.constant 768 : index
    %100 = vector.load %arg10[%c0_114, %c768_115] : memref<256x1152xbf16, #tpu.memory_space<vmem>>, vector<256x128xbf16>
    tpu.vector_store %arg10[%c0_114, %c768_115], %99 {strides = array<i32>} : memref<256x1152xbf16, #tpu.memory_space<vmem>>, vector<256x128xbf16>,
    %c2_116 = arith.constant 2 : index
    %c1_117 = arith.constant 1 : index
    %c0_118 = arith.constant 0 : index
    %101 = vector.load %arg11[%c2_116, %c1_117, %c0_118] : memref<18x18x128xbf16, #tpu.memory_space<vmem>>, vector<16x16x128xbf16>
    %102 = vector.shape_cast %101 : vector<16x16x128xbf16> to vector<256x128xbf16>
    %c0_119 = arith.constant 0 : index
    %c896_120 = arith.constant 896 : index
    %103 = vector.load %arg10[%c0_119, %c896_120] : memref<256x1152xbf16, #tpu.memory_space<vmem>>, vector<256x128xbf16>
    tpu.vector_store %arg10[%c0_119, %c896_120], %102 {strides = array<i32>} : memref<256x1152xbf16, #tpu.memory_space<vmem>>, vector<256x128xbf16>,
    %c2_121 = arith.constant 2 : index
    %c2_122 = arith.constant 2 : index
    %c0_123 = arith.constant 0 : index
    %104 = vector.load %arg11[%c2_121, %c2_122, %c0_123] : memref<18x18x128xbf16, #tpu.memory_space<vmem>>, vector<16x16x128xbf16>
    %105 = vector.shape_cast %104 : vector<16x16x128xbf16> to vector<256x128xbf16>
    %c0_124 = arith.constant 0 : index
    %c1024_125 = arith.constant 1024 : index
    %106 = vector.load %arg10[%c0_124, %c1024_125] : memref<256x1152xbf16, #tpu.memory_space<vmem>>, vector<256x128xbf16>
    tpu.vector_store %arg10[%c0_124, %c1024_125], %105 {strides = array<i32>} : memref<256x1152xbf16, #tpu.memory_space<vmem>>, vector<256x128xbf16>,
    %c0_i32_126 = arith.constant 0 : i32
    %c128_i32_127 = arith.constant 128 : i32
    %107 = arith.muli %c0_i32_126, %c128_i32_127 : i32
    %108 = arith.index_cast %107 : i32 to index
    %c0_128 = arith.constant 0 : index
    %109 = vector.load %arg10[%108, %c0_128] : memref<256x1152xbf16, #tpu.memory_space<vmem>>, vector<128x1152xbf16>
    %c0_129 = arith.constant 0 : index
    %c0_130 = arith.constant 0 : index
    %110 = vector.load %arg6[%c0_129, %c0_130] : memref<1152x128xbf16, #tpu.memory_space<vmem>>, vector<1152x128xbf16>
    %cst_131 = arith.constant dense<0.000000e+00> : vector<128x128xf32>
    %111 = tpu.matmul %109, %110, %cst_131 {dimension_numbers = #tpu.dot_dimension_numbers<[1], [0], [0], [1], [0, 0, 1, 1], [], []>} : vector<128x1152xbf16>, vector<1152x128xbf16>, vector<128x128xf32> -> vector<128x128xf32>
    %c0_132 = arith.constant 0 : index
    %c0_133 = arith.constant 0 : index
    %112 = vector.load %arg7[%c0_132, %c0_133] : memref<1x128xf32, #tpu.memory_space<vmem>>, vector<1x128xf32>
    %113 = vector.broadcast %112 : vector<1x128xf32> to vector<128x128xf32>
    %114 = arith.mulf %111, %113 : vector<128x128xf32>
    %c0_134 = arith.constant 0 : index
    %c0_135 = arith.constant 0 : index
    %115 = vector.load %arg8[%c0_134, %c0_135] : memref<1x128xf32, #tpu.memory_space<vmem>>, vector<1x128xf32>
    %116 = vector.broadcast %115 : vector<1x128xf32> to vector<128x128xf32>
    %117 = arith.addf %114, %116 : vector<128x128xf32>
    %c8_i32_136 = arith.constant 8 : i32
    %118 = arith.muli %c0_i32_126, %c8_i32_136 : i32
    %c0_137 = arith.constant 0 : index
    %119 = arith.index_cast %118 : i32 to index
    %c0_138 = arith.constant 0 : index
    %c0_139 = arith.constant 0 : index
    %120 = vector.load %arg2[%c0_137, %119, %c0_138, %c0_139] : memref<1x16x16x128xf32, #tpu.memory_space<vmem>>, vector<1x8x16x128xf32>
    %121 = vector.shape_cast %120 : vector<1x8x16x128xf32> to vector<8x16x128xf32>
    %122 = vector.shape_cast %121 : vector<8x16x128xf32> to vector<128x128xf32>
    %123 = arith.addf %117, %122 : vector<128x128xf32>
    %cst_140 = arith.constant 0.000000e+00 : f32
    %124 = vector.broadcast %cst_140 : f32 to vector<128x128xf32>
    %125 = arith.maximumf %123, %124 : vector<128x128xf32>
    %126 = vector.shape_cast %125 : vector<128x128xf32> to vector<8x16x128xf32>
    %c8_i32_141 = arith.constant 8 : i32
    %127 = arith.muli %c0_i32_126, %c8_i32_141 : i32
    %c0_142 = arith.constant 0 : index
    %128 = arith.index_cast %127 : i32 to index
    %c0_143 = arith.constant 0 : index
    %c0_144 = arith.constant 0 : index
    %129 = vector.load %arg9[%c0_142, %128, %c0_143, %c0_144] : memref<1x16x16x128xf32, #tpu.memory_space<vmem>>, vector<1x8x16x128xf32>
    %130 = vector.shape_cast %129 : vector<1x8x16x128xf32> to vector<8x16x128xf32>
    %131 = vector.shape_cast %126 : vector<8x16x128xf32> to vector<1x8x16x128xf32>
    tpu.vector_store %arg9[%c0_142, %128, %c0_143, %c0_144], %131 {strides = array<i32>} : memref<1x16x16x128xf32, #tpu.memory_space<vmem>>, vector<1x8x16x128xf32>,
    %c1_i32_145 = arith.constant 1 : i32
    %c128_i32_146 = arith.constant 128 : i32
    %132 = arith.muli %c1_i32_145, %c128_i32_146 : i32
    %133 = arith.index_cast %132 : i32 to index
    %c0_147 = arith.constant 0 : index
    %134 = vector.load %arg10[%133, %c0_147] : memref<256x1152xbf16, #tpu.memory_space<vmem>>, vector<128x1152xbf16>
    %c0_148 = arith.constant 0 : index
    %c0_149 = arith.constant 0 : index
    %135 = vector.load %arg6[%c0_148, %c0_149] : memref<1152x128xbf16, #tpu.memory_space<vmem>>, vector<1152x128xbf16>
    %cst_150 = arith.constant dense<0.000000e+00> : vector<128x128xf32>
    %136 = tpu.matmul %134, %135, %cst_150 {dimension_numbers = #tpu.dot_dimension_numbers<[1], [0], [0], [1], [0, 0, 1, 1], [], []>} : vector<128x1152xbf16>, vector<1152x128xbf16>, vector<128x128xf32> -> vector<128x128xf32>
    %c0_151 = arith.constant 0 : index
    %c0_152 = arith.constant 0 : index
    %137 = vector.load %arg7[%c0_151, %c0_152] : memref<1x128xf32, #tpu.memory_space<vmem>>, vector<1x128xf32>
    %138 = vector.broadcast %137 : vector<1x128xf32> to vector<128x128xf32>
    %139 = arith.mulf %136, %138 : vector<128x128xf32>
    %c0_153 = arith.constant 0 : index
    %c0_154 = arith.constant 0 : index
    %140 = vector.load %arg8[%c0_153, %c0_154] : memref<1x128xf32, #tpu.memory_space<vmem>>, vector<1x128xf32>
    %141 = vector.broadcast %140 : vector<1x128xf32> to vector<128x128xf32>
    %142 = arith.addf %139, %141 : vector<128x128xf32>
    %c8_i32_155 = arith.constant 8 : i32
    %143 = arith.muli %c1_i32_145, %c8_i32_155 : i32
    %c0_156 = arith.constant 0 : index
    %144 = arith.index_cast %143 : i32 to index
    %c0_157 = arith.constant 0 : index
    %c0_158 = arith.constant 0 : index
    %145 = vector.load %arg2[%c0_156, %144, %c0_157, %c0_158] : memref<1x16x16x128xf32, #tpu.memory_space<vmem>>, vector<1x8x16x128xf32>
    %146 = vector.shape_cast %145 : vector<1x8x16x128xf32> to vector<8x16x128xf32>
    %147 = vector.shape_cast %146 : vector<8x16x128xf32> to vector<128x128xf32>
    %148 = arith.addf %142, %147 : vector<128x128xf32>
    %cst_159 = arith.constant 0.000000e+00 : f32
    %149 = vector.broadcast %cst_159 : f32 to vector<128x128xf32>
    %150 = arith.maximumf %148, %149 : vector<128x128xf32>
    %151 = vector.shape_cast %150 : vector<128x128xf32> to vector<8x16x128xf32>
    %c8_i32_160 = arith.constant 8 : i32
    %152 = arith.muli %c1_i32_145, %c8_i32_160 : i32
    %c0_161 = arith.constant 0 : index
    %153 = arith.index_cast %152 : i32 to index
    %c0_162 = arith.constant 0 : index
    %c0_163 = arith.constant 0 : index
    %154 = vector.load %arg9[%c0_161, %153, %c0_162, %c0_163] : memref<1x16x16x128xf32, #tpu.memory_space<vmem>>, vector<1x8x16x128xf32>
    %155 = vector.shape_cast %154 : vector<1x8x16x128xf32> to vector<8x16x128xf32>
    %156 = vector.shape_cast %151 : vector<8x16x128xf32> to vector<1x8x16x128xf32>
    tpu.vector_store %arg9[%c0_161, %153, %c0_162, %c0_163], %156 {strides = array<i32>} : memref<1x16x16x128xf32, #tpu.memory_space<vmem>>, vector<1x8x16x128xf32>,
    %c2_i32_164 = arith.constant 2 : i32
    return
  }
  func.func @transform_0(%arg0: i32) -> (i32, i32, i32, i32) {
    %c0_i32 = arith.constant 0 : i32
    %c0_i32_0 = arith.constant 0 : i32
    %c0_i32_1 = arith.constant 0 : i32
    %c0_i32_2 = arith.constant 0 : i32
    return %arg0, %c0_i32, %c0_i32_0, %c0_i32_1 : i32, i32, i32, i32
  }
  func.func @transform_1(%arg0: i32) -> (i32, i32, i32, i32) {
    %c0_i32 = arith.constant 0 : i32
    %c0_i32_0 = arith.constant 0 : i32
    %c0_i32_1 = arith.constant 0 : i32
    %c0_i32_2 = arith.constant 0 : i32
    return %arg0, %c0_i32, %c0_i32_0, %c0_i32_1 : i32, i32, i32, i32
  }
  func.func @transform_2(%arg0: i32) -> (i32, i32) {
    %c0_i32 = arith.constant 0 : i32
    %c0_i32_0 = arith.constant 0 : i32
    %c0_i32_1 = arith.constant 0 : i32
    return %c0_i32, %c0_i32_0 : i32, i32
  }
  func.func @transform_3(%arg0: i32) -> (i32, i32) {
    %c0_i32 = arith.constant 0 : i32
    %c0_i32_0 = arith.constant 0 : i32
    %c0_i32_1 = arith.constant 0 : i32
    return %c0_i32, %c0_i32_0 : i32, i32
  }
  func.func @transform_4(%arg0: i32) -> (i32, i32) {
    %c0_i32 = arith.constant 0 : i32
    %c0_i32_0 = arith.constant 0 : i32
    %c0_i32_1 = arith.constant 0 : i32
    return %c0_i32, %c0_i32_0 : i32, i32
  }
  func.func @transform_5(%arg0: i32) -> (i32, i32) {
    %c0_i32 = arith.constant 0 : i32
    %c0_i32_0 = arith.constant 0 : i32
    %c0_i32_1 = arith.constant 0 : i32
    return %c0_i32, %c0_i32_0 : i32, i32
  }
  func.func @transform_6(%arg0: i32) -> (i32, i32) {
    %c0_i32 = arith.constant 0 : i32
    %c0_i32_0 = arith.constant 0 : i32
    %c0_i32_1 = arith.constant 0 : i32
    return %c0_i32, %c0_i32_0 : i32, i32
  }
  func.func @transform_7(%arg0: i32) -> (i32, i32) {
    %c0_i32 = arith.constant 0 : i32
    %c0_i32_0 = arith.constant 0 : i32
    %c0_i32_1 = arith.constant 0 : i32
    return %c0_i32, %c0_i32_0 : i32, i32
  }
  func.func @transform_8(%arg0: i32) -> (i32, i32, i32, i32) {
    %c0_i32 = arith.constant 0 : i32
    %c0_i32_0 = arith.constant 0 : i32
    %c0_i32_1 = arith.constant 0 : i32
    %c0_i32_2 = arith.constant 0 : i32
    return %arg0, %c0_i32, %c0_i32_0, %c0_i32_1 : i32, i32, i32, i32
  }
}

</mosaic_0001>

<bundles_post_ra>
// kernel: tpu_custom_call.1
= control target key start
LH: loop header
LB: loop body
LE: loop exit
PB: predicated region body
PF: predicated region fallthrough
CT: control target
= control target key end

     0   :  { %13 = vsyncpa [#allocation5], 0  ;;  %s17814_s0 = inlined_call_operand.vmem [shape: bf16[2,18,18,128], index: 0, kind: input, shape index: {}]   ;;  %s17815_s1 = inlined_call_operand.hbm [shape: f32[2,16,16,128], index: 1, kind: input, shape index: {}]   ;;  %s17816_s2 = inlined_call_operand.vmem [shape: bf16[1152,128], index: 2, kind: input, shape index: {}]   ;;  %s17817_s3 = inlined_call_operand.vmem [shape: f32[1,128], index: 3, kind: input, shape index: {}]   ;;  %s17818_s4 = inlined_call_operand.vmem [shape: f32[1,128], index: 4, kind: input, shape index: {}]   ;;  %s17819_s5 = inlined_call_operand.hbm [shape: bf16[1152,128], index: 5, kind: input, shape index: {}]   ;;  %s17820_s6 = inlined_call_operand.vmem [shape: f32[1,128], index: 6, kind: input, shape index: {}]   ;;  %s17821_s7 = inlined_call_operand.vmem [shape: f32[1,128], index: 7, kind: input, shape index: {}]   ;;  %s17822_s8 = inlined_call_operand.hbm [shape: f32[2,16,16,128], index: 8, kind: output, shape index: {}]  }
   0x1   :  { %15 = vsyncpa [#allocation5 + $0x1], 0 }
   0x2   :  { %16 = vsyncpa [#allocation8], 0 }
   0x3   :  { %17 = vsyncpa [#allocation6], 0 }
   0x4   :  { %19 = vsyncpa [#allocation6 + $0x1], 0  ;;  %s14577_s27 = smov 0   ;;  %s14579_s28 = smov 0  }
   0x5   :  { %s14581_s29 = smov 0   ;;  %s14583_s30 = smov 0  }
   0x6 LB: > { %s14598_s9 = sadd.s32 4294967295, %s14520_s30   ;;  %s11674_s10 = sadd.s32 4294967294, %s14520_s30   ;;  %s14520_s30 = sphi %s14583_s30, %s17882_s30   ;;  %s14516_s29 = sphi %s14581_s29, %s17885_s29   ;;  %s14512_s28 = sphi %s14579_s28, %s17884_s28   ;;  %s14508_s27 = sphi %s14577_s27, %s17883_s27  }
   0x7   : > { %p71_p0 = scmp.ne.s32.totalorder %s14512_s28, %s14508_s27  ;;  %p17823_p1 = scmp.eq.s32.totalorder %s14598_s9, 0 }
   0x8   : > { %p227_p3 = scmp.eq.s32.totalorder %s11674_s10, 1  ;;  %p11675_p5 = scmp.ge.s32.totalorder %s14520_s30, 1 }
   0x9   : > { %p14607_p4 = por %p17823_p1, %p71_p0  ;;  %p234_p7 = scmp.lt.s32.totalorder %s14520_s30, 3 }
   0xa   : > { %p14612_p6 = por %p227_p3, %p71_p0  ;;  %s14522_s14 = smov [#allocation7]  }
   0xb   : > { %s17828_s11 = scalar_select %p14607_p4, 1, 0 }
   0xc   : > { %s17829_s12 = scalar_select %p14612_p6, 1, 0 }
   0xd   : > { %p14617_p8 = pnand %p11675_p5, %p234_p7  ;;  %s255_s15 = sshll.u32 %s14522_s14, 4  ;;  %s14621_s15 = int_to_ptr.vmem [resolvable:$true] %s255_s15 }
   0xe   : > { %s14633_s17 = sadd.s32 1, %s14520_s30   ;;  %s58_s18 = sadd.s32 1, %s14516_s29 }
   0xf   : > { %s17830_s13 = scalar_select %p14617_p8, 1, 0 }
  0x10   : > { %p13950_p9 = pneg %p14617_p8  ;;  %17832 = sst [smem:[#allocation13_spill]] %s14633_s17 }
  0x11   : > { %s55_s19 = ssub.s32 %s14520_s30, %s14633_s17  ;;  %s14392_s22 = scalar_lea.hbm %s17819_s5, 9216 }
  0x12   : > { %p14628_p11 = pnand %p13950_p9, %p17823_p1  ;;  %p14393_p12 = scmp.ne.s32.totalorder %s17819_s5, %s14392_s22 }
  0x13   : > { %p14399_p5 = scmp.lt.u32.totalorder %s14392_s22, %s17819_s5 }
  0x14   : > { %p14394_p13 = pneg %p14628_p11 }
  0x16   : > { %p14395_p0 = pnand %p14394_p13, %p14393_p12 }
  0x18   : > { %p14396_p3 = pneg %p14395_p0 }
  0x1a   : > { %p14401_p7 = pnand %p14399_p5, %p14396_p3 }
  0x1c   : > { %14404 = shalt.err (!%p14401_p7)
}
  0x1d   : > { %s14405_s10 = scalar_lea.vmem %s14621_s15, 9216  ;;  %p14413_p2 = scmp.lt.s32.totalorder %s14621_s15, %s14621_s15 }
  0x1e   : > { %p14406_p9 = scmp.ne.s32.totalorder %s14621_s15, %s14405_s10  ;;  %p14414_p6 = scmp.lt.s32.totalorder %s14405_s10, %s14405_s10 }
  0x20   : > { %p14408_p10 = pnand %p14406_p9, %p14394_p13  ;;  %p14415_p4 = por %p14414_p6, %p14413_p2 }
  0x22   : > { %p14409_p1 = pneg %p14408_p10 }
  0x24   : > { %p14416_p8 = pnand %p14415_p4, %p14409_p1 }
  0x26   : > { %14419 = shalt.err (!%p14416_p8)
}
  0x27   : > { %s14523_s14 = smov 64   ;;  %s14524_s20 = smov 4  }
  0x28   : > { %13953 = dma.hbm_to_vmem [thread:$0]  (!%p14628_p11), %s17819_s5, 9216, %s14621_s15, [#allocation8], %s14523_s14, %s14523_s14, %s14524_s20  }
  0x29   : > { %p56_p2 = scmp.eq.s32.totalorder %s55_s19, 0  ;;  %p65_p1 = scmp.ne.s32.totalorder %s14516_s29, %s14512_s28 }
  0x2a   : > { %p66_p4 = scmp.eq.s32.totalorder %s14520_s30, 0  ;;  %p13963_p6 = scmp.lt.s32.totalorder %s14520_s30, 2 }
  0x2b   : > { %s14664_s23 = scalar_select %p56_p2, %s14516_s29, %s58_s18  }
  0x2c   : > { %p67_p8 = por %p66_p4, %p65_p1  ;;  %p17833_p10 = scmp.eq.s32.totalorder %s14598_s9, 1 }
  0x2d   : > { %s283_s25 = sand.u32 1, %s14516_s29   ;;  %s12691_s26 = sshll.u32 %s14520_s30, 12 }
  0x2e   : > { %p14668_p12 = por %p17833_p10, %p65_p1  ;;  %s11678_s10 = sshll.u32 %s283_s25, 8 }
  0x2f   : > { %s14677_s21 = scalar_lea.hbm %s17815_s1, %s12691_s26  ;;  %s287_s15 = scalar_lea.vmem [#allocation4], %s11678_s10 }
  0x30   : > { %s294_s18 = sshll.u32 %s287_s15, 4  ;;  %p14679_p11 = pnand %p13963_p6, %p67_p8  ;;  %s14683_s18 = int_to_ptr.vmem [resolvable:$true] %s294_s18 }
  0x31   : > { %s14685_s14 = scalar_lea.sflag [#allocation5], %s283_s25  ;;  %s14420_s20 = scalar_lea.hbm %s14677_s21, 4096 }
  0x32   : > { %p14421_p13 = scmp.ne.s32.totalorder %s14677_s21, %s14420_s20  ;;  %p14422_p0 = pneg %p14679_p11 }
  0x33   : > { %s14425_s26 = scalar_lea.hbm %s17815_s1, 8192  ;;  %p14426_p7 = scmp.lt.u32.totalorder %s14677_s21, %s17815_s1 }
  0x34   : > { %p14423_p3 = pnand %p14422_p0, %p14421_p13  ;;  %p14427_p9 = scmp.lt.u32.totalorder %s14425_s26, %s14420_s20 }
  0x35   : > { %p14429_p1 = scmp.lt.u32.totalorder %s14420_s20, %s14677_s21 }
  0x36   : > { %p14424_p5 = pneg %p14423_p3  ;;  %p14428_p2 = por %p14427_p9, %p14426_p7 }
  0x38   : > { %p14430_p4 = por %p14429_p1, %p14428_p2 }
  0x3a   : > { %p14431_p6 = pnand %p14430_p4, %p14424_p5 }
  0x3c   : > { %14434 = shalt.err (!%p14431_p6)
}
  0x3d   : > { %s14435_s25 = scalar_lea.vmem %s14683_s18, 4096  ;;  %s14525_s15 = smov [#allocation4]  }
  0x3e   : > { %p14436_p8 = scmp.ne.s32.totalorder %s14683_s18, %s14435_s25  ;;  %s14440_s17 = sshll.u32 %s14525_s15, 4  ;;  %s14441_s17 = int_to_ptr.vmem [resolvable:$false] %s14440_s17 }
  0x3f   : > { %s14442_s22 = scalar_lea.vmem %s14441_s17, 8192  ;;  %p14443_p3 = scmp.lt.s32.totalorder %s14683_s18, %s14441_s17 }
  0x40   : > { %p14438_p10 = pnand %p14436_p8, %p14422_p0  ;;  %p14444_p7 = scmp.lt.s32.totalorder %s14442_s22, %s14435_s25 }
  0x42   : > { %p14439_p13 = pneg %p14438_p10  ;;  %p14445_p9 = por %p14444_p7, %p14443_p3 }
  0x44   : > { %p14446_p2 = pnand %p14445_p9, %p14439_p13 }
  0x46   : > { %14449 = shalt.err (!%p14446_p2)
}
  0x47   : > { %s14526_s20 = smov 128   ;;  %s14527_s26 = smov 8  }
  0x48   : > { %13957 = dma.hbm_to_vmem [thread:$0]  (!%p14679_p11), %s14677_s21, 4096, %s14683_s18, %s14685_s14, %s14526_s20, %s14526_s20, %s14527_s26  }
  0x49   : > { %p17836_p0 = scmp.ne.s32.totalorder %s17830_s13, 0 }
  0x4b   : > { %306 = sbr.rel (%p17836_p0) target bundleno = 1171 (0x493), region = 52 }
  0x52   : > { %s14716_s10 = sand.u32 1, %s14512_s28   ;;  %p17837_p5 = scmp.ne.s32.totalorder %s17828_s11, 0 }
  0x53   : > { %s11682_s16 = sshll.u32 %s14716_s10, 8  ;;  %s309_s25 = scalar_lea.sflag [#allocation5], %s14716_s10 }
  0x54   : > { %s14722_s15 = scalar_lea.vmem [#allocation4], %s11682_s16 }
  0x55   : > { %14495 = dma.done.wait (%p17837_p5), %s309_s25, 4096  }
  0x56   : > { %14497 = vsyncadd (%p17837_p5), %s309_s25, 4294963200  ;;  %p17838_p11 = scmp.eq.s32.totalorder %s14598_s9, 0 }
  0x58   : > { %14499 = dma.done.wait (%p17838_p11), [#allocation8], 9216   ;;  %p17839_p1 = pmov %p17838_p11 }
  0x59   : > { %v14006_v0 = vld [vmem:[%s17816_s2 + $0x40] sm:$0xff]   ;;  %v14010_v4 = vld [vmem:[%s17816_s2 + $0x48] sm:$0xff]   ;;  %v14014_v8 = vld [vmem:[%s17816_s2 + $0x50] sm:$0xff]   ;;  %p354_p4 = scmp.lt.s32.totalorder %s14598_s9, 1  ;;  %vm672_vm0 = vsmask.f32 3328 }
  0x5a   : > { %14501 = vsyncadd (%p17839_p1), [#allocation8], 4294958080  ;;  %v14007_v1 = vld [vmem:[%s17816_s2 + $0xc0] sm:$0xff]   ;;  %12725 = vmatprep.subr.bf16.mxu0 %v14006_v0  ;;  %v14011_v5 = vld [vmem:[%s17816_s2 + $0xc8] sm:$0xff]   ;;  %vm673_vm1 = vsmask.f32 7440 }
  0x5b   : > { %v14008_v2 = vld [vmem:[%s17816_s2] sm:$0xff]   ;;  %12789 = vmatprep.subr.bf16.mxu1 %v14007_v1  ;;  %v14012_v6 = vld [vmem:[%s17816_s2 + $0x8] sm:$0xff]   ;;  %v14015_v9 = vld [vmem:[%s17816_s2 + $0xd0] sm:$0xff]   ;;  %s355_s13 = scalar_select %p354_p4, %s14598_s9, 1  ;;  %vm1235_vm2 = vcmask 1042432   ;;  %vm1236_vm3 = vcmask 1046532  }
  0x5c   : > { %v14009_v3 = vld [vmem:[%s17816_s2 + $0x80] sm:$0xff]   ;;  %12726 = vmatpush3.bf16.msra.mxu0 %v14008_v2  ;;  %v14013_v7 = vld [vmem:[%s17816_s2 + $0x88] sm:$0xff]   ;;  %v14016_v10 = vld [vmem:[%s17816_s2 + $0x10] sm:$0xff]   ;;  %vm367_vm6 = vcmask 1040384   ;;  %vm368_vm7 = vsmask.f32 256 }
  0x5d   : > { %12790 = vmatpush3.bf16.msra.mxu1 %v14009_v3  ;;  %12727 = vmatprep.subr.bf16.mxu0 %v14010_v4  ;;  %v14017_v11 = vld [vmem:[%s17816_s2 + $0x90] sm:$0xff]   ;;  %v14018_v12 = vld [vmem:[%s17816_s2 + $0x58] sm:$0xff]   ;;  %v14022_v16 = vld [vmem:[%s17816_s2 + $0x60] sm:$0xff]   ;;  %s13941_s26 = smul.u32 216, %s355_s13  ;;  %vm424_vm9 = vsmask.f32 7938 }
  0x5e   : > { %12791 = vmatprep.subr.bf16.mxu1 %v14011_v5  ;;  %v14019_v13 = vld [vmem:[%s17816_s2 + $0xd8] sm:$0xff]   ;;  %v14023_v17 = vld [vmem:[%s17816_s2 + $0xe0] sm:$0xff]   ;;  %v14026_v20 = vld [vmem:[%s17816_s2 + $0x68] sm:$0xff]   ;;  %vm4726_vm11 = vcmask 1043456   ;;  %vm4563_vm12 = vsmask.f32 4368 }
  0x5f   : > { %v14020_v14 = vld [vmem:[%s17816_s2 + $0x18] sm:$0xff]   ;;  %v14024_v18 = vld [vmem:[%s17816_s2 + $0x20] sm:$0xff]   ;;  %v14027_v21 = vld [vmem:[%s17816_s2 + $0xe8] sm:$0xff]   ;;  %s14827_s25 = scalar_lea.vmem %s17814_s0, %s13941_s26  ;;  %s17538_s19 = scalar_lea.vmem [#allocation9], %s11682_s16 }
  0x60   : > { %12728 = vmatpush3.bf16.msra.mxu0 %v14012_v6  ;;  %v14021_v15 = vld [vmem:[%s17816_s2 + $0x98] sm:$0xff]   ;;  %v14025_v19 = vld [vmem:[%s17816_s2 + $0xa0] sm:$0xff]   ;;  %v14028_v22 = vld [vmem:[%s17816_s2 + $0x28] sm:$0xff]   ;;  %s12724_s16 = sshll.u32 %s14598_s9, 12  ;;  %s11579_s14 = sshll.u32 %s17538_s19, 4  ;;  %s17767_s14 = int_to_ptr.vmem [resolvable:$true] %s11579_s14 }
  0x61   : > { %12792 = vmatpush3.bf16.msra.mxu1 %v14013_v7  ;;  %12729 = vmatprep.subr.bf16.mxu0 %v14014_v8  ;;  %v14029_v23 = vld [vmem:[%s17816_s2 + $0xa8] sm:$0xff]   ;;  %v14030_v24 = vld [vmem:[%s17816_s2 + $0x70] sm:$0xff]   ;;  %v14034_v28 = vld [vmem:[%s17816_s2 + $0x78] sm:$0xff]   ;;  %s17765_s11 = scalar_lea.hbm %s17822_s8, %s12724_s16  ;;  %s11566_s9 = scalar_lea.sflag [#allocation6], %s14716_s10 }
  0x62   : > { %12793 = vmatprep.subr.bf16.mxu1 %v14015_v9  ;;  %v14031_v25 = vld [vmem:[%s17816_s2 + $0xf0] sm:$0xff]   ;;  %v14035_v29 = vld [vmem:[%s17816_s2 + $0xf8] sm:$0xff]   ;;  %v624_v32 = vld [vmem:[%s14827_s25] sm:$0xf]  ;;  %s14529_s13 = smov [#allocation9]  }
  0x63   : > { %v14032_v26 = vld [vmem:[%s17816_s2 + $0x30] sm:$0xff]   ;;  %v14036_v30 = vld [vmem:[%s17816_s2 + $0x38] sm:$0xff]   ;;  %v625_v33 = vld [vmem:[%s14827_s25 + $0x4] sm:$0xf]  ;;  %v676_v35 = vshrl.u32 %v624_v32, 16  ;;  %v679_v36 = vshll.u32 %v624_v32, 16 }
  0x64   : > { %12730 = vmatpush3.bf16.msra.mxu0 %v14016_v10  ;;  %v14033_v27 = vld [vmem:[%s17816_s2 + $0xb0] sm:$0xff]   ;;  %v14037_v31 = vld [vmem:[%s17816_s2 + $0xb8] sm:$0xff]   ;;  %v626_v34 = vld [vmem:[%s14827_s25 + $0x8] sm:$0x1]  ;;  %v685_v37 = vshll.u32 %v625_v33, 16  ;;  %v689_v38 = vshrl.u32 %v625_v33, 16 }
  0x65   : > { %12794 = vmatpush3.bf16.msra.mxu1 %v14017_v11  ;;  %12731 = vmatprep.subr.bf16.mxu0 %v14018_v12  ;;  %v695_v39 = vshll.u32 %v626_v34, 16  ;;  %v14038_v40 = vld [vmem:[%s14827_s25 + $0xc] sm:$0xff]   ;;  %v678_v41 = vrot.slane %v676_v35, 4  ;;  %v681_v42 = vrot.slane %v679_v36, 5  ;;  %v1139_v46 = vld [vmem:[%s14827_s25] sm:$0xe]  ;;  %vm14843_vm4 = vmor %vm1235_vm2, %vm1236_vm3 }
  0x66   : > { %12795 = vmatprep.subr.bf16.mxu1 %v14019_v13  ;;  %v687_v43 = vrot.slane %v685_v37, 5  ;;  %v691_v44 = vrot.slane %v689_v38, 4  ;;  %4097 = vmatprep.mubr.bf16.mxu1 %v14038_v40  ;;  %v1140_v47 = vld [vmem:[%s14827_s25 + $0x4] sm:$0xf]  ;;  %vm14849_vm5 = vmor %vm672_vm0, %vm673_vm1  ;;  %v1141_v52 = vld [vmem:[%s14827_s25 + $0x8] sm:$0x1] }
  0x67   : > { %v697_v45 = vrot.slane %v695_v39, 5  ;;  %v682_v50 = vor.u32 %v681_v42, %v678_v41  ;;  %v11718_v53 = vrot.slane %v1139_v46, 9  ;;  %v1240_v54 = vrot.slane %v1140_v47, 5  ;;  %v14040_v56 = vld [vmem:[%s17816_s2 + $0x1c0] sm:$0xff]   ;;  %v627_v63 = vld [vmem:[%s14827_s25 + $0xc] sm:$0xf]  ;;  %vm16066_vm8 = vmand %vm367_vm6, %vm368_vm7 }
  0x68   : > { %12732 = vmatpush3.bf16.msra.mxu0 %v14020_v14  ;;  %v692_v51 = vor.u32 %v691_v44, %v687_v43  ;;  %v1243_v55 = vrot.slane %v1141_v52, 5  ;;  %v14039_v59 = vld [vmem:[%s14827_s25] sm:$0xff]   ;;  %v628_v0 = vld [vmem:[%s14827_s25 + $0x10] sm:$0xf]  ;;  %v629_v1 = vld [vmem:[%s14827_s25 + $0x14] sm:$0x1] }
  0x69   : > { %12796 = vmatpush3.bf16.msra.mxu1 %v14021_v15  ;;  %12733 = vmatprep.subr.bf16.mxu0 %v14022_v16  ;;  %v683_v57 = vrot.slane %v682_v50, 4  ;;  %v1241_v60 = vsel %vm14843_vm4, %v11718_v53, %v1240_v54  ;;  %v1242_v61 = vrot.slane %v1240_v54, 4  ;;  %v14041_v62 = vld [vmem:[%s17816_s2 + $0x180] sm:$0xff]   ;;  %v700_v5 = vshrl.u32 %v627_v63, 16  ;;  %v14042_v6 = vld [vmem:[%s14827_s25 + $0x18] sm:$0xff]   ;;  %v14043_v33 = vld [vmem:[%s14827_s25 + $0xc] sm:$0xff]  }
  0x6a   : > { %12797 = vmatprep.subr.bf16.mxu1 %v14023_v17  ;;  %v693_v58 = vrot.slane %v692_v51, 4  ;;  %v703_v9 = vshll.u32 %v627_v63, 16  ;;  %v709_v10 = vshll.u32 %v628_v0, 16  ;;  %v713_v12 = vshrl.u32 %v628_v0, 16  ;;  %v1142_v14 = vld [vmem:[%s14827_s25 + $0xc] sm:$0xe]  ;;  %vm16073_vm10 = vmand %vm367_vm6, %vm424_vm9 }
  0x6b   : > { %v688_v2 = vsel %vm14849_vm5, %v683_v57, %v687_v43  ;;  %v1244_v4 = vsel %vm14843_vm4, %v1242_v61, %v1243_v55  ;;  %v702_v11 = vrot.slane %v700_v5, 4  ;;  %v719_v13 = vshll.u32 %v629_v1, 16  ;;  %v1143_v17 = vld [vmem:[%s14827_s25 + $0x10] sm:$0xf]  ;;  %v14047_v35 = vld [vmem:[%s17816_s2 + $0x100] sm:$0xff]   ;;  %vm16184_vm13 = vmand %vm4726_vm11, %vm424_vm9 }
  0x6c   : > { %12734 = vmatpush3.bf16.msra.mxu0 %v14024_v18  ;;  %v698_v3 = vsel %vm14849_vm5, %v693_v58, %v697_v45  ;;  %v11734_v8 = vcombine.low %v1241_v60, %v1244_v4  ;;  %v705_v15 = vrot.slane %v703_v9, 5  ;;  %v711_v16 = vrot.slane %v709_v10, 5  ;;  %v1144_v18 = vld [vmem:[%s14827_s25 + $0x14] sm:$0x1]  ;;  %v630_v36 = vld [vmem:[%s14827_s25 + $0x18] sm:$0xf]  ;;  %vm16191_vm14 = vmor %vm368_vm7, %vm4563_vm12 }
  0x6d   : > { %12798 = vmatpush3.bf16.msra.mxu1 %v14025_v19  ;;  %12735 = vmatprep.subr.bf16.mxu0 %v14026_v20  ;;  %v11702_v7 = vcombine.low %v688_v2, %v698_v3  ;;  %v715_v19 = vrot.slane %v713_v12, 4  ;;  %v721_v20 = vrot.slane %v719_v13, 5  ;;  %v631_v39 = vld [vmem:[%s14827_s25 + $0x1c] sm:$0xf]  ;;  %v632_v40 = vld [vmem:[%s14827_s25 + $0x20] sm:$0x1] }
  0x6e   : > { %12799 = vmatprep.subr.bf16.mxu1 %v14027_v21  ;;  %v11719_v21 = vrot.slane %v1142_v14, 9  ;;  %v724_v41 = vshrl.u32 %v630_v36, 16  ;;  %v727_v42 = vshll.u32 %v630_v36, 16  ;;  %v733_v44 = vshll.u32 %v631_v39, 16  ;;  %v14048_v47 = vld [vmem:[%s14827_s25 + $0x24] sm:$0xff]   ;;  %v14050_v0 = vld [vmem:[%s17816_s2 + $0x1d0] sm:$0xff]  }
  0x6f   : > { %4000 = vmatprep.mubr.bf16.mxu0 %v11702_v7  ;;  %v737_v45 = vshrl.u32 %v631_v39, 16  ;;  %v743_v46 = vshll.u32 %v632_v40, 16  ;;  %v1145_v57 = vld [vmem:[%s14827_s25 + $0x18] sm:$0xe]  ;;  %v1146_v58 = vld [vmem:[%s14827_s25 + $0x1c] sm:$0xf] }
  0x70   : > { %12736 = vmatpush3.bf16.msra.mxu0 %v14028_v22  ;;  %v1247_v22 = vrot.slane %v1143_v17, 5  ;;  %v726_v51 = vrot.slane %v724_v41, 4  ;;  %v729_v52 = vrot.slane %v727_v42, 5  ;;  %v735_v53 = vrot.slane %v733_v44, 5  ;;  %v14051_v2 = vld [vmem:[%s17816_s2 + $0x190] sm:$0xff]   ;;  %v14049_v4 = vld [vmem:[%s14827_s25 + $0x18] sm:$0xff]  }
  0x71   : > { %12800 = vmatpush3.bf16.msra.mxu1 %v14029_v23  ;;  %12737 = vmatprep.subr.bf16.mxu0 %v14030_v24  ;;  %v706_v23 = vor.u32 %v705_v15, %v702_v11  ;;  %v1250_v24 = vrot.slane %v1144_v18, 5  ;;  %v739_v54 = vrot.slane %v737_v45, 4  ;;  %v745_v55 = vrot.slane %v743_v46, 5  ;;  %v14053_v11 = vld [vmem:[%s17816_s2 + $0x108] sm:$0xff]   ;;  %v633_v12 = vld [vmem:[%s14827_s25 + $0x24] sm:$0xf] }
  0x72   : > { %12801 = vmatprep.subr.bf16.mxu1 %v14031_v25  ;;  %v14044_v25 = vld [vmem:[%s17816_s2 + $0x1c8] sm:$0xff]   ;;  %v11720_v61 = vrot.slane %v1145_v57, 9  ;;  %v748_v17 = vshrl.u32 %v633_v12, 16  ;;  %v751_v18 = vshll.u32 %v633_v12, 16  ;;  %v14056_v36 = vld [vmem:[%s17816_s2 + $0x1d8] sm:$0xff]   ;;  %v14058_v44 = vld [vmem:[%s17816_s2 + $0x150] sm:$0xff]  }
  0x73   : > { %v740_v60 = vor.u32 %v739_v54, %v735_v53  ;;  %v634_v15 = vld [vmem:[%s14827_s25 + $0x28] sm:$0xf]  ;;  %v638_v54 = vld [vmem:[%s14827_s25 + $0x38] sm:$0x1]  ;;  %v14063_v12 = vld [vmem:[%s17816_s2 + $0x1a0] sm:$0xff]  }
  0x74   : > { %12738 = vmatpush3.bf16.msra.mxu0 %v14032_v26  ;;  %v716_v26 = vor.u32 %v715_v19, %v711_v16  ;;  %v757_v19 = vshll.u32 %v634_v15, 16  ;;  %v14055_v40 = vld [vmem:[%s14827_s25 + $0x24] sm:$0xff]  }
  0x75   : > { %12802 = vmatpush3.bf16.msra.mxu1 %v14033_v27  ;;  %12739 = vmatprep.subr.bf16.mxu0 %v14034_v28  ;;  %v1248_v27 = vsel %vm14843_vm4, %v11719_v21, %v1247_v22  ;;  %v1249_v28 = vrot.slane %v1247_v22, 4  ;;  %v741_v3 = vrot.slane %v740_v60, 4  ;;  %v14054_v22 = vld [vmem:[%s14827_s25 + $0x30] sm:$0xff]   ;;  %v14060_v60 = vld [vmem:[%s14827_s25 + $0x3c] sm:$0xff]  }
  0x76   : > { %12803 = vmatprep.subr.bf16.mxu1 %v14035_v29  ;;  %v14045_v29 = vld [vmem:[%s17816_s2 + $0x188] sm:$0xff]   ;;  %v717_v32 = vrot.slane %v716_v26, 4 }
  0x77   : > { %v1251_v34 = vsel %vm14843_vm4, %v1249_v28, %v1250_v24  ;;  %v746_v9 = vsel %vm14849_vm5, %v741_v3, %v745_v55  ;;  %v753_v24 = vrot.slane %v751_v18, 5  ;;  %v1151_v3 = vld [vmem:[%s14827_s25 + $0x30] sm:$0xe]  ;;  %v14064_v18 = vld [vmem:[%s17816_s2 + $0x158] sm:$0xff]  }
  0x78   : > { %12740 = vmatpush3.bf16.msra.mxu0 %v14036_v30  ;;  %v707_v30 = vrot.slane %v706_v23, 4  ;;  %v11735_v38 = vcombine.low %v1248_v27, %v1251_v34  ;;  %v722_v43 = vsel %vm14849_vm5, %v717_v32, %v721_v20  ;;  %v761_v20 = vshrl.u32 %v634_v15, 16 }
  0x79   : > { %12804 = vmatpush3.bf16.msra.mxu1 %v14037_v31  ;;  %v14046_v31 = vld [vmem:[%s17816_s2 + $0x140] sm:$0xff]   ;;  %v750_v23 = vrot.slane %v748_v17, 4 }
  0x7a   : > { %12917 = vmatprep.subr.bf16.mxu1 %v14040_v56  ;;  %v712_v37 = vsel %vm14849_vm5, %v707_v30, %v711_v16  ;;  %12853 = vmatprep.subr.bf16.mxu0 %v14046_v31  ;;  %v730_v56 = vor.u32 %v729_v52, %v726_v51  ;;  %v635_v16 = vld [vmem:[%s14827_s25 + $0x2c] sm:$0x1]  ;;  %v763_v26 = vrot.slane %v761_v20, 4  ;;  %v1149_v30 = vld [vmem:[%s14827_s25 + $0x28] sm:$0xf] }
  0x7b   : > { %4001 = vmatmul.mubr.bf16.vlgmr.msra.gmra.mrb[0].mxu0 %v14039_v59  ;;  %v11703_v50 = vcombine.low %v712_v37, %v722_v43  ;;  %v1147_v59 = vld [vmem:[%s14827_s25 + $0x20] sm:$0x1]  ;;  %v767_v21 = vshll.u32 %v635_v16, 16  ;;  %v754_v28 = vor.u32 %v753_v24, %v750_v23  ;;  %v1150_v31 = vld [vmem:[%s14827_s25 + $0x2c] sm:$0x1]  ;;  %v1261_v34 = vrot.slane %v1149_v30, 5 }
  0x7c   : > { %4098 = vmatmul.mubr.bf16.vlgmr.msra.gmra.mrb[0].mxu1 %v11734_v8  ;;  %12854 = vmatpush3.bf16.msra.mxu0 %v14047_v35  ;;  %v1257_v63 = vrot.slane %v1147_v59, 5  ;;  %v731_v1 = vrot.slane %v730_v56, 4  ;;  %v14052_v8 = vld [vmem:[%s17816_s2 + $0x148] sm:$0xff]   ;;  %v1264_v35 = vrot.slane %v1150_v31, 5  ;;  %v791_v59 = vshll.u32 %v638_v54, 16 }
  0x7d   : > { %12918 = vmatpush3.bf16.msra.mxu1 %v14041_v62  ;;  %4105 = vmatprep.mubr.bf16.mxu1 %v14042_v6  ;;  %v1254_v62 = vrot.slane %v1146_v58, 5  ;;  %v769_v27 = vrot.slane %v767_v21, 5  ;;  %v755_v37 = vrot.slane %v754_v28, 4  ;;  %v1263_v42 = vrot.slane %v1261_v34, 4  ;;  %v14065_v21 = vld [vmem:[%s17816_s2 + $0x118] sm:$0xff]  }
  0x7e   : > { %12919 = vmatprep.subr.bf16.mxu1 %v14044_v25  ;;  %4008 = vmatprep.mubr.bf16.mxu0 %v11703_v50  ;;  %v736_v7 = vsel %vm14849_vm5, %v731_v1, %v735_v53  ;;  %v759_v25 = vrot.slane %v757_v19, 5  ;;  %v636_v50 = vld [vmem:[%s14827_s25 + $0x30] sm:$0xf]  ;;  %v637_v53 = vld [vmem:[%s14827_s25 + $0x34] sm:$0xf]  ;;  %v793_v1 = vrot.slane %v791_v59, 5 }
  0x7f   : > { %v1255_v5 = vsel %vm14843_vm4, %v11720_v61, %v1254_v62  ;;  %v1256_v6 = vrot.slane %v1254_v62, 4  ;;  %v11704_v13 = vcombine.low %v736_v7, %v746_v9  ;;  %12855 = vmatprep.subr.bf16.mxu0 %v14052_v8  ;;  %v1265_v46 = vsel %vm14843_vm4, %v1263_v42, %v1264_v35  ;;  %v14071_v59 = vld [vmem:[%s17816_s2 + $0x120] sm:$0xff]  }
  0x80   : > { %12856 = vmatpush3.bf16.msra.mxu0 %v14053_v11  ;;  %v764_v32 = vor.u32 %v763_v26, %v759_v25  ;;  %v760_v43 = vsel %vm14849_vm5, %v755_v37, %v759_v25  ;;  %v772_v55 = vshrl.u32 %v636_v50, 16  ;;  %v775_v56 = vshll.u32 %v636_v50, 16  ;;  %v640_v25 = vld [vmem:[%s14827_s25 + $0x40] sm:$0xf]  ;;  %v641_v26 = vld [vmem:[%s14827_s25 + $0x44] sm:$0x1] }
  0x81   : > { %12920 = vmatpush3.bf16.msra.mxu1 %v14045_v29  ;;  %v1258_v10 = vsel %vm14843_vm4, %v1256_v6, %v1257_v63  ;;  %v1148_v29 = vld [vmem:[%s14827_s25 + $0x24] sm:$0xe]  ;;  %12857 = vmatprep.subr.bf16.mxu0 %v14058_v44  ;;  %v781_v57 = vshll.u32 %v637_v53, 16  ;;  %v785_v58 = vshrl.u32 %v637_v53, 16  ;;  %v11722_v7 = vrot.slane %v1151_v3, 9  ;;  %v14069_v50 = vld [vmem:[%s17816_s2 + $0x1a8] sm:$0xff]  }
  0x82   : > { %12921 = vmatprep.subr.bf16.mxu1 %v14050_v0  ;;  %v11736_v14 = vcombine.low %v1255_v5, %v1258_v10  ;;  %v765_v39 = vrot.slane %v764_v32, 4  ;;  %v774_v61 = vrot.slane %v772_v55, 4  ;;  %v777_v62 = vrot.slane %v775_v56, 5  ;;  %v1153_v5 = vld [vmem:[%s14827_s25 + $0x38] sm:$0x1]  ;;  %v14062_v10 = vld [vmem:[%s17816_s2 + $0x1e0] sm:$0xff]  }
  0x83   : > { %4009 = vmatmul.mubr.bf16.gmra.mrb[4].mxu0 %v14043_v33  ;;  %v11721_v33 = vrot.slane %v1148_v29, 9  ;;  %v783_v63 = vrot.slane %v781_v57, 5  ;;  %v787_v0 = vrot.slane %v785_v58, 4  ;;  %v1271_v9 = vrot.slane %v1153_v5, 5  ;;  %v14066_v32 = vld [vmem:[%s14827_s25 + $0x48] sm:$0xff]   ;;  %v14070_v56 = vld [vmem:[%s17816_s2 + $0x160] sm:$0xff]  }
  0x84   : > { %4106 = vmatmul.mubr.bf16.gmra.mrb[4].mxu1 %v11735_v38  ;;  %4016 = vmatprep.mubr.bf16.mxu0 %v11704_v13  ;;  %v14057_v38 = vld [vmem:[%s17816_s2 + $0x198] sm:$0xff]   ;;  %v770_v45 = vsel %vm14849_vm5, %v765_v39, %v769_v27  ;;  %v805_v29 = vshll.u32 %v640_v25, 16  ;;  %v809_v30 = vshrl.u32 %v640_v25, 16  ;;  %v815_v31 = vshll.u32 %v641_v26, 16 }
  0x85   : > { %4113 = vmatprep.mubr.bf16.mxu1 %v14048_v47  ;;  %12922 = vmatpush3.bf16.msra.mxu1 %v14051_v2  ;;  %v1262_v41 = vsel %vm14843_vm4, %v11721_v33, %v1261_v34  ;;  %v14059_v47 = vld [vmem:[%s17816_s2 + $0x110] sm:$0xff]   ;;  %v11705_v51 = vcombine.low %v760_v43, %v770_v45  ;;  %v778_v2 = vor.u32 %v777_v62, %v774_v61  ;;  %v1154_v39 = vld [vmem:[%s14827_s25 + $0x3c] sm:$0xe] }
  0x86   : > { %12923 = vmatprep.subr.bf16.mxu1 %v14056_v36  ;;  %v11737_v52 = vcombine.low %v1262_v41, %v1265_v46  ;;  %12858 = vmatpush3.bf16.msra.mxu0 %v14059_v47  ;;  %v788_v6 = vor.u32 %v787_v0, %v783_v63  ;;  %v807_v35 = vrot.slane %v805_v29, 5  ;;  %v811_v36 = vrot.slane %v809_v30, 4  ;;  %v1156_v41 = vld [vmem:[%s14827_s25 + $0x44] sm:$0x1]  ;;  %v14068_v46 = vld [vmem:[%s17816_s2 + $0x1e8] sm:$0xff]  }
  0x87   : > { %v779_v11 = vrot.slane %v778_v2, 4  ;;  %12859 = vmatprep.subr.bf16.mxu0 %v14064_v18  ;;  %v817_v37 = vrot.slane %v815_v31, 5  ;;  %v11723_v43 = vrot.slane %v1154_v39, 9  ;;  %v1278_v45 = vrot.slane %v1156_v41, 5  ;;  %v644_v0 = vld [vmem:[%s14827_s25 + $0x50] sm:$0x1] }
  0x88   : > { %v789_v13 = vrot.slane %v788_v6, 4  ;;  %v812_v42 = vor.u32 %v811_v36, %v807_v35  ;;  %v839_v5 = vshll.u32 %v644_v0, 16  ;;  %v14072_v6 = vld [vmem:[%s14827_s25 + $0x54] sm:$0xff]   ;;  %v14077_v31 = vld [vmem:[%s17816_s2 + $0x128] sm:$0xff]   ;;  %v647_v36 = vld [vmem:[%s14827_s25 + $0x5c] sm:$0x1] }
  0x89   : > { %12924 = vmatpush3.bf16.msra.mxu1 %v14057_v38  ;;  %v784_v17 = vsel %vm14849_vm5, %v779_v11, %v783_v63  ;;  %v643_v63 = vld [vmem:[%s14827_s25 + $0x4c] sm:$0xf]  ;;  %v863_v41 = vshll.u32 %v647_v36, 16 }
  0x8a   : > { %12925 = vmatprep.subr.bf16.mxu1 %v14062_v10  ;;  %v794_v19 = vsel %vm14849_vm5, %v789_v13, %v793_v1  ;;  %12860 = vmatpush3.bf16.msra.mxu0 %v14065_v21  ;;  %v829_v3 = vshll.u32 %v643_v63, 16  ;;  %v841_v11 = vrot.slane %v839_v5, 5  ;;  %v1157_v13 = vld [vmem:[%s14827_s25 + $0x48] sm:$0xe]  ;;  %v14083_v5 = vld [vmem:[%s17816_s2 + $0x1b8] sm:$0xff]  }
  0x8b   : > { %4017 = vmatmul.mubr.bf16.gmra.mrb[8].mxu0 %v14049_v4  ;;  %v1152_v4 = vld [vmem:[%s14827_s25 + $0x34] sm:$0xf]  ;;  %v11706_v23 = vcombine.low %v784_v17, %v794_v19  ;;  %12861 = vmatprep.subr.bf16.mxu0 %v14070_v56  ;;  %v11724_v17 = vrot.slane %v1157_v13, 9 }
  0x8c   : > { %4114 = vmatmul.mubr.bf16.gmra.mrb[8].mxu1 %v11736_v14  ;;  %4024 = vmatprep.mubr.bf16.mxu0 %v11705_v51  ;;  %v1268_v8 = vrot.slane %v1152_v4, 5  ;;  %v14061_v14 = vld [vmem:[%s14827_s25 + $0x30] sm:$0xff]   ;;  %v813_v51 = vrot.slane %v812_v42, 4  ;;  %v833_v4 = vshrl.u32 %v643_v63, 16  ;;  %v14078_v42 = vld [vmem:[%s14827_s25 + $0x60] sm:$0xff]  }
  0x8d   : > { %4121 = vmatprep.mubr.bf16.mxu1 %v14054_v22  ;;  %12926 = vmatpush3.bf16.msra.mxu1 %v14063_v12  ;;  %v639_v22 = vld [vmem:[%s14827_s25 + $0x3c] sm:$0xf] }
  0x8e   : > { %v1269_v15 = vsel %vm14843_vm4, %v11722_v7, %v1268_v8  ;;  %v1270_v16 = vrot.slane %v1268_v8, 4  ;;  %v796_v27 = vshrl.u32 %v639_v22, 16  ;;  %v799_v28 = vshll.u32 %v639_v22, 16  ;;  %12927 = vmatprep.subr.bf16.mxu1 %v14068_v46  ;;  %12862 = vmatpush3.bf16.msra.mxu0 %v14071_v59  ;;  %v14075_v22 = vld [vmem:[%s17816_s2 + $0x1b0] sm:$0xff]  }
  0x8f   : > { %v818_v57 = vsel %vm14849_vm5, %v813_v51, %v817_v37  ;;  %v835_v10 = vrot.slane %v833_v4, 4  ;;  %v1160_v51 = vld [vmem:[%s14827_s25 + $0x54] sm:$0xe] }
  0x90   : > { %v1272_v20 = vsel %vm14843_vm4, %v1270_v16, %v1271_v9  ;;  %v798_v33 = vrot.slane %v796_v27, 4  ;;  %v801_v34 = vrot.slane %v799_v28, 5  ;;  %v831_v9 = vrot.slane %v829_v3, 5  ;;  %v14076_v28 = vld [vmem:[%s17816_s2 + $0x168] sm:$0xff]  }
  0x91   : > { %v11738_v24 = vcombine.low %v1269_v15, %v1272_v20  ;;  %12928 = vmatpush3.bf16.msra.mxu1 %v14069_v50  ;;  %v1159_v15 = vld [vmem:[%s14827_s25 + $0x50] sm:$0x1]  ;;  %12863 = vmatprep.subr.bf16.mxu0 %v14076_v28 }
  0x92   : > { %v802_v38 = vor.u32 %v801_v34, %v798_v33  ;;  %v836_v16 = vor.u32 %v835_v10, %v831_v9  ;;  %v1285_v19 = vrot.slane %v1159_v15, 5  ;;  %v14074_v20 = vld [vmem:[%s17816_s2 + $0x1f0] sm:$0xff]   ;;  %12864 = vmatpush3.bf16.msra.mxu0 %v14077_v31  ;;  %v11862_v10 = vld [vmem:[%s14827_s25 + $0xc] sm:$0xe] }
  0x93   : > { %4025 = vmatmul.mubr.bf16.gmra.mrb[12].mxu0 %v14055_v40  ;;  %v1155_v40 = vld [vmem:[%s14827_s25 + $0x40] sm:$0xf]  ;;  %12929 = vmatprep.subr.bf16.mxu1 %v14074_v20  ;;  %v11910_v13 = vrot.slane %v11862_v10, 9 }
  0x94   : > { %4122 = vmatmul.mubr.bf16.gmra.mrb[12].mxu1 %v11737_v52  ;;  %4032 = vmatprep.mubr.bf16.mxu0 %v11706_v23  ;;  %v1275_v44 = vrot.slane %v1155_v40, 5  ;;  %v803_v47 = vrot.slane %v802_v38, 4  ;;  %v14067_v52 = vld [vmem:[%s14827_s25 + $0x3c] sm:$0xff]   ;;  %v837_v23 = vrot.slane %v836_v16, 4  ;;  %v11990_v16 = vld [vmem:[%s14827_s25 + $0x18] sm:$0xf] }
  0x95   : > { %4129 = vmatprep.mubr.bf16.mxu1 %v14060_v60  ;;  %v642_v60 = vld [vmem:[%s14827_s25 + $0x48] sm:$0xf]  ;;  %12930 = vmatpush3.bf16.msra.mxu1 %v14075_v22  ;;  %v2572_v20 = vshll.u32 %v11990_v16, 16 }
  0x96   : > { %v1276_v53 = vsel %vm14843_vm4, %v11723_v43, %v1275_v44  ;;  %v1277_v54 = vrot.slane %v1275_v44, 4  ;;  %v808_v55 = vsel %vm14849_vm5, %v803_v47, %v807_v35  ;;  %v820_v1 = vshrl.u32 %v642_v60, 16  ;;  %v646_v35 = vld [vmem:[%s14827_s25 + $0x58] sm:$0xf] }
  0x97   : > { %v11707_v61 = vcombine.low %v808_v55, %v818_v57  ;;  %v823_v2 = vshll.u32 %v642_v60, 16  ;;  %v842_v29 = vsel %vm14849_vm5, %v837_v23, %v841_v11  ;;  %v853_v39 = vshll.u32 %v646_v35, 16  ;;  %v14081_v60 = vld [vmem:[%s17816_s2 + $0x1f8] sm:$0xff]   ;;  %v11863_v11 = vld [vmem:[%s14827_s25 + $0x10] sm:$0xf] }
  0x98   : > { %v1279_v58 = vsel %vm14843_vm4, %v1277_v54, %v1278_v45  ;;  %v822_v7 = vrot.slane %v820_v1, 4  ;;  %v857_v40 = vshrl.u32 %v646_v35, 16  ;;  %v865_v47 = vrot.slane %v863_v41, 5  ;;  %12931 = vmatprep.subr.bf16.mxu1 %v14081_v60  ;;  %v11867_v60 = vld [vmem:[%s14827_s25 + $0x20] sm:$0x1] }
  0x99   : > { %v11739_v62 = vcombine.low %v1276_v53, %v1279_v58  ;;  %v825_v8 = vrot.slane %v823_v2, 5  ;;  %v855_v45 = vrot.slane %v853_v39, 5  ;;  %v1162_v53 = vld [vmem:[%s14827_s25 + $0x5c] sm:$0x1]  ;;  %v11725_v55 = vrot.slane %v1160_v51, 9  ;;  %v14080_v58 = vld [vmem:[%s17816_s2 + $0x170] sm:$0xff]   ;;  %12932 = vmatpush3.bf16.msra.mxu1 %v14083_v5 }
  0x9a   : > { %v859_v46 = vrot.slane %v857_v40, 4  ;;  %v1292_v57 = vrot.slane %v1162_v53, 5  ;;  %12865 = vmatprep.subr.bf16.mxu0 %v14080_v58  ;;  %v14082_v2 = vld [vmem:[%s17816_s2 + $0x130] sm:$0xff]   ;;  %v14086_v51 = vld [vmem:[%s14827_s25 + $0x18] sm:$0xff]   ;;  %v2195_v5 = vrot.slane %v11867_v60, 5 }
  0x9b   : > { %4033 = vmatmul.mubr.bf16.gmra.mrb[16].mxu0 %v14061_v14  ;;  %v826_v12 = vor.u32 %v825_v8, %v822_v7  ;;  %v1158_v14 = vld [vmem:[%s14827_s25 + $0x4c] sm:$0xf]  ;;  %v14084_v8 = vld [vmem:[%s17816_s2 + $0x178] sm:$0xff]  }
  0x9c   : > { %4130 = vmatmul.mubr.bf16.gmra.mrb[16].mxu1 %v11738_v24  ;;  %4040 = vmatprep.mubr.bf16.mxu0 %v11707_v61  ;;  %v1282_v18 = vrot.slane %v1158_v14, 5  ;;  %v14073_v24 = vld [vmem:[%s14827_s25 + $0x48] sm:$0xff]   ;;  %v860_v54 = vor.u32 %v859_v46, %v855_v45  ;;  %v2185_v14 = vrot.slane %v11863_v11, 5 }
  0x9d   : > { %4137 = vmatprep.mubr.bf16.mxu1 %v14066_v32  ;;  %v827_v21 = vrot.slane %v826_v12, 4  ;;  %v645_v32 = vld [vmem:[%s14827_s25 + $0x54] sm:$0xf]  ;;  %12866 = vmatpush3.bf16.msra.mxu0 %v14082_v2 }
  0x9e   : > { %v1283_v25 = vsel %vm14843_vm4, %v11724_v17, %v1282_v18  ;;  %v1284_v26 = vrot.slane %v1282_v18, 4  ;;  %v844_v37 = vshrl.u32 %v645_v32, 16  ;;  %v847_v38 = vshll.u32 %v645_v32, 16  ;;  %v11864_v12 = vld [vmem:[%s14827_s25 + $0x14] sm:$0x1]  ;;  %12867 = vmatprep.subr.bf16.mxu0 %v14084_v8 }
  0x9f   : > { %v832_v27 = vsel %vm14849_vm5, %v827_v21, %v831_v9  ;;  %v861_v61 = vrot.slane %v860_v54, 4  ;;  %v14085_v9 = vld [vmem:[%s17816_s2 + $0x138] sm:$0xff]   ;;  %v2188_v15 = vrot.slane %v11864_v12, 5  ;;  %v11992_v18 = vld [vmem:[%s14827_s25 + $0x20] sm:$0x1]  ;;  %v2186_v23 = vsel %vm14843_vm4, %v11910_v13, %v2185_v14 }
  0xa0   : > { %v1286_v30 = vsel %vm14843_vm4, %v1284_v26, %v1285_v19  ;;  %v11708_v33 = vcombine.low %v832_v27, %v842_v29  ;;  %v846_v43 = vrot.slane %v844_v37, 4  ;;  %v849_v44 = vrot.slane %v847_v38, 5  ;;  %v11991_v17 = vld [vmem:[%s14827_s25 + $0x1c] sm:$0xf]  ;;  %v11798_v26 = vld [vmem:[%s14827_s25 + $0xc] sm:$0xf] }
  0xa1   : > { %v11740_v34 = vcombine.low %v1283_v25, %v1286_v30  ;;  %v866_v3 = vsel %vm14849_vm5, %v861_v61, %v865_v47  ;;  %12868 = vmatpush3.bf16.msra.mxu0 %v14085_v9  ;;  %v2569_v19 = vshrl.u32 %v11990_v16, 16  ;;  %v2578_v21 = vshll.u32 %v11991_v17, 16  ;;  %v11799_v27 = vld [vmem:[%s14827_s25 + $0x10] sm:$0xf]  ;;  %v11800_v32 = vld [vmem:[%s14827_s25 + $0x14] sm:$0x1] }
  0xa2   : > { %v850_v50 = vor.u32 %v849_v44, %v846_v43  ;;  %v2582_v22 = vshrl.u32 %v11991_v17, 16  ;;  %v2588_v25 = vshll.u32 %v11992_v18, 16  ;;  %v2574_v29 = vrot.slane %v2572_v20, 5  ;;  %v14087_v37 = vld [vmem:[%s17816_s2 + $0x40] sm:$0xff]  }
  0xa3   : > { %4041 = vmatmul.mubr.bf16.gmra.mrb[20].mxu0 %v14067_v52  ;;  %v1161_v52 = vld [vmem:[%s14827_s25 + $0x58] sm:$0xf]  ;;  %v2571_v28 = vrot.slane %v2569_v19, 4  ;;  %v2580_v30 = vrot.slane %v2578_v21, 5  ;;  %v1624_v35 = vshrl.u32 %v11798_v26, 16  ;;  %v1627_v36 = vshll.u32 %v11798_v26, 16  ;;  %12997 = vmatprep.subr.bf16.mxu1 %v14087_v37 }
  0xa4   : > { %4138 = vmatmul.mubr.bf16.gmra.mrb[20].mxu1 %v11739_v62  ;;  %4048 = vmatprep.mubr.bf16.mxu0 %v11708_v33  ;;  %v1289_v56 = vrot.slane %v1161_v52, 5  ;;  %v851_v59 = vrot.slane %v850_v50, 4  ;;  %v14079_v62 = vld [vmem:[%s14827_s25 + $0x54] sm:$0xff]   ;;  %v2584_v31 = vrot.slane %v2582_v22, 4  ;;  %v1633_v41 = vshll.u32 %v11799_v27, 16 }
  0xa5   : > { %4145 = vmatprep.mubr.bf16.mxu1 %v14072_v6  ;;  %v2575_v39 = vor.u32 %v2574_v29, %v2571_v28  ;;  %v1629_v43 = vrot.slane %v1627_v36, 5  ;;  %v1637_v44 = vshrl.u32 %v11799_v27, 16  ;;  %v11803_v20 = vld [vmem:[%s14827_s25 + $0x20] sm:$0x1]  ;;  %v14091_v29 = vld [vmem:[%s17816_s2 + $0x8] sm:$0xff]  }
  0xa6   : > { %v1290_v63 = vsel %vm14843_vm4, %v11725_v55, %v1289_v56  ;;  %v1291_v0 = vrot.slane %v1289_v56, 4  ;;  %v856_v1 = vsel %vm14849_vm5, %v851_v59, %v855_v45  ;;  %v2585_v40 = vor.u32 %v2584_v31, %v2580_v30  ;;  %v14088_v55 = vld [vmem:[%s17816_s2] sm:$0xff]   ;;  %v11865_v56 = vld [vmem:[%s14827_s25 + $0x18] sm:$0xe]  ;;  %v11866_v59 = vld [vmem:[%s14827_s25 + $0x1c] sm:$0xf] }
  0xa7   : > { %v11709_v6 = vcombine.low %v856_v1, %v866_v3  ;;  %v1643_v45 = vshll.u32 %v11800_v32, 16  ;;  %v2576_v46 = vrot.slane %v2575_v39, 4  ;;  %v1635_v50 = vrot.slane %v1633_v41, 5  ;;  %v11993_v3 = vld [vmem:[%s14827_s25 + $0x24] sm:$0xf] }
  0xa8   : > { %v1293_v4 = vsel %vm14843_vm4, %v1291_v0, %v1292_v57  ;;  %v2586_v47 = vrot.slane %v2585_v40, 4  ;;  %v1639_v53 = vrot.slane %v1637_v44, 4  ;;  %v11911_v61 = vrot.slane %v11865_v56, 9 }
  0xa9   : > { %v11741_v7 = vcombine.low %v1290_v63, %v1293_v4  ;;  %v1645_v54 = vrot.slane %v1643_v45, 5  ;;  %v2581_v57 = vsel %vm14849_vm5, %v2576_v46, %v2580_v30  ;;  %v2192_v2 = vrot.slane %v11866_v59, 5  ;;  %v11994_v4 = vld [vmem:[%s14827_s25 + $0x28] sm:$0xf]  ;;  %v11868_v46 = vld [vmem:[%s14827_s25 + $0x24] sm:$0xe] }
  0xaa   : > { %v1640_v1 = vor.u32 %v1639_v53, %v1635_v50  ;;  %v2596_v8 = vshll.u32 %v11993_v3, 16  ;;  %v2602_v9 = vshll.u32 %v11994_v4, 16  ;;  %v2606_v19 = vshrl.u32 %v11994_v4, 16  ;;  %v14089_v45 = vld [vmem:[%s14827_s25 + $0x24] sm:$0xff]   ;;  %v14094_v53 = vld [vmem:[%s17816_s2 + $0x50] sm:$0xff]  }
  0xab   : > { %4049 = vmatmul.mubr.bf16.gmra.mrb[24].mxu0 %v14073_v24  ;;  %v2187_v24 = vrot.slane %v2185_v14, 4  ;;  %v2193_v12 = vsel %vm14843_vm4, %v11911_v61, %v2192_v2  ;;  %v2194_v13 = vrot.slane %v2192_v2, 4  ;;  %v11801_v14 = vld [vmem:[%s14827_s25 + $0x18] sm:$0xf]  ;;  %v1667_v37 = vshll.u32 %v11803_v20, 16 }
  0xac   : > { %4146 = vmatmul.mubr.bf16.gmra.mrb[24].mxu1 %v11740_v34  ;;  %4056 = vmatprep.mubr.bf16.mxu0 %v11709_v6  ;;  %v2590_v34 = vrot.slane %v2588_v25, 5  ;;  %v11995_v6 = vld [vmem:[%s14827_s25 + $0x2c] sm:$0x1]  ;;  %v1641_v11 = vrot.slane %v1640_v1, 4  ;;  %v2598_v17 = vrot.slane %v2596_v8, 5  ;;  %v2604_v18 = vrot.slane %v2602_v9, 5 }
  0xad   : > { %4153 = vmatprep.mubr.bf16.mxu1 %v14078_v42  ;;  %v2189_v33 = vsel %vm14843_vm4, %v2187_v24, %v2188_v15  ;;  %v1626_v42 = vrot.slane %v1624_v35, 4  ;;  %v11802_v15 = vld [vmem:[%s14827_s25 + $0x1c] sm:$0xf]  ;;  %v2196_v22 = vsel %vm14843_vm4, %v2194_v13, %v2195_v5  ;;  %v1648_v24 = vshrl.u32 %v11801_v14, 16  ;;  %v11997_v59 = vld [vmem:[%s14827_s25 + $0x34] sm:$0xf] }
  0xae   : > { %v11926_v38 = vcombine.low %v2186_v23, %v2189_v33  ;;  %v2591_v58 = vsel %vm14849_vm5, %v2586_v47, %v2590_v34  ;;  %v1646_v21 = vsel %vm14849_vm5, %v1641_v11, %v1645_v54  ;;  %v2612_v23 = vshll.u32 %v11995_v6, 16  ;;  %v14095_v1 = vld [vmem:[%s17816_s2 + $0x10] sm:$0xff]   ;;  %v11804_v6 = vld [vmem:[%s14827_s25 + $0x24] sm:$0xf] }
  0xaf   : > { %v1630_v52 = vor.u32 %v1629_v43, %v1626_v42  ;;  %v12038_v63 = vcombine.low %v2581_v57, %v2591_v58  ;;  %v11927_v26 = vcombine.low %v2193_v12, %v2196_v22  ;;  %v2608_v28 = vrot.slane %v2606_v19, 4  ;;  %v11996_v58 = vld [vmem:[%s14827_s25 + $0x30] sm:$0xf]  ;;  %v11805_v12 = vld [vmem:[%s14827_s25 + $0x28] sm:$0xf]  ;;  %v14098_v22 = vld [vmem:[%s17816_s2 + $0x58] sm:$0xff]  }
  0xb0   : > { %v2614_v30 = vrot.slane %v2612_v23, 5  ;;  %v1650_v31 = vrot.slane %v1648_v24, 4  ;;  %v1651_v32 = vshll.u32 %v11801_v14, 16  ;;  %v1657_v33 = vshll.u32 %v11802_v15, 16 }
  0xb1   : > { %v1631_v0 = vrot.slane %v1630_v52, 4  ;;  %v2609_v35 = vor.u32 %v2608_v28, %v2604_v18  ;;  %v1661_v36 = vshrl.u32 %v11802_v15, 16  ;;  %v1669_v44 = vrot.slane %v1667_v37, 5 }
  0xb2   : > { %v1653_v39 = vrot.slane %v1651_v32, 5  ;;  %v1659_v40 = vrot.slane %v1657_v33, 5  ;;  %v11912_v52 = vrot.slane %v11868_v46, 9  ;;  %v2626_v5 = vshll.u32 %v11997_v59, 16  ;;  %v11873_v46 = vld [vmem:[%s14827_s25 + $0x38] sm:$0x1] }
  0xb3   : > { %4057 = vmatmul.mubr.bf16.gmra.mrb[28].mxu0 %v14079_v62  ;;  %v14090_v62 = vld [vmem:[%s17816_s2 + $0x48] sm:$0xff]   ;;  %v1636_v10 = vsel %vm14849_vm5, %v1631_v0, %v1635_v50  ;;  %v2610_v42 = vrot.slane %v2609_v35, 4  ;;  %v1663_v43 = vrot.slane %v1661_v36, 4  ;;  %v2620_v0 = vshll.u32 %v11996_v58, 16  ;;  %v14100_v35 = vld [vmem:[%s17816_s2 + $0x210] sm:$0xff]  }
  0xb4   : > { %4154 = vmatmul.mubr.bf16.gmra.mrb[28].mxu1 %v11741_v7  ;;  %4194 = vmatprep.mubr.bf16.mxu0 %v11926_v38  ;;  %v2593_v7 = vshrl.u32 %v11993_v3, 16  ;;  %v11846_v25 = vcombine.low %v1636_v10, %v1646_v21  ;;  %v14092_v38 = vld [vmem:[%s17816_s2 + $0x200] sm:$0xff]   ;;  %v1654_v47 = vor.u32 %v1653_v39, %v1650_v31  ;;  %v11869_v50 = vld [vmem:[%s14827_s25 + $0x28] sm:$0xf]  ;;  %v2630_v11 = vshrl.u32 %v11997_v59, 16  ;;  %v14099_v31 = vld [vmem:[%s17816_s2 + $0x18] sm:$0xff]  }
  0xb5   : > { %4291 = vmatprep.mubr.bf16.mxu1 %v12038_v63  ;;  %13813 = vmatprep.subr.bf16.mxu0 %v14092_v38  ;;  %v2615_v54 = vsel %vm14849_vm5, %v2610_v42, %v2614_v30  ;;  %v2199_v56 = vrot.slane %v11869_v50, 5  ;;  %v2617_v63 = vshrl.u32 %v11996_v58, 16  ;;  %v2622_v10 = vrot.slane %v2620_v0, 5  ;;  %v11871_v42 = vld [vmem:[%s14827_s25 + $0x30] sm:$0xe] }
  0xb6   : > { %v2595_v16 = vrot.slane %v2593_v7, 4  ;;  %v1655_v61 = vrot.slane %v1654_v47, 4  ;;  %v14096_v7 = vld [vmem:[%s17816_s2 + $0x208] sm:$0xff]   ;;  %v2628_v15 = vrot.slane %v2626_v5, 5  ;;  %v2632_v21 = vrot.slane %v2630_v11, 4 }
  0xb7   : > { %v2200_v3 = vsel %vm14843_vm4, %v11912_v52, %v2199_v56  ;;  %v2201_v4 = vrot.slane %v2199_v56, 4  ;;  %v2619_v9 = vrot.slane %v2617_v63, 4  ;;  %v1672_v24 = vshrl.u32 %v11804_v6, 16  ;;  %v12001_v56 = vld [vmem:[%s14827_s25 + $0x44] sm:$0x1] }
  0xb8   : > { %v2599_v27 = vor.u32 %v2598_v17, %v2595_v16  ;;  %v1660_v8 = vsel %vm14849_vm5, %v1655_v61, %v1659_v40  ;;  %v11806_v17 = vld [vmem:[%s14827_s25 + $0x2c] sm:$0x1]  ;;  %v2633_v28 = vor.u32 %v2632_v21, %v2628_v15  ;;  %v11913_v47 = vrot.slane %v11871_v42, 9  ;;  %v11807_v61 = vld [vmem:[%s14827_s25 + $0x30] sm:$0xf] }
  0xb9   : > { %v2623_v20 = vor.u32 %v2622_v10, %v2619_v9  ;;  %v1691_v30 = vshll.u32 %v11806_v17, 16  ;;  %v1674_v32 = vrot.slane %v1672_v24, 4  ;;  %v11809_v9 = vld [vmem:[%s14827_s25 + $0x38] sm:$0x1]  ;;  %v1699_v17 = vshll.u32 %v11807_v61, 16 }
  0xba   : > { %v2600_v34 = vrot.slane %v2599_v27, 4  ;;  %v2634_v37 = vrot.slane %v2633_v28, 4  ;;  %v1715_v21 = vshll.u32 %v11809_v9, 16 }
  0xbb   : > { %4195 = vmatmul.mubr.bf16.vlgmr.msra.gmra.mrb[32].mxu0 %v11846_v25  ;;  %v1675_v25 = vshll.u32 %v11804_v6, 16  ;;  %v2624_v27 = vrot.slane %v2623_v20, 4  ;;  %v1693_v39 = vrot.slane %v1691_v30, 5 }
  0xbc   : > { %4292 = vmatmul.mubr.bf16.vlgmr.msra.gmra.mrb[32].mxu1 %v14086_v51  ;;  %4202 = vmatprep.mubr.bf16.mxu0 %v11927_v26  ;;  %v2605_v41 = vsel %vm14849_vm5, %v2600_v34, %v2604_v18  ;;  %v11870_v51 = vld [vmem:[%s14827_s25 + $0x2c] sm:$0x1]  ;;  %v1681_v26 = vshll.u32 %v11805_v12, 16 }
  0xbd   : > { %12998 = vmatpush3.bf16.msra.mxu1 %v14088_v55  ;;  %13814 = vmatpush3.bf16.msra.mxu0 %v14092_v38  ;;  %v1664_v55 = vor.u32 %v1663_v43, %v1659_v40  ;;  %v2202_v57 = vrot.slane %v11870_v51, 5  ;;  %v12039_v60 = vcombine.low %v2605_v41, %v2615_v54  ;;  %v1677_v33 = vrot.slane %v1675_v25, 5  ;;  %v14093_v40 = vld [vmem:[%s14827_s25 + $0x30] sm:$0xff]   ;;  %v11999_v51 = vld [vmem:[%s14827_s25 + $0x3c] sm:$0xf] }
  0xbe   : > { %12999 = vmatprep.subr.bf16.mxu1 %v14090_v62  ;;  %v11998_v62 = vld [vmem:[%s14827_s25 + $0x38] sm:$0x1]  ;;  %13815 = vmatprep.subr.bf16.mxu0 %v14096_v7  ;;  %v1683_v34 = vrot.slane %v1681_v26, 5  ;;  %v2629_v36 = vsel %vm14849_vm5, %v2624_v27, %v2628_v15  ;;  %v11872_v43 = vld [vmem:[%s14827_s25 + $0x34] sm:$0xf]  ;;  %v2209_v54 = vrot.slane %v11873_v46, 5 }
  0xbf   : > { %v1665_v2 = vrot.slane %v1664_v55, 4  ;;  %4299 = vmatprep.mubr.bf16.mxu1 %v12039_v60  ;;  %v2203_v14 = vsel %vm14843_vm4, %v2201_v4, %v2202_v57  ;;  %v2636_v16 = vshll.u32 %v11998_v62, 16  ;;  %v1678_v41 = vor.u32 %v1677_v33, %v1674_v32  ;;  %v12000_v55 = vld [vmem:[%s14827_s25 + $0x40] sm:$0xf]  ;;  %v11874_v33 = vld [vmem:[%s14827_s25 + $0x3c] sm:$0xe] }
  0xc0   : > { %v11928_v19 = vcombine.low %v2200_v3, %v2203_v14  ;;  %v2206_v50 = vrot.slane %v11872_v43, 5  ;;  %v2641_v60 = vshrl.u32 %v11999_v51, 16  ;;  %v14102_v62 = vld [vmem:[%s17816_s2 + $0x60] sm:$0xff]   ;;  %v2644_v0 = vshll.u32 %v11999_v51, 16  ;;  %v11808_v3 = vld [vmem:[%s14827_s25 + $0x34] sm:$0xf] }
  0xc1   : > { %13000 = vmatpush3.bf16.msra.mxu1 %v14091_v29  ;;  %v1670_v13 = vsel %vm14849_vm5, %v1665_v2, %v1669_v44  ;;  %13816 = vmatpush3.bf16.msra.mxu0 %v14096_v7  ;;  %v2638_v23 = vrot.slane %v2636_v16, 5  ;;  %v1685_v29 = vshrl.u32 %v11805_v12, 16  ;;  %v2654_v2 = vshrl.u32 %v12000_v55, 16  ;;  %v14103_v4 = vld [vmem:[%s17816_s2 + $0x20] sm:$0xff]  }
  0xc2   : > { %13001 = vmatprep.subr.bf16.mxu1 %v14094_v53  ;;  %v11847_v18 = vcombine.low %v1660_v8, %v1670_v13  ;;  %13817 = vmatprep.subr.bf16.mxu0 %v14100_v35  ;;  %v1679_v53 = vrot.slane %v1678_v41, 4  ;;  %v2207_v58 = vsel %vm14843_vm4, %v11913_v47, %v2206_v50  ;;  %v2208_v59 = vrot.slane %v2206_v50, 4  ;;  %v14097_v32 = vld [vmem:[%s14827_s25 + $0x3c] sm:$0xff]  }
  0xc3   : > { %v1687_v38 = vrot.slane %v1685_v29, 4  ;;  %v2639_v44 = vsel %vm14849_vm5, %v2634_v37, %v2638_v23  ;;  %v2643_v7 = vrot.slane %v2641_v60, 4  ;;  %v2660_v8 = vshll.u32 %v12001_v56, 16  ;;  %v11876_v37 = vld [vmem:[%s14827_s25 + $0x44] sm:$0x1] }
  0xc4   : > { %4300 = vmatmul.mubr.bf16.gmra.mrb[36].mxu1 %v14089_v45  ;;  %4203 = vmatmul.mubr.bf16.gmra.mrb[36].mxu0 %v11847_v18  ;;  %v12040_v52 = vcombine.low %v2629_v36, %v2639_v44  ;;  %v1684_v63 = vsel %vm14849_vm5, %v1679_v53, %v1683_v34  ;;  %v2210_v6 = vsel %vm14843_vm4, %v2208_v59, %v2209_v54  ;;  %v2646_v12 = vrot.slane %v2644_v0, 5  ;;  %v12003_v44 = vld [vmem:[%s14827_s25 + $0x4c] sm:$0xf]  ;;  %v11811_v53 = vld [vmem:[%s14827_s25 + $0x40] sm:$0xf] }
  0xc5   : > { %13002 = vmatpush3.bf16.msra.mxu1 %v14095_v1  ;;  %4210 = vmatprep.mubr.bf16.mxu0 %v11928_v19  ;;  %v1688_v45 = vor.u32 %v1687_v38, %v1683_v34  ;;  %v2650_v1 = vshll.u32 %v12000_v55, 16  ;;  %v11929_v11 = vcombine.low %v2207_v58, %v2210_v6  ;;  %v2656_v14 = vrot.slane %v2654_v2, 4  ;;  %v11875_v34 = vld [vmem:[%s14827_s25 + $0x40] sm:$0xf]  ;;  %v11812_v58 = vld [vmem:[%s14827_s25 + $0x44] sm:$0x1] }
  0xc6   : > { %13003 = vmatprep.subr.bf16.mxu1 %v14098_v22  ;;  %13818 = vmatpush3.bf16.msra.mxu0 %v14100_v35  ;;  %v2662_v15 = vrot.slane %v2660_v8, 5  ;;  %v1696_v16 = vshrl.u32 %v11807_v61, 16  ;;  %v2647_v18 = vor.u32 %v2646_v12, %v2643_v7  ;;  %v1705_v19 = vshll.u32 %v11808_v3, 16  ;;  %v14104_v22 = vld [vmem:[%s17816_s2 + $0x218] sm:$0xff]   ;;  %v14106_v59 = vld [vmem:[%s17816_s2 + $0x68] sm:$0xff]  }
  0xc7   : > { %v1689_v57 = vrot.slane %v1688_v45, 4  ;;  %4307 = vmatprep.mubr.bf16.mxu1 %v12040_v52  ;;  %v2652_v13 = vrot.slane %v2650_v1, 5  ;;  %v1709_v20 = vshrl.u32 %v11808_v3, 16  ;;  %v1701_v25 = vrot.slane %v1699_v17, 5  ;;  %13819 = vmatprep.subr.bf16.mxu0 %v14104_v22  ;;  %v12004_v45 = vld [vmem:[%s14827_s25 + $0x50] sm:$0x1] }
  0xc8   : > { %v1698_v24 = vrot.slane %v1696_v16, 4  ;;  %v2648_v26 = vrot.slane %v2647_v18, 4  ;;  %v1707_v27 = vrot.slane %v1705_v19, 5  ;;  %v11914_v38 = vrot.slane %v11874_v33, 9  ;;  %v11810_v52 = vld [vmem:[%s14827_s25 + $0x3c] sm:$0xf] }
  0xc9   : > { %13004 = vmatpush3.bf16.msra.mxu1 %v14099_v31  ;;  %v1694_v5 = vsel %vm14849_vm5, %v1689_v57, %v1693_v39  ;;  %v2657_v23 = vor.u32 %v2656_v14, %v2652_v13  ;;  %v1711_v28 = vrot.slane %v1709_v20, 4  ;;  %v1717_v31 = vrot.slane %v1715_v21, 5  ;;  %v14107_v12 = vld [vmem:[%s17816_s2 + $0x28] sm:$0xff]  }
  0xca   : > { %13005 = vmatprep.subr.bf16.mxu1 %v14102_v62  ;;  %v11848_v10 = vcombine.low %v1684_v63, %v1694_v5  ;;  %v1702_v30 = vor.u32 %v1701_v25, %v1698_v24  ;;  %13820 = vmatpush3.bf16.msra.mxu0 %v14104_v22  ;;  %v2653_v35 = vsel %vm14849_vm5, %v2648_v26, %v2652_v13  ;;  %v2213_v39 = vrot.slane %v11875_v34, 5  ;;  %v11877_v20 = vld [vmem:[%s14827_s25 + $0x48] sm:$0xe]  ;;  %v11879_v24 = vld [vmem:[%s14827_s25 + $0x50] sm:$0x1] }
  0xcb   : > { %v2658_v29 = vrot.slane %v2657_v23, 4  ;;  %v1712_v36 = vor.u32 %v1711_v28, %v1707_v27  ;;  %v2216_v43 = vrot.slane %v11876_v37, 5  ;;  %v2674_v57 = vshll.u32 %v12003_v44, 16  ;;  %v11878_v23 = vld [vmem:[%s14827_s25 + $0x4c] sm:$0xf] }
  0xcc   : > { %4308 = vmatmul.mubr.bf16.gmra.mrb[40].mxu1 %v14093_v40  ;;  %4211 = vmatmul.mubr.bf16.gmra.mrb[40].mxu0 %v11848_v10  ;;  %v12002_v40 = vld [vmem:[%s14827_s25 + $0x48] sm:$0xf]  ;;  %v1703_v42 = vrot.slane %v1702_v30, 4  ;;  %v2214_v50 = vsel %vm14843_vm4, %v11914_v38, %v2213_v39  ;;  %v2215_v51 = vrot.slane %v2213_v39, 4  ;;  %v2678_v62 = vshrl.u32 %v12003_v44, 16 }
  0xcd   : > { %13006 = vmatpush3.bf16.msra.mxu1 %v14103_v4  ;;  %4218 = vmatprep.mubr.bf16.mxu0 %v11929_v11  ;;  %v2663_v41 = vsel %vm14849_vm5, %v2658_v29, %v2662_v15  ;;  %v1713_v47 = vrot.slane %v1712_v36, 4  ;;  %v2665_v55 = vshrl.u32 %v12002_v40, 16  ;;  %v2668_v56 = vshll.u32 %v12002_v40, 16  ;;  %v12005_v29 = vld [vmem:[%s14827_s25 + $0x54] sm:$0xf]  ;;  %v14101_v33 = vld [vmem:[%s14827_s25 + $0x48] sm:$0xff]  }
  0xce   : > { %v12041_v46 = vcombine.low %v2653_v35, %v2663_v41  ;;  %v1708_v54 = vsel %vm14849_vm5, %v1703_v42, %v1707_v27  ;;  %v2217_v61 = vsel %vm14843_vm4, %v2215_v51, %v2216_v43  ;;  %v2684_v63 = vshll.u32 %v12004_v45, 16  ;;  %13007 = vmatprep.subr.bf16.mxu1 %v14106_v59  ;;  %v12006_v30 = vld [vmem:[%s14827_s25 + $0x58] sm:$0xf]  ;;  %v12007_v36 = vld [vmem:[%s14827_s25 + $0x5c] sm:$0x1]  ;;  %v14110_v43 = vld [vmem:[%s17816_s2 + $0x70] sm:$0xff]  }
  0xcf   : > { %v1718_v60 = vsel %vm14849_vm5, %v1713_v47, %v1717_v31  ;;  %v11930_v1 = vcombine.low %v2214_v50, %v2217_v61  ;;  %v2667_v2 = vrot.slane %v2665_v55, 4  ;;  %v2670_v3 = vrot.slane %v2668_v56, 5  ;;  %v14108_v31 = vld [vmem:[%s17816_s2 + $0x220] sm:$0xff]   ;;  %v11813_v42 = vld [vmem:[%s14827_s25 + $0x48] sm:$0xf]  ;;  %v14111_v51 = vld [vmem:[%s17816_s2 + $0x30] sm:$0xff]  }
  0xd0   : > { %4315 = vmatprep.mubr.bf16.mxu1 %v12041_v46  ;;  %v11849_v0 = vcombine.low %v1708_v54, %v1718_v60  ;;  %v2676_v4 = vrot.slane %v2674_v57, 5  ;;  %v2680_v5 = vrot.slane %v2678_v62, 4  ;;  %v2686_v6 = vrot.slane %v2684_v63, 5  ;;  %13821 = vmatprep.subr.bf16.mxu0 %v14108_v31  ;;  %v11814_v50 = vld [vmem:[%s14827_s25 + $0x4c] sm:$0xf] }
  0xd1   : > { %v1720_v7 = vshrl.u32 %v11810_v52, 16  ;;  %v2671_v8 = vor.u32 %v2670_v3, %v2667_v2  ;;  %v1723_v9 = vshll.u32 %v11810_v52, 16  ;;  %v1729_v10 = vshll.u32 %v11811_v53, 16  ;;  %13008 = vmatpush3.bf16.msra.mxu1 %v14107_v12  ;;  %13822 = vmatpush3.bf16.msra.mxu0 %v14108_v31  ;;  %v11815_v56 = vld [vmem:[%s14827_s25 + $0x50] sm:$0x1] }
  0xd2   : > { %v1733_v11 = vshrl.u32 %v11811_v53, 16  ;;  %v2681_v13 = vor.u32 %v2680_v5, %v2676_v4  ;;  %v1739_v15 = vshll.u32 %v11812_v58, 16  ;;  %v11915_v28 = vrot.slane %v11877_v20, 9  ;;  %13009 = vmatprep.subr.bf16.mxu1 %v14110_v43 }
  0xd3   : > { %v1722_v14 = vrot.slane %v1720_v7, 4  ;;  %v2672_v16 = vrot.slane %v2671_v8, 4  ;;  %v1725_v17 = vrot.slane %v1723_v9, 5  ;;  %v1731_v18 = vrot.slane %v1729_v10, 5  ;;  %v14112_v9 = vld [vmem:[%s17816_s2 + $0x228] sm:$0xff]  }
  0xd4   : > { %4316 = vmatmul.mubr.bf16.gmra.mrb[44].mxu1 %v14097_v32  ;;  %4219 = vmatmul.mubr.bf16.gmra.mrb[44].mxu0 %v11849_v0  ;;  %v1735_v19 = vrot.slane %v1733_v11, 4  ;;  %v2682_v21 = vrot.slane %v2681_v13, 4  ;;  %v1741_v22 = vrot.slane %v1739_v15, 5  ;;  %v2220_v34 = vrot.slane %v11878_v23, 5 }
  0xd5   : > { %4226 = vmatprep.mubr.bf16.mxu0 %v11930_v1  ;;  %v2677_v25 = vsel %vm14849_vm5, %v2672_v16, %v2676_v4  ;;  %v1726_v26 = vor.u32 %v1725_v17, %v1722_v14  ;;  %v2223_v35 = vrot.slane %v11879_v24, 5  ;;  %v2689_v37 = vshrl.u32 %v12005_v29, 16  ;;  %13010 = vmatpush3.bf16.msra.mxu1 %v14111_v51  ;;  %v14105_v16 = vld [vmem:[%s14827_s25 + $0x54] sm:$0xff]   ;;  %v12008_v24 = vld [vmem:[%s14827_s25 + $0x60] sm:$0xf] }
  0xd6   : > { %v1736_v27 = vor.u32 %v1735_v19, %v1731_v18  ;;  %v2687_v32 = vsel %vm14849_vm5, %v2682_v21, %v2686_v6  ;;  %v2692_v41 = vshll.u32 %v12005_v29, 16  ;;  %v2221_v44 = vsel %vm14843_vm4, %v11915_v28, %v2220_v34  ;;  %v11880_v17 = vld [vmem:[%s14827_s25 + $0x54] sm:$0xe]  ;;  %13823 = vmatprep.subr.bf16.mxu0 %v14112_v9  ;;  %v11882_v21 = vld [vmem:[%s14827_s25 + $0x5c] sm:$0x1] }
  0xd7   : > { %v12042_v38 = vcombine.low %v2677_v25, %v2687_v32  ;;  %v1727_v39 = vrot.slane %v1726_v26, 4  ;;  %v2222_v45 = vrot.slane %v2220_v34, 4  ;;  %v2691_v46 = vrot.slane %v2689_v37, 4  ;;  %13824 = vmatpush3.bf16.msra.mxu0 %v14112_v9  ;;  %v12010_v28 = vld [vmem:[%s14827_s25 + $0x68] sm:$0x1] }
  0xd8   : > { %v1737_v40 = vrot.slane %v1736_v27, 4  ;;  %v2698_v47 = vshll.u32 %v12006_v30, 16  ;;  %v2694_v54 = vrot.slane %v2692_v41, 5  ;;  %v2702_v55 = vshrl.u32 %v12006_v30, 16  ;;  %v12009_v27 = vld [vmem:[%s14827_s25 + $0x64] sm:$0xf] }
  0xd9   : > { %4323 = vmatprep.mubr.bf16.mxu1 %v12042_v38  ;;  %v1732_v52 = vsel %vm14849_vm5, %v1727_v39, %v1731_v18  ;;  %v2224_v58 = vsel %vm14843_vm4, %v2222_v45, %v2223_v35  ;;  %v2708_v60 = vshll.u32 %v12007_v36, 16  ;;  %v1744_v0 = vshrl.u32 %v11813_v42, 16  ;;  %v11881_v18 = vld [vmem:[%s14827_s25 + $0x58] sm:$0xf]  ;;  %v11816_v34 = vld [vmem:[%s14827_s25 + $0x54] sm:$0xf] }
  0xda   : > { %v1742_v53 = vsel %vm14849_vm5, %v1737_v40, %v1741_v22  ;;  %v2700_v59 = vrot.slane %v2698_v47, 5  ;;  %v11931_v61 = vcombine.low %v2221_v44, %v2224_v58  ;;  %v2695_v62 = vor.u32 %v2694_v54, %v2691_v46  ;;  %v11817_v35 = vld [vmem:[%s14827_s25 + $0x58] sm:$0xf]  ;;  %v11818_v40 = vld [vmem:[%s14827_s25 + $0x5c] sm:$0x1] }
  0xdb   : > { %v11850_v57 = vcombine.low %v1732_v52, %v1742_v53  ;;  %v2704_v63 = vrot.slane %v2702_v55, 4  ;;  %v2710_v1 = vrot.slane %v2708_v60, 5  ;;  %v1747_v2 = vshll.u32 %v11813_v42, 16  ;;  %v14114_v55 = vld [vmem:[%s17816_s2 + $0x230] sm:$0xff]   ;;  %v14115_v60 = vld [vmem:[%s17816_s2 + $0x78] sm:$0xff]  }
  0xdc   : > { %4324 = vmatmul.mubr.bf16.gmra.mrb[48].mxu1 %v14101_v33  ;;  %v1753_v3 = vshll.u32 %v11814_v50, 16  ;;  %v1757_v4 = vshrl.u32 %v11814_v50, 16  ;;  %v2696_v5 = vrot.slane %v2695_v62, 4  ;;  %v1746_v7 = vrot.slane %v1744_v0, 4  ;;  %13825 = vmatprep.subr.bf16.mxu0 %v14114_v55  ;;  %v11885_v9 = vld [vmem:[%s14827_s25 + $0x68] sm:$0x1] }
  0xdd   : > { %4227 = vmatmul.mubr.bf16.gmra.mrb[48].mxu0 %v11850_v57  ;;  %v2705_v6 = vor.u32 %v2704_v63, %v2700_v59  ;;  %v1763_v8 = vshll.u32 %v11815_v56, 16  ;;  %v1749_v10 = vrot.slane %v1747_v2, 5  ;;  %v11916_v22 = vrot.slane %v11880_v17, 9  ;;  %13011 = vmatprep.subr.bf16.mxu1 %v14115_v60 }
  0xde   : > { %4234 = vmatprep.mubr.bf16.mxu0 %v11931_v61  ;;  %v1755_v11 = vrot.slane %v1753_v3, 5  ;;  %v1759_v12 = vrot.slane %v1757_v4, 4  ;;  %v2701_v13 = vsel %vm14849_vm5, %v2696_v5, %v2700_v59  ;;  %v2227_v23 = vrot.slane %v11881_v18, 5  ;;  %v11883_v4 = vld [vmem:[%s14827_s25 + $0x60] sm:$0xe]  ;;  %13826 = vmatpush3.bf16.msra.mxu0 %v14114_v55 }
  0xdf   : > { %v2706_v14 = vrot.slane %v2705_v6, 4  ;;  %v1765_v15 = vrot.slane %v1763_v8, 5  ;;  %v1750_v19 = vor.u32 %v1749_v10, %v1746_v7  ;;  %v2230_v26 = vrot.slane %v11882_v21, 5  ;;  %v14109_v7 = vld [vmem:[%s14827_s25 + $0x60] sm:$0xff]  }
  0xe0   : > { %v1760_v20 = vor.u32 %v1759_v12, %v1755_v11  ;;  %v2713_v29 = vshrl.u32 %v12008_v24, 16  ;;  %v2228_v33 = vsel %vm14843_vm4, %v11916_v22, %v2227_v23  ;;  %v2229_v36 = vrot.slane %v2227_v23, 4  ;;  %v11884_v8 = vld [vmem:[%s14827_s25 + $0x64] sm:$0xf]  ;;  %v14117_v22 = vld [vmem:[%s17816_s2 + $0x238] sm:$0xff]  }
  0xe1   : > { %v2711_v25 = vsel %vm14849_vm5, %v2706_v14, %v2710_v1  ;;  %v1751_v31 = vrot.slane %v1750_v19, 4  ;;  %v2716_v38 = vshll.u32 %v12008_v24, 16  ;;  %v2722_v39 = vshll.u32 %v12009_v27, 16  ;;  %v12011_v14 = vld [vmem:[%s14827_s25 + $0x6c] sm:$0xf]  ;;  %13827 = vmatprep.subr.bf16.mxu0 %v14117_v22 }
  0xe2   : > { %v12043_v30 = vcombine.low %v2701_v13, %v2711_v25  ;;  %v1761_v32 = vrot.slane %v1760_v20, 4  ;;  %v2715_v37 = vrot.slane %v2713_v29, 4  ;;  %v2726_v43 = vshrl.u32 %v12009_v27, 16  ;;  %v12013_v20 = vld [vmem:[%s14827_s25 + $0x74] sm:$0x1]  ;;  %13828 = vmatpush3.bf16.msra.mxu0 %v14117_v22 }
  0xe3   : > { %v1756_v41 = vsel %vm14849_vm5, %v1751_v31, %v1755_v11  ;;  %v2732_v44 = vshll.u32 %v12010_v28, 16  ;;  %v2231_v46 = vsel %vm14843_vm4, %v2229_v36, %v2230_v26  ;;  %v2718_v47 = vrot.slane %v2716_v38, 5  ;;  %v11819_v27 = vld [vmem:[%s14827_s25 + $0x60] sm:$0xf]  ;;  %v11821_v38 = vld [vmem:[%s14827_s25 + $0x68] sm:$0x1] }
  0xe4   : > { %4331 = vmatprep.mubr.bf16.mxu1 %v12043_v30  ;;  %v1766_v42 = vsel %vm14849_vm5, %v1761_v32, %v1765_v15  ;;  %v2724_v50 = vrot.slane %v2722_v39, 5  ;;  %v11932_v51 = vcombine.low %v2228_v33, %v2231_v46  ;;  %v2728_v52 = vrot.slane %v2726_v43, 4  ;;  %v12012_v15 = vld [vmem:[%s14827_s25 + $0x70] sm:$0xf]  ;;  %v11820_v32 = vld [vmem:[%s14827_s25 + $0x64] sm:$0xf] }
  0xe5   : > { %v11851_v45 = vcombine.low %v1756_v41, %v1766_v42  ;;  %4332 = vmatmul.mubr.bf16.gmra.mrb[52].mxu1 %v14105_v16  ;;  %v2734_v53 = vrot.slane %v2732_v44, 5  ;;  %v1768_v54 = vshrl.u32 %v11816_v34, 16  ;;  %v2719_v56 = vor.u32 %v2718_v47, %v2715_v37  ;;  %v14116_v16 = vld [vmem:[%s17816_s2 + $0x38] sm:$0xff]   ;;  %v14119_v33 = vld [vmem:[%s17816_s2 + $0xc0] sm:$0xff]  }
  0xe6   : > { %v1771_v57 = vshll.u32 %v11816_v34, 16  ;;  %v1777_v58 = vshll.u32 %v11817_v35, 16  ;;  %v1781_v59 = vshrl.u32 %v11817_v35, 16  ;;  %v2729_v61 = vor.u32 %v2728_v52, %v2724_v50  ;;  %13012 = vmatpush3.bf16.msra.mxu1 %v14116_v16  ;;  %13061 = vmatprep.subr.bf16.mxu0 %v14119_v33 }
  0xe7   : > { %4235 = vmatmul.mubr.bf16.gmra.mrb[52].mxu0 %v11851_v45  ;;  %v1770_v62 = vrot.slane %v1768_v54, 4  ;;  %v1787_v63 = vshll.u32 %v11818_v40, 16  ;;  %v2720_v0 = vrot.slane %v2719_v56, 4  ;;  %v11917_v13 = vrot.slane %v11883_v4, 9  ;;  %v12056_v4 = vld [vmem:[%s14827_s25 + $0x20] sm:$0x1] }
  0xe8   : > { %4242 = vmatprep.mubr.bf16.mxu0 %v11932_v51  ;;  %v1773_v1 = vrot.slane %v1771_v57, 5  ;;  %v1779_v2 = vrot.slane %v1777_v58, 5  ;;  %v1783_v3 = vrot.slane %v1781_v59, 4  ;;  %v2730_v5 = vrot.slane %v2729_v61, 4  ;;  %v14120_v57 = vld [vmem:[%s17816_s2 + $0x140] sm:$0xff]  }
  0xe9   : > { %v1789_v6 = vrot.slane %v1787_v63, 5  ;;  %v2725_v10 = vsel %vm14849_vm5, %v2720_v0, %v2724_v50  ;;  %v2234_v18 = vrot.slane %v11884_v8, 5  ;;  %v2237_v19 = vrot.slane %v11885_v9, 5  ;;  %13125 = vmatprep.subr.bf16.mxu1 %v14120_v57  ;;  %v14127_v57 = vld [vmem:[%s17816_s2 + $0x148] sm:$0xff]  }
  0xea   : > { %v1774_v11 = vor.u32 %v1773_v1, %v1770_v62  ;;  %v1784_v12 = vor.u32 %v1783_v3, %v1779_v2  ;;  %v2735_v17 = vsel %vm14849_vm5, %v2730_v5, %v2734_v53  ;;  %v2737_v21 = vshrl.u32 %v12011_v14, 16  ;;  %v12055_v3 = vld [vmem:[%s14827_s25 + $0x1c] sm:$0xf] }
  0xeb   : > { %v12044_v23 = vcombine.low %v2725_v10, %v2735_v17  ;;  %v2740_v26 = vshll.u32 %v12011_v14, 16  ;;  %v2235_v28 = vsel %vm14843_vm4, %v11917_v13, %v2234_v18  ;;  %v2236_v29 = vrot.slane %v2234_v18, 4  ;;  %v648_v10 = vld [vmem:[%s14827_s25 + $0x60] sm:$0xf]  ;;  %v649_v14 = vld [vmem:[%s14827_s25 + $0x64] sm:$0xf] }
  0xec   : > { %v1775_v24 = vrot.slane %v1774_v11, 4  ;;  %v1785_v25 = vrot.slane %v1784_v12, 4  ;;  %v2739_v30 = vrot.slane %v2737_v21, 4  ;;  %v2746_v31 = vshll.u32 %v12012_v15, 16 }
  0xed   : > { %4339 = vmatprep.mubr.bf16.mxu1 %v12044_v23  ;;  %v2742_v36 = vrot.slane %v2740_v26, 5  ;;  %v2750_v37 = vshrl.u32 %v12012_v15, 16  ;;  %v2238_v40 = vsel %vm14843_vm4, %v2236_v29, %v2237_v19  ;;  %v2756_v42 = vshll.u32 %v12013_v20, 16  ;;  %v650_v15 = vld [vmem:[%s14827_s25 + $0x68] sm:$0x1] }
  0xee   : > { %v1780_v34 = vsel %vm14849_vm5, %v1775_v24, %v1779_v2  ;;  %v1790_v35 = vsel %vm14849_vm5, %v1785_v25, %v1789_v6  ;;  %4340 = vmatmul.mubr.bf16.gmra.mrb[56].mxu1 %v14109_v7  ;;  %v2748_v41 = vrot.slane %v2746_v31, 5  ;;  %v11933_v43 = vcombine.low %v2235_v28, %v2238_v40  ;;  %v12054_v2 = vld [vmem:[%s14827_s25 + $0x18] sm:$0xe]  ;;  %v14113_v6 = vld [vmem:[%s14827_s25 + $0x6c] sm:$0xff]   ;;  %v12057_v20 = vld [vmem:[%s14827_s25 + $0x24] sm:$0xe] }
  0xef   : > { %v11852_v39 = vcombine.low %v1780_v34, %v1790_v35  ;;  %v2743_v44 = vor.u32 %v2742_v36, %v2739_v30  ;;  %v2752_v45 = vrot.slane %v2750_v37, 4  ;;  %v1792_v46 = vshrl.u32 %v11819_v27, 16  ;;  %v12058_v25 = vld [vmem:[%s14827_s25 + $0x28] sm:$0xf]  ;;  %v12059_v26 = vld [vmem:[%s14827_s25 + $0x2c] sm:$0x1] }
  0xf0   : > { %v2758_v47 = vrot.slane %v2756_v42, 5  ;;  %v1795_v50 = vshll.u32 %v11819_v27, 16  ;;  %v1801_v51 = vshll.u32 %v11820_v32, 16  ;;  %v1805_v52 = vshrl.u32 %v11820_v32, 16 }
  0xf1   : > { %4243 = vmatmul.mubr.bf16.gmra.mrb[56].mxu0 %v11852_v39  ;;  %v2744_v53 = vrot.slane %v2743_v44, 4  ;;  %v2753_v54 = vor.u32 %v2752_v45, %v2748_v41  ;;  %v1794_v55 = vrot.slane %v1792_v46, 4  ;;  %v1811_v56 = vshll.u32 %v11821_v38, 16  ;;  %v14118_v45 = vld [vmem:[%s14827_s25 + $0x60] sm:$0xff]  }
  0xf2   : > { %4250 = vmatprep.mubr.bf16.mxu0 %v11933_v43  ;;  %v1797_v58 = vrot.slane %v1795_v50, 5  ;;  %v1803_v59 = vrot.slane %v1801_v51, 5  ;;  %v1807_v60 = vrot.slane %v1805_v52, 4  ;;  %v12102_v7 = vrot.slane %v12054_v2, 9  ;;  %v14121_v46 = vld [vmem:[%s17816_s2 + $0x80] sm:$0xff]   ;;  %v14123_v52 = vld [vmem:[%s17816_s2 + $0xc8] sm:$0xff]  }
  0xf3   : > { %v2749_v61 = vsel %vm14849_vm5, %v2744_v53, %v2748_v41  ;;  %v2754_v62 = vrot.slane %v2753_v54, 4  ;;  %v1813_v63 = vrot.slane %v1811_v56, 5  ;;  %v3130_v8 = vrot.slane %v12055_v3, 5  ;;  %v14122_v51 = vld [vmem:[%s17816_s2 + $0x100] sm:$0xff]   ;;  %v12061_v56 = vld [vmem:[%s14827_s25 + $0x34] sm:$0xf] }
  0xf4   : > { %v1798_v0 = vor.u32 %v1797_v58, %v1794_v55  ;;  %v1808_v1 = vor.u32 %v1807_v60, %v1803_v59  ;;  %v3133_v9 = vrot.slane %v12056_v4, 5  ;;  %v868_v18 = vshrl.u32 %v648_v10, 16  ;;  %v12060_v55 = vld [vmem:[%s14827_s25 + $0x30] sm:$0xe]  ;;  %v653_v2 = vld [vmem:[%s14827_s25 + $0x74] sm:$0x1] }
  0xf5   : > { %v2759_v5 = vsel %vm14849_vm5, %v2754_v62, %v2758_v47  ;;  %v3131_v16 = vsel %vm14843_vm4, %v12102_v7, %v3130_v8  ;;  %v3132_v17 = vrot.slane %v3130_v8, 4  ;;  %v871_v19 = vshll.u32 %v648_v10, 16  ;;  %v651_v62 = vld [vmem:[%s14827_s25 + $0x6c] sm:$0xf]  ;;  %v12063_v8 = vld [vmem:[%s14827_s25 + $0x3c] sm:$0xe] }
  0xf6   : > { %v12045_v11 = vcombine.low %v2749_v61, %v2759_v5  ;;  %v1799_v12 = vrot.slane %v1798_v0, 4  ;;  %v1809_v13 = vrot.slane %v1808_v1, 4  ;;  %v877_v23 = vshll.u32 %v649_v14, 16  ;;  %v652_v1 = vld [vmem:[%s14827_s25 + $0x70] sm:$0xf] }
  0xf7   : > { %v881_v24 = vshrl.u32 %v649_v14, 16  ;;  %v3134_v28 = vsel %vm14843_vm4, %v3132_v17, %v3133_v9  ;;  %v870_v29 = vrot.slane %v868_v18, 4  ;;  %v873_v30 = vrot.slane %v871_v19, 5  ;;  %v14126_v9 = vld [vmem:[%s17816_s2 + $0xd0] sm:$0xff]   ;;  %v12065_v18 = vld [vmem:[%s14827_s25 + $0x44] sm:$0x1] }
  0xf8   : > { %4347 = vmatprep.mubr.bf16.mxu1 %v12045_v11  ;;  %v1804_v21 = vsel %vm14849_vm5, %v1799_v12, %v1803_v59  ;;  %v1814_v22 = vsel %vm14849_vm5, %v1809_v13, %v1813_v63  ;;  %v12118_v31 = vcombine.low %v3131_v16, %v3134_v28  ;;  %v879_v32 = vrot.slane %v877_v23, 5  ;;  %v12062_v59 = vld [vmem:[%s14827_s25 + $0x38] sm:$0x1]  ;;  %v14124_v63 = vld [vmem:[%s17816_s2 + $0x88] sm:$0xff]   ;;  %v12064_v13 = vld [vmem:[%s14827_s25 + $0x40] sm:$0xf] }
  0xf9   : > { %v11853_v27 = vcombine.low %v1804_v21, %v1814_v22  ;;  %4348 = vmatmul.mubr.bf16.gmra.mrb[60].mxu1 %v14113_v6  ;;  %v883_v33 = vrot.slane %v881_v24, 4  ;;  %v887_v34 = vshll.u32 %v650_v15, 16  ;;  %v874_v35 = vor.u32 %v873_v30, %v870_v29 }
  0xfa   : > { %v12103_v36 = vrot.slane %v12057_v20, 9  ;;  %v3137_v37 = vrot.slane %v12058_v25, 5  ;;  %v3140_v38 = vrot.slane %v12059_v26, 5  ;;  %v12104_v60 = vrot.slane %v12060_v55, 9  ;;  %v14129_v20 = vld [vmem:[%s17816_s2 + $0x108] sm:$0xff]  }
  0xfb   : > { %4251 = vmatmul.mubr.bf16.gmra.mrb[60].mxu0 %v11853_v27  ;;  %v884_v39 = vor.u32 %v883_v33, %v879_v32  ;;  %v889_v40 = vrot.slane %v887_v34, 5  ;;  %v875_v41 = vrot.slane %v874_v35, 4  ;;  %v3144_v61 = vrot.slane %v12061_v56, 5  ;;  %v14125_v34 = vld [vmem:[%s14827_s25 + $0x6c] sm:$0xff]   ;;  %v14130_v35 = vld [vmem:[%s17816_s2 + $0xd8] sm:$0xff]  }
  0xfc   : > { %13829 = vmatprep.mubr.bf16.mxu0 %v12118_v31  ;;  %v3138_v42 = vsel %vm14843_vm4, %v12103_v36, %v3137_v37  ;;  %v3139_v43 = vrot.slane %v3137_v37, 4  ;;  %v3147_v0 = vrot.slane %v12062_v59, 5  ;;  %v892_v3 = vshrl.u32 %v651_v62, 16  ;;  %v14128_v31 = vld [vmem:[%s17816_s2 + $0x90] sm:$0xff]   ;;  %v14131_v37 = vld [vmem:[%s17816_s2 + $0x98] sm:$0xff]  }
  0xfd   : > { %v885_v44 = vrot.slane %v884_v39, 4  ;;  %v880_v47 = vsel %vm14849_vm5, %v875_v41, %v879_v32  ;;  %v3145_v4 = vsel %vm14843_vm4, %v12104_v60, %v3144_v61  ;;  %v3146_v5 = vrot.slane %v3144_v61, 4  ;;  %v12066_v39 = vld [vmem:[%s14827_s25 + $0x48] sm:$0xe]  ;;  %v14133_v41 = vld [vmem:[%s17816_s2 + $0xe0] sm:$0xff]  }
  0xfe   : > { %v3141_v50 = vsel %vm14843_vm4, %v3139_v43, %v3140_v38  ;;  %v895_v6 = vshll.u32 %v651_v62, 16  ;;  %v901_v7 = vshll.u32 %v652_v1, 16  ;;  %v894_v10 = vrot.slane %v892_v3, 4  ;;  %v12068_v43 = vld [vmem:[%s14827_s25 + $0x50] sm:$0x1] }
  0xff   : > { %v890_v53 = vsel %vm14849_vm5, %v885_v44, %v889_v40  ;;  %v12119_v54 = vcombine.low %v3138_v42, %v3141_v50  ;;  %v905_v11 = vshrl.u32 %v652_v1, 16  ;;  %v911_v12 = vshll.u32 %v653_v2, 16  ;;  %v12067_v40 = vld [vmem:[%s14827_s25 + $0x4c] sm:$0xf]  ;;  %v655_v50 = vld [vmem:[%s14827_s25 + $0x7c] sm:$0xf] }
 0x100   : > { %v11710_v58 = vcombine.low %v880_v47, %v890_v53  ;;  %v12105_v14 = vrot.slane %v12063_v8, 9  ;;  %v3148_v15 = vsel %vm14843_vm4, %v3146_v5, %v3147_v0  ;;  %v897_v16 = vrot.slane %v895_v6, 5  ;;  %v12070_v62 = vld [vmem:[%s14827_s25 + $0x58] sm:$0xf]  ;;  %v12071_v3 = vld [vmem:[%s14827_s25 + $0x5c] sm:$0x1] }
 0x101   : > { %v903_v17 = vrot.slane %v901_v7, 5  ;;  %v3151_v19 = vrot.slane %v12064_v13, 5  ;;  %v12120_v21 = vcombine.low %v3145_v4, %v3148_v15  ;;  %v907_v22 = vrot.slane %v905_v11, 4  ;;  %v14135_v5 = vld [vmem:[%s17816_s2 + $0xa0] sm:$0xff]  }
 0x102   : > { %5464 = vmatprep.mubr.bf16.mxu1 %v11710_v58  ;;  %v3154_v23 = vrot.slane %v12065_v18, 5  ;;  %v898_v24 = vor.u32 %v897_v16, %v894_v10  ;;  %v913_v25 = vrot.slane %v911_v12, 5  ;;  %v12106_v44 = vrot.slane %v12066_v39, 9  ;;  %v14134_v58 = vld [vmem:[%s17816_s2 + $0x150] sm:$0xff]   ;;  %v14138_v18 = vld [vmem:[%s17816_s2 + $0xa8] sm:$0xff]  }
 0x103   : > { %13830 = vmatmul.mubr.bf16.vlgmr.msra.gmra.mrb[64].mxu0 %v12119_v54  ;;  %5465 = vmatmul.mubr.bf16.vlgmr.msra.gmra.mrb[64].mxu1 %v14118_v45  ;;  %v3152_v26 = vsel %vm14843_vm4, %v12105_v14, %v3151_v19  ;;  %v3153_v27 = vrot.slane %v3151_v19, 4  ;;  %v908_v28 = vor.u32 %v907_v22, %v903_v17  ;;  %v3158_v45 = vrot.slane %v12067_v40, 5  ;;  %v14136_v10 = vld [vmem:[%s17816_s2 + $0x110] sm:$0xff]   ;;  %v14137_v14 = vld [vmem:[%s17816_s2 + $0xe8] sm:$0xff]  }
 0x104   : > { %13062 = vmatpush3.bf16.msra.mxu0 %v14121_v46  ;;  %13126 = vmatpush3.bf16.msra.mxu1 %v14122_v51  ;;  %v899_v29 = vrot.slane %v898_v24, 4  ;;  %v654_v46 = vld [vmem:[%s14827_s25 + $0x78] sm:$0xf]  ;;  %v3161_v47 = vrot.slane %v12068_v43, 5  ;;  %v656_v51 = vld [vmem:[%s14827_s25 + $0x80] sm:$0x1] }
 0x105   : > { %13063 = vmatprep.subr.bf16.mxu0 %v14123_v52  ;;  %13127 = vmatprep.subr.bf16.mxu1 %v14127_v57  ;;  %v3155_v30 = vsel %vm14843_vm4, %v3153_v27, %v3154_v23  ;;  %v909_v32 = vrot.slane %v908_v28, 4  ;;  %v916_v52 = vshrl.u32 %v654_v46, 16  ;;  %v3159_v53 = vsel %vm14843_vm4, %v12106_v44, %v3158_v45  ;;  %v12069_v57 = vld [vmem:[%s14827_s25 + $0x54] sm:$0xe]  ;;  %v12072_v24 = vld [vmem:[%s14827_s25 + $0x60] sm:$0xe] }
 0x106   : > { %13833 = vmatprep.mubr.bf16.mxu0 %v12120_v21  ;;  %v12121_v33 = vcombine.low %v3152_v26, %v3155_v30  ;;  %v904_v36 = vsel %vm14849_vm5, %v899_v29, %v903_v17  ;;  %v3160_v54 = vrot.slane %v3158_v45, 4  ;;  %v919_v55 = vshll.u32 %v654_v46, 16  ;;  %v14132_v21 = vld [vmem:[%s14827_s25 + $0x78] sm:$0xff]   ;;  %v12074_v27 = vld [vmem:[%s14827_s25 + $0x68] sm:$0x1]  ;;  %v14140_v40 = vld [vmem:[%s17816_s2 + $0xf0] sm:$0xff]  }
 0x107   : > { %v914_v38 = vsel %vm14849_vm5, %v909_v32, %v913_v25  ;;  %v925_v56 = vshll.u32 %v655_v50, 16  ;;  %v918_v59 = vrot.slane %v916_v52, 4  ;;  %v929_v60 = vshrl.u32 %v655_v50, 16  ;;  %v12073_v25 = vld [vmem:[%s14827_s25 + $0x64] sm:$0xf] }
 0x108   : > { %13064 = vmatpush3.bf16.msra.mxu0 %v14124_v63  ;;  %13128 = vmatpush3.bf16.msra.mxu1 %v14129_v20  ;;  %v11711_v42 = vcombine.low %v904_v36, %v914_v38  ;;  %v935_v61 = vshll.u32 %v656_v51, 16  ;;  %v12107_v63 = vrot.slane %v12069_v57, 9  ;;  %v3162_v0 = vsel %vm14843_vm4, %v3160_v54, %v3161_v47  ;;  %v657_v30 = vld [vmem:[%s14827_s25 + $0x84] sm:$0xf]  ;;  %v658_v32 = vld [vmem:[%s14827_s25 + $0x88] sm:$0xf] }
 0x109   : > { %13065 = vmatprep.subr.bf16.mxu0 %v14126_v9  ;;  %v921_v1 = vrot.slane %v919_v55, 5  ;;  %v927_v2 = vrot.slane %v925_v56, 5  ;;  %v3165_v4 = vrot.slane %v12070_v62, 5  ;;  %13129 = vmatprep.subr.bf16.mxu1 %v14134_v58  ;;  %v12122_v6 = vcombine.low %v3159_v53, %v3162_v0  ;;  %v12075_v39 = vld [vmem:[%s14827_s25 + $0x6c] sm:$0xe]  ;;  %v14141_v53 = vld [vmem:[%s17816_s2 + $0x158] sm:$0xff]  }
 0x10a   : > { %5472 = vmatprep.mubr.bf16.mxu1 %v11711_v42  ;;  %v931_v7 = vrot.slane %v929_v60, 4  ;;  %v937_v8 = vrot.slane %v935_v61, 5  ;;  %v3168_v9 = vrot.slane %v12071_v3, 5  ;;  %v12108_v28 = vrot.slane %v12072_v24, 9  ;;  %v12076_v44 = vld [vmem:[%s14827_s25 + $0x70] sm:$0xf] }
 0x10b   : > { %13834 = vmatmul.mubr.bf16.gmra.mrb[68].mxu0 %v12121_v33  ;;  %5473 = vmatmul.mubr.bf16.gmra.mrb[68].mxu1 %v14125_v34  ;;  %v922_v11 = vor.u32 %v921_v1, %v918_v59  ;;  %v3166_v12 = vsel %vm14843_vm4, %v12107_v63, %v3165_v4  ;;  %v3167_v13 = vrot.slane %v3165_v4, 4  ;;  %v3172_v29 = vrot.slane %v12073_v25, 5  ;;  %v659_v33 = vld [vmem:[%s14827_s25 + $0x8c] sm:$0x1]  ;;  %v12077_v51 = vld [vmem:[%s14827_s25 + $0x74] sm:$0x1] }
 0x10c   : > { %13066 = vmatpush3.bf16.msra.mxu0 %v14128_v31  ;;  %13837 = vmatprep.mubr.bf16.mxu0 %v12122_v6  ;;  %v932_v15 = vor.u32 %v931_v7, %v927_v2  ;;  %v3175_v31 = vrot.slane %v12074_v27, 5  ;;  %v940_v34 = vshrl.u32 %v657_v30, 16  ;;  %v949_v38 = vshll.u32 %v658_v32, 16  ;;  %v14142_v58 = vld [vmem:[%s17816_s2 + $0xb0] sm:$0xff]   ;;  %v14143_v62 = vld [vmem:[%s17816_s2 + $0x118] sm:$0xff]  }
 0x10d   : > { %13067 = vmatprep.subr.bf16.mxu0 %v14130_v35  ;;  %13130 = vmatpush3.bf16.msra.mxu1 %v14136_v10  ;;  %v923_v16 = vrot.slane %v922_v11, 4  ;;  %v3169_v17 = vsel %vm14843_vm4, %v3167_v13, %v3168_v9  ;;  %v3173_v35 = vsel %vm14843_vm4, %v12108_v28, %v3172_v29  ;;  %v3174_v36 = vrot.slane %v3172_v29, 4  ;;  %v14145_v6 = vld [vmem:[%s17816_s2 + $0xb8] sm:$0xff]   ;;  %v660_v9 = vld [vmem:[%s14827_s25 + $0x90] sm:$0xf]  ;;  %v14148_v29 = vld [vmem:[%s17816_s2 + $0x160] sm:$0xff]  }
 0x10e   : > { %v933_v19 = vrot.slane %v932_v15, 4  ;;  %v12123_v20 = vcombine.low %v3166_v12, %v3169_v17  ;;  %v953_v42 = vshrl.u32 %v658_v32, 16  ;;  %v959_v43 = vshll.u32 %v659_v33, 16  ;;  %13131 = vmatprep.subr.bf16.mxu1 %v14141_v53  ;;  %v661_v10 = vld [vmem:[%s14827_s25 + $0x94] sm:$0xf] }
 0x10f   : > { %v928_v22 = vsel %vm14849_vm5, %v923_v16, %v927_v2  ;;  %v12109_v45 = vrot.slane %v12075_v39, 9  ;;  %v3176_v46 = vsel %vm14843_vm4, %v3174_v36, %v3175_v31  ;;  %v951_v50 = vrot.slane %v949_v38, 5  ;;  %v14144_v2 = vld [vmem:[%s17816_s2 + $0xf8] sm:$0xff]   ;;  %v14146_v16 = vld [vmem:[%s14827_s25 + $0x6c] sm:$0xff]   ;;  %v1163_v24 = vld [vmem:[%s14827_s25 + $0x60] sm:$0xe] }
 0x110   : > { %13068 = vmatpush3.bf16.msra.mxu0 %v14131_v37  ;;  %v938_v23 = vsel %vm14849_vm5, %v933_v19, %v937_v8  ;;  %v943_v37 = vshll.u32 %v657_v30, 16  ;;  %v3179_v52 = vrot.slane %v12076_v44, 5  ;;  %v12124_v54 = vcombine.low %v3173_v35, %v3176_v46  ;;  %v662_v12 = vld [vmem:[%s14827_s25 + $0x98] sm:$0x1]  ;;  %v1165_v27 = vld [vmem:[%s14827_s25 + $0x68] sm:$0x1] }
 0x111   : > { %13069 = vmatprep.subr.bf16.mxu0 %v14133_v41  ;;  %v11712_v26 = vcombine.low %v928_v22, %v938_v23  ;;  %v942_v41 = vrot.slane %v940_v34, 4  ;;  %v955_v55 = vrot.slane %v953_v42, 4  ;;  %v961_v56 = vrot.slane %v959_v43, 5  ;;  %13132 = vmatpush3.bf16.msra.mxu1 %v14143_v62  ;;  %v14149_v34 = vld [vmem:[%s17816_s2 + $0x120] sm:$0xff]   ;;  %v14147_v36 = vld [vmem:[%s14827_s25 + $0x90] sm:$0xff]   ;;  %v14150_v46 = vld [vmem:[%s14827_s25 + $0x78] sm:$0xff]  }
 0x112   : > { %v945_v47 = vrot.slane %v943_v37, 5  ;;  %v3182_v57 = vrot.slane %v12077_v51, 5  ;;  %v3180_v60 = vsel %vm14843_vm4, %v12109_v45, %v3179_v52  ;;  %v3181_v61 = vrot.slane %v3179_v52, 4  ;;  %13133 = vmatprep.subr.bf16.mxu1 %v14148_v29  ;;  %v663_v39 = vld [vmem:[%s14827_s25 + $0x9c] sm:$0xf] }
 0x113   : > { %13838 = vmatmul.mubr.bf16.gmra.mrb[72].mxu0 %v12123_v20  ;;  %5480 = vmatprep.mubr.bf16.mxu1 %v11712_v26  ;;  %v956_v63 = vor.u32 %v955_v55, %v951_v50  ;;  %v964_v13 = vshrl.u32 %v660_v9, 16  ;;  %v973_v15 = vshll.u32 %v661_v10, 16  ;;  %v977_v17 = vshrl.u32 %v661_v10, 16  ;;  %v1164_v26 = vld [vmem:[%s14827_s25 + $0x64] sm:$0xf] }
 0x114   : > { %13070 = vmatpush3.bf16.msra.mxu0 %v14135_v5  ;;  %5481 = vmatmul.mubr.bf16.gmra.mrb[72].mxu1 %v14132_v21  ;;  %v946_v59 = vor.u32 %v945_v47, %v942_v41  ;;  %v3183_v1 = vsel %vm14843_vm4, %v3181_v61, %v3182_v57  ;;  %v14139_v5 = vld [vmem:[%s14827_s25 + $0x84] sm:$0xff]   ;;  %v11726_v28 = vrot.slane %v1163_v24, 9  ;;  %v1296_v31 = vrot.slane %v1164_v26, 5  ;;  %v1167_v62 = vld [vmem:[%s14827_s25 + $0x70] sm:$0xf] }
 0x115   : > { %13071 = vmatprep.subr.bf16.mxu0 %v14137_v14  ;;  %13841 = vmatprep.mubr.bf16.mxu0 %v12124_v54  ;;  %v957_v3 = vrot.slane %v956_v63, 4  ;;  %v12125_v4 = vcombine.low %v3180_v60, %v3183_v1  ;;  %v967_v14 = vshll.u32 %v660_v9, 16  ;;  %v966_v19 = vrot.slane %v964_v13, 4  ;;  %v665_v42 = vld [vmem:[%s14827_s25 + $0xa4] sm:$0x1]  ;;  %v14152_v1 = vld [vmem:[%s17816_s2 + $0x168] sm:$0xff]  }
 0x116   : > { %v947_v0 = vrot.slane %v946_v59, 4  ;;  %v975_v21 = vrot.slane %v973_v15, 5  ;;  %v979_v22 = vrot.slane %v977_v17, 4  ;;  %v1299_v32 = vrot.slane %v1165_v27, 5  ;;  %13134 = vmatpush3.bf16.msra.mxu1 %v14149_v34  ;;  %v1166_v60 = vld [vmem:[%s14827_s25 + $0x6c] sm:$0xe] }
 0x117   : > { %v962_v8 = vsel %vm14849_vm5, %v957_v3, %v961_v56  ;;  %v969_v20 = vrot.slane %v967_v14, 5  ;;  %v1297_v37 = vsel %vm14843_vm4, %v11726_v28, %v1296_v31  ;;  %v1298_v38 = vrot.slane %v1296_v31, 4  ;;  %v1168_v63 = vld [vmem:[%s14827_s25 + $0x74] sm:$0x1]  ;;  %13135 = vmatprep.subr.bf16.mxu1 %v14152_v1  ;;  %v668_v14 = vld [vmem:[%s14827_s25 + $0xb0] sm:$0x1] }
 0x118   : > { %13072 = vmatpush3.bf16.msra.mxu0 %v14138_v18  ;;  %v952_v7 = vsel %vm14849_vm5, %v947_v0, %v951_v50  ;;  %v983_v18 = vshll.u32 %v662_v12, 16  ;;  %v980_v30 = vor.u32 %v979_v22, %v975_v21  ;;  %v988_v43 = vshrl.u32 %v663_v39, 16  ;;  %v667_v12 = vld [vmem:[%s14827_s25 + $0xac] sm:$0xf] }
 0x119   : > { %13073 = vmatprep.subr.bf16.mxu0 %v14140_v40  ;;  %v11713_v11 = vcombine.low %v952_v7, %v962_v8  ;;  %v970_v25 = vor.u32 %v969_v20, %v966_v19  ;;  %v664_v40 = vld [vmem:[%s14827_s25 + $0xa0] sm:$0xf]  ;;  %v991_v44 = vshll.u32 %v663_v39, 16  ;;  %v1300_v50 = vsel %vm14843_vm4, %v1298_v38, %v1299_v32  ;;  %v1170_v32 = vld [vmem:[%s14827_s25 + $0x7c] sm:$0xf] }
 0x11a   : > { %v985_v23 = vrot.slane %v983_v18, 5  ;;  %v981_v35 = vrot.slane %v980_v30, 4  ;;  %v997_v45 = vshll.u32 %v664_v40, 16  ;;  %v1001_v51 = vshrl.u32 %v664_v40, 16  ;;  %v14151_v8 = vld [vmem:[%s14827_s25 + $0x9c] sm:$0xff]   ;;  %v14154_v18 = vld [vmem:[%s14827_s25 + $0x84] sm:$0xff]  }
 0x11b   : > { %13842 = vmatmul.mubr.bf16.gmra.mrb[76].mxu0 %v12125_v4  ;;  %5488 = vmatprep.mubr.bf16.mxu1 %v11713_v11  ;;  %v971_v33 = vrot.slane %v970_v25, 4  ;;  %v1007_v52 = vshll.u32 %v665_v42, 16  ;;  %v11742_v54 = vcombine.low %v1297_v37, %v1300_v50  ;;  %v990_v55 = vrot.slane %v988_v43, 4  ;;  %v666_v11 = vld [vmem:[%s14827_s25 + $0xa8] sm:$0xf]  ;;  %v14157_v40 = vld [vmem:[%s17816_s2 + $0x130] sm:$0xff]  }
 0x11c   : > { %13074 = vmatpush3.bf16.msra.mxu0 %v14142_v58  ;;  %5561 = vmatprep.mubr.bf16.mxu0 %v14146_v16  ;;  %v986_v47 = vsel %vm14849_vm5, %v981_v35, %v985_v23  ;;  %v993_v56 = vrot.slane %v991_v44, 5  ;;  %v999_v57 = vrot.slane %v997_v45, 5  ;;  %v1003_v58 = vrot.slane %v1001_v51, 4  ;;  %v1169_v30 = vld [vmem:[%s14827_s25 + $0x78] sm:$0xe]  ;;  %v14156_v35 = vld [vmem:[%s17816_s2 + $0x170] sm:$0xff]  }
 0x11d   : > { %13075 = vmatprep.subr.bf16.mxu0 %v14144_v2  ;;  %5489 = vmatmul.mubr.bf16.gmra.mrb[76].mxu1 %v14139_v5  ;;  %v976_v41 = vsel %vm14849_vm5, %v971_v33, %v975_v21  ;;  %v1009_v59 = vrot.slane %v1007_v52, 5  ;;  %v11727_v0 = vrot.slane %v1166_v60, 9  ;;  %v1303_v3 = vrot.slane %v1167_v62, 5  ;;  %v1171_v33 = vld [vmem:[%s14827_s25 + $0x80] sm:$0x1]  ;;  %v14155_v42 = vld [vmem:[%s14827_s25 + $0xa8] sm:$0xff]  }
 0x11e   : > { %v11714_v53 = vcombine.low %v976_v41, %v986_v47  ;;  %v994_v61 = vor.u32 %v993_v56, %v990_v55  ;;  %v1004_v2 = vor.u32 %v1003_v58, %v999_v57  ;;  %v1306_v4 = vrot.slane %v1168_v63, 5  ;;  %v669_v45 = vld [vmem:[%s14827_s25 + $0xb4] sm:$0xf]  ;;  %v671_v50 = vld [vmem:[%s14827_s25 + $0xbc] sm:$0x1] }
 0x11f   : > { %v1304_v9 = vsel %vm14843_vm4, %v11727_v0, %v1303_v3  ;;  %v1305_v10 = vrot.slane %v1303_v3, 4  ;;  %v1012_v15 = vshrl.u32 %v666_v11, 16  ;;  %v1015_v16 = vshll.u32 %v666_v11, 16 }
 0x120   : > { %13076 = vmatpush3.bf16.msra.mxu0 %v14145_v6  ;;  %5496 = vmatprep.mubr.bf16.mxu1 %v11714_v53  ;;  %v995_v5 = vrot.slane %v994_v61, 4  ;;  %v14153_v6 = vld [vmem:[%s17816_s2 + $0x128] sm:$0xff]   ;;  %v1005_v7 = vrot.slane %v1004_v2, 4  ;;  %v1021_v17 = vshll.u32 %v667_v12, 16  ;;  %v1025_v21 = vshrl.u32 %v667_v12, 16  ;;  %v14161_v12 = vld [vmem:[%s17816_s2 + $0x138] sm:$0xff]  }
 0x121   : > { %13136 = vmatpush3.bf16.msra.mxu1 %v14153_v6  ;;  %v1307_v20 = vsel %vm14843_vm4, %v1305_v10, %v1306_v4  ;;  %v1031_v22 = vshll.u32 %v668_v14, 16  ;;  %v1014_v25 = vrot.slane %v1012_v15, 4  ;;  %v1017_v26 = vrot.slane %v1015_v16, 5  ;;  %v1172_v2 = vld [vmem:[%s14827_s25 + $0x84] sm:$0xe]  ;;  %v14159_v14 = vld [vmem:[%s14827_s25 + $0xb4] sm:$0xff]  }
 0x122   : > { %v1000_v13 = vsel %vm14849_vm5, %v995_v5, %v999_v57  ;;  %v1010_v19 = vsel %vm14849_vm5, %v1005_v7, %v1009_v59  ;;  %v11743_v24 = vcombine.low %v1304_v9, %v1307_v20  ;;  %v1023_v27 = vrot.slane %v1021_v17, 5  ;;  %13137 = vmatprep.subr.bf16.mxu1 %v14156_v35  ;;  %v1173_v4 = vld [vmem:[%s14827_s25 + $0x88] sm:$0xf]  ;;  %v1174_v5 = vld [vmem:[%s14827_s25 + $0x8c] sm:$0x1]  ;;  %v14160_v7 = vld [vmem:[%s17816_s2 + $0x178] sm:$0xff]  }
 0x123   : > { %5562 = vmatmul.mubr.bf16.vlgmr.msra.gmra.mrb[80].mxu0 %v11742_v54  ;;  %v11715_v23 = vcombine.low %v1000_v13, %v1010_v19  ;;  %v1027_v28 = vrot.slane %v1025_v21, 4  ;;  %v1033_v29 = vrot.slane %v1031_v22, 5  ;;  %v1018_v31 = vor.u32 %v1017_v26, %v1014_v25  ;;  %v14158_v54 = vld [vmem:[%s14827_s25 + $0x90] sm:$0xff]   ;;  %v14163_v22 = vld [vmem:[%s17816_s2 + $0x180] sm:$0xff]  }
 0x124   : > { %5569 = vmatprep.mubr.bf16.mxu0 %v14150_v46  ;;  %v11728_v34 = vrot.slane %v1169_v30, 9  ;;  %v1310_v37 = vrot.slane %v1170_v32, 5  ;;  %v1313_v38 = vrot.slane %v1171_v33, 5  ;;  %v670_v46 = vld [vmem:[%s14827_s25 + $0xb8] sm:$0xf]  ;;  %v1036_v51 = vshrl.u32 %v669_v45, 16 }
 0x125   : > { %5497 = vmatmul.mubr.bf16.gmra.mrb[80].mxu1 %v14147_v36  ;;  %v1028_v36 = vor.u32 %v1027_v28, %v1023_v27  ;;  %v1019_v39 = vrot.slane %v1018_v31, 4  ;;  %v1039_v52 = vshll.u32 %v669_v45, 16  ;;  %v1045_v53 = vshll.u32 %v670_v46, 16  ;;  %v14164_v26 = vld [vmem:[%s14827_s25 + $0x9c] sm:$0xff]   ;;  %v11887_v28 = vld [vmem:[%s14827_s25 + $0x70] sm:$0xf] }
 0x126   : > { %5504 = vmatprep.mubr.bf16.mxu1 %v11715_v23  ;;  %v1311_v43 = vsel %vm14843_vm4, %v11728_v34, %v1310_v37  ;;  %v1312_v44 = vrot.slane %v1310_v37, 4  ;;  %13138 = vmatpush3.bf16.msra.mxu1 %v14157_v40  ;;  %v1049_v57 = vshrl.u32 %v670_v46, 16  ;;  %v1055_v58 = vshll.u32 %v671_v50, 16  ;;  %v11888_v30 = vld [vmem:[%s14827_s25 + $0x74] sm:$0x1] }
 0x127   : > { %v1029_v41 = vrot.slane %v1028_v36, 4  ;;  %v1024_v47 = vsel %vm14849_vm5, %v1019_v39, %v1023_v27  ;;  %v1038_v61 = vrot.slane %v1036_v51, 4  ;;  %v1041_v62 = vrot.slane %v1039_v52, 5  ;;  %13139 = vmatprep.subr.bf16.mxu1 %v14160_v7  ;;  %v11886_v27 = vld [vmem:[%s14827_s25 + $0x6c] sm:$0xe] }
 0x128   : > { %v1314_v56 = vsel %vm14843_vm4, %v1312_v44, %v1313_v38  ;;  %v1047_v63 = vrot.slane %v1045_v53, 5  ;;  %v1051_v0 = vrot.slane %v1049_v57, 4  ;;  %v1057_v1 = vrot.slane %v1055_v58, 5  ;;  %v1175_v33 = vld [vmem:[%s14827_s25 + $0x90] sm:$0xe]  ;;  %v15590_v44 = vld [vmem:[%s17816_s2 + $0x200] sm:$0xff]  }
 0x129   : > { %v1034_v55 = vsel %vm14849_vm5, %v1029_v41, %v1033_v29  ;;  %v11744_v60 = vcombine.low %v1311_v43, %v1314_v56  ;;  %v1042_v3 = vor.u32 %v1041_v62, %v1038_v61  ;;  %v11729_v6 = vrot.slane %v1172_v2, 9  ;;  %v1176_v36 = vld [vmem:[%s14827_s25 + $0x94] sm:$0xf]  ;;  %v1177_v37 = vld [vmem:[%s14827_s25 + $0x98] sm:$0x1]  ;;  %v14167_v2 = vld [vmem:[%s17816_s2 + $0x188] sm:$0xff]  }
 0x12a   : > { %v11716_v59 = vcombine.low %v1024_v47, %v1034_v55  ;;  %v1317_v9 = vrot.slane %v1173_v4, 5  ;;  %v1320_v10 = vrot.slane %v1174_v5, 5  ;;  %13140 = vmatpush3.bf16.msra.mxu1 %v14161_v12  ;;  %v11918_v31 = vrot.slane %v11886_v27, 9  ;;  %v11822_v43 = vld [vmem:[%s14827_s25 + $0x6c] sm:$0xf] }
 0x12b   : > { %5570 = vmatmul.mubr.bf16.gmra.mrb[84].mxu0 %v11743_v24  ;;  %v1043_v11 = vrot.slane %v1042_v3, 4  ;;  %v2241_v32 = vrot.slane %v11887_v28, 5  ;;  %v2244_v35 = vrot.slane %v11888_v30, 5  ;;  %v11730_v38 = vrot.slane %v1175_v33, 9  ;;  %v11823_v45 = vld [vmem:[%s14827_s25 + $0x70] sm:$0xf]  ;;  %13845 = vmatprep.subr.bf16.mxu1 %v15590_v44 }
 0x12c   : > { %5577 = vmatprep.mubr.bf16.mxu0 %v14154_v18  ;;  %v1318_v15 = vsel %vm14843_vm4, %v11729_v6, %v1317_v9  ;;  %v1319_v16 = vrot.slane %v1317_v9, 4  ;;  %v14162_v18 = vld [vmem:[%s17816_s2 + $0x1c0] sm:$0xff]   ;;  %v1324_v41 = vrot.slane %v1176_v36, 5  ;;  %v11824_v46 = vld [vmem:[%s14827_s25 + $0x74] sm:$0x1]  ;;  %v1816_v47 = vshrl.u32 %v11822_v43, 16 }
 0x12d   : > { %5505 = vmatmul.mubr.bf16.gmra.mrb[84].mxu1 %v14151_v8  ;;  %v1052_v8 = vor.u32 %v1051_v0, %v1047_v63  ;;  %v1048_v17 = vsel %vm14849_vm5, %v1043_v11, %v1047_v63  ;;  %13189 = vmatprep.subr.bf16.mxu0 %v14162_v18  ;;  %v2242_v39 = vsel %vm14843_vm4, %v11918_v31, %v2241_v32  ;;  %v2243_v40 = vrot.slane %v2241_v32, 4  ;;  %v14168_v4 = vld [vmem:[%s14827_s25 + $0xa8] sm:$0xff]   ;;  %v11889_v5 = vld [vmem:[%s14827_s25 + $0x78] sm:$0xe]  ;;  %v11891_v9 = vld [vmem:[%s14827_s25 + $0x80] sm:$0x1] }
 0x12e   : > { %5512 = vmatprep.mubr.bf16.mxu1 %v11716_v59  ;;  %v1321_v21 = vsel %vm14843_vm4, %v1319_v16, %v1320_v10  ;;  %13190 = vmatpush3.bf16.msra.mxu0 %v14163_v22  ;;  %v1819_v50 = vshll.u32 %v11822_v43, 16  ;;  %v1325_v52 = vsel %vm14843_vm4, %v11730_v38, %v1324_v41  ;;  %v1326_v53 = vrot.slane %v1324_v41, 4  ;;  %v14166_v59 = vld [vmem:[%s17816_s2 + $0x1c8] sm:$0xff]   ;;  %v11827_v30 = vld [vmem:[%s14827_s25 + $0x80] sm:$0x1] }
 0x12f   : > { %v1053_v13 = vrot.slane %v1052_v8, 4  ;;  %v11745_v25 = vcombine.low %v1318_v15, %v1321_v21  ;;  %v2245_v51 = vsel %vm14843_vm4, %v2243_v40, %v2244_v35  ;;  %v1818_v56 = vrot.slane %v1816_v47, 4  ;;  %13191 = vmatprep.subr.bf16.mxu0 %v14166_v59  ;;  %v11890_v8 = vld [vmem:[%s14827_s25 + $0x7c] sm:$0xf]  ;;  %v14170_v41 = vld [vmem:[%s17816_s2 + $0x208] sm:$0xff]   ;;  %v14175_v59 = vld [vmem:[%s17816_s2 + $0x1e0] sm:$0xff]  }
 0x130   : > { %v11934_v55 = vcombine.low %v2242_v39, %v2245_v51  ;;  %v1821_v57 = vrot.slane %v1819_v50, 5  ;;  %v1829_v58 = vshrl.u32 %v11823_v45, 16  ;;  %v1835_v62 = vshll.u32 %v11824_v46, 16  ;;  %v14172_v50 = vld [vmem:[%s17816_s2 + $0x1d8] sm:$0xff]  }
 0x131   : > { %v1058_v20 = vsel %vm14849_vm5, %v1053_v13, %v1057_v1  ;;  %v11919_v10 = vrot.slane %v11889_v5, 9  ;;  %v2248_v11 = vrot.slane %v11890_v8, 5  ;;  %v2251_v12 = vrot.slane %v11891_v9, 5  ;;  %v1178_v13 = vld [vmem:[%s14827_s25 + $0x9c] sm:$0xe]  ;;  %v14177_v5 = vld [vmem:[%s17816_s2 + $0x1a0] sm:$0xff]  }
 0x132   : > { %v11717_v24 = vcombine.low %v1048_v17, %v1058_v20  ;;  %v1822_v0 = vor.u32 %v1821_v57, %v1818_v56  ;;  %v1831_v1 = vrot.slane %v1829_v58, 4  ;;  %v1837_v3 = vrot.slane %v1835_v62, 5  ;;  %13192 = vmatpush3.bf16.msra.mxu0 %v14167_v2  ;;  %v1180_v17 = vld [vmem:[%s14827_s25 + $0xa4] sm:$0x1]  ;;  %v14169_v20 = vld [vmem:[%s17816_s2 + $0x1d0] sm:$0xff]  }
 0x133   : > { %5578 = vmatmul.mubr.bf16.gmra.mrb[88].mxu0 %v11744_v60  ;;  %v11731_v18 = vrot.slane %v1178_v13, 9  ;;  %v2249_v21 = vsel %vm14843_vm4, %v11919_v10, %v2248_v11  ;;  %v2250_v22 = vrot.slane %v2248_v11, 4  ;;  %13193 = vmatprep.subr.bf16.mxu0 %v14169_v20  ;;  %v1859_v47 = vshll.u32 %v11827_v30, 16  ;;  %v11893_v58 = vld [vmem:[%s14827_s25 + $0x88] sm:$0xf] }
 0x134   : > { %5585 = vmatprep.mubr.bf16.mxu0 %v14158_v54  ;;  %v1825_v54 = vshll.u32 %v11823_v45, 16  ;;  %v1823_v6 = vrot.slane %v1822_v0, 4  ;;  %v14176_v0 = vld [vmem:[%s17816_s2 + $0x210] sm:$0xff]   ;;  %v11828_v11 = vld [vmem:[%s14827_s25 + $0x84] sm:$0xf] }
 0x135   : > { %5513 = vmatmul.mubr.bf16.gmra.mrb[88].mxu1 %v14155_v42  ;;  %v1327_v42 = vrot.slane %v1177_v37, 5  ;;  %v2252_v33 = vsel %vm14843_vm4, %v2250_v22, %v2251_v12  ;;  %v1183_v9 = vld [vmem:[%s14827_s25 + $0xb0] sm:$0x1] }
 0x136   : > { %5520 = vmatprep.mubr.bf16.mxu1 %v11717_v24  ;;  %v1827_v61 = vrot.slane %v1825_v54, 5  ;;  %v1334_v24 = vrot.slane %v1180_v17, 5  ;;  %v11935_v37 = vcombine.low %v2249_v21, %v2252_v33  ;;  %v1861_v54 = vrot.slane %v1859_v47, 5  ;;  %v14180_v47 = vld [vmem:[%s14827_s25 + $0xc0] sm:$0xff]  }
 0x137   : > { %v1328_v60 = vsel %vm14843_vm4, %v1326_v53, %v1327_v42  ;;  %v14171_v42 = vld [vmem:[%s17816_s2 + $0x190] sm:$0xff]  }
 0x138   : > { %v11746_v63 = vcombine.low %v1325_v52, %v1328_v60  ;;  %v1832_v7 = vor.u32 %v1831_v1, %v1827_v61  ;;  %v1828_v15 = vsel %vm14849_vm5, %v1823_v6, %v1827_v61  ;;  %v14173_v52 = vld [vmem:[%s17816_s2 + $0x198] sm:$0xff]   ;;  %13194 = vmatpush3.bf16.msra.mxu0 %v14171_v42  ;;  %v11894_v61 = vld [vmem:[%s14827_s25 + $0x8c] sm:$0x1] }
 0x139   : > { %13195 = vmatprep.subr.bf16.mxu0 %v14172_v50  ;;  %v2258_v2 = vrot.slane %v11894_v61, 5  ;;  %v14179_v42 = vld [vmem:[%s17816_s2 + $0x1a8] sm:$0xff]   ;;  %v1184_v61 = vld [vmem:[%s14827_s25 + $0xb4] sm:$0xe] }
 0x13a   : > { %v1833_v16 = vrot.slane %v1832_v7, 4 }
 0x13b   : > { %5586 = vmatmul.mubr.bf16.gmra.mrb[92].mxu0 %v11745_v25  ;;  %v11825_v25 = vld [vmem:[%s14827_s25 + $0x78] sm:$0xf] }
 0x13c   : > { %5593 = vmatprep.mubr.bf16.mxu0 %v14164_v26  ;;  %v11826_v26 = vld [vmem:[%s14827_s25 + $0x7c] sm:$0xf]  ;;  %v1838_v27 = vsel %vm14849_vm5, %v1833_v16, %v1837_v3  ;;  %v1840_v31 = vshrl.u32 %v11825_v25, 16  ;;  %v1843_v35 = vshll.u32 %v11825_v25, 16  ;;  %v1181_v3 = vld [vmem:[%s14827_s25 + $0xa8] sm:$0xe]  ;;  %13196 = vmatpush3.bf16.msra.mxu0 %v14173_v52 }
 0x13d   : > { %5521 = vmatmul.mubr.bf16.gmra.mrb[92].mxu1 %v14159_v14  ;;  %v1179_v14 = vld [vmem:[%s14827_s25 + $0xa0] sm:$0xf]  ;;  %v11854_v32 = vcombine.low %v1828_v15, %v1838_v27  ;;  %v1849_v36 = vshll.u32 %v11826_v26, 16  ;;  %v1853_v40 = vshrl.u32 %v11826_v26, 16  ;;  %v11732_v10 = vrot.slane %v1181_v3, 9  ;;  %13197 = vmatprep.subr.bf16.mxu0 %v14175_v59 }
 0x13e   : > { %5658 = vmatprep.mubr.bf16.mxu1 %v11934_v55  ;;  %v1842_v39 = vrot.slane %v1840_v31, 4  ;;  %v1845_v45 = vrot.slane %v1843_v35, 5  ;;  %v14174_v55 = vld [vmem:[%s14827_s25 + $0xb4] sm:$0xff]   ;;  %v11829_v15 = vld [vmem:[%s14827_s25 + $0x88] sm:$0xf] }
 0x13f   : > { %v1851_v46 = vrot.slane %v1849_v36, 5  ;;  %v1855_v51 = vrot.slane %v1853_v40, 4  ;;  %v11830_v16 = vld [vmem:[%s14827_s25 + $0x8c] sm:$0x1]  ;;  %v1873_v20 = vshll.u32 %v11829_v15, 16  ;;  %v1877_v26 = vshrl.u32 %v11829_v15, 16 }
 0x140   : > { %v1846_v53 = vor.u32 %v1845_v45, %v1842_v39  ;;  %v1883_v30 = vshll.u32 %v11830_v16, 16  ;;  %13198 = vmatpush3.bf16.msra.mxu0 %v14177_v5  ;;  %v14178_v35 = vld [vmem:[%s17816_s2 + $0x1e8] sm:$0xff]  }
 0x141   : > { %v1856_v56 = vor.u32 %v1855_v51, %v1851_v46  ;;  %13199 = vmatprep.subr.bf16.mxu0 %v14178_v35 }
 0x142   : > { %v1847_v57 = vrot.slane %v1846_v53, 4  ;;  %v11895_v53 = vld [vmem:[%s14827_s25 + $0x90] sm:$0xe] }
 0x143   : > { %5594 = vmatmul.mubr.bf16.gmra.mrb[96].mxu0 %v11746_v63  ;;  %v1857_v60 = vrot.slane %v1856_v56, 4  ;;  %v2255_v63 = vrot.slane %v11893_v58, 5  ;;  %v11897_v56 = vld [vmem:[%s14827_s25 + $0x98] sm:$0x1] }
 0x144   : > { %5601 = vmatprep.mubr.bf16.mxu0 %v14168_v4  ;;  %v1852_v1 = vsel %vm14849_vm5, %v1847_v57, %v1851_v46  ;;  %v1182_v4 = vld [vmem:[%s14827_s25 + $0xac] sm:$0xf]  ;;  %13200 = vmatpush3.bf16.msra.mxu0 %v14179_v42  ;;  %v11921_v57 = vrot.slane %v11895_v53, 9 }
 0x145   : > { %5659 = vmatmul.mubr.bf16.vlgmr.msra.gmra.mrb[96].mxu1 %v11854_v32  ;;  %v1862_v6 = vsel %vm14849_vm5, %v1857_v60, %v1861_v54  ;;  %v2257_v8 = vrot.slane %v2255_v63, 4  ;;  %v1338_v13 = vrot.slane %v1182_v4, 5  ;;  %v1879_v32 = vrot.slane %v1877_v26, 4  ;;  %v14181_v54 = vld [vmem:[%s17816_s2 + $0x1f0] sm:$0xff]  }
 0x146   : > { %13846 = vmatpush3.bf16.msra.mxu1 %v15590_v44  ;;  %5666 = vmatprep.mubr.bf16.mxu1 %v11935_v37  ;;  %v11892_v44 = vld [vmem:[%s14827_s25 + $0x84] sm:$0xe]  ;;  %v11855_v12 = vcombine.low %v1852_v1, %v1862_v6  ;;  %v2265_v60 = vrot.slane %v11897_v56, 5  ;;  %v1186_v1 = vld [vmem:[%s14827_s25 + $0xbc] sm:$0x1] }
 0x147   : > { %13847 = vmatprep.subr.bf16.mxu1 %v14170_v41  ;;  %v11920_v62 = vrot.slane %v11892_v44, 9  ;;  %v2259_v17 = vsel %vm14843_vm4, %v2257_v8, %v2258_v2  ;;  %v1340_v25 = vrot.slane %v1338_v13, 4  ;;  %v14182_v44 = vld [vmem:[%s17816_s2 + $0x218] sm:$0xff]   ;;  %13201 = vmatprep.subr.bf16.mxu0 %v14181_v54  ;;  %v11733_v2 = vrot.slane %v1184_v61, 9  ;;  %v11831_v4 = vld [vmem:[%s14827_s25 + $0x90] sm:$0xf] }
 0x148   : > { %v11832_v8 = vld [vmem:[%s14827_s25 + $0x94] sm:$0xf]  ;;  %v11900_v54 = vld [vmem:[%s14827_s25 + $0xa4] sm:$0x1]  ;;  %v12014_v56 = vld [vmem:[%s14827_s25 + $0x78] sm:$0xf] }
 0x149   : > { %v2256_v7 = vsel %vm14843_vm4, %v11920_v62, %v2255_v63  ;;  %v1185_v62 = vld [vmem:[%s14827_s25 + $0xb8] sm:$0xf]  ;;  %v1897_v16 = vshll.u32 %v11832_v8, 16 }
 0x14a   : > { %13848 = vmatpush3.bf16.msra.mxu1 %v14170_v41  ;;  %v11936_v22 = vcombine.low %v2256_v7, %v2259_v17  ;;  %v1345_v3 = vrot.slane %v1185_v62, 5  ;;  %v1348_v7 = vrot.slane %v1186_v1, 5  ;;  %v1901_v17 = vshrl.u32 %v11832_v8, 16  ;;  %v11836_v8 = vld [vmem:[%s14827_s25 + $0xa4] sm:$0x1] }
 0x14b   : > { %13849 = vmatprep.subr.bf16.mxu1 %v14176_v0  ;;  %v1899_v26 = vrot.slane %v1897_v16, 5  ;;  %v2764_v1 = vshll.u32 %v12014_v56, 16 }
 0x14d   : > { %5667 = vmatmul.mubr.bf16.gmra.mrb[100].mxu1 %v11855_v12  ;;  %v1888_v12 = vshrl.u32 %v11831_v4, 16 }
 0x14e   : > { %v12741_v19 = vpop.f32.mrb[0].mxu0  ;;  %13850 = vmatpush3.bf16.msra.mxu1 %v14176_v0  ;;  %5674 = vmatprep.mubr.bf16.mxu1 %v11936_v22 }
 0x14f   : > { %v15573_v23 = vpop.f32.mrb[0].mxu1  ;;  %v12742_v29 = vpop.f32.mrb[1].mxu0  ;;  %13851 = vmatprep.subr.bf16.mxu1 %v14182_v44  ;;  %v1890_v22 = vrot.slane %v1888_v12, 4 }
 0x150   : > { %v15580_v34 = vadd.f32 %v12742_v29, %v12741_v19  ;;  %v1331_v19 = vrot.slane %v1179_v14, 5  ;;  %v1341_v14 = vrot.slane %v1183_v9, 5  ;;  %v12806_v21 = vpop.f32.mrb[1].mxu1  ;;  %v12744_v39 = vpop.f32.mrb[2].mxu0  ;;  %v11833_v9 = vld [vmem:[%s14827_s25 + $0x98] sm:$0x1] }
 0x151   : > { %v12807_v33 = vadd.f32 %v12806_v21, %v15573_v23  ;;  %v12808_v41 = vpop.f32.mrb[2].mxu1  ;;  %v12745_v45 = vpop.f32.mrb[3].mxu0 }
 0x152   : > { %v1332_v28 = vsel %vm14843_vm4, %v11731_v18, %v1331_v19  ;;  %v1333_v29 = vrot.slane %v1331_v19, 4  ;;  %v1864_v18 = vshrl.u32 %v11828_v11, 16  ;;  %v1867_v19 = vshll.u32 %v11828_v11, 16  ;;  %v12809_v46 = vpop.f32.mrb[3].mxu1  ;;  %13852 = vmatpush3.bf16.msra.mxu1 %v14182_v44 }
 0x153   : > { %v1342_v31 = vsel %vm14843_vm4, %v1340_v25, %v1341_v14  ;;  %v15684_v23 = vadd.f32 %v12807_v33, %v15580_v34  ;;  %v12746_v51 = vadd.f32 %v12745_v45, %v12744_v39  ;;  %v12810_v52 = vadd.f32 %v12809_v46, %v12808_v41  ;;  %v14183_v14 = vld [vmem:[%s17816_s2 + $0x1b0] sm:$0xff]  }
 0x154   : > { %v1335_v38 = vsel %vm14843_vm4, %v1333_v29, %v1334_v24  ;;  %v1339_v24 = vsel %vm14843_vm4, %v11732_v10, %v1338_v13  ;;  %v1866_v27 = vrot.slane %v1864_v18, 4  ;;  %v1875_v29 = vrot.slane %v1873_v20, 5  ;;  %13202 = vmatpush3.bf16.msra.mxu0 %v14183_v14 }
 0x155   : > { %v11747_v43 = vcombine.low %v1332_v28, %v1335_v38  ;;  %v1869_v28 = vrot.slane %v1867_v19, 5  ;;  %v11748_v36 = vcombine.low %v1339_v24, %v1342_v31  ;;  %v1885_v38 = vrot.slane %v1883_v30, 5 }
 0x156   : > { %v1880_v40 = vor.u32 %v1879_v32, %v1875_v29  ;;  %v15702_v63 = vadd.f32 %v12810_v52, %v12746_v51  ;;  %v1346_v10 = vsel %vm14843_vm4, %v11733_v2, %v1345_v3  ;;  %v1347_v11 = vrot.slane %v1345_v3, 4  ;;  %v12747_v19 = vpop.f32.mrb[4].mxu0  ;;  %v11834_v2 = vld [vmem:[%s14827_s25 + $0x9c] sm:$0xf]  ;;  %v11835_v3 = vld [vmem:[%s14827_s25 + $0xa0] sm:$0xf] }
 0x157   : > { %5602 = vmatmul.mubr.bf16.gmra.mrb[100].mxu0 %v11747_v43  ;;  %v1870_v37 = vor.u32 %v1869_v28, %v1866_v27  ;;  %v1891_v13 = vshll.u32 %v11831_v4, 16  ;;  %v1907_v18 = vshll.u32 %v11833_v9, 16  ;;  %v1903_v27 = vrot.slane %v1901_v17, 4  ;;  %v12748_v31 = vpop.f32.mrb[5].mxu0  ;;  %v14187_v17 = vld [vmem:[%s17816_s2 + $0x220] sm:$0xff]  }
 0x158   : > { %5609 = vmatprep.mubr.bf16.mxu0 %v14174_v55  ;;  %v1881_v50 = vrot.slane %v1880_v40, 4  ;;  %v11896_v55 = vld [vmem:[%s14827_s25 + $0x94] sm:$0xf]  ;;  %v1349_v21 = vsel %vm14843_vm4, %v1347_v11, %v1348_v7  ;;  %v12749_v35 = vadd.f32 %v12748_v31, %v12747_v19  ;;  %v14185_v40 = vld [vmem:[%s17816_s2 + $0x1b8] sm:$0xff]   ;;  %v2272_v44 = vrot.slane %v11900_v54, 5  ;;  %13853 = vmatprep.subr.bf16.mxu1 %v14187_v17 }
 0x159   : > { %v1871_v43 = vrot.slane %v1870_v37, 4  ;;  %v2262_v59 = vrot.slane %v11896_v55, 5  ;;  %v1893_v24 = vrot.slane %v1891_v13, 5  ;;  %v11749_v25 = vcombine.low %v1346_v10, %v1349_v21  ;;  %v14184_v37 = vld [vmem:[%s17816_s2 + $0x1f8] sm:$0xff]   ;;  %13854 = vmatpush3.bf16.msra.mxu1 %v14187_v17  ;;  %v11903_v54 = vld [vmem:[%s14827_s25 + $0xb0] sm:$0x1] }
 0x15a   : > { %v1886_v58 = vsel %vm14849_vm5, %v1881_v50, %v1885_v38  ;;  %v1909_v28 = vrot.slane %v1907_v18, 5  ;;  %v1904_v33 = vor.u32 %v1903_v27, %v1899_v26  ;;  %v12750_v38 = vpop.f32.mrb[6].mxu0  ;;  %13203 = vmatprep.subr.bf16.mxu0 %v14184_v37  ;;  %v11899_v50 = vld [vmem:[%s14827_s25 + $0xa0] sm:$0xf]  ;;  %v2766_v10 = vrot.slane %v2764_v1, 5 }
 0x15b   : > { %v1876_v34 = vsel %vm14849_vm5, %v1871_v43, %v1875_v29  ;;  %v2263_v5 = vsel %vm14843_vm4, %v11921_v57, %v2262_v59  ;;  %v2264_v6 = vrot.slane %v2262_v59, 4  ;;  %v12811_v29 = vpop.f32.mrb[4].mxu1  ;;  %v1894_v30 = vor.u32 %v1893_v24, %v1890_v22  ;;  %v12751_v42 = vpop.f32.mrb[7].mxu0  ;;  %13204 = vmatpush3.bf16.msra.mxu0 %v14185_v40  ;;  %v12016_v59 = vld [vmem:[%s14827_s25 + $0x80] sm:$0x1] }
 0x15c   : > { %v11856_v0 = vcombine.low %v1876_v34, %v1886_v58  ;;  %v12812_v32 = vpop.f32.mrb[5].mxu1  ;;  %v1905_v43 = vrot.slane %v1904_v33, 4  ;;  %v12752_v45 = vadd.f32 %v12751_v42, %v12750_v38  ;;  %v2269_v55 = vrot.slane %v11899_v50, 5  ;;  %v12015_v58 = vld [vmem:[%s14827_s25 + $0x7c] sm:$0xf] }
 0x15d   : > { %v2266_v15 = vsel %vm14843_vm4, %v2264_v6, %v2265_v60  ;;  %v12814_v39 = vpop.f32.mrb[6].mxu1  ;;  %v1895_v41 = vrot.slane %v1894_v30, 4  ;;  %v2761_v60 = vshrl.u32 %v12014_v56, 16  ;;  %v2774_v6 = vshrl.u32 %v12015_v58, 16  ;;  %v11901_v37 = vld [vmem:[%s14827_s25 + $0xa8] sm:$0xe] }
 0x15e   : > { %5675 = vmatmul.mubr.bf16.gmra.mrb[104].mxu1 %v11856_v0  ;;  %v11937_v20 = vcombine.low %v2263_v5, %v2266_v15  ;;  %v12815_v46 = vpop.f32.mrb[7].mxu1  ;;  %v1910_v57 = vsel %vm14849_vm5, %v1905_v43, %v1909_v28  ;;  %v2271_v0 = vrot.slane %v2269_v55, 4  ;;  %v2770_v5 = vshll.u32 %v12015_v58, 16  ;;  %v12753_v22 = vpop.f32.mrb[8].mxu0  ;;  %v12018_v58 = vld [vmem:[%s14827_s25 + $0x88] sm:$0xf] }
 0x15f   : > { %5610 = vmatmul.mubr.bf16.gmra.mrb[104].mxu0 %v11748_v36  ;;  %v12813_v36 = vadd.f32 %v12812_v32, %v12811_v29  ;;  %v1900_v52 = vsel %vm14849_vm5, %v1895_v41, %v1899_v26  ;;  %v12816_v53 = vadd.f32 %v12815_v46, %v12814_v39  ;;  %v2763_v4 = vrot.slane %v2761_v60, 4  ;;  %v12817_v27 = vpop.f32.mrb[8].mxu1  ;;  %v12754_v28 = vpop.f32.mrb[9].mxu0  ;;  %v14186_v41 = vld [vmem:[%s14827_s25 + $0x78] sm:$0xff]   ;;  %v12019_v1 = vld [vmem:[%s14827_s25 + $0x8c] sm:$0x1] }
 0x160   : > { %5617 = vmatprep.mubr.bf16.mxu0 %v14180_v47  ;;  %5682 = vmatprep.mubr.bf16.mxu1 %v11937_v20  ;;  %v11898_v47 = vld [vmem:[%s14827_s25 + $0x9c] sm:$0xe]  ;;  %v11857_v61 = vcombine.low %v1900_v52, %v1910_v57  ;;  %v2780_v7 = vshll.u32 %v12016_v59, 16  ;;  %v2273_v9 = vsel %vm14843_vm4, %v2271_v0, %v2272_v44  ;;  %v1912_v11 = vshrl.u32 %v11834_v2, 16  ;;  %v12017_v44 = vld [vmem:[%s14827_s25 + $0x84] sm:$0xf] }
 0x161   : > { %v15727_v51 = vadd.f32 %v12813_v36, %v12749_v35  ;;  %v11922_v34 = vrot.slane %v11898_v47, 9  ;;  %v1915_v12 = vshll.u32 %v11834_v2, 16  ;;  %v2772_v14 = vrot.slane %v2770_v5, 5  ;;  %v12818_v35 = vpop.f32.mrb[9].mxu1  ;;  %v12756_v36 = vpop.f32.mrb[10].mxu0  ;;  %v14189_v59 = vld [vmem:[%s17816_s2 + $0x228] sm:$0xff]  }
 0x162   : > { %v2776_v15 = vrot.slane %v2774_v6, 4  ;;  %v2782_v16 = vrot.slane %v2780_v7, 5  ;;  %v2767_v18 = vor.u32 %v2766_v10, %v2763_v4  ;;  %v1914_v19 = vrot.slane %v1912_v11, 4  ;;  %v12820_v43 = vpop.f32.mrb[10].mxu1  ;;  %v11837_v2 = vld [vmem:[%s14827_s25 + $0xa8] sm:$0xf]  ;;  %13855 = vmatprep.subr.bf16.mxu1 %v14189_v59 }
 0x163   : > { %v2270_v62 = vsel %vm14843_vm4, %v11922_v34, %v2269_v55  ;;  %v1917_v20 = vrot.slane %v1915_v12, 5  ;;  %v1921_v21 = vshll.u32 %v11835_v3, 16  ;;  %v1931_v26 = vshll.u32 %v11836_v8, 16  ;;  %v12821_v52 = vpop.f32.mrb[11].mxu1  ;;  %v11838_v7 = vld [vmem:[%s14827_s25 + $0xac] sm:$0xf]  ;;  %13856 = vmatpush3.bf16.msra.mxu1 %v14189_v59 }
 0x164   : > { %v11938_v13 = vcombine.low %v2270_v62, %v2273_v9  ;;  %v2777_v24 = vor.u32 %v2776_v15, %v2772_v14  ;;  %v15747_v29 = vadd.f32 %v12816_v53, %v12752_v45  ;;  %v2768_v30 = vrot.slane %v2767_v18, 4  ;;  %v12757_v45 = vpop.f32.mrb[11].mxu0  ;;  %v11902_v53 = vld [vmem:[%s14827_s25 + $0xac] sm:$0xf]  ;;  %v11839_v12 = vld [vmem:[%s14827_s25 + $0xb0] sm:$0x1] }
 0x165   : > { %v1918_v31 = vor.u32 %v1917_v20, %v1914_v19  ;;  %v1923_v32 = vrot.slane %v1921_v21, 5  ;;  %v15749_v33 = vadd.f32 %v12754_v28, %v12753_v22  ;;  %v1933_v40 = vrot.slane %v1931_v26, 5 }
 0x166   : > { %5683 = vmatmul.mubr.bf16.gmra.mrb[108].mxu1 %v11857_v61  ;;  %v2778_v38 = vrot.slane %v2777_v24, 4  ;;  %v15753_v42 = vadd.f32 %v12818_v35, %v12817_v27  ;;  %v2773_v46 = vsel %vm14849_vm5, %v2768_v30, %v2772_v14  ;;  %v15757_v50 = vadd.f32 %v12757_v45, %v12756_v36 }
 0x167   : > { %5618 = vmatmul.mubr.bf16.gmra.mrb[108].mxu0 %v11749_v25  ;;  %5690 = vmatprep.mubr.bf16.mxu1 %v11938_v13  ;;  %v1925_v25 = vshrl.u32 %v11835_v3, 16  ;;  %v1919_v47 = vrot.slane %v1918_v31, 4  ;;  %v15763_v56 = vadd.f32 %v12821_v52, %v12820_v43  ;;  %v11923_v57 = vrot.slane %v11901_v37, 9  ;;  %v12759_v13 = vpop.f32.mrb[12].mxu0  ;;  %v12823_v18 = vpop.f32.mrb[12].mxu1 }
 0x168   : > { %v2783_v34 = vsel %vm14849_vm5, %v2778_v38, %v2782_v16  ;;  %v2276_v62 = vrot.slane %v11902_v53, 5  ;;  %v2279_v0 = vrot.slane %v11903_v54, 5  ;;  %v2785_v4 = vshrl.u32 %v12017_v44, 16  ;;  %v12760_v28 = vpop.f32.mrb[13].mxu0  ;;  %v12824_v30 = vpop.f32.mrb[13].mxu1 }
 0x169   : > { %v1927_v39 = vrot.slane %v1925_v25, 4  ;;  %v12046_v60 = vcombine.low %v2773_v46, %v2783_v34  ;;  %v1924_v61 = vsel %vm14849_vm5, %v1919_v47, %v1923_v32  ;;  %v2788_v5 = vshll.u32 %v12017_v44, 16  ;;  %v12762_v37 = vpop.f32.mrb[14].mxu0  ;;  %v12826_v38 = vpop.f32.mrb[14].mxu1  ;;  %v14191_v47 = vld [vmem:[%s17816_s2 + $0x230] sm:$0xff]  }
 0x16a   : > { %v2794_v6 = vshll.u32 %v12018_v58, 16  ;;  %v2277_v8 = vsel %vm14843_vm4, %v11923_v57, %v2276_v62  ;;  %v2278_v9 = vrot.slane %v2276_v62, 4  ;;  %v2798_v10 = vshrl.u32 %v12018_v58, 16  ;;  %v12763_v45 = vpop.f32.mrb[15].mxu0  ;;  %v12827_v46 = vpop.f32.mrb[15].mxu1  ;;  %13857 = vmatprep.subr.bf16.mxu1 %v14191_v47 }
 0x16b   : > { %v1928_v55 = vor.u32 %v1927_v39, %v1923_v32  ;;  %5755 = vmatprep.mubr.bf16.mxu0 %v12046_v60  ;;  %v2804_v11 = vshll.u32 %v12019_v1, 16  ;;  %v2787_v15 = vrot.slane %v2785_v4, 4  ;;  %v2790_v16 = vrot.slane %v2788_v5, 5  ;;  %v11904_v57 = vld [vmem:[%s14827_s25 + $0xb4] sm:$0xe]  ;;  %13858 = vmatpush3.bf16.msra.mxu1 %v14191_v47 }
 0x16c   : > { %v2796_v17 = vrot.slane %v2794_v6, 5  ;;  %v2280_v20 = vsel %vm14843_vm4, %v2278_v9, %v2279_v0  ;;  %v2800_v21 = vrot.slane %v2798_v10, 4  ;;  %v1936_v26 = vshrl.u32 %v11837_v2, 16  ;;  %v11906_v62 = vld [vmem:[%s14827_s25 + $0xbc] sm:$0x1] }
 0x16d   : > { %v1929_v3 = vrot.slane %v1928_v55, 4  ;;  %v2806_v22 = vrot.slane %v2804_v11, 5  ;;  %v11939_v24 = vcombine.low %v2277_v8, %v2280_v20  ;;  %v2791_v25 = vor.u32 %v2790_v16, %v2787_v15  ;;  %v14188_v55 = vld [vmem:[%s14827_s25 + $0x84] sm:$0xff]   ;;  %v12020_v0 = vld [vmem:[%s14827_s25 + $0x90] sm:$0xf] }
 0x16e   : > { %v1939_v27 = vshll.u32 %v11837_v2, 16  ;;  %v2801_v31 = vor.u32 %v2800_v21, %v2796_v17  ;;  %v1945_v32 = vshll.u32 %v11838_v7, 16  ;;  %v1949_v35 = vshrl.u32 %v11838_v7, 16  ;;  %v12021_v5 = vld [vmem:[%s14827_s25 + $0x94] sm:$0xf]  ;;  %v12765_v7 = vpop.f32.mrb[16].mxu0 }
 0x16f   : > { %v1934_v14 = vsel %vm14849_vm5, %v1929_v3, %v1933_v40  ;;  %5756 = vmatmul.mubr.bf16.vlgmr.msra.gmra.mrb[112].mxu0 %v14186_v41  ;;  %v1955_v36 = vshll.u32 %v11839_v12, 16  ;;  %v2792_v39 = vrot.slane %v2791_v25, 4  ;;  %v1938_v40 = vrot.slane %v1936_v26, 4  ;;  %v12022_v6 = vld [vmem:[%s14827_s25 + $0x98] sm:$0x1] }
 0x170   : > { %v11858_v19 = vcombine.low %v1924_v61, %v1934_v14  ;;  %v1941_v41 = vrot.slane %v1939_v27, 5  ;;  %v15782_v43 = vadd.f32 %v12760_v28, %v12759_v13  ;;  %v2802_v52 = vrot.slane %v2801_v31, 4  ;;  %v11905_v61 = vld [vmem:[%s14827_s25 + $0xb8] sm:$0xf]  ;;  %v11840_v12 = vld [vmem:[%s14827_s25 + $0xb4] sm:$0xf] }
 0x171   : > { %v1947_v53 = vrot.slane %v1945_v32, 5  ;;  %v1951_v54 = vrot.slane %v1949_v35, 4  ;;  %v1957_v34 = vrot.slane %v1955_v36, 5  ;;  %v2797_v44 = vsel %vm14849_vm5, %v2792_v39, %v2796_v17  ;;  %v12829_v13 = vpop.f32.mrb[16].mxu1 }
 0x172   : > { %5691 = vmatmul.mubr.bf16.gmra.mrb[112].mxu1 %v11858_v19  ;;  %v1942_v58 = vor.u32 %v1941_v41, %v1938_v40  ;;  %v15791_v59 = vadd.f32 %v12824_v30, %v12823_v18  ;;  %v15793_v60 = vadd.f32 %v12763_v45, %v12762_v37  ;;  %v2807_v1 = vsel %vm14849_vm5, %v2802_v52, %v2806_v22  ;;  %v11841_v18 = vld [vmem:[%s14827_s25 + $0xb8] sm:$0xf]  ;;  %v12766_v30 = vpop.f32.mrb[17].mxu0  ;;  %v12830_v41 = vpop.f32.mrb[17].mxu1 }
 0x173   : > { %5698 = vmatprep.mubr.bf16.mxu1 %v11939_v24  ;;  %v1952_v2 = vor.u32 %v1951_v54, %v1947_v53  ;;  %v15800_v3 = vadd.f32 %v12827_v46, %v12826_v38  ;;  %v11924_v4 = vrot.slane %v11904_v57, 9  ;;  %v12047_v8 = vcombine.low %v2797_v44, %v2807_v1  ;;  %v11842_v24 = vld [vmem:[%s14827_s25 + $0xbc] sm:$0x1]  ;;  %v12768_v45 = vpop.f32.mrb[18].mxu0  ;;  %v12832_v54 = vpop.f32.mrb[18].mxu1 }
 0x174   : > { %v1943_v9 = vrot.slane %v1942_v58, 4  ;;  %v2283_v10 = vrot.slane %v11905_v61, 5  ;;  %v2286_v11 = vrot.slane %v11906_v62, 5  ;;  %v2809_v15 = vshrl.u32 %v12020_v0, 16  ;;  %v12833_v62 = vpop.f32.mrb[19].mxu1 }
 0x175   : > { %v1953_v14 = vrot.slane %v1952_v2, 4  ;;  %v2812_v16 = vshll.u32 %v12020_v0, 16  ;;  %v2818_v17 = vshll.u32 %v12021_v5, 16  ;;  %5763 = vmatprep.mubr.bf16.mxu0 %v12047_v8  ;;  %v2822_v22 = vshrl.u32 %v12021_v5, 16  ;;  %v14193_v0 = vld [vmem:[%s17816_s2 + $0x238] sm:$0xff]  }
 0x176   : > { %v1948_v19 = vsel %vm14849_vm5, %v1943_v9, %v1947_v53  ;;  %v2284_v20 = vsel %vm14843_vm4, %v11924_v4, %v2283_v10  ;;  %v2285_v21 = vrot.slane %v2283_v10, 4  ;;  %v2811_v26 = vrot.slane %v2809_v15, 4  ;;  %v12023_v15 = vld [vmem:[%s14827_s25 + $0x9c] sm:$0xf]  ;;  %13859 = vmatprep.subr.bf16.mxu1 %v14193_v0 }
 0x177   : > { %v1958_v25 = vsel %vm14849_vm5, %v1953_v14, %v1957_v34  ;;  %5764 = vmatmul.mubr.bf16.gmra.mrb[116].mxu0 %v14188_v55  ;;  %v2814_v27 = vrot.slane %v2812_v16, 5  ;;  %v2820_v28 = vrot.slane %v2818_v17, 5  ;;  %v2824_v35 = vrot.slane %v2822_v22, 4  ;;  %v12769_v34 = vpop.f32.mrb[19].mxu0  ;;  %v11907_v55 = vld [vmem:[%s14827_s25 + $0xc0] sm:$0xe]  ;;  %13860 = vmatpush3.bf16.msra.mxu1 %v14193_v0 }
 0x178   : > { %v11859_v31 = vcombine.low %v1948_v19, %v1958_v25  ;;  %v2287_v32 = vsel %vm14843_vm4, %v2285_v21, %v2286_v11  ;;  %v2828_v36 = vshll.u32 %v12022_v6, 16  ;;  %v1960_v39 = vshrl.u32 %v11840_v12, 16  ;;  %v11908_v6 = vld [vmem:[%s14827_s25 + $0xc4] sm:$0xf]  ;;  %v15822_v8 = vpop.f32.mrb[20].mxu0  ;;  %v15830_v16 = vpop.f32.mrb[20].mxu1 }
 0x179   : > { %v11940_v37 = vcombine.low %v2284_v20, %v2287_v32  ;;  %v2815_v38 = vor.u32 %v2814_v27, %v2811_v26  ;;  %v1963_v40 = vshll.u32 %v11840_v12, 16  ;;  %v2825_v46 = vor.u32 %v2824_v35, %v2820_v28  ;;  %v11909_v14 = vld [vmem:[%s14827_s25 + $0xc8] sm:$0x1]  ;;  %v12024_v21 = vld [vmem:[%s14827_s25 + $0xa0] sm:$0xf] }
 0x17a   : > { %5699 = vmatmul.mubr.bf16.gmra.mrb[116].mxu1 %v11859_v31  ;;  %v2830_v47 = vrot.slane %v2828_v36, 5  ;;  %v1969_v52 = vshll.u32 %v11841_v18, 16  ;;  %v1973_v53 = vshrl.u32 %v11841_v18, 16  ;;  %v1962_v44 = vrot.slane %v1960_v39, 4  ;;  %v14190_v18 = vld [vmem:[%s14827_s25 + $0x90] sm:$0xff]  }
 0x17b   : > { %5706 = vmatprep.mubr.bf16.mxu1 %v11940_v37  ;;  %v2816_v57 = vrot.slane %v2815_v38, 4  ;;  %v1965_v58 = vrot.slane %v1963_v40, 5  ;;  %v1979_v61 = vshll.u32 %v11842_v24, 16  ;;  %v2826_v1 = vrot.slane %v2825_v46, 4  ;;  %v12025_v22 = vld [vmem:[%s14827_s25 + $0xa4] sm:$0x1] }
 0x17c   : > { %v1971_v2 = vrot.slane %v1969_v52, 5  ;;  %v1975_v4 = vrot.slane %v1973_v53, 4  ;;  %v15819_v5 = vadd.f32 %v12766_v30, %v12765_v7  ;;  %v15826_v12 = vadd.f32 %v12830_v41, %v12829_v13  ;;  %v11843_v27 = vld [vmem:[%s14827_s25 + $0xc0] sm:$0xf]  ;;  %v11844_v36 = vld [vmem:[%s14827_s25 + $0xc4] sm:$0xf] }
 0x17d   : > { %v2821_v9 = vsel %vm14849_vm5, %v2816_v57, %v2820_v28  ;;  %v1966_v10 = vor.u32 %v1965_v58, %v1962_v44  ;;  %v1981_v11 = vrot.slane %v1979_v61, 5  ;;  %v2831_v7 = vsel %vm14849_vm5, %v2826_v1, %v2830_v47  ;;  %v12772_v28 = vpop.f32.mrb[21].mxu0  ;;  %v11845_v41 = vld [vmem:[%s14827_s25 + $0xc8] sm:$0x1]  ;;  %v12836_v53 = vpop.f32.mrb[21].mxu1 }
 0x17e   : > { %v1976_v17 = vor.u32 %v1975_v4, %v1971_v2  ;;  %v15835_v19 = vadd.f32 %v12769_v34, %v12768_v45  ;;  %v15837_v20 = vadd.f32 %v12833_v62, %v12832_v54  ;;  %v12048_v13 = vcombine.low %v2821_v9, %v2831_v7  ;;  %v12774_v44 = vpop.f32.mrb[22].mxu0  ;;  %v12838_v58 = vpop.f32.mrb[22].mxu1 }
 0x17f   : > { %v1967_v24 = vrot.slane %v1966_v10, 4  ;;  %v11925_v25 = vrot.slane %v11907_v55, 9  ;;  %v2290_v26 = vrot.slane %v11908_v6, 5  ;;  %v2293_v31 = vrot.slane %v11909_v14, 5  ;;  %v12839_v4 = vpop.f32.mrb[23].mxu1 }
 0x180   : > { %v1977_v30 = vrot.slane %v1976_v17, 4  ;;  %v2833_v32 = vshrl.u32 %v12023_v15, 16  ;;  %v2836_v35 = vshll.u32 %v12023_v15, 16  ;;  %5771 = vmatprep.mubr.bf16.mxu0 %v12048_v13  ;;  %v2842_v40 = vshll.u32 %v12024_v21, 16 }
 0x181   : > { %v1972_v37 = vsel %vm14849_vm5, %v1967_v24, %v1971_v2  ;;  %v2291_v38 = vsel %vm14843_vm4, %v11925_v25, %v2290_v26  ;;  %v2292_v39 = vrot.slane %v2290_v26, 4  ;;  %5772 = vmatmul.mubr.bf16.gmra.mrb[120].mxu0 %v14190_v18  ;;  %v2846_v52 = vshrl.u32 %v12024_v21, 16  ;;  %v12775_v2 = vpop.f32.mrb[23].mxu0  ;;  %v12026_v18 = vld [vmem:[%s14827_s25 + $0xa8] sm:$0xf] }
 0x182   : > { %v1982_v45 = vsel %vm14849_vm5, %v1977_v30, %v1981_v11  ;;  %v2835_v46 = vrot.slane %v2833_v32, 4  ;;  %v2838_v47 = vrot.slane %v2836_v35, 5  ;;  %v2844_v55 = vrot.slane %v2842_v40, 5  ;;  %v12027_v25 = vld [vmem:[%s14827_s25 + $0xac] sm:$0xf]  ;;  %v15857_v26 = vpop.f32.mrb[24].mxu0 }
 0x183   : > { %v11860_v54 = vcombine.low %v1972_v37, %v1982_v45  ;;  %v2294_v34 = vsel %vm14843_vm4, %v2292_v39, %v2293_v31  ;;  %v2852_v57 = vshll.u32 %v12025_v22, 16  ;;  %v2848_v0 = vrot.slane %v2846_v52, 4  ;;  %v14192_v32 = vld [vmem:[%s14827_s25 + $0x9c] sm:$0xff]   ;;  %v12078_v37 = vld [vmem:[%s14827_s25 + $0x78] sm:$0xe] }
 0x184   : > { %v11941_v61 = vcombine.low %v2291_v38, %v2294_v34  ;;  %v2839_v62 = vor.u32 %v2838_v47, %v2835_v46  ;;  %v1984_v1 = vshrl.u32 %v11843_v27, 16  ;;  %v1987_v9 = vshll.u32 %v11843_v27, 16  ;;  %v12079_v40 = vld [vmem:[%s14827_s25 + $0x7c] sm:$0xf]  ;;  %v12080_v52 = vld [vmem:[%s14827_s25 + $0x80] sm:$0x1] }
 0x185   : > { %5707 = vmatmul.mubr.bf16.gmra.mrb[120].mxu1 %v11860_v54  ;;  %v2854_v6 = vrot.slane %v2852_v57, 5  ;;  %v1993_v10 = vshll.u32 %v11844_v36, 16  ;;  %v1997_v11 = vshrl.u32 %v11844_v36, 16  ;;  %v2849_v15 = vor.u32 %v2848_v0, %v2844_v55  ;;  %v12028_v36 = vld [vmem:[%s14827_s25 + $0xb0] sm:$0x1] }
 0x186   : > { %5714 = vmatprep.mubr.bf16.mxu1 %v11941_v61  ;;  %v2840_v14 = vrot.slane %v2839_v62, 4  ;;  %v1986_v7 = vrot.slane %v1984_v1, 4  ;;  %v2003_v17 = vshll.u32 %v11845_v41, 16  ;;  %v1989_v21 = vrot.slane %v1987_v9, 5  ;;  %v12081_v54 = vld [vmem:[%s14827_s25 + $0x84] sm:$0xe] }
 0x187   : > { %v1995_v22 = vrot.slane %v1993_v10, 5  ;;  %v1999_v13 = vrot.slane %v1997_v11, 4  ;;  %v15854_v24 = vadd.f32 %v12772_v28, %v15822_v8  ;;  %v2850_v30 = vrot.slane %v2849_v15, 4  ;;  %v12082_v61 = vld [vmem:[%s14827_s25 + $0x88] sm:$0xf] }
 0x188   : > { %v2845_v27 = vsel %vm14849_vm5, %v2840_v14, %v2844_v55  ;;  %v2005_v31 = vrot.slane %v2003_v17, 5  ;;  %v15863_v35 = vadd.f32 %v12836_v53, %v15830_v16  ;;  %v1990_v38 = vor.u32 %v1989_v21, %v1986_v7  ;;  %v12841_v16 = vpop.f32.mrb[24].mxu1  ;;  %v12083_v14 = vld [vmem:[%s14827_s25 + $0x8c] sm:$0x1] }
 0x189   : > { %v2000_v8 = vor.u32 %v1999_v13, %v1995_v22  ;;  %v15867_v28 = vadd.f32 %v12775_v2, %v12774_v44  ;;  %v15869_v39 = vadd.f32 %v12839_v4, %v12838_v58  ;;  %v2855_v41 = vsel %vm14849_vm5, %v2850_v30, %v2854_v6  ;;  %v12778_v44 = vpop.f32.mrb[25].mxu0  ;;  %v12842_v2 = vpop.f32.mrb[25].mxu1 }
 0x18a   : > { %v2857_v45 = vshrl.u32 %v12026_v18, 16  ;;  %v2860_v46 = vshll.u32 %v12026_v18, 16  ;;  %v2866_v47 = vshll.u32 %v12027_v25, 16  ;;  %v12049_v53 = vcombine.low %v2845_v27, %v2855_v41  ;;  %v12780_v4 = vpop.f32.mrb[26].mxu0  ;;  %v12844_v15 = vpop.f32.mrb[26].mxu1 }
 0x18b   : > { %v1991_v34 = vrot.slane %v1990_v38, 4  ;;  %v2001_v55 = vrot.slane %v2000_v8, 4  ;;  %v2870_v57 = vshrl.u32 %v12027_v25, 16  ;;  %v2876_v1 = vshll.u32 %v12028_v36, 16  ;;  %v12781_v7 = vpop.f32.mrb[27].mxu0  ;;  %v12845_v25 = vpop.f32.mrb[27].mxu1 }
 0x18c   : > { %v2859_v62 = vrot.slane %v2857_v45, 4  ;;  %v2862_v58 = vrot.slane %v2860_v46, 5  ;;  %v2868_v0 = vrot.slane %v2866_v47, 5  ;;  %5779 = vmatprep.mubr.bf16.mxu0 %v12049_v53  ;;  %v12110_v11 = vrot.slane %v12078_v37, 9  ;;  %v12783_v38 = vpop.f32.mrb[28].mxu0  ;;  %v14194_v47 = vld [vmem:[%s14827_s25 + $0xa8] sm:$0xff]  }
 0x18d   : > { %v1996_v6 = vsel %vm14849_vm5, %v1991_v34, %v1995_v22  ;;  %v2006_v9 = vsel %vm14849_vm5, %v2001_v55, %v2005_v31  ;;  %v2872_v10 = vrot.slane %v2870_v57, 4  ;;  %5780 = vmatmul.mubr.bf16.gmra.mrb[124].mxu0 %v14192_v32  ;;  %v2878_v21 = vrot.slane %v2876_v1, 5  ;;  %v12029_v31 = vld [vmem:[%s14827_s25 + $0xb4] sm:$0xf]  ;;  %v12030_v45 = vld [vmem:[%s14827_s25 + $0xb8] sm:$0xf] }
 0x18e   : > { %v11861_v17 = vcombine.low %v1996_v6, %v2006_v9  ;;  %v2863_v18 = vor.u32 %v2862_v58, %v2859_v62  ;;  %v3186_v13 = vrot.slane %v12079_v40, 5  ;;  %v3189_v30 = vrot.slane %v12080_v52, 5  ;;  %v12847_v40 = vpop.f32.mrb[28].mxu1  ;;  %v12031_v34 = vld [vmem:[%s14827_s25 + $0xbc] sm:$0x1] }
 0x18f   : > { %v2873_v27 = vor.u32 %v2872_v10, %v2868_v0  ;;  %v12111_v22 = vrot.slane %v12081_v54, 9  ;;  %v3193_v36 = vrot.slane %v12082_v61, 5  ;;  %v3196_v41 = vrot.slane %v12083_v14, 5  ;;  %v12084_v55 = vld [vmem:[%s14827_s25 + $0x90] sm:$0xe]  ;;  %v12848_v14 = vpop.f32.mrb[29].mxu1 }
 0x190   : > { %5715 = vmatmul.mubr.bf16.gmra.mrb[124].mxu1 %v11861_v17  ;;  %v2864_v37 = vrot.slane %v2863_v18, 4  ;;  %v3187_v8 = vsel %vm14843_vm4, %v12110_v11, %v3186_v13  ;;  %v3188_v32 = vrot.slane %v3186_v13, 4  ;;  %v15890_v53 = vadd.f32 %v12778_v44, %v15857_v26  ;;  %v12085_v1 = vld [vmem:[%s14827_s25 + $0x94] sm:$0xf]  ;;  %v12086_v10 = vld [vmem:[%s14827_s25 + $0x98] sm:$0x1] }
 0x191   : > { %v2874_v46 = vrot.slane %v2873_v27, 4  ;;  %v3194_v52 = vsel %vm14843_vm4, %v12111_v22, %v3193_v36  ;;  %v3195_v54 = vrot.slane %v3193_v36, 4  ;;  %v15898_v62 = vadd.f32 %v12842_v2, %v12841_v16  ;;  %v12784_v11 = vpop.f32.mrb[29].mxu0  ;;  %v12850_v13 = vpop.f32.mrb[30].mxu1 }
 0x192   : > { %v2869_v57 = vsel %vm14849_vm5, %v2864_v37, %v2868_v0  ;;  %v3190_v61 = vsel %vm14843_vm4, %v3188_v32, %v3189_v30  ;;  %v15900_v58 = vadd.f32 %v12781_v7, %v12780_v4  ;;  %v15907_v44 = vadd.f32 %v12845_v25, %v12844_v15  ;;  %v12087_v0 = vld [vmem:[%s14827_s25 + $0x9c] sm:$0xe]  ;;  %v12088_v4 = vld [vmem:[%s14827_s25 + $0xa0] sm:$0xf]  ;;  %v12786_v7 = vpop.f32.mrb[30].mxu0  ;;  %v12851_v15 = vpop.f32.mrb[31].mxu1 }
 0x193   : > { %v2879_v6 = vsel %vm14849_vm5, %v2874_v46, %v2878_v21  ;;  %v12126_v9 = vcombine.low %v3187_v8, %v3190_v61  ;;  %v3197_v26 = vsel %vm14843_vm4, %v3195_v54, %v3196_v41  ;;  %v2881_v16 = vshrl.u32 %v12029_v31, 16  ;;  %v12787_v36 = vpop.f32.mrb[31].mxu0  ;;  %v12089_v41 = vld [vmem:[%s14827_s25 + $0xa4] sm:$0x1]  ;;  %v12032_v61 = vld [vmem:[%s14827_s25 + $0xc0] sm:$0xf] }
 0x194   : > { %v12050_v17 = vcombine.low %v2869_v57, %v2879_v6  ;;  %v12127_v18 = vcombine.low %v3194_v52, %v3197_v26  ;;  %v2884_v2 = vshll.u32 %v12029_v31, 16  ;;  %v2890_v21 = vshll.u32 %v12030_v45, 16 }
 0x195   : > { %13861 = vmatprep.mubr.bf16.mxu1 %v12126_v9  ;;  %v2894_v27 = vshrl.u32 %v12030_v45, 16  ;;  %v2900_v30 = vshll.u32 %v12031_v34, 16  ;;  %v12112_v22 = vrot.slane %v12084_v55, 9  ;;  %v2883_v25 = vrot.slane %v2881_v16, 4 }
 0x196   : > { %5787 = vmatprep.mubr.bf16.mxu0 %v12050_v17  ;;  %v2886_v37 = vrot.slane %v2884_v2, 5  ;;  %v3200_v8 = vrot.slane %v12085_v1, 5  ;;  %v3203_v32 = vrot.slane %v12086_v10, 5  ;;  %v2892_v31 = vrot.slane %v2890_v21, 5  ;;  %v12033_v1 = vld [vmem:[%s14827_s25 + $0xc4] sm:$0xf] }
 0x197   : > { %5788 = vmatmul.mubr.bf16.gmra.mrb[128].mxu0 %v14194_v47  ;;  %v2896_v46 = vrot.slane %v2894_v27, 4  ;;  %v2902_v52 = vrot.slane %v2900_v30, 5  ;;  %v12113_v54 = vrot.slane %v12087_v0, 9  ;;  %v3207_v57 = vrot.slane %v12088_v4, 5  ;;  %v12034_v10 = vld [vmem:[%s14827_s25 + $0xc8] sm:$0x1] }
 0x198   : > { %13862 = vmatmul.mubr.bf16.vlgmr.msra.gmra.mrb[128].mxu1 %v12127_v18  ;;  %v2887_v45 = vor.u32 %v2886_v37, %v2883_v25  ;;  %v3201_v34 = vsel %vm14843_vm4, %v12112_v22, %v3200_v8  ;;  %v3202_v55 = vrot.slane %v3200_v8, 4  ;;  %v3210_v47 = vrot.slane %v12089_v41, 5  ;;  %v12090_v2 = vld [vmem:[%s14827_s25 + $0xa8] sm:$0xe]  ;;  %v12091_v4 = vld [vmem:[%s14827_s25 + $0xac] sm:$0xf] }
 0x199   : > { %v2897_v6 = vor.u32 %v2896_v46, %v2892_v31  ;;  %v15917_v9 = vadd.f32 %v12784_v11, %v12783_v38  ;;  %v15919_v26 = vadd.f32 %v12848_v14, %v12847_v40  ;;  %v3208_v18 = vsel %vm14843_vm4, %v12113_v54, %v3207_v57  ;;  %v14195_v30 = vld [vmem:[%s14827_s25 + $0xb4] sm:$0xff]   ;;  %v12092_v40 = vld [vmem:[%s14827_s25 + $0xb0] sm:$0x1]  ;;  %v12869_v14 = vpop.f32.mrb[32].mxu0  ;;  %v12933_v46 = vpop.f32.mrb[32].mxu1 }
 0x19a   : > { %v2888_v0 = vrot.slane %v2887_v45, 4  ;;  %v3204_v17 = vsel %vm14843_vm4, %v3202_v55, %v3203_v32  ;;  %v3209_v16 = vrot.slane %v3207_v57, 4  ;;  %v15929_v22 = vadd.f32 %v12787_v36, %v12786_v7  ;;  %v12093_v11 = vld [vmem:[%s14827_s25 + $0xb4] sm:$0xe]  ;;  %v12094_v41 = vld [vmem:[%s14827_s25 + $0xb8] sm:$0xf] }
 0x19b   : > { %17844 = vst [vmem:[#allocation14_spill] sm:$0xff] %v15917_v9  ;;  %17845 = vst [vmem:[#allocation15_spill] sm:$0xff] %v15919_v26  ;;  %v2898_v21 = vrot.slane %v2897_v6, 4  ;;  %v12128_v27 = vcombine.low %v3201_v34, %v3204_v17  ;;  %v15931_v38 = vadd.f32 %v12851_v15, %v12850_v13  ;;  %v2905_v8 = vshrl.u32 %v12032_v61, 16  ;;  %v12870_v54 = vpop.f32.mrb[33].mxu0  ;;  %v12934_v34 = vpop.f32.mrb[33].mxu1 }
 0x19c   : > { %17846 = vst [vmem:[#allocation16_spill] sm:$0xff] %v15929_v22  ;;  %v2893_v25 = vsel %vm14849_vm5, %v2888_v0, %v2892_v31  ;;  %v3211_v37 = vsel %vm14843_vm4, %v3209_v16, %v3210_v47  ;;  %v2908_v32 = vshll.u32 %v12032_v61, 16  ;;  %v2914_v36 = vshll.u32 %v12033_v1, 16  ;;  %v12095_v45 = vld [vmem:[%s14827_s25 + $0xbc] sm:$0x1]  ;;  %v12872_v55 = vpop.f32.mrb[34].mxu0 }
 0x19d   : > { %17847 = vst [vmem:[#allocation17_spill] sm:$0xff] %v15931_v38  ;;  %v2903_v7 = vsel %vm14849_vm5, %v2898_v21, %v2902_v52  ;;  %13865 = vmatprep.mubr.bf16.mxu1 %v12128_v27  ;;  %v12129_v13 = vcombine.low %v3208_v18, %v3211_v37  ;;  %v2918_v15 = vshrl.u32 %v12033_v1, 16  ;;  %v2907_v31 = vrot.slane %v2905_v8, 4  ;;  %v12936_v47 = vpop.f32.mrb[34].mxu1  ;;  %v12873_v17 = vpop.f32.mrb[35].mxu0 }
 0x19e   : > { %v12051_v57 = vcombine.low %v2893_v25, %v2903_v7  ;;  %v2910_v6 = vrot.slane %v2908_v32, 5  ;;  %v2924_v0 = vshll.u32 %v12034_v10, 16  ;;  %v2916_v61 = vrot.slane %v2914_v36, 5  ;;  %v12937_v26 = vpop.f32.mrb[35].mxu1  ;;  %v15943_v52 = vpop.f32.mrb[36].mxu0 }
 0x19f   : > { %v2920_v16 = vrot.slane %v2918_v15, 4  ;;  %v12114_v38 = vrot.slane %v12090_v2, 9  ;;  %v3214_v22 = vrot.slane %v12091_v4, 5  ;;  %v3217_v21 = vrot.slane %v12092_v40, 5  ;;  %v15945_v10 = vpop.f32.mrb[36].mxu1 }
 0x1a0   : > { %5795 = vmatprep.mubr.bf16.mxu0 %v12051_v57  ;;  %13866 = vmatmul.mubr.bf16.gmra.mrb[132].mxu1 %v12129_v13  ;;  %v2911_v1 = vor.u32 %v2910_v6, %v2907_v31  ;;  %v2926_v18 = vrot.slane %v2924_v0, 5  ;;  %v12115_v27 = vrot.slane %v12093_v11, 9  ;;  %v3221_v37 = vrot.slane %v12094_v41, 5  ;;  %v12035_v8 = vld [vmem:[%s14827_s25 + $0xcc] sm:$0xf]  ;;  %v14196_v57 = vld [vmem:[%s14827_s25 + $0xc0] sm:$0xff]  }
 0x1a1   : > { %5796 = vmatmul.mubr.bf16.gmra.mrb[132].mxu0 %v14195_v30  ;;  %v2921_v25 = vor.u32 %v2920_v16, %v2916_v61  ;;  %v3215_v2 = vsel %vm14843_vm4, %v12114_v38, %v3214_v22  ;;  %v3216_v4 = vrot.slane %v3214_v22, 4  ;;  %v3224_v7 = vrot.slane %v12095_v45, 5  ;;  %v12036_v11 = vld [vmem:[%s14827_s25 + $0xd0] sm:$0xf]  ;;  %v12037_v36 = vld [vmem:[%s14827_s25 + $0xd4] sm:$0x1] }
 0x1a2   : > { %v2912_v32 = vrot.slane %v2911_v1, 4  ;;  %v12871_v13 = vadd.f32 %v12870_v54, %v12869_v14  ;;  %v15950_v40 = vadd.f32 %v12934_v34, %v12933_v46  ;;  %v3222_v38 = vsel %vm14843_vm4, %v12115_v27, %v3221_v37  ;;  %v12096_v41 = vld [vmem:[%s14827_s25 + $0xc0] sm:$0xe]  ;;  %v12097_v31 = vld [vmem:[%s14827_s25 + $0xc4] sm:$0xf]  ;;  %v12876_v0 = vpop.f32.mrb[37].mxu0 }
 0x1a3   : > { %v2922_v15 = vrot.slane %v2921_v25, 4  ;;  %v3218_v30 = vsel %vm14843_vm4, %v3216_v4, %v3217_v21  ;;  %v3223_v22 = vrot.slane %v3221_v37, 4  ;;  %v12874_v45 = vadd.f32 %v12873_v17, %v12872_v55  ;;  %v12098_v34 = vld [vmem:[%s14827_s25 + $0xc8] sm:$0x1]  ;;  %v12099_v6 = vld [vmem:[%s14827_s25 + $0xcc] sm:$0xe] }
 0x1a4   : > { %17848 = vst [vmem:[#allocation18_spill] sm:$0xff] %v15950_v40  ;;  %v2917_v14 = vsel %vm14849_vm5, %v2912_v32, %v2916_v61  ;;  %v12130_v54 = vcombine.low %v3215_v2, %v3218_v30  ;;  %v15964_v46 = vadd.f32 %v12871_v13, %v15684_v23  ;;  %v12940_v16 = vpop.f32.mrb[37].mxu1  ;;  %v15972_v27 = vadd.f32 %v12937_v26, %v12936_v47  ;;  %v12100_v61 = vld [vmem:[%s14827_s25 + $0xd0] sm:$0xf]  ;;  %v12878_v2 = vpop.f32.mrb[38].mxu0  ;;  %v14198_v23 = vld [vmem:[#allocation7 + $0x40] sm:$0xff]  }
 0x1a5   : > { %v2927_v1 = vsel %vm14849_vm5, %v2922_v15, %v2926_v18  ;;  %v3225_v21 = vsel %vm14843_vm4, %v3223_v22, %v3224_v7  ;;  %v2929_v25 = vshrl.u32 %v12035_v8, 16  ;;  %v15975_v4 = vpop.f32.mrb[38].mxu1  ;;  %v15978_v37 = vadd.f32 %v12874_v45, %v15702_v63  ;;  %v12101_v13 = vld [vmem:[%s14827_s25 + $0xd4] sm:$0x1]  ;;  %v12879_v18 = vpop.f32.mrb[39].mxu0  ;;  %v14199_v30 = vld [vmem:[#allocation7] sm:$0xff]   ;;  %13269 = vmatprep.subr.bf16.mxu0 %v14198_v23 }
 0x1a6   : > { %17849 = vst [vmem:[#allocation19_spill] sm:$0xff] %v15964_v46  ;;  %17850 = vst [vmem:[#allocation20_spill] sm:$0xff] %v15972_v27  ;;  %v12052_v55 = vcombine.low %v2917_v14, %v2927_v1  ;;  %13869 = vmatprep.mubr.bf16.mxu1 %v12130_v54  ;;  %v12131_v17 = vcombine.low %v3222_v38, %v3225_v21  ;;  %v2932_v32 = vshll.u32 %v12035_v8, 16  ;;  %v12943_v15 = vpop.f32.mrb[39].mxu1  ;;  %v2938_v26 = vshll.u32 %v12036_v11, 16  ;;  %v12881_v27 = vpop.f32.mrb[40].mxu0 }
 0x1a7   : > { %17851 = vst [vmem:[#allocation21_spill] sm:$0xff] %v15978_v37  ;;  %v2931_v7 = vrot.slane %v2929_v25, 4  ;;  %v2942_v47 = vshrl.u32 %v12036_v11, 16  ;;  %v2948_v22 = vshll.u32 %v12037_v36, 16  ;;  %v12945_v40 = vpop.f32.mrb[40].mxu1  ;;  %v12116_v54 = vrot.slane %v12096_v41, 9  ;;  %13270 = vmatpush3.bf16.msra.mxu0 %v14199_v30 }
 0x1a8   : > { %5803 = vmatprep.mubr.bf16.mxu0 %v12052_v55  ;;  %13870 = vmatmul.mubr.bf16.gmra.mrb[136].mxu1 %v12131_v17  ;;  %v2934_v14 = vrot.slane %v2932_v32, 5  ;;  %v3228_v38 = vrot.slane %v12097_v31, 5  ;;  %v3231_v1 = vrot.slane %v12098_v34, 5  ;;  %v12882_v63 = vpop.f32.mrb[41].mxu0  ;;  %v12946_v45 = vpop.f32.mrb[41].mxu1  ;;  %v2940_v8 = vrot.slane %v2938_v26, 5 }
 0x1a9   : > { %5804 = vmatmul.mubr.bf16.gmra.mrb[136].mxu0 %v14196_v57  ;;  %v2944_v21 = vrot.slane %v2942_v47, 4  ;;  %v2950_v37 = vrot.slane %v2948_v22, 5  ;;  %v12117_v46 = vrot.slane %v12099_v6, 9  ;;  %v12884_v25 = vpop.f32.mrb[42].mxu0  ;;  %v12948_v9 = vpop.f32.mrb[42].mxu1  ;;  %v3235_v55 = vrot.slane %v12100_v61, 5 }
 0x1aa   : > { %v2935_v11 = vor.u32 %v2934_v14, %v2931_v7  ;;  %v3229_v36 = vsel %vm14843_vm4, %v12116_v54, %v3228_v38  ;;  %v3230_v23 = vrot.slane %v3228_v38, 4  ;;  %v12885_v17 = vpop.f32.mrb[43].mxu0  ;;  %v12949_v32 = vpop.f32.mrb[43].mxu1  ;;  %v3238_v31 = vrot.slane %v12101_v13, 5  ;;  %v14200_v47 = vld [vmem:[#allocation7 + $0x48] sm:$0xff]  }
 0x1ab   : > { %v2945_v41 = vor.u32 %v2944_v21, %v2940_v8  ;;  %v12877_v57 = vadd.f32 %v12876_v0, %v15943_v52  ;;  %v15985_v34 = vadd.f32 %v12940_v16, %v15945_v10  ;;  %v12887_v6 = vpop.f32.mrb[44].mxu0  ;;  %v12951_v26 = vpop.f32.mrb[44].mxu1  ;;  %v3236_v61 = vsel %vm14843_vm4, %v12117_v46, %v3235_v55  ;;  %v14197_v21 = vld [vmem:[%s14827_s25 + $0xcc] sm:$0xff]   ;;  %13271 = vmatprep.subr.bf16.mxu0 %v14200_v47  ;;  %s14454_s25 = sshll.u32 %s14529_s13, 4  ;;  %s14455_s25 = int_to_ptr.vmem [resolvable:$false] %s14454_s25 }
 0x1ac   : > { %v2936_v7 = vrot.slane %v2935_v11, 4  ;;  %v3232_v22 = vsel %vm14843_vm4, %v3230_v23, %v3231_v1  ;;  %v3237_v14 = vrot.slane %v3235_v55, 4  ;;  %v12888_v30 = vpop.f32.mrb[45].mxu0  ;;  %v12952_v54 = vpop.f32.mrb[45].mxu1  ;;  %v12880_v10 = vadd.f32 %v12879_v18, %v12878_v2  ;;  %v14201_v11 = vld [vmem:[#allocation7 + $0x8] sm:$0xff]   ;;  %s14456_s22 = scalar_lea.vmem %s14455_s25, 8192  ;;  %p14457_p13 = scmp.lt.s32.totalorder %s17767_s14, %s14455_s25 }
 0x1ad   : > { %v2946_v38 = vrot.slane %v2945_v41, 4  ;;  %v12132_v13 = vcombine.low %v3229_v36, %v3232_v22  ;;  %v15993_v52 = vadd.f32 %v12877_v57, %v15727_v51  ;;  %v12890_v0 = vpop.f32.mrb[46].mxu0  ;;  %v12954_v16 = vpop.f32.mrb[46].mxu1  ;;  %v16000_v23 = vadd.f32 %v12943_v15, %v15975_v4  ;;  %13272 = vmatpush3.bf16.msra.mxu0 %v14201_v11  ;;  %v14202_v22 = vld [vmem:[#allocation7 + $0x50] sm:$0xff]  }
 0x1ae   : > { %v2941_v1 = vsel %vm14849_vm5, %v2936_v7, %v2940_v8  ;;  %v3239_v46 = vsel %vm14843_vm4, %v3237_v14, %v3238_v31  ;;  %v4116_v36 = vadd.f32 %v15753_v42, %v15749_v33  ;;  %v12891_v55 = vpop.f32.mrb[47].mxu0  ;;  %v12955_v51 = vpop.f32.mrb[47].mxu1  ;;  %v16007_v41 = vadd.f32 %v12880_v10, %v15747_v29  ;;  %13273 = vmatprep.subr.bf16.mxu0 %v14202_v22  ;;  %v14204_v10 = vld [vmem:[#allocation7 + $0xc0] sm:$0xff]   ;;  %v17854_v22 = vld [vmem:[#allocation16_spill] sm:$0xff] }
 0x1af   : > { %v2951_v2 = vsel %vm14849_vm5, %v2946_v38, %v2950_v37  ;;  %13873 = vmatprep.mubr.bf16.mxu1 %v12132_v13  ;;  %v12133_v18 = vcombine.low %v3236_v61, %v3239_v46  ;;  %v12883_v8 = vadd.f32 %v12882_v63, %v12881_v27  ;;  %v12957_v47 = vpop.f32.mrb[48].mxu1  ;;  %v16009_v7 = vadd.f32 %v12946_v45, %v12945_v40  ;;  %v14203_v45 = vld [vmem:[#allocation7 + $0x10] sm:$0xff]  }
 0x1b0   : > { %v12893_v57 = vpop.f32.mrb[48].mxu0  ;;  %v12053_v31 = vcombine.low %v2941_v1, %v2951_v2  ;;  %v4119_v4 = vadd.f32 %v15763_v56, %v15757_v50  ;;  %v12886_v33 = vadd.f32 %v12885_v17, %v12884_v25  ;;  %v12958_v15 = vpop.f32.mrb[49].mxu1  ;;  %v16015_v61 = vadd.f32 %v12949_v32, %v12948_v9  ;;  %13333 = vmatprep.subr.bf16.mxu1 %v14204_v10 }
 0x1b1   : > { %v12894_v42 = vpop.f32.mrb[49].mxu0  ;;  %13874 = vmatmul.mubr.bf16.gmra.mrb[140].mxu1 %v12133_v18  ;;  %v16013_v37 = vadd.f32 %v12883_v8, %v4116_v36  ;;  %v4124_v29 = vadd.f32 %v15791_v59, %v15782_v43  ;;  %v12889_v27 = vadd.f32 %v12888_v30, %v12887_v6  ;;  %v12960_v40 = vpop.f32.mrb[50].mxu1  ;;  %v16021_v50 = vadd.f32 %v12952_v54, %v12951_v26  ;;  %v376_v18 = vld [vmem:[#allocation3 + $0x18] sm:$0x1]  ;;  %v373_v8 = vld [vmem:[#allocation3 + $0xc] sm:$0x1] }
 0x1b2   : > { %v12896_v63 = vpop.f32.mrb[50].mxu0  ;;  %5811 = vmatprep.mubr.bf16.mxu0 %v12053_v31  ;;  %v16019_v14 = vadd.f32 %v12886_v33, %v4119_v4  ;;  %v4127_v56 = vadd.f32 %v15800_v3, %v15793_v60  ;;  %v12892_v25 = vadd.f32 %v12891_v55, %v12890_v0  ;;  %v12961_v38 = vpop.f32.mrb[51].mxu1  ;;  %v16027_v32 = vadd.f32 %v12955_v51, %v12954_v16  ;;  %v14205_v0 = vld [vmem:[#allocation7 + $0x80] sm:$0xff]  }
 0x1b3   : > { %v12897_v17 = vpop.f32.mrb[51].mxu0  ;;  %5812 = vmatmul.mubr.bf16.gmra.mrb[140].mxu0 %v14197_v21  ;;  %v16025_v9 = vadd.f32 %v12889_v27, %v4124_v29  ;;  %v4132_v43 = vadd.f32 %v15826_v12, %v15819_v5  ;;  %v12895_v59 = vadd.f32 %v12894_v42, %v12893_v57  ;;  %v16033_v26 = vadd.f32 %v12958_v15, %v12957_v47  ;;  %v17852_v15 = vld [vmem:[#allocation14_spill] sm:$0xff]  ;;  %v17855_v29 = vld [vmem:[#allocation17_spill] sm:$0xff] }
 0x1b4   : > { %v16031_v13 = vadd.f32 %v12892_v25, %v4127_v56  ;;  %v4135_v60 = vadd.f32 %v15837_v20, %v15835_v19  ;;  %v12898_v3 = vadd.f32 %v12897_v17, %v12896_v63  ;;  %v16039_v11 = vadd.f32 %v12961_v38, %v12960_v40  ;;  %13274 = vmatpush3.bf16.msra.mxu0 %v14203_v45  ;;  %v14206_v63 = vld [vmem:[#allocation7 + $0xc8] sm:$0xff]  }
 0x1b5   : > { %v16037_v16 = vadd.f32 %v12895_v59, %v4132_v43  ;;  %v4140_v5 = vadd.f32 %v15863_v35, %v15854_v24  ;;  %v4143_v20 = vadd.f32 %v15869_v39, %v15867_v28  ;;  %v4148_v2 = vadd.f32 %v15898_v62, %v15890_v53  ;;  %13334 = vmatpush3.bf16.msra.mxu1 %v14205_v0  ;;  %v432_v28 = vld [vmem:[#allocation3 + $0x20] sm:$0x1]  ;;  %v429_v39 = vld [vmem:[#allocation3 + $0x14] sm:$0x1] }
 0x1b6   : > { %v16043_v36 = vadd.f32 %v12898_v3, %v4135_v60  ;;  %v4151_v4 = vadd.f32 %v15907_v44, %v15900_v58  ;;  %v17853_v53 = vld [vmem:[#allocation15_spill] sm:$0xff]  ;;  %v16061_v27 = vadd.f32 %v17855_v29, %v17854_v22  ;;  %v377_v43 = vsel %vm16066_vm8, 0, %v376_v18  ;;  %13335 = vmatprep.subr.bf16.mxu1 %v14206_v63  ;;  %v14207_v60 = vld [vmem:[#allocation7 + $0x58] sm:$0xff]  }
 0x1b7   : > { %v4156_v62 = vadd.f32 %v17853_v53, %v17852_v15  ;;  %378 = vst [vmem:[#allocation3 + $0x18] sm:$0x1] %v377_v43  ;;  %13275 = vmatprep.subr.bf16.mxu0 %v14207_v60  ;;  %v16112_v15 = vadd.f32 %v16027_v32, %v16031_v13  ;;  %v16116_v53 = vadd.f32 %v16015_v61, %v16019_v14 }
 0x1b8   : > { %v12963_v30 = vpop.f32.mrb[52].mxu1 }
 0x1b9   : > { %v12964_v21 = vpop.f32.mrb[53].mxu1 }
 0x1ba   : > { %v12899_v6 = vpop.f32.mrb[52].mxu0  ;;  %v12966_v46 = vpop.f32.mrb[54].mxu1  ;;  %v16045_v19 = vadd.f32 %v12964_v21, %v12963_v30  ;;  %v374_v30 = vsel %vm16066_vm8, 0, %v373_v8 }
 0x1bb   : > { %v12900_v54 = vpop.f32.mrb[53].mxu0  ;;  %v12967_v51 = vpop.f32.mrb[55].mxu1  ;;  %375 = vst [vmem:[#allocation3 + $0xc] sm:$0x1] %v374_v30 }
 0x1bc   : > { %v12901_v12 = vadd.f32 %v12900_v54, %v12899_v6  ;;  %v12902_v1 = vpop.f32.mrb[54].mxu0  ;;  %v16053_v57 = vadd.f32 %v12967_v51, %v12966_v46  ;;  %v4302_v6 = vadd.f32 %v15985_v34, %v15993_v52  ;;  %v433_v34 = vsel %vm16073_vm10, 0, %v432_v28  ;;  %v17863_v28 = vld [vmem:[#allocation20_spill] sm:$0xff] }
 0x1bd   : > { %v12903_v55 = vpop.f32.mrb[55].mxu0  ;;  %v4305_v52 = vadd.f32 %v16000_v23, %v16007_v41  ;;  %434 = vst [vmem:[#allocation3 + $0x20] sm:$0x1] %v433_v34  ;;  %v14208_v41 = vld [vmem:[#allocation7 + $0x88] sm:$0xff]   ;;  %v438_v34 = vld [vmem:[#allocation3 + $0x38] sm:$0x1] }
 0x1be   : > { %v16051_v24 = vadd.f32 %v12901_v12, %v4140_v5  ;;  %v12904_v35 = vadd.f32 %v12903_v55, %v12902_v1  ;;  %v17860_v5 = vld [vmem:[#allocation19_spill] sm:$0xff]  ;;  %v17861_v12 = vld [vmem:[#allocation18_spill] sm:$0xff]  ;;  %v430_v55 = vsel %vm16073_vm10, 0, %v429_v39  ;;  %13336 = vmatpush3.bf16.msra.mxu1 %v14208_v41 }
 0x1bf   : > { %v4294_v1 = vadd.f32 %v17861_v12, %v17860_v5  ;;  %431 = vst [vmem:[#allocation3 + $0x14] sm:$0x1] %v430_v55 }
 0x1c0   : > { %v4240_v40 = vadd.f32 %v12904_v35, %v4143_v20  ;;  %v16125_v32 = vadd.f32 %v16045_v19, %v16051_v24 }
 0x1c1   : > { %v12969_v31 = vpop.f32.mrb[56].mxu1 }
 0x1c2   : > { %v12970_v42 = vpop.f32.mrb[57].mxu1 }
 0x1c3   : > { %v16063_v56 = vadd.f32 %v12970_v42, %v12969_v31  ;;  %v12972_v44 = vpop.f32.mrb[58].mxu1  ;;  %v17862_v31 = vld [vmem:[#allocation21_spill] sm:$0xff]  ;;  %v16108_v42 = vadd.f32 %v16009_v7, %v16013_v37 }
 0x1c4   : > { %v12905_v47 = vpop.f32.mrb[56].mxu0  ;;  %v12973_v38 = vpop.f32.mrb[59].mxu1  ;;  %v4297_v23 = vadd.f32 %v17863_v28, %v17862_v31  ;;  %v14209_v7 = vld [vmem:[#allocation7 + $0x18] sm:$0xff]  }
 0x1c5   : > { %v12906_v33 = vpop.f32.mrb[57].mxu0  ;;  %v16083_v21 = vadd.f32 %v12973_v38, %v12972_v44  ;;  %v382_v37 = vld [vmem:[#allocation3 + $0x30] sm:$0x1]  ;;  %v14211_v44 = vld [vmem:[#allocation7 + $0x90] sm:$0xff]   ;;  %v16134_v38 = vadd.f32 %v16053_v57, %v4240_v40  ;;  %13276 = vmatpush3.bf16.msra.mxu0 %v14209_v7  ;;  %v16142_v57 = vadd.f32 %v16039_v11, %v16043_v36  ;;  %v14215_v7 = vld [vmem:[#allocation7 + $0x20] sm:$0xff]  }
 0x1c6   : > { %v12907_v45 = vadd.f32 %v12906_v33, %v12905_v47  ;;  %v12908_v58 = vpop.f32.mrb[58].mxu0  ;;  %v16098_v47 = vld [vmem:[%s17817_s3] ss:$0 sm:$0xff] }
 0x1c7   : > { %v12909_v17 = vpop.f32.mrb[59].mxu0 }
 0x1c8   : > { %v16081_v3 = vadd.f32 %v12907_v45, %v4148_v2  ;;  %v12910_v54 = vadd.f32 %v12909_v17, %v12908_v58  ;;  %v14210_v58 = vld [vmem:[#allocation7 + $0xd0] sm:$0xff]   ;;  %v16131_v17 = vadd.f32 %v16033_v26, %v16037_v16 }
 0x1c9   : > { %13337 = vmatprep.subr.bf16.mxu1 %v14210_v58 }
 0x1ca   : > { %v16093_v51 = vadd.f32 %v12910_v54, %v4151_v4  ;;  %v16104_v4 = vadd.f32 %v16021_v50, %v16025_v9  ;;  %v16121_v50 = vld [vmem:[%s17818_s4] ss:$0 sm:$0xff]  ;;  %13338 = vmatpush3.bf16.msra.mxu1 %v14211_v44  ;;  %v16155_v11 = vadd.f32 %v16063_v56, %v16081_v3 }
 0x1cc   : > { %v12975_v0 = vpop.f32.mrb[60].mxu1 }
 0x1cd   : > { %v12976_v20 = vpop.f32.mrb[61].mxu1 }
 0x1ce   : > { %v12911_v10 = vpop.f32.mrb[60].mxu0  ;;  %v12977_v18 = vadd.f32 %v12976_v20, %v12975_v0  ;;  %v12978_v35 = vpop.f32.mrb[62].mxu1 }
 0x1cf   : > { %v12912_v46 = vpop.f32.mrb[61].mxu0  ;;  %v12979_v39 = vpop.f32.mrb[63].mxu1 }
 0x1d0   : > { %v12913_v2 = vadd.f32 %v12912_v46, %v12911_v10  ;;  %v12914_v8 = vpop.f32.mrb[62].mxu0  ;;  %v12980_v63 = vadd.f32 %v12979_v39, %v12978_v35  ;;  %v16165_v35 = vadd.f32 %v16083_v21, %v16093_v51 }
 0x1d1   : > { %v12915_v33 = vpop.f32.mrb[63].mxu0 }
 0x1d2   : > { %v4253_v22 = vadd.f32 %v12913_v2, %v4156_v62  ;;  %v12916_v29 = vadd.f32 %v12915_v33, %v12914_v8  ;;  %v383_v62 = vsel %vm16066_vm8, 0, %v382_v37  ;;  %v439_v2 = vsel %vm16073_vm10, 0, %v438_v34  ;;  %v14213_v8 = vld [vmem:[#allocation7 + $0x60] sm:$0xff]  }
 0x1d3   : > { %384 = vst [vmem:[#allocation3 + $0x30] sm:$0x1] %v383_v62  ;;  %440 = vst [vmem:[#allocation3 + $0x38] sm:$0x1] %v439_v2  ;;  %13277 = vmatprep.subr.bf16.mxu0 %v14213_v8  ;;  %v14216_v62 = vld [vmem:[#allocation7 + $0xe0] sm:$0xff]  }
 0x1d4   : > { %v4256_v43 = vadd.f32 %v12916_v29, %v16061_v27  ;;  %v16144_v27 = vadd.f32 %v12977_v18, %v4253_v22  ;;  %v435_v18 = vld [vmem:[#allocation3 + $0x2c] sm:$0x1]  ;;  %13278 = vmatpush3.bf16.msra.mxu0 %v14215_v7 }
 0x1d5   : > { %v436_v3 = vsel %vm16073_vm10, 0, %v435_v18  ;;  %v4739_v18 = vld [vmem:[#allocation3 + $0x20] sm:$0x1] }
 0x1d6   : > { %v13831_v45 = vpop.f32.mrb[64].mxu0  ;;  %v13013_v9 = vpop.f32.mrb[64].mxu1  ;;  %v16157_v36 = vadd.f32 %v12980_v63, %v4256_v43  ;;  %437 = vst [vmem:[#allocation3 + $0x2c] sm:$0x1] %v436_v3 }
 0x1d7   : > { %v4399_v61 = vadd.f32 %v13831_v45, %v4302_v6  ;;  %v4390_v14 = vpop.f32.mrb[65].mxu0  ;;  %v13014_v13 = vpop.f32.mrb[65].mxu1  ;;  %v379_v6 = vld [vmem:[#allocation3 + $0x24] sm:$0x1] }
 0x1d8   : > { %v4391_v30 = vadd.f32 %v4390_v14, %v4294_v1  ;;  %v16137_v60 = vadd.f32 %v13014_v13, %v13013_v9  ;;  %v13832_v19 = vpop.f32.mrb[66].mxu0  ;;  %v13016_v24 = vpop.f32.mrb[66].mxu1  ;;  %v380_v12 = vsel %vm16066_vm8, 0, %v379_v6  ;;  %v14212_v1 = vld [vmem:[#allocation7 + $0xd8] sm:$0xff]   ;;  %v4735_v6 = vld [vmem:[#allocation3 + $0x18] sm:$0xf] }
 0x1d9   : > { %v4462_v54 = vmul.f32 %v16098_v47, %v4399_v61  ;;  %v4402_v10 = vadd.f32 %v13832_v19, %v4305_v52  ;;  %v4393_v26 = vpop.f32.mrb[67].mxu0  ;;  %v13017_v16 = vpop.f32.mrb[67].mxu1  ;;  %381 = vst [vmem:[#allocation3 + $0x24] sm:$0x1] %v380_v12  ;;  %13339 = vmatprep.subr.bf16.mxu1 %v14212_v1  ;;  %v14214_v9 = vld [vmem:[#allocation7 + $0x98] sm:$0xff]  }
 0x1da   : > { %v4460_v40 = vmul.f32 %v16098_v47, %v4391_v30  ;;  %v4394_v0 = vadd.f32 %v4393_v26, %v4297_v23  ;;  %v16147_v5 = vadd.f32 %v13017_v16, %v13016_v24  ;;  %13340 = vmatpush3.bf16.msra.mxu1 %v14214_v9  ;;  %v4728_v12 = vld [vmem:[#allocation3 + $0xc] sm:$0xf] }
 0x1db   : > { %v4485_v46 = vadd.f32 %v16121_v50, %v4462_v54  ;;  %v4463_v20 = vmul.f32 %v16098_v47, %v4402_v10  ;;  %13341 = vmatprep.subr.bf16.mxu1 %v14216_v62 }
 0x1dc   : > { %v4483_v52 = vadd.f32 %v16121_v50, %v4460_v40  ;;  %v4461_v55 = vmul.f32 %v16098_v47, %v4394_v0 }
 0x1dd   : > { %v4501_v31 = vmax.f32 %v4485_v46, 0.0  ;;  %v4486_v56 = vadd.f32 %v16121_v50, %v4463_v20 }
 0x1de   : > { %v4499_v28 = vmax.f32 %v4483_v52, 0.0  ;;  %v4484_v23 = vadd.f32 %v16121_v50, %v4461_v55  ;;  %v13835_v41 = vpop.f32.mrb[68].mxu0  ;;  %v16178_v30 = vpop.f32.mrb[68].mxu1 }
 0x1df   : > { %v12694_v33 = vpack.c.bf16 %v4501_v31, %v4501_v31  ;;  %v4502_v39 = vmax.f32 %v4486_v56, 0.0  ;;  %v4415_v22 = vadd.f32 %v13835_v41, %v16104_v4  ;;  %v4406_v21 = vpop.f32.mrb[69].mxu0  ;;  %v13020_v16 = vpop.f32.mrb[69].mxu1 }
 0x1e0   : > { %v12692_v51 = vpack.c.bf16 %v4499_v28, %v4499_v28  ;;  %v4500_v29 = vmax.f32 %v4484_v23, 0.0  ;;  %v4407_v63 = vadd.f32 %v4406_v21, %v16108_v42  ;;  %v16173_v45 = vpop.f32.mrb[70].mxu0  ;;  %v14217_v42 = vld [vmem:[#allocation7 + $0xa0] sm:$0xff]   ;;  %v13022_v34 = vpop.f32.mrb[70].mxu1 }
 0x1e1   : > { %v4583_v37 = vshrl.u32 %v12694_v33, 16  ;;  %v4586_v58 = vshll.u32 %v12694_v33, 16  ;;  %v12695_v61 = vpack.c.bf16 %v4502_v39, %v4502_v39  ;;  %v4466_v14 = vmul.f32 %v16098_v47, %v4415_v22  ;;  %v16176_v13 = vpop.f32.mrb[71].mxu0  ;;  %v13023_v31 = vpop.f32.mrb[71].mxu1  ;;  %13342 = vmatpush3.bf16.msra.mxu1 %v14217_v42  ;;  %v14218_v33 = vld [vmem:[#allocation7 + $0xe8] sm:$0xff]  }
 0x1e2   : > { %v4566_v44 = vshrl.u32 %v12692_v51, 16  ;;  %v4569_v43 = vshll.u32 %v12692_v51, 16  ;;  %v12693_v4 = vpack.c.bf16 %v4500_v29, %v4500_v29  ;;  %v4464_v19 = vmul.f32 %v16098_v47, %v4407_v63  ;;  %v4732_v51 = vld [vmem:[#allocation3 + $0x14] sm:$0x1]  ;;  %v14219_v63 = vld [vmem:[#allocation7 + $0x68] sm:$0xff]   ;;  %13343 = vmatprep.subr.bf16.mxu1 %v14218_v33 }
 0x1e3   : > { %v4585_v24 = vrot.slane %v4583_v37, 7  ;;  %v4591_v54 = vshrl.u32 %v12695_v61, 16  ;;  %v4594_v10 = vshll.u32 %v12695_v61, 16  ;;  %v4489_v26 = vadd.f32 %v16121_v50, %v4466_v14  ;;  %v14220_v61 = vld [vmem:[#allocation7 + $0xa8] sm:$0xff]   ;;  %13279 = vmatprep.subr.bf16.mxu0 %v14219_v63 }
 0x1e4   : > { %v4568_v0 = vrot.slane %v4566_v44, 7  ;;  %v4574_v1 = vshrl.u32 %v12693_v4, 16  ;;  %v4577_v46 = vshll.u32 %v12693_v4, 16  ;;  %v4487_v20 = vadd.f32 %v16121_v50, %v4464_v19  ;;  %v388_v4 = vld [vmem:[#allocation3 + $0x48] sm:$0x1] }
 0x1e5   : > { %v4588_v52 = vor.u32 %v4586_v58, %v4585_v24  ;;  %v4589_v55 = vrot.slane %v4585_v24, 4  ;;  %v4593_v2 = vrot.slane %v4591_v54, 7  ;;  %v4505_v8 = vmax.f32 %v4489_v26, 0.0  ;;  %v385_v19 = vld [vmem:[#allocation3 + $0x3c] sm:$0x1]  ;;  %13344 = vmatpush3.bf16.msra.mxu1 %v14220_v61 }
 0x1e6   : > { %v4571_v56 = vor.u32 %v4569_v43, %v4568_v0  ;;  %v4572_v3 = vrot.slane %v4568_v0, 4  ;;  %v4576_v23 = vrot.slane %v4574_v1, 7  ;;  %v4503_v41 = vmax.f32 %v4487_v20, 0.0  ;;  %v13839_v26 = vpop.f32.mrb[72].mxu0  ;;  %v14221_v0 = vld [vmem:[#allocation7 + $0x28] sm:$0xff]  }
 0x1e7   : > { %v4736_v39 = vsel %vm16184_vm13, %v4588_v52, %v4735_v6  ;;  %v4596_v22 = vor.u32 %v4594_v10, %v4593_v2  ;;  %v4598_v21 = vrot.slane %v4593_v2, 4  ;;  %v12698_v29 = vpack.c.bf16 %v4505_v8, %v4505_v8  ;;  %v4749_v6 = vld [vmem:[#allocation3 + $0x30] sm:$0xf]  ;;  %v4742_v1 = vld [vmem:[#allocation3 + $0x24] sm:$0xf]  ;;  %13280 = vmatpush3.bf16.msra.mxu0 %v14221_v0  ;;  %v13025_v33 = vpop.f32.mrb[72].mxu1 }
 0x1e8   : > { %4737 = vst [vmem:[#allocation3 + $0x18] sm:$0xf] %v4736_v39  ;;  %v4729_v9 = vsel %vm16184_vm13, %v4571_v56, %v4728_v12  ;;  %v4579_v7 = vor.u32 %v4577_v46, %v4576_v23  ;;  %v4581_v37 = vrot.slane %v4576_v23, 4  ;;  %v12696_v58 = vpack.c.bf16 %v4503_v41, %v4503_v41  ;;  %v444_v2 = vld [vmem:[#allocation3 + $0x50] sm:$0x1] }
 0x1e9   : > { %4730 = vst [vmem:[#allocation3 + $0xc] sm:$0xf] %v4729_v9  ;;  %v4597_v14 = vsel %vm16191_vm14, %v4589_v55, %v4596_v22  ;;  %v4740_v62 = vsel %vm16066_vm8, %v4598_v21, %v4739_v18  ;;  %v4617_v44 = vshrl.u32 %v12698_v29, 16  ;;  %v4620_v43 = vshll.u32 %v12698_v29, 16  ;;  %v4422_v55 = vpop.f32.mrb[73].mxu0  ;;  %v14223_v22 = vld [vmem:[#allocation7 + $0x70] sm:$0xff]  }
 0x1ea   : > { %4738 = vst [vmem:[#allocation3 + $0x1c] sm:$0xf] %v4597_v14  ;;  %4741 = vst [vmem:[#allocation3 + $0x20] sm:$0x1] %v4740_v62  ;;  %v4580_v42 = vsel %vm16191_vm14, %v4572_v3, %v4579_v7  ;;  %v4733_v24 = vsel %vm16066_vm8, %v4581_v37, %v4732_v51  ;;  %v4600_v54 = vshrl.u32 %v12696_v58, 16  ;;  %v4603_v10 = vshll.u32 %v12696_v58, 16  ;;  %13281 = vmatprep.subr.bf16.mxu0 %v14223_v22 }
 0x1eb   : > { %4731 = vst [vmem:[#allocation3 + $0x10] sm:$0xf] %v4580_v42  ;;  %4734 = vst [vmem:[#allocation3 + $0x14] sm:$0x1] %v4733_v24  ;;  %v16207_v12 = vrot.slane %v4617_v44, 7  ;;  %v16210_v46 = vadd.f32 %v13020_v16, %v16178_v30  ;;  %v4418_v20 = vadd.f32 %v16173_v45, %v16112_v15  ;;  %v4410_v52 = vadd.f32 %v16176_v13, %v16116_v53  ;;  %v13840_v23 = vpop.f32.mrb[74].mxu0 }
 0x1ec   : > { %v16216_v18 = vrot.slane %v4600_v54, 7  ;;  %v16218_v8 = vadd.f32 %v13023_v31, %v13022_v34  ;;  %v389_v56 = vsel %vm16066_vm8, 0, %v388_v4  ;;  %v4431_v3 = vadd.f32 %v13839_v26, %v16125_v32  ;;  %v14222_v30 = vld [vmem:[#allocation7 + $0xf0] sm:$0xff]   ;;  %v441_v13 = vld [vmem:[#allocation3 + $0x44] sm:$0x1]  ;;  %v4425_v34 = vpop.f32.mrb[75].mxu0 }
 0x1ed   : > { %v4622_v16 = vor.u32 %v4620_v43, %v16207_v12  ;;  %v4623_v15 = vrot.slane %v16207_v12, 4  ;;  %v4467_v53 = vmul.f32 %v16098_v47, %v4418_v20  ;;  %v4465_v45 = vmul.f32 %v16098_v47, %v4410_v52  ;;  %390 = vst [vmem:[#allocation3 + $0x48] sm:$0x1] %v389_v56  ;;  %13345 = vmatprep.subr.bf16.mxu1 %v14222_v30  ;;  %v13026_v9 = vpop.f32.mrb[73].mxu1  ;;  %v394_v7 = vld [vmem:[#allocation3 + $0x60] sm:$0x1] }
 0x1ee   : > { %v4605_v31 = vor.u32 %v4603_v10, %v16216_v18  ;;  %v4606_v41 = vrot.slane %v16216_v18, 4  ;;  %v4470_v32 = vmul.f32 %v16098_v47, %v4431_v3  ;;  %v386_v39 = vsel %vm16066_vm8, 0, %v385_v19  ;;  %v14224_v37 = vld [vmem:[#allocation7 + $0xb0] sm:$0xff]   ;;  %v13028_v44 = vpop.f32.mrb[74].mxu1  ;;  %v391_v24 = vld [vmem:[#allocation3 + $0x54] sm:$0x1] }
 0x1ef   : > { %v4750_v21 = vsel %vm16184_vm13, %v4622_v16, %v4749_v6  ;;  %v4490_v51 = vadd.f32 %v16121_v50, %v4467_v53  ;;  %v4488_v29 = vadd.f32 %v16121_v50, %v4465_v45  ;;  %387 = vst [vmem:[#allocation3 + $0x3c] sm:$0x1] %v386_v39  ;;  %v4423_v63 = vadd.f32 %v4422_v55, %v16131_v17  ;;  %v13029_v42 = vpop.f32.mrb[75].mxu1  ;;  %v14225_v6 = vld [vmem:[#allocation7 + $0x30] sm:$0xff]   ;;  %v4753_v53 = vld [vmem:[#allocation3 + $0x38] sm:$0x1] }
 0x1f0   : > { %4751 = vst [vmem:[#allocation3 + $0x30] sm:$0xf] %v4750_v21  ;;  %v4743_v58 = vsel %vm16184_vm13, %v4605_v31, %v4742_v1  ;;  %v4493_v61 = vadd.f32 %v16121_v50, %v4470_v32  ;;  %v16240_v14 = vadd.f32 %v13026_v9, %v13025_v33  ;;  %v445_v62 = vsel %vm16073_vm10, 0, %v444_v2  ;;  %13346 = vmatpush3.bf16.msra.mxu1 %v14224_v37  ;;  %v13843_v32 = vpop.f32.mrb[76].mxu0  ;;  %v4746_v22 = vld [vmem:[#allocation3 + $0x2c] sm:$0x1] }
 0x1f1   : > { %4744 = vst [vmem:[#allocation3 + $0x24] sm:$0xf] %v4743_v58  ;;  %v4506_v43 = vmax.f32 %v4490_v51, 0.0  ;;  %v4504_v4 = vmax.f32 %v4488_v29, 0.0  ;;  %v4468_v17 = vmul.f32 %v16098_v47, %v4423_v63  ;;  %446 = vst [vmem:[#allocation3 + $0x50] sm:$0x1] %v445_v62  ;;  %v4434_v19 = vadd.f32 %v13840_v23, %v16134_v38  ;;  %13282 = vmatpush3.bf16.msra.mxu0 %v14225_v6 }
 0x1f2   : > { %v4509_v54 = vmax.f32 %v4493_v61, 0.0  ;;  %v442_v10 = vsel %vm16073_vm10, 0, %v441_v13  ;;  %v4426_v26 = vadd.f32 %v4425_v34, %v16142_v57  ;;  %v16249_v0 = vadd.f32 %v13029_v42, %v13028_v44  ;;  %v4438_v29 = vpop.f32.mrb[77].mxu0  ;;  %v14226_v63 = vld [vmem:[#allocation7 + $0xf8] sm:$0xff]  }
 0x1f3   : > { %v12699_v1 = vpack.c.bf16 %v4506_v43, %v4506_v43  ;;  %v12697_v20 = vpack.c.bf16 %v4504_v4, %v4504_v4  ;;  %v4491_v52 = vadd.f32 %v16121_v50, %v4468_v17  ;;  %v4471_v55 = vmul.f32 %v16098_v47, %v4434_v19  ;;  %443 = vst [vmem:[#allocation3 + $0x44] sm:$0x1] %v442_v10  ;;  %v13844_v62 = vpop.f32.mrb[78].mxu0  ;;  %v14227_v44 = vld [vmem:[#allocation7 + $0x78] sm:$0xff]  }
 0x1f4   : > { %v12702_v38 = vpack.c.bf16 %v4509_v54, %v4509_v54  ;;  %v4469_v2 = vmul.f32 %v16098_v47, %v4426_v26  ;;  %v395_v56 = vsel %vm16066_vm8, 0, %v394_v7  ;;  %v392_v3 = vsel %vm16066_vm8, 0, %v391_v24  ;;  %v4763_v7 = vld [vmem:[#allocation3 + $0x48] sm:$0xf]  ;;  %v4441_v42 = vpop.f32.mrb[79].mxu0  ;;  %13347 = vmatprep.subr.bf16.mxu1 %v14226_v63  ;;  %v14228_v24 = vld [vmem:[#allocation7 + $0xb8] sm:$0xff]   ;;  %13283 = vmatprep.subr.bf16.mxu0 %v14227_v44 }
 0x1f5   : > { %v4625_v57 = vshrl.u32 %v12699_v1, 16  ;;  %v4628_v23 = vshll.u32 %v12699_v1, 16  ;;  %v4608_v30 = vshrl.u32 %v12697_v20, 16  ;;  %v4611_v16 = vshll.u32 %v12697_v20, 16  ;;  %396 = vst [vmem:[#allocation3 + $0x60] sm:$0x1] %v395_v56  ;;  %13348 = vmatpush3.bf16.msra.mxu1 %v14228_v24 }
 0x1f6   : > { %393 = vst [vmem:[#allocation3 + $0x54] sm:$0x1] %v392_v3  ;;  %v4651_v45 = vshrl.u32 %v12702_v38, 16  ;;  %v4654_v13 = vshll.u32 %v12702_v38, 16  ;;  %v4507_v34 = vmax.f32 %v4491_v52, 0.0  ;;  %v4494_v31 = vadd.f32 %v16121_v50, %v4471_v55  ;;  %v13031_v26 = vpop.f32.mrb[76].mxu1 }
 0x1f7   : > { %v4627_v33 = vrot.slane %v4625_v57, 7  ;;  %v4610_v39 = vrot.slane %v4608_v30, 7  ;;  %v4492_v21 = vadd.f32 %v16121_v50, %v4469_v2  ;;  %v4447_v51 = vadd.f32 %v13843_v32, %v16144_v27  ;;  %v450_v1 = vld [vmem:[#allocation3 + $0x68] sm:$0x1]  ;;  %v13032_v38 = vpop.f32.mrb[77].mxu1  ;;  %v14229_v2 = vld [vmem:[#allocation7 + $0x38] sm:$0xff]  }
 0x1f8   : > { %v16261_v9 = vrot.slane %v4651_v45, 7  ;;  %v12700_v37 = vpack.c.bf16 %v4507_v34, %v4507_v34  ;;  %v4510_v58 = vmax.f32 %v4494_v31, 0.0  ;;  %v4439_v61 = vadd.f32 %v4438_v29, %v16155_v11  ;;  %v4756_v56 = vld [vmem:[#allocation3 + $0x3c] sm:$0xf]  ;;  %13284 = vmatpush3.bf16.msra.mxu0 %v14229_v2 }
 0x1f9   : > { %v4630_v43 = vor.u32 %v4628_v23, %v4627_v33  ;;  %v4632_v4 = vrot.slane %v4627_v33, 4  ;;  %v4613_v17 = vor.u32 %v4611_v16, %v4610_v39  ;;  %v4615_v19 = vrot.slane %v4610_v39, 4  ;;  %v447_v57 = vld [vmem:[#allocation3 + $0x5c] sm:$0x1]  ;;  %v4767_v33 = vld [vmem:[#allocation3 + $0x50] sm:$0x1] }
 0x1fa   : > { %v4656_v27 = vor.u32 %v4654_v13, %v16261_v9  ;;  %v4657_v6 = vrot.slane %v16261_v9, 4  ;;  %v4634_v54 = vshrl.u32 %v12700_v37, 16  ;;  %v4637_v10 = vshll.u32 %v12700_v37, 16 }
 0x1fb   : > { %v4631_v11 = vsel %vm16191_vm14, %v4623_v15, %v4630_v43  ;;  %v4754_v20 = vsel %vm16066_vm8, %v4632_v4, %v4753_v53  ;;  %v4614_v52 = vsel %vm16191_vm14, %v4606_v41, %v4613_v17  ;;  %v4747_v55 = vsel %vm16066_vm8, %v4615_v19, %v4746_v22  ;;  %v13034_v53 = vpop.f32.mrb[78].mxu1 }
 0x1fc   : > { %4752 = vst [vmem:[#allocation3 + $0x34] sm:$0xf] %v4631_v11  ;;  %4755 = vst [vmem:[#allocation3 + $0x38] sm:$0x1] %v4754_v20  ;;  %v4764_v12 = vsel %vm16184_vm13, %v4656_v27, %v4763_v7  ;;  %v16280_v15 = vrot.slane %v4634_v54, 7  ;;  %v12703_v18 = vpack.c.bf16 %v4510_v58, %v4510_v58  ;;  %v4508_v3 = vmax.f32 %v4492_v21, 0.0 }
 0x1fd   : > { %4745 = vst [vmem:[#allocation3 + $0x28] sm:$0xf] %v4614_v52  ;;  %4748 = vst [vmem:[#allocation3 + $0x2c] sm:$0x1] %v4747_v55  ;;  %v4474_v41 = vmul.f32 %v16098_v47, %v4447_v51  ;;  %v4472_v23 = vmul.f32 %v16098_v47, %v4439_v61  ;;  %v16284_v30 = vadd.f32 %v13032_v38, %v13031_v26  ;;  %v451_v16 = vsel %vm16073_vm10, 0, %v450_v1  ;;  %v13035_v32 = vpop.f32.mrb[79].mxu1 }
 0x1fe   : > { %4765 = vst [vmem:[#allocation3 + $0x48] sm:$0xf] %v4764_v12  ;;  %v4639_v45 = vor.u32 %v4637_v10, %v16280_v15  ;;  %v4640_v13 = vrot.slane %v16280_v15, 4  ;;  %v4659_v34 = vshrl.u32 %v12703_v18, 16  ;;  %v4662_v31 = vshll.u32 %v12703_v18, 16  ;;  %v14230_v58 = vld [vmem:[#allocation3 + $0xc] sm:$0xff]  }
 0x1ff   : > { %452 = vst [vmem:[#allocation3 + $0x68] sm:$0x1] %v451_v16  ;;  %v12701_v39 = vpack.c.bf16 %v4508_v3, %v4508_v3  ;;  %v4497_v22 = vadd.f32 %v16121_v50, %v4474_v41  ;;  %v4495_v21 = vadd.f32 %v16121_v50, %v4472_v23  ;;  %v4450_v51 = vadd.f32 %v13844_v62, %v16157_v36  ;;  %v4760_v1 = vld [vmem:[#allocation3 + $0x44] sm:$0x1]  ;;  %v13037_v20 = vpop.f32.mrb[80].mxu1 }
 0x200   : > { %v4757_v29 = vsel %vm16184_vm13, %v4639_v45, %v4756_v56  ;;  %v4661_v63 = vrot.slane %v4659_v34, 7  ;;  %v448_v7 = vsel %vm16073_vm10, 0, %v447_v57  ;;  %v4442_v37 = vadd.f32 %v4441_v42, %v16165_v35  ;;  %9854 = vmatprep.mubr.bf16.mxu1 %v14230_v58  ;;  %v13077_v35 = vpop.f32.mrb[80].mxu0  ;;  %v13038_v9 = vpop.f32.mrb[81].mxu1  ;;  %v4777_v15 = vld [vmem:[#allocation3 + $0x60] sm:$0xf] }
 0x201   : > { %4758 = vst [vmem:[#allocation3 + $0x3c] sm:$0xf] %v4757_v29  ;;  %v4642_v61 = vshrl.u32 %v12701_v39, 16  ;;  %v4645_v44 = vshll.u32 %v12701_v39, 16  ;;  %v4513_v43 = vmax.f32 %v4497_v22, 0.0  ;;  %v4511_v4 = vmax.f32 %v4495_v21, 0.0 }
 0x202   : > { %449 = vst [vmem:[#allocation3 + $0x5c] sm:$0x1] %v448_v7  ;;  %v4664_v17 = vor.u32 %v4662_v31, %v4661_v63  ;;  %v4666_v19 = vrot.slane %v4661_v63, 4  ;;  %v4475_v36 = vmul.f32 %v16098_v47, %v4450_v51  ;;  %v4473_v62 = vmul.f32 %v16098_v47, %v4442_v37  ;;  %v13078_v52 = vpop.f32.mrb[81].mxu0  ;;  %v13040_v57 = vpop.f32.mrb[82].mxu1  ;;  %v14235_v37 = vld [vmem:[#allocation7 + $0x140] sm:$0xff]  }
 0x203   : > { %v4644_v24 = vrot.slane %v4642_v61, 7  ;;  %v12706_v27 = vpack.c.bf16 %v4513_v43, %v4513_v43  ;;  %v12704_v54 = vpack.c.bf16 %v4511_v4, %v4511_v4  ;;  %v16300_v10 = vadd.f32 %v13035_v32, %v13034_v53  ;;  %v13080_v41 = vpop.f32.mrb[82].mxu0  ;;  %v4770_v53 = vld [vmem:[#allocation3 + $0x54] sm:$0xf]  ;;  %v13041_v45 = vpop.f32.mrb[83].mxu1  ;;  %13397 = vmatprep.subr.bf16.mxu0 %v14235_v37 }
 0x204   : > { %v4665_v42 = vsel %vm16191_vm14, %v4657_v6, %v4664_v17  ;;  %v4768_v26 = vsel %vm16066_vm8, %v4666_v19, %v4767_v33  ;;  %v4498_v11 = vadd.f32 %v16121_v50, %v4475_v36  ;;  %v4496_v47 = vadd.f32 %v16121_v50, %v4473_v62  ;;  %v13081_v34 = vpop.f32.mrb[83].mxu0  ;;  %v6391_v31 = vld [vmem:[#allocation3 + $0xc] sm:$0xf]  ;;  %v16320_v21 = vld [vmem:[#allocation3 + $0x10] sm:$0xf] }
 0x205   : > { %4766 = vst [vmem:[#allocation3 + $0x4c] sm:$0xf] %v4665_v42  ;;  %4769 = vst [vmem:[#allocation3 + $0x50] sm:$0x1] %v4768_v26  ;;  %v4647_v55 = vor.u32 %v4645_v44, %v4644_v24  ;;  %v4649_v38 = vrot.slane %v4644_v24, 4  ;;  %v4685_v2 = vshrl.u32 %v12706_v27, 16  ;;  %v13079_v63 = vadd.f32 %v13078_v52, %v13077_v35 }
 0x206   : > { %v4688_v12 = vshll.u32 %v12706_v27, 16  ;;  %v4668_v56 = vshrl.u32 %v12704_v54, 16  ;;  %v4671_v6 = vshll.u32 %v12704_v54, 16  ;;  %v4514_v18 = vmax.f32 %v4498_v11, 0.0  ;;  %v16333_v62 = vpop.f32.mrb[84].mxu0  ;;  %v13043_v42 = vpop.f32.mrb[84].mxu1 }
 0x207   : > { %v4512_v3 = vmax.f32 %v4496_v47, 0.0  ;;  %v4648_v23 = vsel %vm16191_vm14, %v4640_v13, %v4647_v55  ;;  %v4761_v50 = vsel %vm16066_vm8, %v4649_v38, %v4760_v1  ;;  %v16314_v16 = vrot.slane %v4685_v2, 7  ;;  %v4781_v54 = vld [vmem:[#allocation3 + $0x68] sm:$0x1]  ;;  %v13084_v1 = vpop.f32.mrb[85].mxu0  ;;  %v13044_v52 = vpop.f32.mrb[85].mxu1 }
 0x208   : > { %4759 = vst [vmem:[#allocation3 + $0x40] sm:$0xf] %v4648_v23  ;;  %4762 = vst [vmem:[#allocation3 + $0x44] sm:$0x1] %v4761_v50  ;;  %v16316_v32 = vrot.slane %v4668_v56, 7  ;;  %v12707_v33 = vpack.c.bf16 %v4514_v18, %v4514_v18  ;;  %v14528_v22 = vmov 0   ;;  %v16318_v13 = vadd.f32 %v13038_v9, %v13037_v20 }
 0x209   : > { %v12705_v39 = vpack.c.bf16 %v4512_v3, %v4512_v3  ;;  %360 = vst [vmem:[#allocation3] sm:$0xf] %v14528_v22  ;;  %361 = vst [vmem:[#allocation3 + $0x4] sm:$0xf] %v14528_v22  ;;  %v4690_v51 = vor.u32 %v4688_v12, %v16314_v16  ;;  %v4691_v29 = vrot.slane %v16314_v16, 4  ;;  %v16324_v7 = vadd.f32 %v13041_v45, %v13040_v57  ;;  %v16339_v55 = vpop.f32.mrb[86].mxu0 }
 0x20a   : > { %362 = vst [vmem:[#allocation3 + $0x8] sm:$0x1] %v14528_v22  ;;  %364 = vst [vmem:[#allocation3 + $0xcc] sm:$0xf] %v14528_v22  ;;  %v4673_v58 = vor.u32 %v4671_v6, %v16316_v32  ;;  %v4674_v61 = vrot.slane %v16316_v32, 4  ;;  %v4693_v44 = vshrl.u32 %v12707_v33, 16  ;;  %v16331_v36 = vadd.f32 %v13079_v63, %v16137_v60 }
 0x20b   : > { %365 = vst [vmem:[#allocation3 + $0xd0] sm:$0xf] %v14528_v22  ;;  %366 = vst [vmem:[#allocation3 + $0xd4] sm:$0x1] %v14528_v22  ;;  %v4696_v43 = vshll.u32 %v12707_v33, 16  ;;  %v4778_v4 = vsel %vm16184_vm13, %v4690_v51, %v4777_v15  ;;  %v4676_v17 = vshrl.u32 %v12705_v39, 16  ;;  %v13082_v35 = vadd.f32 %v13081_v34, %v13080_v41 }
 0x20c   : > { %v4679_v19 = vshll.u32 %v12705_v39, 16  ;;  %4779 = vst [vmem:[#allocation3 + $0x60] sm:$0xf] %v4778_v4  ;;  %v4771_v24 = vsel %vm16184_vm13, %v4673_v58, %v4770_v53  ;;  %v4695_v27 = vrot.slane %v4693_v44, 7  ;;  %v6461_v26 = vshrl.u32 %v6391_v31, 16  ;;  %v13046_v6 = vpop.f32.mrb[86].mxu1 }
 0x20d   : > { %4772 = vst [vmem:[#allocation3 + $0x54] sm:$0xf] %v4771_v24  ;;  %v4678_v11 = vrot.slane %v4676_v17, 7  ;;  %v6464_v47 = vshll.u32 %v6391_v31, 16  ;;  %v6470_v20 = vshll.u32 %v16320_v21, 16  ;;  %v6474_v60 = vshrl.u32 %v16320_v21, 16 }
 0x20e   : > { %v4698_v38 = vor.u32 %v4696_v43, %v4695_v27  ;;  %v4700_v2 = vrot.slane %v4695_v27, 4  ;;  %v4774_v12 = vld [vmem:[#allocation3 + $0x5c] sm:$0x1]  ;;  %v16342_v9 = vadd.f32 %v13082_v35, %v16147_v5  ;;  %v6393_v15 = vld [vmem:[#allocation3 + $0x14] sm:$0x1]  ;;  %v6463_v56 = vrot.slane %v6461_v26, 4 }
 0x20f   : > { %v13087_v18 = vpop.f32.mrb[87].mxu0  ;;  %v4681_v3 = vor.u32 %v4679_v19, %v4678_v11  ;;  %v4683_v57 = vrot.slane %v4678_v11, 4  ;;  %v6466_v50 = vrot.slane %v6464_v47, 5  ;;  %v16344_v16 = vadd.f32 %v13044_v52, %v13043_v42  ;;  %v6394_v63 = vld [vmem:[#allocation3 + $0x18] sm:$0xf] }
 0x210   : > { %v370_v41 = vld [vmem:[#allocation3] sm:$0x1]  ;;  %v4699_v53 = vsel %vm16191_vm14, %v4691_v29, %v4698_v38  ;;  %v4782_v45 = vsel %vm16066_vm8, %v4700_v2, %v4781_v54  ;;  %v6389_v31 = vld [vmem:[#allocation3 + $0x4] sm:$0xf]  ;;  %v6900_v32 = vld [vmem:[#allocation3] sm:$0xe] }
 0x211   : > { %v426_v23 = vld [vmem:[#allocation3 + $0x8] sm:$0x1]  ;;  %v371_v5 = vsel %vm16066_vm8, 0, %v370_v41  ;;  %4780 = vst [vmem:[#allocation3 + $0x64] sm:$0xf] %v4699_v53  ;;  %v4682_v33 = vsel %vm16191_vm14, %v4674_v61, %v4681_v3  ;;  %v4775_v39 = vsel %vm16066_vm8, %v4683_v57, %v4774_v12  ;;  %v6446_v22 = vshll.u32 %v6389_v31, 16 }
 0x212   : > { %v427_v34 = vsel %vm16073_vm10, 0, %v426_v23  ;;  %4783 = vst [vmem:[#allocation3 + $0x68] sm:$0x1] %v4782_v45  ;;  %372 = vst [vmem:[#allocation3] sm:$0x1] %v371_v5  ;;  %v6450_v21 = vshrl.u32 %v6389_v31, 16  ;;  %v6467_v44 = vor.u32 %v6466_v50, %v6463_v56 }
 0x213   : > { %428 = vst [vmem:[#allocation3 + $0x8] sm:$0x1] %v427_v34  ;;  %v6901_v51 = vld [vmem:[#allocation3 + $0x4] sm:$0xf]  ;;  %v16358_v29 = vld [vmem:[#allocation3 + $0x10] sm:$0xf] }
 0x214   : > { %4773 = vst [vmem:[#allocation3 + $0x58] sm:$0xf] %v4682_v33  ;;  %4776 = vst [vmem:[#allocation3 + $0x5c] sm:$0x1] %v4775_v39  ;;  %v12346_v37 = vrot.slane %v6900_v32, 9  ;;  %v6998_v58 = vrot.slane %v6901_v51, 5 }
 0x215   : > { %v16360_v43 = vrot.slane %v6470_v20, 5  ;;  %v16362_v4 = vld [vmem:[#allocation3 + $0xc] sm:$0xe]  ;;  %v13047_v61 = vpop.f32.mrb[87].mxu1  ;;  %v16364_v17 = vrot.slane %v6446_v22, 5  ;;  %v6452_v19 = vrot.slane %v6450_v21, 4 }
 0x216   : > { %v6476_v24 = vrot.slane %v6474_v60, 4  ;;  %v6480_v27 = vshll.u32 %v6393_v15, 16  ;;  %v16366_v54 = vld [vmem:[#allocation3 + $0x14] sm:$0x1]  ;;  %v13049_v35 = vpop.f32.mrb[88].mxu1  ;;  %v6999_v42 = vsel %vm14843_vm4, %v12346_v37, %v6998_v58  ;;  %v7000_v26 = vrot.slane %v6998_v58, 4 }
 0x217   : > { %v16370_v11 = vrot.slane %v6467_v44, 4  ;;  %v13089_v20 = vpop.f32.mrb[88].mxu0  ;;  %v13050_v52 = vpop.f32.mrb[89].mxu1  ;;  %v6453_v38 = vor.u32 %v6452_v19, %v16364_v17  ;;  %v7005_v2 = vrot.slane %v16358_v29, 5  ;;  %v13085_v60 = vadd.f32 %v13084_v1, %v16333_v62  ;;  %v6395_v5 = vld [vmem:[#allocation3 + $0x1c] sm:$0xf] }
 0x218   : > { %v6477_v47 = vor.u32 %v6476_v24, %v16360_v43  ;;  %v6485_v12 = vshrl.u32 %v6394_v63, 16  ;;  %v6482_v56 = vrot.slane %v6480_v27, 5  ;;  %v12347_v3 = vrot.slane %v16362_v4, 9  ;;  %v13090_v41 = vpop.f32.mrb[89].mxu0  ;;  %v16388_v22 = vld [vmem:[#allocation3 + $0x20] sm:$0x1] }
 0x219   : > { %v7008_v57 = vrot.slane %v16366_v54, 5  ;;  %v6388_v23 = vld [vmem:[#allocation3] sm:$0xf]  ;;  %v16381_v45 = vadd.f32 %v13085_v60, %v16210_v46  ;;  %v16383_v34 = vadd.f32 %v13047_v61, %v13046_v6  ;;  %v13088_v62 = vadd.f32 %v13087_v18, %v16339_v55  ;;  %v16392_v58 = vld [vmem:[#allocation3 + $0x1c] sm:$0xf] }
 0x21a   : > { %v16376_v15 = vrot.slane %v6477_v47, 4  ;;  %v6390_v50 = vld [vmem:[#allocation3 + $0x8] sm:$0x1]  ;;  %v16386_v1 = vadd.f32 %v13050_v52, %v13049_v35  ;;  %v6437_v31 = vshrl.u32 %v6388_v23, 16  ;;  %v6440_v32 = vshll.u32 %v6388_v23, 16  ;;  %v14232_v18 = vld [vmem:[#allocation3 + $0x18] sm:$0xff]  }
 0x21b   : > { %v6902_v53 = vld [vmem:[#allocation3 + $0x8] sm:$0x1]  ;;  %v6456_v33 = vshll.u32 %v6390_v50, 16  ;;  %v6454_v21 = vrot.slane %v6453_v38, 4  ;;  %v7007_v51 = vrot.slane %v7005_v2, 4  ;;  %v6487_v37 = vrot.slane %v6485_v12, 4 }
 0x21c   : > { %v7001_v39 = vrot.slane %v6902_v53, 5  ;;  %v6488_v46 = vshll.u32 %v6394_v63, 16  ;;  %v6439_v6 = vrot.slane %v6437_v31, 4  ;;  %v6442_v44 = vrot.slane %v6440_v32, 5  ;;  %v16396_v19 = vld [vmem:[#allocation3 + $0x18] sm:$0xe] }
 0x21d   : > { %v6458_v61 = vrot.slane %v6456_v33, 5  ;;  %v14239_v24 = vld [vmem:[#allocation7 + $0x1c0] sm:$0xff]   ;;  %v13052_v35 = vpop.f32.mrb[90].mxu1  ;;  %v6483_v63 = vsel %vm14849_vm5, %v16376_v15, %v6482_v56  ;;  %v6494_v52 = vshll.u32 %v6395_v5, 16  ;;  %v6498_v38 = vshrl.u32 %v6395_v5, 16  ;;  %v13092_v50 = vpop.f32.mrb[90].mxu0 }
 0x21e   : > { %v7002_v55 = vsel %vm14843_vm4, %v7000_v26, %v7001_v39  ;;  %v6490_v54 = vrot.slane %v6488_v46, 5  ;;  %v6443_v47 = vor.u32 %v6442_v44, %v6439_v6  ;;  %13461 = vmatprep.subr.bf16.mxu1 %v14239_v24  ;;  %v6504_v12 = vshll.u32 %v16388_v22, 16  ;;  %v14240_v53 = vld [vmem:[#allocation7 + $0x180] sm:$0xff]   ;;  %v14231_v32 = vld [vmem:[#allocation3] sm:$0xff]   ;;  %v13053_v46 = vpop.f32.mrb[91].mxu1 }
 0x21f   : > { %v12362_v27 = vcombine.low %v6999_v42, %v7002_v55  ;;  %v6459_v60 = vsel %vm14849_vm5, %v6454_v21, %v6458_v61  ;;  %v16405_v23 = vadd.f32 %v13088_v62, %v16218_v8  ;;  %v6908_v42 = vld [vmem:[#allocation3 + $0x20] sm:$0x1]  ;;  %v16407_v15 = vrot.slane %v6494_v52, 5  ;;  %v6397_v33 = vld [vmem:[#allocation3 + $0x24] sm:$0xf] }
 0x220   : > { %v6491_v26 = vor.u32 %v6490_v54, %v6487_v37  ;;  %v6444_v31 = vrot.slane %v6443_v47, 4  ;;  %v6500_v56 = vrot.slane %v6498_v38, 4  ;;  %v7012_v5 = vrot.slane %v16392_v58, 5  ;;  %v6398_v21 = vld [vmem:[#allocation3 + $0x28] sm:$0xf]  ;;  %v14241_v54 = vld [vmem:[#allocation7 + $0x148] sm:$0xff]  }
 0x221   : > { %9855 = vmatmul.mubr.bf16.vlgmr.msra.gmra.mrb[144].mxu1 %v12362_v27  ;;  %v6473_v39 = vsel %vm14849_vm5, %v16370_v11, %v16360_v43  ;;  %v7009_v8 = vsel %vm14843_vm4, %v7007_v51, %v7008_v57  ;;  %v12348_v62 = vrot.slane %v16396_v19, 9  ;;  %v13091_v22 = vadd.f32 %v13090_v41, %v13089_v20  ;;  %v6399_v37 = vld [vmem:[#allocation3 + $0x2c] sm:$0x1]  ;;  %v14236_v43 = vld [vmem:[#allocation7 + $0x100] sm:$0xff]   ;;  %v13093_v11 = vpop.f32.mrb[91].mxu0  ;;  %v13055_v38 = vpop.f32.mrb[92].mxu1 }
 0x222   : > { %9862 = vmatprep.mubr.bf16.mxu1 %v14232_v18  ;;  %13462 = vmatpush3.bf16.msra.mxu1 %v14240_v53  ;;  %v6449_v6 = vsel %vm14849_vm5, %v6444_v31, %v16364_v17  ;;  %v12331_v44 = vcombine.low %v6473_v39, %v6483_v63  ;;  %v16420_v61 = vrot.slane %v6491_v26, 4  ;;  %v6501_v55 = vor.u32 %v6500_v56, %v16407_v15  ;;  %v6910_v39 = vld [vmem:[#allocation3 + $0x28] sm:$0xf]  ;;  %v14246_v58 = vld [vmem:[#allocation7 + $0x188] sm:$0xff]  }
 0x223   : > { %v12330_v18 = vcombine.low %v6449_v6, %v6459_v60  ;;  %v7015_v57 = vrot.slane %v6908_v42, 5  ;;  %v16424_v51 = vadd.f32 %v13091_v22, %v16240_v14  ;;  %v6509_v20 = vshrl.u32 %v6397_v33, 16  ;;  %v14234_v60 = vld [vmem:[#allocation3 + $0x24] sm:$0xff]  }
 0x224   : > { %v7006_v17 = vsel %vm14843_vm4, %v12347_v3, %v7005_v2  ;;  %v7014_v41 = vrot.slane %v7012_v5, 4  ;;  %v6512_v24 = vshll.u32 %v6397_v33, 16  ;;  %v6518_v27 = vshll.u32 %v6398_v21, 16  ;;  %v13095_v2 = vpop.f32.mrb[92].mxu0  ;;  %v13056_v3 = vpop.f32.mrb[93].mxu1 }
 0x225   : > { %9757 = vmatprep.mubr.bf16.mxu0 %v12330_v18  ;;  %v12363_v47 = vcombine.low %v7006_v17, %v7009_v8  ;;  %v6511_v63 = vrot.slane %v6509_v20, 4  ;;  %v6522_v52 = vshrl.u32 %v6398_v21, 16  ;;  %v6528_v14 = vshll.u32 %v6399_v37, 16  ;;  %v6909_v33 = vld [vmem:[#allocation3 + $0x24] sm:$0xe]  ;;  %v13096_v37 = vpop.f32.mrb[93].mxu0 }
 0x226   : > { %9758 = vmatmul.mubr.bf16.vlgmr.msra.gmra.mrb[144].mxu0 %v14231_v32  ;;  %v6502_v29 = vrot.slane %v6501_v55, 4  ;;  %v6514_v26 = vrot.slane %v6512_v24, 5  ;;  %v16434_v4 = vrot.slane %v6518_v27, 5  ;;  %v16436_v42 = vadd.f32 %v13053_v46, %v13052_v35  ;;  %v14242_v21 = vld [vmem:[#allocation7 + $0x108] sm:$0xff]   ;;  %v14233_v55 = vld [vmem:[#allocation3 + $0xc] sm:$0xff]   ;;  %v13098_v24 = vpop.f32.mrb[94].mxu0 }
 0x227   : > { %9765 = vmatprep.mubr.bf16.mxu0 %v12331_v44  ;;  %v6506_v53 = vrot.slane %v6504_v12, 5  ;;  %v6524_v31 = vrot.slane %v6522_v52, 4  ;;  %v13094_v56 = vadd.f32 %v13093_v11, %v13092_v50  ;;  %13398 = vmatpush3.bf16.msra.mxu0 %v14236_v43  ;;  %v7016_v32 = vsel %vm14843_vm4, %v7014_v41, %v7015_v57  ;;  %v13058_v44 = vpop.f32.mrb[94].mxu1  ;;  %v14245_v20 = vld [vmem:[#allocation7 + $0x1c8] sm:$0xff]   ;;  %v6911_v41 = vld [vmem:[#allocation3 + $0x2c] sm:$0x1] }
 0x228   : > { %v6515_v8 = vor.u32 %v6514_v26, %v6511_v63  ;;  %v16440_v22 = vrot.slane %v6528_v14, 5  ;;  %v7019_v35 = vrot.slane %v6910_v39, 5  ;;  %13399 = vmatprep.subr.bf16.mxu0 %v14241_v54  ;;  %v16446_v12 = vadd.f32 %v13056_v3, %v13055_v38  ;;  %13463 = vmatprep.subr.bf16.mxu1 %v14245_v20  ;;  %v6400_v63 = vld [vmem:[#allocation3 + $0x30] sm:$0xf]  ;;  %v6401_v52 = vld [vmem:[#allocation3 + $0x34] sm:$0xf] }
 0x229   : > { %9863 = vmatmul.mubr.bf16.gmra.mrb[148].mxu1 %v12363_v47  ;;  %v6525_v46 = vor.u32 %v6524_v31, %v16434_v4  ;;  %v16444_v6 = vadd.f32 %v13094_v56, %v16249_v0  ;;  %v13097_v50 = vadd.f32 %v13096_v37, %v13095_v2  ;;  %v6507_v43 = vsel %vm14849_vm5, %v6502_v29, %v6506_v53  ;;  %v14238_v47 = vld [vmem:[#allocation3 + $0x30] sm:$0xff]   ;;  %v13059_v2 = vpop.f32.mrb[95].mxu1  ;;  %v13099_v19 = vpop.f32.mrb[95].mxu0  ;;  %v14247_v39 = vld [vmem:[#allocation7 + $0x150] sm:$0xff]  }
 0x22a   : > { %9870 = vmatprep.mubr.bf16.mxu1 %v14234_v60  ;;  %v16450_v11 = vrot.slane %v6515_v8, 4  ;;  %v12349_v18 = vrot.slane %v6909_v33, 9  ;;  %v7021_v57 = vrot.slane %v7019_v35, 4  ;;  %v6497_v27 = vsel %vm14849_vm5, %v16420_v61, %v16407_v15  ;;  %13464 = vmatpush3.bf16.msra.mxu1 %v14246_v58  ;;  %v14248_v37 = vld [vmem:[#allocation7 + $0x110] sm:$0xff]   ;;  %v6913_v20 = vld [vmem:[#allocation3 + $0x34] sm:$0xf] }
 0x22b   : > { %v16452_v17 = vrot.slane %v6525_v46, 4  ;;  %v16455_v0 = vadd.f32 %v13097_v50, %v16284_v30  ;;  %v7013_v54 = vsel %vm14843_vm4, %v12348_v62, %v7012_v5  ;;  %13400 = vmatpush3.bf16.msra.mxu0 %v14242_v21  ;;  %v6402_v30 = vld [vmem:[#allocation3 + $0x38] sm:$0x1]  ;;  %v12332_v14 = vcombine.low %v6497_v27, %v6507_v43  ;;  %v13101_v46 = vpop.f32.mrb[96].mxu0  ;;  %v13141_v50 = vpop.f32.mrb[96].mxu1 }
 0x22c   : > { %v12364_v38 = vcombine.low %v7013_v54, %v7016_v32  ;;  %v6533_v60 = vshrl.u32 %v6400_v63, 16  ;;  %v6536_v29 = vshll.u32 %v6400_v63, 16  ;;  %v6542_v26 = vshll.u32 %v6401_v52, 16  ;;  %13401 = vmatprep.subr.bf16.mxu0 %v14247_v39  ;;  %v14244_v63 = vld [vmem:[#allocation3 + $0x3c] sm:$0xff]  }
 0x22d   : > { %v6546_v15 = vshrl.u32 %v6401_v52, 16  ;;  %v6552_v61 = vshll.u32 %v6402_v30, 16  ;;  %v16467_v3 = vadd.f32 %v13059_v2, %v13058_v44  ;;  %v13100_v53 = vadd.f32 %v13099_v19, %v13098_v24  ;;  %v14237_v44 = vld [vmem:[#allocation3 + $0x18] sm:$0xff]   ;;  %v6404_v2 = vld [vmem:[#allocation3 + $0x40] sm:$0xf] }
 0x22e   : > { %9766 = vmatmul.mubr.bf16.gmra.mrb[148].mxu0 %v14233_v55  ;;  %v6535_v5 = vrot.slane %v6533_v60, 4  ;;  %v6538_v62 = vrot.slane %v6536_v29, 5  ;;  %v7022_v31 = vrot.slane %v6911_v41, 5  ;;  %v16469_v56 = vrot.slane %v6542_v26, 5  ;;  %v6914_v41 = vld [vmem:[#allocation3 + $0x38] sm:$0x1] }
 0x22f   : > { %9773 = vmatprep.mubr.bf16.mxu0 %v12332_v14  ;;  %v6548_v33 = vrot.slane %v6546_v15, 4  ;;  %v7020_v32 = vsel %vm14843_vm4, %v12349_v18, %v7019_v35  ;;  %v16474_v21 = vadd.f32 %v13100_v53, %v16300_v10  ;;  %v6521_v55 = vsel %vm14849_vm5, %v16450_v11, %v16434_v4  ;;  %v6912_v18 = vld [vmem:[#allocation3 + $0x30] sm:$0xe]  ;;  %13402 = vmatpush3.bf16.msra.mxu0 %v14248_v37  ;;  %v13102_v4 = vpop.f32.mrb[97].mxu0  ;;  %v13142_v11 = vpop.f32.mrb[97].mxu1  ;;  %v14251_v60 = vld [vmem:[#allocation7 + $0x1d0] sm:$0xff]  }
 0x230   : > { %v6539_v8 = vor.u32 %v6538_v62, %v6535_v5  ;;  %v6531_v43 = vsel %vm14849_vm5, %v16452_v17, %v16440_v22  ;;  %v7023_v35 = vsel %vm14843_vm4, %v7021_v57, %v7022_v31  ;;  %v6554_v27 = vrot.slane %v6552_v61, 5  ;;  %v13104_v15 = vpop.f32.mrb[98].mxu0  ;;  %v13144_v61 = vpop.f32.mrb[98].mxu1  ;;  %v6403_v58 = vld [vmem:[#allocation3 + $0x3c] sm:$0xf]  ;;  %13465 = vmatprep.subr.bf16.mxu1 %v14251_v60  ;;  %v14252_v31 = vld [vmem:[#allocation7 + $0x190] sm:$0xff]  }
 0x231   : > { %9871 = vmatmul.mubr.bf16.gmra.mrb[152].mxu1 %v12364_v38  ;;  %v6549_v10 = vor.u32 %v6548_v33, %v16469_v56  ;;  %v12350_v54 = vrot.slane %v6912_v18, 9  ;;  %v7029_v30 = vrot.slane %v6914_v41, 5  ;;  %v13103_v22 = vadd.f32 %v13102_v4, %v13101_v46  ;;  %v6405_v19 = vld [vmem:[#allocation3 + $0x44] sm:$0x1]  ;;  %v14250_v41 = vld [vmem:[#allocation3 + $0x48] sm:$0xff]  }
 0x232   : > { %9878 = vmatprep.mubr.bf16.mxu1 %v14238_v47  ;;  %v6540_v24 = vrot.slane %v6539_v8, 4  ;;  %v7026_v47 = vrot.slane %v6913_v20, 5  ;;  %v13143_v17 = vadd.f32 %v13142_v11, %v13141_v50  ;;  %v12333_v14 = vcombine.low %v6521_v55, %v6531_v43  ;;  %v13145_v8 = vpop.f32.mrb[99].mxu1  ;;  %13466 = vmatpush3.bf16.msra.mxu1 %v14252_v31  ;;  %v14253_v55 = vld [vmem:[#allocation7 + $0x158] sm:$0xff]   ;;  %v14243_v43 = vld [vmem:[#allocation3 + $0x24] sm:$0xff]  }
 0x233   : > { %v6550_v52 = vrot.slane %v6549_v10, 4  ;;  %v12365_v57 = vcombine.low %v7020_v32, %v7023_v35  ;;  %v16488_v29 = vadd.f32 %v13103_v22, %v16318_v13  ;;  %v6557_v5 = vshrl.u32 %v6403_v58, 16  ;;  %v13105_v32 = vpop.f32.mrb[99].mxu0  ;;  %13403 = vmatprep.subr.bf16.mxu0 %v14253_v55  ;;  %v14254_v11 = vld [vmem:[#allocation7 + $0x118] sm:$0xff]  }
 0x234   : > { %v7028_v38 = vrot.slane %v7026_v47, 4  ;;  %v16491_v26 = vadd.f32 %v13143_v17, %v16331_v36  ;;  %v6560_v62 = vshll.u32 %v6403_v58, 16  ;;  %v6566_v53 = vshll.u32 %v6404_v2, 16  ;;  %13404 = vmatpush3.bf16.msra.mxu0 %v14254_v11 }
 0x235   : > { %v6555_v13 = vsel %vm14849_vm5, %v6550_v52, %v6554_v27  ;;  %v6570_v33 = vshrl.u32 %v6404_v2, 16  ;;  %v6576_v39 = vshll.u32 %v6405_v19, 16  ;;  %v6559_v37 = vrot.slane %v6557_v5, 4  ;;  %v13147_v52 = vpop.f32.mrb[100].mxu1  ;;  %v14257_v5 = vld [vmem:[#allocation7 + $0x1d8] sm:$0xff]  }
 0x236   : > { %9774 = vmatmul.mubr.bf16.gmra.mrb[152].mxu0 %v14237_v44  ;;  %v7030_v36 = vsel %vm14843_vm4, %v7028_v38, %v7029_v30  ;;  %v6562_v46 = vrot.slane %v6560_v62, 5  ;;  %v6568_v50 = vrot.slane %v6566_v53, 5  ;;  %v13106_v44 = vadd.f32 %v13105_v32, %v13104_v15  ;;  %v13148_v15 = vpop.f32.mrb[101].mxu1  ;;  %13467 = vmatprep.subr.bf16.mxu1 %v14257_v5 }
 0x237   : > { %9781 = vmatprep.mubr.bf16.mxu0 %v12333_v14  ;;  %v6572_v35 = vrot.slane %v6570_v33, 4  ;;  %v13146_v10 = vadd.f32 %v13145_v8, %v13144_v61  ;;  %v6545_v18 = vsel %vm14849_vm5, %v6540_v24, %v16469_v56  ;;  %v7027_v20 = vsel %vm14843_vm4, %v12350_v54, %v7026_v47  ;;  %v6916_v56 = vld [vmem:[#allocation3 + $0x40] sm:$0xf]  ;;  %v6917_v24 = vld [vmem:[#allocation3 + $0x44] sm:$0x1]  ;;  %v14249_v33 = vld [vmem:[#allocation3 + $0x30] sm:$0xff]  }
 0x238   : > { %v6563_v27 = vor.u32 %v6562_v46, %v6559_v37  ;;  %v16503_v4 = vadd.f32 %v13106_v44, %v16324_v7  ;;  %v12334_v30 = vcombine.low %v6545_v18, %v6555_v13  ;;  %v12366_v22 = vcombine.low %v7027_v20, %v7030_v36  ;;  %v13150_v36 = vpop.f32.mrb[102].mxu1  ;;  %v6406_v8 = vld [vmem:[#allocation3 + $0x48] sm:$0xf]  ;;  %v6407_v37 = vld [vmem:[#allocation3 + $0x4c] sm:$0xf] }
 0x239   : > { %9879 = vmatmul.mubr.bf16.gmra.mrb[156].mxu1 %v12365_v57  ;;  %v6573_v17 = vor.u32 %v6572_v35, %v6568_v50  ;;  %v16506_v14 = vadd.f32 %v13146_v10, %v16342_v9  ;;  %v6915_v57 = vld [vmem:[#allocation3 + $0x3c] sm:$0xe]  ;;  %v6578_v47 = vrot.slane %v6576_v39, 5  ;;  %v7033_v60 = vrot.slane %v6916_v56, 5  ;;  %v6408_v46 = vld [vmem:[#allocation3 + $0x50] sm:$0x1] }
 0x23a   : > { %9886 = vmatprep.mubr.bf16.mxu1 %v14244_v63  ;;  %v13107_v63 = vpop.f32.mrb[100].mxu0  ;;  %v6564_v54 = vrot.slane %v6563_v27, 4  ;;  %v12351_v38 = vrot.slane %v6915_v57, 9  ;;  %v7036_v58 = vrot.slane %v6917_v24, 5  ;;  %v13149_v19 = vadd.f32 %v13148_v15, %v13147_v52 }
 0x23b   : > { %v13108_v7 = vpop.f32.mrb[101].mxu0  ;;  %v6574_v61 = vrot.slane %v6573_v17, 4  ;;  %v7035_v9 = vrot.slane %v7033_v60, 4  ;;  %v6581_v44 = vshrl.u32 %v6406_v8, 16  ;;  %v6584_v55 = vshll.u32 %v6406_v8, 16 }
 0x23c   : > { %v13109_v2 = vadd.f32 %v13108_v7, %v13107_v63  ;;  %v16514_v31 = vadd.f32 %v13149_v19, %v16381_v45  ;;  %v13110_v13 = vpop.f32.mrb[102].mxu0  ;;  %v6569_v39 = vsel %vm14849_vm5, %v6564_v54, %v6568_v50  ;;  %v6590_v45 = vshll.u32 %v6407_v37, 16  ;;  %v13151_v50 = vpop.f32.mrb[103].mxu1  ;;  %v14260_v54 = vld [vmem:[#allocation7 + $0x120] sm:$0xff]  }
 0x23d   : > { %v6579_v62 = vsel %vm14849_vm5, %v6574_v61, %v6578_v47  ;;  %v7037_v32 = vsel %vm14843_vm4, %v7035_v9, %v7036_v58  ;;  %v6594_v18 = vshrl.u32 %v6407_v37, 16  ;;  %v6600_v20 = vshll.u32 %v6408_v46, 16  ;;  %v6918_v61 = vld [vmem:[#allocation3 + $0x48] sm:$0xe]  ;;  %v6919_v58 = vld [vmem:[#allocation3 + $0x4c] sm:$0xf] }
 0x23e   : > { %9782 = vmatmul.mubr.bf16.gmra.mrb[156].mxu0 %v14243_v43  ;;  %v16511_v53 = vadd.f32 %v13109_v2, %v16344_v16  ;;  %v7034_v16 = vsel %vm14843_vm4, %v12351_v38, %v7033_v60  ;;  %v14258_v43 = vld [vmem:[#allocation7 + $0x198] sm:$0xff]   ;;  %v12335_v35 = vcombine.low %v6569_v39, %v6579_v62  ;;  %v6583_v27 = vrot.slane %v6581_v44, 4  ;;  %v13153_v38 = vpop.f32.mrb[104].mxu1  ;;  %v14261_v60 = vld [vmem:[#allocation7 + $0x1e0] sm:$0xff]  }
 0x23f   : > { %9789 = vmatprep.mubr.bf16.mxu0 %v12334_v30  ;;  %v12367_v10 = vcombine.low %v7034_v16, %v7037_v32  ;;  %v6586_v11 = vrot.slane %v6584_v55, 5  ;;  %v6592_v63 = vrot.slane %v6590_v45, 5  ;;  %13468 = vmatpush3.bf16.msra.mxu1 %v14258_v43  ;;  %v14259_v30 = vld [vmem:[#allocation7 + $0x160] sm:$0xff]   ;;  %v6596_v17 = vrot.slane %v6594_v18, 4  ;;  %v6920_v2 = vld [vmem:[#allocation3 + $0x50] sm:$0x1] }
 0x240   : > { %v13152_v57 = vadd.f32 %v13151_v50, %v13150_v36  ;;  %13405 = vmatprep.subr.bf16.mxu0 %v14259_v30  ;;  %v6602_v9 = vrot.slane %v6600_v20, 5  ;;  %v7040_v5 = vrot.slane %v6919_v58, 5  ;;  %13469 = vmatprep.subr.bf16.mxu1 %v14261_v60  ;;  %v7043_v32 = vrot.slane %v6920_v2, 5  ;;  %v14263_v43 = vld [vmem:[#allocation3 + $0x60] sm:$0xff]   ;;  %v14262_v58 = vld [vmem:[#allocation3 + $0x48] sm:$0xff]  }
 0x241   : > { %9887 = vmatmul.mubr.bf16.gmra.mrb[160].mxu1 %v12366_v22  ;;  %v14256_v22 = vld [vmem:[#allocation3 + $0x54] sm:$0xff]   ;;  %v6587_v56 = vor.u32 %v6586_v11, %v6583_v27  ;;  %v6597_v7 = vor.u32 %v6596_v17, %v6592_v63  ;;  %13406 = vmatpush3.bf16.msra.mxu0 %v14260_v54  ;;  %v14265_v20 = vld [vmem:[#allocation7 + $0x1e8] sm:$0xff]  }
 0x242   : > { %9894 = vmatprep.mubr.bf16.mxu1 %v14250_v41  ;;  %v13111_v41 = vpop.f32.mrb[103].mxu0  ;;  %v16526_v15 = vadd.f32 %v13152_v57, %v16405_v23  ;;  %v7042_v39 = vrot.slane %v7040_v5, 4  ;;  %v6409_v27 = vld [vmem:[#allocation3 + $0x54] sm:$0xf]  ;;  %v6410_v11 = vld [vmem:[#allocation3 + $0x58] sm:$0xf] }
 0x243   : > { %v13112_v52 = vadd.f32 %v13111_v41, %v13110_v13  ;;  %v13113_v47 = vpop.f32.mrb[104].mxu0  ;;  %v6588_v19 = vrot.slane %v6587_v56, 4  ;;  %v6598_v62 = vrot.slane %v6597_v7, 4  ;;  %v12352_v13 = vrot.slane %v6918_v61, 9 }
 0x244   : > { %v13114_v36 = vpop.f32.mrb[105].mxu0  ;;  %v7044_v55 = vsel %vm14843_vm4, %v7042_v39, %v7043_v32  ;;  %v6608_v30 = vshll.u32 %v6409_v27, 16  ;;  %v6921_v39 = vld [vmem:[#allocation3 + $0x54] sm:$0xe]  ;;  %v14269_v32 = vld [vmem:[#allocation7 + $0x1f0] sm:$0xff]  }
 0x245   : > { %v16523_v24 = vadd.f32 %v13112_v52, %v16383_v34  ;;  %v14255_v34 = vld [vmem:[#allocation3 + $0x3c] sm:$0xff]   ;;  %v13115_v8 = vadd.f32 %v13114_v36, %v13113_v47  ;;  %v6593_v23 = vsel %vm14849_vm5, %v6588_v19, %v6592_v63  ;;  %v6603_v37 = vsel %vm14849_vm5, %v6598_v62, %v6602_v9 }
 0x246   : > { %9790 = vmatmul.mubr.bf16.gmra.mrb[160].mxu0 %v14249_v33  ;;  %v13154_v33 = vpop.f32.mrb[105].mxu1  ;;  %v12336_v16 = vcombine.low %v6593_v23, %v6603_v37  ;;  %v7041_v44 = vsel %vm14843_vm4, %v12352_v13, %v7040_v5  ;;  %v6411_v63 = vld [vmem:[#allocation3 + $0x5c] sm:$0x1]  ;;  %v6605_v52 = vshrl.u32 %v6409_v27, 16  ;;  %v6610_v60 = vrot.slane %v6608_v30, 5  ;;  %v14267_v5 = vld [vmem:[#allocation7 + $0x1a8] sm:$0xff]  }
 0x247   : > { %9797 = vmatprep.mubr.bf16.mxu0 %v12335_v35  ;;  %v13155_v46 = vadd.f32 %v13154_v33, %v13153_v38  ;;  %v16537_v45 = vadd.f32 %v13115_v8, %v16386_v1  ;;  %v14264_v35 = vld [vmem:[#allocation7 + $0x1a0] sm:$0xff]   ;;  %v13156_v18 = vpop.f32.mrb[106].mxu1  ;;  %v12368_v41 = vcombine.low %v7041_v44, %v7044_v55  ;;  %v6618_v1 = vshrl.u32 %v6410_v11, 16  ;;  %v14266_v38 = vld [vmem:[#allocation7 + $0x168] sm:$0xff]   ;;  %v14271_v27 = vld [vmem:[#allocation7 + $0x170] sm:$0xff]  }
 0x248   : > { %13470 = vmatpush3.bf16.msra.mxu1 %v14264_v35  ;;  %v13157_v57 = vpop.f32.mrb[107].mxu1  ;;  %v6624_v56 = vshll.u32 %v6411_v63, 16  ;;  %13407 = vmatprep.subr.bf16.mxu0 %v14266_v38  ;;  %v14268_v13 = vld [vmem:[#allocation7 + $0x128] sm:$0xff]   ;;  %v6922_v37 = vld [vmem:[#allocation3 + $0x58] sm:$0xf] }
 0x249   : > { %9895 = vmatmul.mubr.bf16.gmra.mrb[164].mxu1 %v12367_v10  ;;  %v13116_v10 = vpop.f32.mrb[106].mxu0  ;;  %v16540_v50 = vadd.f32 %v13155_v46, %v16424_v51  ;;  %v13158_v47 = vadd.f32 %v13157_v57, %v13156_v18  ;;  %13471 = vmatprep.subr.bf16.mxu1 %v14265_v20  ;;  %v6607_v51 = vrot.slane %v6605_v52, 4  ;;  %v6620_v61 = vrot.slane %v6618_v1, 4  ;;  %v13159_v33 = vpop.f32.mrb[108].mxu1  ;;  %v6923_v46 = vld [vmem:[#allocation3 + $0x5c] sm:$0x1] }
 0x24a   : > { %9902 = vmatprep.mubr.bf16.mxu1 %v14256_v22  ;;  %v6614_v22 = vshll.u32 %v6410_v11, 16  ;;  %v13117_v17 = vpop.f32.mrb[107].mxu0  ;;  %v6626_v2 = vrot.slane %v6624_v56, 5  ;;  %13408 = vmatpush3.bf16.msra.mxu0 %v14268_v13  ;;  %v14272_v1 = vld [vmem:[#allocation7 + $0x1b0] sm:$0xff]   ;;  %v8278_v57 = vld [vmem:[#allocation3 + $0x1c] sm:$0xf] }
 0x24b   : > { %v13118_v54 = vadd.f32 %v13117_v17, %v13116_v10  ;;  %v16546_v9 = vadd.f32 %v13158_v47, %v16444_v6  ;;  %v13119_v36 = vpop.f32.mrb[108].mxu0  ;;  %v13160_v10 = vpop.f32.mrb[109].mxu1  ;;  %13409 = vmatprep.subr.bf16.mxu0 %v14271_v27  ;;  %v8277_v17 = vld [vmem:[#allocation3 + $0x18] sm:$0xf]  ;;  %v8279_v47 = vld [vmem:[#allocation3 + $0x20] sm:$0x1] }
 0x24c   : > { %v6616_v7 = vrot.slane %v6614_v22, 5  ;;  %13472 = vmatpush3.bf16.msra.mxu1 %v14267_v5  ;;  %v13120_v6 = vpop.f32.mrb[109].mxu0  ;;  %v14270_v22 = vld [vmem:[#allocation3 + $0x54] sm:$0xff]   ;;  %v8329_v38 = vshll.u32 %v8277_v17, 16  ;;  %v14273_v5 = vld [vmem:[#allocation7 + $0x130] sm:$0xff]  }
 0x24d   : > { %v16543_v19 = vadd.f32 %v13118_v54, %v16436_v42  ;;  %v12353_v42 = vrot.slane %v6921_v39, 9  ;;  %13473 = vmatprep.subr.bf16.mxu1 %v14269_v32  ;;  %v13121_v35 = vadd.f32 %v13120_v6, %v13119_v36  ;;  %v13122_v56 = vpop.f32.mrb[110].mxu0  ;;  %v7845_v36 = vld [vmem:[#allocation3 + $0x10] sm:$0xf] }
 0x24e   : > { %9798 = vmatmul.mubr.bf16.gmra.mrb[164].mxu0 %v14255_v34  ;;  %v6611_v34 = vor.u32 %v6610_v60, %v6607_v51  ;;  %v6621_v62 = vor.u32 %v6620_v61, %v6616_v7  ;;  %v8335_v51 = vshll.u32 %v8278_v57, 16  ;;  %v13162_v60 = vpop.f32.mrb[110].mxu1  ;;  %v8345_v61 = vshll.u32 %v8279_v47, 16  ;;  %v14277_v27 = vld [vmem:[#allocation7 + $0x138] sm:$0xff]  }
 0x24f   : > { %9805 = vmatprep.mubr.bf16.mxu0 %v12336_v16  ;;  %v7047_v16 = vrot.slane %v6922_v37, 5  ;;  %v16553_v11 = vadd.f32 %v13121_v35, %v16446_v12  ;;  %v8326_v12 = vshrl.u32 %v8277_v17, 16  ;;  %13410 = vmatpush3.bf16.msra.mxu0 %v14273_v5  ;;  %v13123_v37 = vpop.f32.mrb[111].mxu0  ;;  %v14275_v35 = vld [vmem:[#allocation7 + $0x178] sm:$0xff]  }
 0x250   : > { %v6612_v8 = vrot.slane %v6611_v34, 4  ;;  %v6622_v23 = vrot.slane %v6621_v62, 4  ;;  %13474 = vmatpush3.bf16.msra.mxu1 %v14272_v1  ;;  %v7844_v34 = vld [vmem:[#allocation3 + $0xc] sm:$0xe]  ;;  %v8347_v13 = vrot.slane %v8345_v61, 5  ;;  %v13124_v6 = vadd.f32 %v13123_v37, %v13122_v56  ;;  %13411 = vmatprep.subr.bf16.mxu0 %v14275_v35  ;;  %v13205_v1 = vpop.f32.mrb[112].mxu0 }
 0x251   : > { %9903 = vmatmul.mubr.bf16.gmra.mrb[168].mxu1 %v12368_v41  ;;  %v7049_v20 = vrot.slane %v7047_v16, 4  ;;  %v13161_v41 = vadd.f32 %v13160_v10, %v13159_v33  ;;  %v7048_v63 = vsel %vm14843_vm4, %v12353_v42, %v7047_v16  ;;  %v7846_v33 = vld [vmem:[#allocation3 + $0x14] sm:$0x1]  ;;  %v12410_v32 = vrot.slane %v7844_v34, 9 }
 0x252   : > { %9910 = vmatprep.mubr.bf16.mxu1 %v14263_v43  ;;  %v6617_v44 = vsel %vm14849_vm5, %v6612_v8, %v6616_v7  ;;  %v6627_v55 = vsel %vm14849_vm5, %v6622_v23, %v6626_v2  ;;  %v7050_v43 = vrot.slane %v6923_v46, 5  ;;  %v8339_v7 = vshrl.u32 %v8278_v57, 16  ;;  %v13163_v46 = vpop.f32.mrb[111].mxu1  ;;  %v14274_v42 = vld [vmem:[#allocation7 + $0x1f8] sm:$0xff]  }
 0x253   : > { %v12337_v18 = vcombine.low %v6617_v44, %v6627_v55  ;;  %v16560_v30 = vadd.f32 %v13161_v41, %v16455_v0  ;;  %v8331_v2 = vrot.slane %v8329_v38, 5  ;;  %v8337_v0 = vrot.slane %v8335_v51, 5  ;;  %13475 = vmatprep.subr.bf16.mxu1 %v14274_v42  ;;  %v14276_v10 = vld [vmem:[#allocation7 + $0x1b8] sm:$0xff]   ;;  %13412 = vmatpush3.bf16.msra.mxu0 %v14277_v27  ;;  %v7332_v38 = vld [vmem:[#allocation3 + $0xc] sm:$0xf] }
 0x254   : > { %v7051_v52 = vsel %vm14843_vm4, %v7049_v20, %v7050_v43  ;;  %v8341_v62 = vrot.slane %v8339_v7, 4  ;;  %v7942_v8 = vrot.slane %v7845_v36, 5  ;;  %v7945_v23 = vrot.slane %v7846_v33, 5  ;;  %13476 = vmatpush3.bf16.msra.mxu1 %v14276_v10  ;;  %v7333_v51 = vld [vmem:[#allocation3 + $0x10] sm:$0xf] }
 0x255   : > { %v12369_v54 = vcombine.low %v7048_v63, %v7051_v52  ;;  %v13164_v44 = vadd.f32 %v13163_v46, %v13162_v60  ;;  %v16563_v20 = vadd.f32 %v13124_v6, %v16467_v3  ;;  %v7334_v61 = vld [vmem:[#allocation3 + $0x14] sm:$0x1]  ;;  %v8280_v36 = vld [vmem:[#allocation3 + $0x24] sm:$0xf]  ;;  %v8281_v33 = vld [vmem:[#allocation3 + $0x28] sm:$0xf] }
 0x256   : > { %9806 = vmatmul.mubr.bf16.gmra.mrb[168].mxu0 %v14262_v58  ;;  %v8328_v58 = vrot.slane %v8326_v12, 4  ;;  %v8342_v16 = vor.u32 %v8341_v62, %v8337_v0  ;;  %v7944_v43 = vrot.slane %v7942_v8, 4  ;;  %v7943_v63 = vsel %vm14843_vm4, %v12410_v32, %v7942_v8  ;;  %v13206_v12 = vpop.f32.mrb[113].mxu0  ;;  %v7848_v10 = vld [vmem:[#allocation3 + $0x1c] sm:$0xf] }
 0x257   : > { %9813 = vmatprep.mubr.bf16.mxu0 %v12337_v18  ;;  %v16566_v41 = vadd.f32 %v13164_v44, %v16474_v21  ;;  %v14278_v21 = vld [vmem:[#allocation3 + $0x18] sm:$0xff]   ;;  %v16576_v7 = vadd.f32 %v13206_v12, %v13205_v1  ;;  %v13208_v5 = vpop.f32.mrb[114].mxu0  ;;  %v7394_v62 = vshrl.u32 %v7333_v51, 16  ;;  %v8350_v37 = vshrl.u32 %v8280_v36, 16 }
 0x258   : > { %v8332_v39 = vor.u32 %v8331_v2, %v8328_v58  ;;  %v8343_v18 = vrot.slane %v8342_v16, 4  ;;  %v7946_v52 = vsel %vm14843_vm4, %v7944_v43, %v7945_v23  ;;  %v7381_v58 = vshrl.u32 %v7332_v38, 16  ;;  %v8282_v23 = vld [vmem:[#allocation3 + $0x2c] sm:$0x1]  ;;  %v7847_v44 = vld [vmem:[#allocation3 + $0x18] sm:$0xe] }
 0x259   : > { %9911 = vmatmul.mubr.bf16.gmra.mrb[172].mxu1 %v12369_v54  ;;  %v12426_v57 = vcombine.low %v7943_v63, %v7946_v52  ;;  %v7384_v2 = vshll.u32 %v7332_v38, 16  ;;  %v7396_v46 = vrot.slane %v7394_v62, 4  ;;  %v8353_v16 = vshll.u32 %v8280_v36, 16 }
 0x25a   : > { %v8333_v55 = vrot.slane %v8332_v39, 4  ;;  %v8348_v3 = vsel %vm14849_vm5, %v8343_v18, %v8347_v13  ;;  %v7400_v13 = vshll.u32 %v7334_v61, 16  ;;  %v7383_v39 = vrot.slane %v7381_v58, 4 }
 0x25b   : > { %v7386_v32 = vrot.slane %v7384_v2, 5  ;;  %v8359_v6 = vshll.u32 %v8281_v33, 16  ;;  %v8352_v43 = vrot.slane %v8350_v37, 4  ;;  %v8363_v35 = vshrl.u32 %v8281_v33, 16  ;;  %v7335_v33 = vld [vmem:[#allocation3 + $0x18] sm:$0xf] }
 0x25c   : > { %v8338_v17 = vsel %vm14849_vm5, %v8333_v55, %v8337_v0  ;;  %v7390_v0 = vshll.u32 %v7333_v51, 16  ;;  %v7402_v42 = vrot.slane %v7400_v13, 5  ;;  %v8355_v63 = vrot.slane %v8353_v16, 5 }
 0x25d   : > { %v12458_v54 = vcombine.low %v8338_v17, %v8348_v3  ;;  %v7387_v55 = vor.u32 %v7386_v32, %v7383_v39  ;;  %v8361_v52 = vrot.slane %v8359_v6, 5  ;;  %v12411_v1 = vrot.slane %v7847_v44, 9  ;;  %v13209_v17 = vpop.f32.mrb[115].mxu0 }
 0x25e   : > { %9814 = vmatmul.mubr.bf16.gmra.mrb[172].mxu0 %v14270_v22  ;;  %v13165_v22 = vpop.f32.mrb[112].mxu1  ;;  %v7392_v8 = vrot.slane %v7390_v0, 5  ;;  %v8356_v38 = vor.u32 %v8355_v63, %v8352_v43  ;;  %v16590_v37 = vadd.f32 %v13209_v17, %v13208_v5  ;;  %v7405_v5 = vshrl.u32 %v7335_v33, 16  ;;  %v14279_v63 = vld [vmem:[#allocation3 + $0x24] sm:$0xff]  }
 0x25f   : > { %v13166_v56 = vpop.f32.mrb[113].mxu1  ;;  %9951 = vmatprep.mubr.bf16.mxu0 %v12426_v57  ;;  %10048 = vmatprep.mubr.bf16.mxu1 %v12458_v54  ;;  %v7388_v3 = vrot.slane %v7387_v55, 4  ;;  %v8365_v57 = vrot.slane %v8363_v35, 4  ;;  %v7337_v55 = vld [vmem:[#allocation3 + $0x20] sm:$0x1] }
 0x260   : > { %v13167_v47 = vadd.f32 %v13166_v56, %v13165_v22  ;;  %v13168_v60 = vpop.f32.mrb[114].mxu1  ;;  %v7397_v27 = vor.u32 %v7396_v46, %v7392_v8  ;;  %v7849_v22 = vld [vmem:[#allocation3 + $0x20] sm:$0x1]  ;;  %v7949_v56 = vrot.slane %v7848_v10, 5  ;;  %v8357_v32 = vrot.slane %v8356_v38, 4 }
 0x261   : > { %10049 = vmatmul.mubr.bf16.vlgmr.msra.gmra.mrb[176].mxu1 %v14278_v21  ;;  %v13169_v18 = vpop.f32.mrb[115].mxu1  ;;  %v7952_v51 = vrot.slane %v7849_v22, 5  ;;  %v7393_v58 = vsel %vm14849_vm5, %v7388_v3, %v7392_v8  ;;  %v8366_v2 = vor.u32 %v8365_v57, %v8361_v52  ;;  %v8284_v10 = vld [vmem:[#allocation3 + $0x34] sm:$0xf]  ;;  %v8285_v3 = vld [vmem:[#allocation3 + $0x38] sm:$0x1] }
 0x262   : > { %v16579_v34 = vadd.f32 %v13167_v47, %v16488_v29  ;;  %v8369_v29 = vshll.u32 %v8282_v23, 16  ;;  %v13171_v54 = vpop.f32.mrb[116].mxu1  ;;  %v13211_v47 = vpop.f32.mrb[116].mxu0  ;;  %v7398_v12 = vrot.slane %v7397_v27, 4  ;;  %v13170_v61 = vadd.f32 %v13169_v18, %v13168_v60  ;;  %v7336_v60 = vld [vmem:[#allocation3 + $0x1c] sm:$0xf] }
 0x263   : > { %v7950_v0 = vsel %vm14843_vm4, %v12411_v1, %v7949_v56  ;;  %v7951_v62 = vrot.slane %v7949_v56, 4  ;;  %v13172_v13 = vpop.f32.mrb[117].mxu1  ;;  %v13212_v36 = vpop.f32.mrb[117].mxu0  ;;  %v8367_v16 = vrot.slane %v8366_v2, 4  ;;  %v7408_v1 = vshll.u32 %v7335_v33, 16 }
 0x264   : > { %v8371_v21 = vrot.slane %v8369_v29, 5  ;;  %v7403_v39 = vsel %vm14849_vm5, %v7398_v12, %v7402_v42  ;;  %v16588_v23 = vadd.f32 %v13170_v61, %v16503_v4  ;;  %v16592_v46 = vpop.f32.mrb[118].mxu1  ;;  %v13173_v44 = vadd.f32 %v13172_v13, %v13171_v54  ;;  %v16596_v43 = vpop.f32.mrb[118].mxu0  ;;  %v8283_v29 = vld [vmem:[#allocation3 + $0x30] sm:$0xf] }
 0x265   : > { %v12394_v8 = vcombine.low %v7393_v58, %v7403_v39  ;;  %v7953_v6 = vsel %vm14843_vm4, %v7951_v62, %v7952_v51  ;;  %v8362_v42 = vsel %vm14849_vm5, %v8357_v32, %v8361_v52  ;;  %v16600_v4 = vadd.f32 %v13212_v36, %v13211_v47  ;;  %v13175_v18 = vpop.f32.mrb[119].mxu1  ;;  %v7850_v57 = vld [vmem:[#allocation3 + $0x24] sm:$0xe]  ;;  %v7851_v12 = vld [vmem:[#allocation3 + $0x28] sm:$0xf]  ;;  %v13215_v38 = vpop.f32.mrb[119].mxu0 }
 0x266   : > { %v12427_v35 = vcombine.low %v7950_v0, %v7953_v6  ;;  %v8372_v27 = vsel %vm14849_vm5, %v8367_v16, %v8371_v21  ;;  %v16605_v22 = vadd.f32 %v13173_v44, %v16511_v53  ;;  %v7414_v17 = vshll.u32 %v7336_v60, 16  ;;  %v7852_v21 = vld [vmem:[#allocation3 + $0x2c] sm:$0x1]  ;;  %v14280_v36 = vld [vmem:[#allocation7 + $0x200] sm:$0xff]   ;;  %v13177_v33 = vpop.f32.mrb[120].mxu1  ;;  %v13217_v16 = vpop.f32.mrb[120].mxu0 }
 0x267   : > { %9952 = vmatmul.mubr.bf16.vlgmr.msra.gmra.mrb[176].mxu0 %v12394_v8  ;;  %v12459_v52 = vcombine.low %v8362_v42, %v8372_v27  ;;  %v7407_v56 = vrot.slane %v7405_v5, 4  ;;  %v7418_v54 = vshrl.u32 %v7336_v60, 16  ;;  %v7424_v47 = vshll.u32 %v7337_v55, 16  ;;  %13877 = vmatprep.subr.bf16.mxu0 %v14280_v36 }
 0x268   : > { %9959 = vmatprep.mubr.bf16.mxu0 %v12427_v35  ;;  %v7410_v51 = vrot.slane %v7408_v1, 5  ;;  %v7416_v61 = vrot.slane %v7414_v17, 5  ;;  %v8374_v58 = vshrl.u32 %v8283_v29, 16  ;;  %v8377_v2 = vshll.u32 %v8283_v29, 16  ;;  %13878 = vmatpush3.bf16.msra.mxu0 %v14280_v36  ;;  %v13178_v1 = vpop.f32.mrb[121].mxu1  ;;  %v14282_v17 = vld [vmem:[#allocation7 + $0x40] sm:$0xff]  }
 0x269   : > { %10056 = vmatprep.mubr.bf16.mxu1 %v12459_v52  ;;  %v7420_v0 = vrot.slane %v7418_v54, 4  ;;  %v7426_v53 = vrot.slane %v7424_v47, 5  ;;  %v8383_v62 = vshll.u32 %v8284_v10, 16  ;;  %v8387_v13 = vshrl.u32 %v8284_v10, 16  ;;  %v13218_v10 = vpop.f32.mrb[121].mxu0  ;;  %13541 = vmatprep.subr.bf16.mxu1 %v14282_v17 }
 0x26a   : > { %10057 = vmatmul.mubr.bf16.gmra.mrb[180].mxu1 %v14279_v63  ;;  %v7411_v39 = vor.u32 %v7410_v51, %v7407_v56  ;;  %v8376_v32 = vrot.slane %v8374_v58, 4  ;;  %v8379_v8 = vrot.slane %v8377_v2, 5  ;;  %v8393_v60 = vshll.u32 %v8285_v3, 16  ;;  %v7338_v58 = vld [vmem:[#allocation3 + $0x24] sm:$0xf] }
 0x26b   : > { %v7421_v6 = vor.u32 %v7420_v0, %v7416_v61  ;;  %v8385_v44 = vrot.slane %v8383_v62, 5  ;;  %v8389_v55 = vrot.slane %v8387_v13, 4  ;;  %v12412_v42 = vrot.slane %v7850_v57, 9  ;;  %v7339_v2 = vld [vmem:[#allocation3 + $0x28] sm:$0xf] }
 0x26c   : > { %v7412_v35 = vrot.slane %v7411_v39, 4  ;;  %v8380_v5 = vor.u32 %v8379_v8, %v8376_v32  ;;  %v8395_v29 = vrot.slane %v8393_v60, 5  ;;  %v7956_v27 = vrot.slane %v7851_v12, 5  ;;  %v14283_v8 = vld [vmem:[#allocation7] sm:$0xff]   ;;  %v7854_v17 = vld [vmem:[#allocation3 + $0x34] sm:$0xf] }
 0x26d   : > { %v7422_v52 = vrot.slane %v7421_v6, 4  ;;  %v8390_v63 = vor.u32 %v8389_v55, %v8385_v44  ;;  %v7959_v56 = vrot.slane %v7852_v21, 5  ;;  %v13176_v54 = vadd.f32 %v13175_v18, %v16592_v46  ;;  %v7340_v18 = vld [vmem:[#allocation3 + $0x2c] sm:$0x1]  ;;  %v16620_v21 = vpop.f32.mrb[122].mxu1  ;;  %13542 = vmatpush3.bf16.msra.mxu1 %v14283_v8 }
 0x26e   : > { %v7417_v3 = vsel %vm14849_vm5, %v7412_v35, %v7416_v61  ;;  %v8381_v47 = vrot.slane %v8380_v5, 4  ;;  %v7957_v57 = vsel %vm14843_vm4, %v12412_v42, %v7956_v27  ;;  %v7958_v51 = vrot.slane %v7956_v27, 4  ;;  %v8286_v61 = vld [vmem:[#allocation3 + $0x3c] sm:$0xf]  ;;  %v8287_v55 = vld [vmem:[#allocation3 + $0x40] sm:$0xf] }
 0x26f   : > { %v7427_v12 = vsel %vm14849_vm5, %v7422_v52, %v7426_v53  ;;  %v8391_v0 = vrot.slane %v8390_v63, 4  ;;  %v16615_v62 = vadd.f32 %v13176_v54, %v16523_v24  ;;  %v16618_v46 = vadd.f32 %v13215_v38, %v16596_v43  ;;  %v13220_v53 = vpop.f32.mrb[122].mxu0  ;;  %v14281_v43 = vld [vmem:[#allocation3 + $0x30] sm:$0xff]   ;;  %v8288_v42 = vld [vmem:[#allocation3 + $0x44] sm:$0x1]  ;;  %v13181_v35 = vpop.f32.mrb[123].mxu1 }
 0x270   : > { %v12395_v13 = vcombine.low %v7417_v3, %v7427_v12  ;;  %v8386_v36 = vsel %vm14849_vm5, %v8381_v47, %v8385_v44  ;;  %v7960_v39 = vsel %vm14843_vm4, %v7958_v51, %v7959_v56  ;;  %v13179_v32 = vadd.f32 %v13178_v1, %v13177_v33  ;;  %v7853_v1 = vld [vmem:[#allocation3 + $0x30] sm:$0xe]  ;;  %v14284_v51 = vld [vmem:[#allocation7 + $0x208] sm:$0xff]  }
 0x271   : > { %v8396_v24 = vsel %vm14849_vm5, %v8391_v0, %v8395_v29  ;;  %v12428_v60 = vcombine.low %v7957_v57, %v7960_v39  ;;  %v16628_v38 = vadd.f32 %v13218_v10, %v13217_v16  ;;  %v7429_v6 = vshrl.u32 %v7338_v58, 16  ;;  %v7855_v10 = vld [vmem:[#allocation3 + $0x38] sm:$0x1]  ;;  %v13221_v57 = vpop.f32.mrb[123].mxu0  ;;  %13879 = vmatprep.subr.bf16.mxu0 %v14284_v51 }
 0x272   : > { %9960 = vmatmul.mubr.bf16.gmra.mrb[180].mxu0 %v12395_v13  ;;  %v12460_v5 = vcombine.low %v8386_v36, %v8396_v24  ;;  %v16631_v44 = vadd.f32 %v13179_v32, %v16537_v45  ;;  %v7432_v27 = vshll.u32 %v7338_v58, 16  ;;  %v7438_v33 = vshll.u32 %v7339_v2, 16 }
 0x273   : > { %9967 = vmatprep.mubr.bf16.mxu0 %v12428_v60  ;;  %v7431_v29 = vrot.slane %v7429_v6, 4  ;;  %v7442_v52 = vshrl.u32 %v7339_v2, 16  ;;  %v7448_v63 = vshll.u32 %v7340_v18, 16  ;;  %v8398_v16 = vshrl.u32 %v8286_v61, 16  ;;  %v13183_v2 = vpop.f32.mrb[124].mxu1  ;;  %13880 = vmatpush3.bf16.msra.mxu0 %v14284_v51 }
 0x274   : > { %10064 = vmatprep.mubr.bf16.mxu1 %v12460_v5  ;;  %v7434_v56 = vrot.slane %v7432_v27, 5  ;;  %v7440_v54 = vrot.slane %v7438_v33, 5  ;;  %v8401_v3 = vshll.u32 %v8286_v61, 16  ;;  %v8407_v47 = vshll.u32 %v8287_v55, 16  ;;  %v13223_v61 = vpop.f32.mrb[124].mxu0 }
 0x275   : > { %10065 = vmatmul.mubr.bf16.gmra.mrb[184].mxu1 %v14281_v43  ;;  %v7444_v45 = vrot.slane %v7442_v52, 4  ;;  %v7450_v58 = vrot.slane %v7448_v63, 5  ;;  %v8400_v12 = vrot.slane %v8398_v16, 4  ;;  %v8411_v0 = vshrl.u32 %v8287_v55, 16  ;;  %v13184_v63 = vpop.f32.mrb[125].mxu1 }
 0x276   : > { %v7435_v13 = vor.u32 %v7434_v56, %v7431_v29  ;;  %v8403_v36 = vrot.slane %v8401_v3, 5  ;;  %v8409_v39 = vrot.slane %v8407_v47, 5  ;;  %v8417_v32 = vshll.u32 %v8288_v42, 16  ;;  %v13224_v42 = vpop.f32.mrb[125].mxu0  ;;  %v7341_v3 = vld [vmem:[#allocation3 + $0x30] sm:$0xf] }
 0x277   : > { %v7445_v18 = vor.u32 %v7444_v45, %v7440_v54  ;;  %v8413_v8 = vrot.slane %v8411_v0, 4  ;;  %v12413_v24 = vrot.slane %v7853_v1, 9  ;;  %v7963_v60 = vrot.slane %v7854_v17, 5  ;;  %v14286_v47 = vld [vmem:[#allocation7 + $0x48] sm:$0xff]   ;;  %v7342_v0 = vld [vmem:[#allocation3 + $0x34] sm:$0xf] }
 0x278   : > { %v7436_v6 = vrot.slane %v7435_v13, 4  ;;  %v8404_v5 = vor.u32 %v8403_v36, %v8400_v12  ;;  %v8419_v27 = vrot.slane %v8417_v32, 5  ;;  %v7966_v43 = vrot.slane %v7855_v10, 5  ;;  %v7343_v13 = vld [vmem:[#allocation3 + $0x38] sm:$0x1]  ;;  %v16644_v36 = vpop.f32.mrb[126].mxu1  ;;  %13543 = vmatprep.subr.bf16.mxu1 %v14286_v47 }
 0x279   : > { %v7446_v33 = vrot.slane %v7445_v18, 4  ;;  %v8414_v52 = vor.u32 %v8413_v8, %v8409_v39  ;;  %v7964_v55 = vsel %vm14843_vm4, %v12413_v24, %v7963_v60  ;;  %v7965_v29 = vrot.slane %v7963_v60, 4  ;;  %v14285_v32 = vld [vmem:[#allocation3 + $0x3c] sm:$0xff]   ;;  %v8290_v24 = vld [vmem:[#allocation3 + $0x4c] sm:$0xf] }
 0x27a   : > { %v7441_v16 = vsel %vm14849_vm5, %v7436_v6, %v7440_v54  ;;  %v8405_v56 = vrot.slane %v8404_v5, 4  ;;  %v13182_v1 = vadd.f32 %v13181_v35, %v16620_v21  ;;  %v16638_v17 = vadd.f32 %v13221_v57, %v13220_v53  ;;  %v8289_v57 = vld [vmem:[#allocation3 + $0x48] sm:$0xf]  ;;  %v8291_v60 = vld [vmem:[#allocation3 + $0x50] sm:$0x1]  ;;  %v13226_v6 = vpop.f32.mrb[126].mxu0 }
 0x27b   : > { %v7451_v10 = vsel %vm14849_vm5, %v7446_v33, %v7450_v58  ;;  %v8415_v51 = vrot.slane %v8414_v52, 4  ;;  %v7967_v45 = vsel %vm14843_vm4, %v7965_v29, %v7966_v43  ;;  %v13185_v12 = vadd.f32 %v13184_v63, %v13183_v2  ;;  %v7856_v33 = vld [vmem:[#allocation3 + $0x3c] sm:$0xe]  ;;  %v7857_v52 = vld [vmem:[#allocation3 + $0x40] sm:$0xf] }
 0x27c   : > { %v12396_v54 = vcombine.low %v7441_v16, %v7451_v10  ;;  %v8410_v21 = vsel %vm14849_vm5, %v8405_v56, %v8409_v39  ;;  %v12429_v53 = vcombine.low %v7964_v55, %v7967_v45  ;;  %v16649_v35 = vadd.f32 %v13182_v1, %v16543_v19  ;;  %v14287_v55 = vld [vmem:[#allocation7 + $0x8] sm:$0xff]   ;;  %v13187_v45 = vpop.f32.mrb[127].mxu1 }
 0x27d   : > { %v8420_v58 = vsel %vm14849_vm5, %v8415_v51, %v8419_v27  ;;  %v16654_v2 = vadd.f32 %v13185_v12, %v16553_v11  ;;  %v16656_v18 = vadd.f32 %v13224_v42, %v13223_v61  ;;  %v7453_v8 = vshrl.u32 %v7341_v3, 16  ;;  %v7858_v16 = vld [vmem:[#allocation3 + $0x44] sm:$0x1]  ;;  %13544 = vmatpush3.bf16.msra.mxu1 %v14287_v55  ;;  %v13227_v12 = vpop.f32.mrb[127].mxu0 }
 0x27e   : > { %9968 = vmatmul.mubr.bf16.gmra.mrb[184].mxu0 %v12396_v54  ;;  %v12461_v39 = vcombine.low %v8410_v21, %v8420_v58  ;;  %v7456_v5 = vshll.u32 %v7341_v3, 16  ;;  %v7462_v19 = vshll.u32 %v7342_v0, 16  ;;  %v7466_v43 = vshrl.u32 %v7342_v0, 16 }
 0x27f   : > { %9975 = vmatprep.mubr.bf16.mxu0 %v12429_v53  ;;  %v7455_v27 = vrot.slane %v7453_v8, 4  ;;  %v7472_v29 = vshll.u32 %v7343_v13, 16  ;;  %v8422_v63 = vshrl.u32 %v8289_v57, 16  ;;  %v8425_v11 = vshll.u32 %v8289_v57, 16 }
 0x280   : > { %10072 = vmatprep.mubr.bf16.mxu1 %v12461_v39  ;;  %v7458_v61 = vrot.slane %v7456_v5, 5  ;;  %v7464_v42 = vrot.slane %v7462_v19, 5  ;;  %v7468_v56 = vrot.slane %v7466_v43, 4  ;;  %v8431_v1 = vshll.u32 %v8290_v24, 16  ;;  %v14288_v39 = vld [vmem:[#allocation7 + $0x210] sm:$0xff]   ;;  %v13229_v5 = vpop.f32.mrb[128].mxu0 }
 0x281   : > { %10073 = vmatmul.mubr.bf16.gmra.mrb[188].mxu1 %v14285_v32  ;;  %v7474_v47 = vrot.slane %v7472_v29, 5  ;;  %v8424_v3 = vrot.slane %v8422_v63, 4  ;;  %v8427_v10 = vrot.slane %v8425_v11, 5  ;;  %v8435_v51 = vshrl.u32 %v8290_v24, 16  ;;  %v13863_v19 = vpop.f32.mrb[128].mxu1  ;;  %13881 = vmatprep.subr.bf16.mxu0 %v14288_v39 }
 0x282   : > { %v7459_v0 = vor.u32 %v7458_v61, %v7455_v27  ;;  %v7469_v54 = vor.u32 %v7468_v56, %v7464_v42  ;;  %v8433_v21 = vrot.slane %v8431_v1, 5  ;;  %v8441_v13 = vshll.u32 %v8291_v60, 16  ;;  %v400_v61 = vld [vmem:[#allocation3 + $0x78] sm:$0x1]  ;;  %13882 = vmatpush3.bf16.msra.mxu0 %v14288_v39 }
 0x283   : > { %v8428_v53 = vor.u32 %v8427_v10, %v8424_v3  ;;  %v8437_v57 = vrot.slane %v8435_v51, 4  ;;  %v12414_v58 = vrot.slane %v7856_v33, 9  ;;  %v7970_v8 = vrot.slane %v7857_v52, 5 }
 0x284   : > { %v7460_v43 = vrot.slane %v7459_v0, 4  ;;  %v7470_v55 = vrot.slane %v7469_v54, 4  ;;  %v8443_v32 = vrot.slane %v8441_v13, 5  ;;  %v7973_v29 = vrot.slane %v7858_v16, 5  ;;  %v13230_v16 = vpop.f32.mrb[129].mxu0  ;;  %v5854_v0 = vpop.f32.mrb[129].mxu1 }
 0x285   : > { %v8429_v63 = vrot.slane %v8428_v53, 4  ;;  %v8438_v11 = vor.u32 %v8437_v57, %v8433_v21  ;;  %v7971_v24 = vsel %vm14843_vm4, %v12414_v58, %v7970_v8  ;;  %v7972_v27 = vrot.slane %v7970_v8, 4  ;;  %v7346_v13 = vld [vmem:[#allocation3 + $0x44] sm:$0x1]  ;;  %v14290_v53 = vld [vmem:[#allocation7 + $0x50] sm:$0xff]   ;;  %v16696_v39 = vpop.f32.mrb[130].mxu0 }
 0x286   : > { %v7465_v60 = vsel %vm14849_vm5, %v7460_v43, %v7464_v42  ;;  %v7475_v33 = vsel %vm14849_vm5, %v7470_v55, %v7474_v47  ;;  %v13188_v52 = vadd.f32 %v13187_v45, %v16644_v36  ;;  %v16665_v56 = vadd.f32 %v13227_v12, %v13226_v6  ;;  %v16674_v42 = vld [vmem:[%s17817_s3] ss:$0 sm:$0xff]  ;;  %v397_v47 = vld [vmem:[#allocation3 + $0x6c] sm:$0x1]  ;;  %v7344_v36 = vld [vmem:[#allocation3 + $0x3c] sm:$0xf]  ;;  %13545 = vmatprep.subr.bf16.mxu1 %v14290_v53 }
 0x287   : > { %v12397_v1 = vcombine.low %v7465_v60, %v7475_v33  ;;  %v8434_v3 = vsel %vm14849_vm5, %v8429_v63, %v8433_v21  ;;  %v8439_v10 = vrot.slane %v8438_v11, 4  ;;  %v7974_v51 = vsel %vm14843_vm4, %v7972_v27, %v7973_v29  ;;  %v7345_v21 = vld [vmem:[#allocation3 + $0x40] sm:$0xf]  ;;  %v8293_v33 = vld [vmem:[#allocation3 + $0x58] sm:$0xf] }
 0x288   : > { %v12430_v6 = vcombine.low %v7971_v24, %v7974_v51  ;;  %v16677_v45 = vadd.f32 %v13188_v52, %v16563_v20  ;;  %v401_v12 = vsel %vm16066_vm8, 0, %v400_v61  ;;  %v5766_v54 = vadd.f32 %v16600_v4, %v16514_v31  ;;  %v16688_v58 = vld [vmem:[%s17818_s4] ss:$0 sm:$0xff]  ;;  %v8292_v4 = vld [vmem:[#allocation3 + $0x54] sm:$0xf]  ;;  %v16698_v61 = vpop.f32.mrb[130].mxu1 }
 0x289   : > { %9976 = vmatmul.mubr.bf16.gmra.mrb[188].mxu0 %v12397_v1  ;;  %v8444_v57 = vsel %vm14849_vm5, %v8439_v10, %v8443_v32  ;;  %402 = vst [vmem:[#allocation3 + $0x78] sm:$0x1] %v401_v12  ;;  %v16690_v20 = vadd.f32 %v13230_v16, %v13229_v5  ;;  %v398_v8 = vsel %vm16066_vm8, 0, %v397_v47  ;;  %v5758_v31 = vadd.f32 %v16576_v7, %v16491_v26  ;;  %v14289_v32 = vld [vmem:[#allocation3 + $0x48] sm:$0xff]   ;;  %v8294_v51 = vld [vmem:[#allocation3 + $0x5c] sm:$0x1] }
 0x28a   : > { %v12462_v43 = vcombine.low %v8434_v3, %v8444_v57  ;;  %9983 = vmatprep.mubr.bf16.mxu0 %v12430_v6  ;;  %v5863_v55 = vadd.f32 %v13863_v19, %v5766_v54  ;;  %399 = vst [vmem:[#allocation3 + $0x6c] sm:$0x1] %v398_v8  ;;  %v7477_v29 = vshrl.u32 %v7344_v36, 16  ;;  %v7480_v63 = vshll.u32 %v7344_v36, 16  ;;  %v14291_v16 = vld [vmem:[#allocation7 + $0x10] sm:$0xff]   ;;  %v16702_v47 = vpop.f32.mrb[131].mxu0 }
 0x28b   : > { %v5855_v11 = vadd.f32 %v5854_v0, %v5758_v31  ;;  %v7486_v5 = vshll.u32 %v7345_v21, 16  ;;  %v7490_v24 = vshrl.u32 %v7345_v21, 16  ;;  %v7496_v27 = vshll.u32 %v7346_v13, 16  ;;  %13546 = vmatpush3.bf16.msra.mxu1 %v14291_v16 }
 0x28c   : > { %10080 = vmatprep.mubr.bf16.mxu1 %v12462_v43  ;;  %v5926_v26 = vmul.f32 %v16674_v42, %v5863_v55  ;;  %v7479_v7 = vrot.slane %v7477_v29, 4  ;;  %v7482_v60 = vrot.slane %v7480_v63, 5  ;;  %v8446_v52 = vshrl.u32 %v8292_v4, 16  ;;  %v456_v55 = vld [vmem:[#allocation3 + $0x80] sm:$0x1] }
 0x28d   : > { %10081 = vmatmul.mubr.bf16.gmra.mrb[192].mxu1 %v14289_v32  ;;  %v5924_v19 = vmul.f32 %v16674_v42, %v5855_v11  ;;  %v7488_v1 = vrot.slane %v7486_v5, 5  ;;  %v7492_v3 = vrot.slane %v7490_v24, 4  ;;  %v7498_v10 = vrot.slane %v7496_v27, 5  ;;  %v7859_v5 = vld [vmem:[#allocation3 + $0x48] sm:$0xe] }
 0x28e   : > { %v5949_v0 = vadd.f32 %v16688_v58, %v5926_v26  ;;  %v7483_v36 = vor.u32 %v7482_v60, %v7479_v7  ;;  %v8448_v6 = vrot.slane %v8446_v52, 4  ;;  %v8449_v12 = vshll.u32 %v8292_v4, 16  ;;  %v7860_v7 = vld [vmem:[#allocation3 + $0x4c] sm:$0xf]  ;;  %v16708_v60 = vpop.f32.mrb[131].mxu1 }
 0x28f   : > { %v5947_v54 = vadd.f32 %v16688_v58, %v5924_v19  ;;  %v7493_v21 = vor.u32 %v7492_v3, %v7488_v1  ;;  %v8455_v13 = vshll.u32 %v8293_v33, 16  ;;  %v8459_v53 = vshrl.u32 %v8293_v33, 16  ;;  %v14292_v3 = vld [vmem:[#allocation7 + $0x218] sm:$0xff]  }
 0x290   : > { %v5965_v57 = vmax.f32 %v5949_v0, 0.0  ;;  %v7484_v8 = vrot.slane %v7483_v36, 4  ;;  %v8451_v31 = vrot.slane %v8449_v12, 5  ;;  %v8465_v43 = vshll.u32 %v8294_v51, 16  ;;  %v13235_v51 = vpop.f32.mrb[132].mxu0  ;;  %v16714_v0 = vpop.f32.mrb[132].mxu1  ;;  %13883 = vmatprep.subr.bf16.mxu0 %v14292_v3 }
 0x291   : > { %v5963_v32 = vmax.f32 %v5947_v54, 0.0  ;;  %v7494_v29 = vrot.slane %v7493_v21, 4  ;;  %v8457_v63 = vrot.slane %v8455_v13, 5  ;;  %v8461_v11 = vrot.slane %v8459_v53, 4  ;;  %v7861_v54 = vld [vmem:[#allocation3 + $0x50] sm:$0x1]  ;;  %13884 = vmatpush3.bf16.msra.mxu0 %v14292_v3 }
 0x292   : > { %v12710_v24 = vpack.c.bf16 %v5965_v57, %v5965_v57  ;;  %v7489_v4 = vsel %vm14849_vm5, %v7484_v8, %v7488_v1  ;;  %v8452_v27 = vor.u32 %v8451_v31, %v8448_v6  ;;  %v8467_v26 = vrot.slane %v8465_v43, 5  ;;  %v13236_v57 = vpop.f32.mrb[133].mxu0  ;;  %v403_v3 = vld [vmem:[#allocation3 + $0x84] sm:$0x1] }
 0x293   : > { %v12708_v33 = vpack.c.bf16 %v5963_v32, %v5963_v32  ;;  %v7499_v52 = vsel %vm14849_vm5, %v7494_v29, %v7498_v10  ;;  %v8462_v16 = vor.u32 %v8461_v11, %v8457_v63  ;;  %v457_v19 = vsel %vm16073_vm10, 0, %v456_v55  ;;  %v5870_v32 = vpop.f32.mrb[133].mxu1  ;;  %v6195_v29 = vld [vmem:[#allocation3 + $0x78] sm:$0xf] }
 0x294   : > { %v6045_v36 = vshrl.u32 %v12710_v24, 16  ;;  %v6048_v12 = vshll.u32 %v12710_v24, 16  ;;  %v12398_v1 = vcombine.low %v7489_v4, %v7499_v52  ;;  %v8453_v6 = vrot.slane %v8452_v27, 4  ;;  %458 = vst [vmem:[#allocation3 + $0x80] sm:$0x1] %v457_v19 }
 0x295   : > { %v6028_v21 = vshrl.u32 %v12708_v33, 16  ;;  %v6031_v13 = vshll.u32 %v12708_v33, 16  ;;  %v8463_v53 = vrot.slane %v8462_v16, 4  ;;  %v5769_v10 = vadd.f32 %v16618_v46, %v16526_v15  ;;  %v453_v46 = vld [vmem:[#allocation3 + $0x74] sm:$0x1] }
 0x296   : > { %v16718_v8 = vrot.slane %v6045_v36, 7  ;;  %9984 = vmatmul.mubr.bf16.gmra.mrb[192].mxu0 %v12398_v1  ;;  %v8458_v31 = vsel %vm14849_vm5, %v8453_v6, %v8457_v63  ;;  %v12415_v43 = vrot.slane %v7859_v5, 9  ;;  %v7977_v55 = vrot.slane %v7860_v7, 5  ;;  %v6188_v52 = vld [vmem:[#allocation3 + $0x6c] sm:$0xf]  ;;  %v14294_v16 = vld [vmem:[#allocation7 + $0x58] sm:$0xff]  }
 0x297   : > { %v16722_v11 = vrot.slane %v6028_v21, 7  ;;  %v8468_v24 = vsel %vm14849_vm5, %v8463_v53, %v8467_v26  ;;  %v5866_v4 = vadd.f32 %v16698_v61, %v5769_v10  ;;  %v7980_v15 = vrot.slane %v7861_v54, 5  ;;  %v406_v7 = vld [vmem:[#allocation3 + $0x90] sm:$0x1]  ;;  %v14293_v1 = vld [vmem:[#allocation3 + $0x54] sm:$0xff]   ;;  %13547 = vmatprep.subr.bf16.mxu1 %v14294_v16  ;;  %v16744_v53 = vpop.f32.mrb[134].mxu0 }
 0x298   : > { %v6050_v27 = vor.u32 %v6048_v12, %v16718_v8  ;;  %v6051_v33 = vrot.slane %v16718_v8, 4  ;;  %v12463_v63 = vcombine.low %v8458_v31, %v8468_v24  ;;  %v7978_v5 = vsel %vm14843_vm4, %v12415_v43, %v7977_v55  ;;  %v7348_v43 = vld [vmem:[#allocation3 + $0x4c] sm:$0xf] }
 0x299   : > { %v6033_v19 = vor.u32 %v6031_v13, %v16722_v11  ;;  %v6034_v26 = vrot.slane %v16722_v11, 4  ;;  %v5927_v61 = vmul.f32 %v16674_v42, %v5866_v4  ;;  %v7979_v36 = vrot.slane %v7977_v55, 4  ;;  %v7347_v13 = vld [vmem:[#allocation3 + $0x48] sm:$0xf] }
 0x29a   : > { %v6196_v12 = vsel %vm16184_vm13, %v6050_v27, %v6195_v29  ;;  %10088 = vmatprep.mubr.bf16.mxu1 %v12463_v63  ;;  %v16738_v6 = vadd.f32 %v16702_v47, %v16696_v39  ;;  %v454_v54 = vsel %vm16073_vm10, 0, %v453_v46  ;;  %v5761_v21 = vadd.f32 %v16590_v37, %v16506_v14  ;;  %v16753_v14 = vpop.f32.mrb[134].mxu1  ;;  %v7349_v27 = vld [vmem:[#allocation3 + $0x50] sm:$0x1] }
 0x29b   : > { %6197 = vst [vmem:[#allocation3 + $0x78] sm:$0xf] %v6196_v12  ;;  %v6189_v10 = vsel %vm16184_vm13, %v6033_v19, %v6188_v52  ;;  %v5950_v31 = vadd.f32 %v16688_v58, %v5927_v61  ;;  %v7981_v39 = vsel %vm14843_vm4, %v7979_v36, %v7980_v15  ;;  %455 = vst [vmem:[#allocation3 + $0x74] sm:$0x1] %v454_v54  ;;  %v407_v47 = vsel %vm16066_vm8, 0, %v406_v7  ;;  %v14295_v63 = vld [vmem:[#allocation7 + $0x18] sm:$0xff]  }
 0x29c   : > { %10089 = vmatmul.mubr.bf16.gmra.mrb[196].mxu1 %v14293_v1  ;;  %6190 = vst [vmem:[#allocation3 + $0x6c] sm:$0xf] %v6189_v10  ;;  %v12431_v37 = vcombine.low %v7978_v5, %v7981_v39  ;;  %v5858_v55 = vadd.f32 %v16708_v60, %v5761_v21  ;;  %408 = vst [vmem:[#allocation3 + $0x90] sm:$0x1] %v407_v47  ;;  %v5782_v29 = vadd.f32 %v16656_v18, %v16560_v30  ;;  %v16766_v19 = vld [vmem:[#allocation3 + $0x60] sm:$0xf] }
 0x29d   : > { %v16758_v24 = vadd.f32 %v13236_v57, %v13235_v51  ;;  %v5966_v4 = vmax.f32 %v5950_v31, 0.0  ;;  %v404_v15 = vsel %vm16066_vm8, 0, %v403_v3  ;;  %v5774_v46 = vadd.f32 %v16628_v38, %v16540_v50  ;;  %13548 = vmatpush3.bf16.msra.mxu1 %v14295_v63  ;;  %v16768_v61 = vpop.f32.mrb[135].mxu0  ;;  %v16770_v50 = vpop.f32.mrb[135].mxu1  ;;  %v14296_v21 = vld [vmem:[#allocation7 + $0x220] sm:$0xff]  }
 0x29e   : > { %v7501_v52 = vshrl.u32 %v7347_v13, 16  ;;  %9991 = vmatprep.mubr.bf16.mxu0 %v12431_v37  ;;  %v5925_v5 = vmul.f32 %v16674_v42, %v5858_v55  ;;  %v5879_v60 = vadd.f32 %v16714_v0, %v5782_v29  ;;  %405 = vst [vmem:[#allocation3 + $0x84] sm:$0x1] %v404_v15  ;;  %v7504_v7 = vshll.u32 %v7347_v13, 16  ;;  %v16775_v13 = vpop.f32.mrb[136].mxu0  ;;  %v16777_v10 = vpop.f32.mrb[136].mxu1  ;;  %13885 = vmatprep.subr.bf16.mxu0 %v14296_v21 }
 0x29f   : > { %v7510_v30 = vshll.u32 %v7348_v43, 16  ;;  %v12711_v18 = vpack.c.bf16 %v5966_v4, %v5966_v4  ;;  %v5871_v51 = vadd.f32 %v5870_v32, %v5774_v46  ;;  %v7514_v16 = vshrl.u32 %v7348_v43, 16  ;;  %v6199_v55 = vld [vmem:[#allocation3 + $0x80] sm:$0x1]  ;;  %13886 = vmatpush3.bf16.msra.mxu0 %v14296_v21 }
 0x2a0   : > { %v7503_v57 = vrot.slane %v7501_v52, 4  ;;  %v5948_v38 = vadd.f32 %v16688_v58, %v5925_v5  ;;  %v5930_v36 = vmul.f32 %v16674_v42, %v5879_v60  ;;  %v7506_v1 = vrot.slane %v7504_v7, 5 }
 0x2a1   : > { %v7512_v0 = vrot.slane %v7510_v30, 5  ;;  %v6053_v3 = vshrl.u32 %v12711_v18, 16  ;;  %v6056_v12 = vshll.u32 %v12711_v18, 16  ;;  %v5928_v54 = vmul.f32 %v16674_v42, %v5871_v51  ;;  %v16782_v51 = vpop.f32.mrb[137].mxu0 }
 0x2a2   : > { %v7516_v32 = vrot.slane %v7514_v16, 4  ;;  %v5964_v31 = vmax.f32 %v5948_v38, 0.0  ;;  %v5953_v39 = vadd.f32 %v16688_v58, %v5930_v36  ;;  %v7507_v47 = vor.u32 %v7506_v1, %v7503_v57  ;;  %v16786_v36 = vpop.f32.mrb[137].mxu1  ;;  %v14298_v1 = vld [vmem:[#allocation7 + $0x60] sm:$0xff]   ;;  %v16796_v8 = vpop.f32.mrb[138].mxu0 }
 0x2a3   : > { %v7520_v43 = vshll.u32 %v7349_v27, 16  ;;  %v6055_v37 = vrot.slane %v6053_v3, 7  ;;  %v5951_v29 = vadd.f32 %v16688_v58, %v5928_v54  ;;  %v8470_v15 = vshrl.u32 %v16766_v19, 16  ;;  %v6192_v54 = vld [vmem:[#allocation3 + $0x74] sm:$0x1]  ;;  %13549 = vmatprep.subr.bf16.mxu1 %v14298_v1 }
 0x2a4   : > { %v7517_v4 = vor.u32 %v7516_v32, %v7512_v0  ;;  %v12709_v46 = vpack.c.bf16 %v5964_v31, %v5964_v31  ;;  %v5969_v52 = vmax.f32 %v5953_v39, 0.0  ;;  %v7508_v63 = vrot.slane %v7507_v47, 4  ;;  %v8296_v31 = vld [vmem:[#allocation3 + $0x64] sm:$0xf]  ;;  %v8297_v39 = vld [vmem:[#allocation3 + $0x68] sm:$0x1] }
 0x2a5   : > { %v7522_v5 = vrot.slane %v7520_v43, 5  ;;  %v6058_v60 = vor.u32 %v6056_v12, %v6055_v37  ;;  %v6060_v7 = vrot.slane %v6055_v37, 4  ;;  %v5967_v30 = vmax.f32 %v5951_v29, 0.0 }
 0x2a6   : > { %v7518_v18 = vrot.slane %v7517_v4, 4  ;;  %v6036_v27 = vshrl.u32 %v12709_v46, 16  ;;  %v6039_v57 = vshll.u32 %v12709_v46, 16  ;;  %v12714_v16 = vpack.c.bf16 %v5969_v52, %v5969_v52  ;;  %v462_v46 = vld [vmem:[#allocation3 + $0x98] sm:$0x1] }
 0x2a7   : > { %v7513_v38 = vsel %vm14849_vm5, %v7508_v63, %v7512_v0  ;;  %v6059_v3 = vsel %vm16191_vm14, %v6051_v33, %v6058_v60  ;;  %v6200_v12 = vsel %vm16066_vm8, %v6060_v7, %v6199_v55  ;;  %v12712_v32 = vpack.c.bf16 %v5967_v30, %v5967_v30  ;;  %v7862_v7 = vld [vmem:[#allocation3 + $0x54] sm:$0xe]  ;;  %v16801_v30 = vpop.f32.mrb[138].mxu1 }
 0x2a8   : > { %v7523_v21 = vsel %vm14849_vm5, %v7518_v18, %v7522_v5  ;;  %6198 = vst [vmem:[#allocation3 + $0x7c] sm:$0xf] %v6059_v3  ;;  %6201 = vst [vmem:[#allocation3 + $0x80] sm:$0x1] %v6200_v12  ;;  %v6038_v0 = vrot.slane %v6036_v27, 7  ;;  %v6079_v47 = vshrl.u32 %v12714_v16, 16 }
 0x2a9   : > { %v6082_v43 = vshll.u32 %v12714_v16, 16  ;;  %v12399_v37 = vcombine.low %v7513_v38, %v7523_v21  ;;  %v6062_v33 = vshrl.u32 %v12712_v32, 16  ;;  %v6065_v29 = vshll.u32 %v12712_v32, 16  ;;  %v6209_v18 = vld [vmem:[#allocation3 + $0x90] sm:$0xf] }
 0x2aa   : > { %v8472_v4 = vrot.slane %v8470_v15, 4  ;;  %v8473_v55 = vshll.u32 %v16766_v19, 16  ;;  %v6041_v52 = vor.u32 %v6039_v57, %v6038_v0  ;;  %v6043_v63 = vrot.slane %v6038_v0, 4  ;;  %v7863_v3 = vld [vmem:[#allocation3 + $0x58] sm:$0xf] }
 0x2ab   : > { %v16799_v5 = vrot.slane %v6079_v47, 7  ;;  %9992 = vmatmul.mubr.bf16.gmra.mrb[196].mxu0 %v12399_v37  ;;  %v8479_v60 = vshll.u32 %v8296_v31, 16  ;;  %v16803_v27 = vrot.slane %v6062_v33, 7  ;;  %v8483_v38 = vshrl.u32 %v8296_v31, 16  ;;  %v7864_v15 = vld [vmem:[#allocation3 + $0x5c] sm:$0x1] }
 0x2ac   : > { %v8475_v16 = vrot.slane %v8473_v55, 5  ;;  %v8489_v1 = vshll.u32 %v8297_v39, 16  ;;  %v6042_v19 = vsel %vm16191_vm14, %v6034_v26, %v6041_v52  ;;  %v6193_v57 = vsel %vm16066_vm8, %v6043_v63, %v6192_v54  ;;  %v6202_v21 = vld [vmem:[#allocation3 + $0x84] sm:$0xf]  ;;  %v459_v0 = vld [vmem:[#allocation3 + $0x8c] sm:$0x1] }
 0x2ad   : > { %v6084_v12 = vor.u32 %v6082_v43, %v16799_v5  ;;  %v6085_v32 = vrot.slane %v16799_v5, 4  ;;  %v14299_v47 = vld [vmem:[#allocation7 + $0x20] sm:$0xff]   ;;  %6191 = vst [vmem:[#allocation3 + $0x70] sm:$0xf] %v6042_v19  ;;  %6194 = vst [vmem:[#allocation3 + $0x74] sm:$0x1] %v6193_v57  ;;  %v6067_v31 = vor.u32 %v6065_v29, %v16803_v27  ;;  %v16829_v19 = vadd.f32 %v16768_v61, %v16744_v53 }
 0x2ae   : > { %v6068_v39 = vrot.slane %v16803_v27, 4  ;;  %v8476_v11 = vor.u32 %v8475_v16, %v8472_v4  ;;  %v8481_v37 = vrot.slane %v8479_v60, 5  ;;  %v8485_v33 = vrot.slane %v8483_v38, 4  ;;  %v412_v55 = vld [vmem:[#allocation3 + $0xa8] sm:$0x1]  ;;  %13550 = vmatpush3.bf16.msra.mxu1 %v14299_v47  ;;  %v16819_v52 = vpop.f32.mrb[139].mxu0 }
 0x2af   : > { %v6210_v26 = vsel %vm16184_vm13, %v6084_v12, %v6209_v18  ;;  %v8491_v54 = vrot.slane %v8489_v1, 5  ;;  %v463_v43 = vsel %vm16073_vm10, 0, %v462_v46  ;;  %v6203_v29 = vsel %vm16184_vm13, %v6067_v31, %v6202_v21  ;;  %v16825_v18 = vpop.f32.mrb[139].mxu1  ;;  %v14300_v16 = vld [vmem:[#allocation7 + $0x228] sm:$0xff]   ;;  %v16831_v57 = vpop.f32.mrb[140].mxu0 }
 0x2b0   : > { %6211 = vst [vmem:[#allocation3 + $0x90] sm:$0xf] %v6210_v26  ;;  %v8477_v63 = vrot.slane %v8476_v11, 4  ;;  %464 = vst [vmem:[#allocation3 + $0x98] sm:$0x1] %v463_v43  ;;  %v5785_v4 = vadd.f32 %v16665_v56, %v16566_v41  ;;  %v12416_v60 = vrot.slane %v7862_v7, 9  ;;  %v8486_v38 = vor.u32 %v8485_v33, %v8481_v37  ;;  %13887 = vmatprep.subr.bf16.mxu0 %v14300_v16 }
 0x2b1   : > { %6204 = vst [vmem:[#allocation3 + $0x84] sm:$0xf] %v6203_v29  ;;  %v7984_v46 = vrot.slane %v7863_v3, 5  ;;  %v7987_v1 = vrot.slane %v7864_v15, 5  ;;  %v16833_v12 = vpop.f32.mrb[140].mxu1  ;;  %v460_v56 = vsel %vm16073_vm10, 0, %v459_v0  ;;  %v5777_v7 = vadd.f32 %v16638_v17, %v16546_v9  ;;  %13888 = vmatpush3.bf16.msra.mxu0 %v14300_v16 }
 0x2b2   : > { %v8482_v21 = vsel %vm14849_vm5, %v8477_v63, %v8481_v37  ;;  %v5882_v41 = vadd.f32 %v16753_v14, %v5785_v4  ;;  %v409_v3 = vld [vmem:[#allocation3 + $0x9c] sm:$0x1]  ;;  %v16842_v15 = vpop.f32.mrb[141].mxu0  ;;  %v8487_v53 = vrot.slane %v8486_v38, 4  ;;  %461 = vst [vmem:[#allocation3 + $0x8c] sm:$0x1] %v460_v56  ;;  %v5798_v17 = vadd.f32 %v16758_v24, %v16605_v22 }
 0x2b3   : > { %v7985_v61 = vsel %vm14843_vm4, %v12416_v60, %v7984_v46  ;;  %v7986_v47 = vrot.slane %v7984_v46, 4  ;;  %v413_v31 = vsel %vm16066_vm8, 0, %v412_v55  ;;  %v16848_v14 = vpop.f32.mrb[141].mxu1  ;;  %v5874_v9 = vadd.f32 %v16770_v50, %v5777_v7  ;;  %v7350_v37 = vld [vmem:[#allocation3 + $0x54] sm:$0xf]  ;;  %v14301_v29 = vld [vmem:[#allocation7 + $0x230] sm:$0xff]  }
 0x2b4   : > { %v5931_v0 = vmul.f32 %v16674_v42, %v5882_v41  ;;  %414 = vst [vmem:[#allocation3 + $0xa8] sm:$0x1] %v413_v31  ;;  %v16856_v11 = vadd.f32 %v16782_v51, %v16775_v13  ;;  %v7351_v26 = vld [vmem:[#allocation3 + $0x58] sm:$0xf]  ;;  %v8492_v33 = vsel %vm14849_vm5, %v8487_v53, %v8491_v54  ;;  %v410_v55 = vsel %vm16066_vm8, 0, %v409_v3  ;;  %v14302_v63 = vld [vmem:[#allocation7 + $0x68] sm:$0xff]   ;;  %13889 = vmatprep.subr.bf16.mxu0 %v14301_v29 }
 0x2b5   : > { %v7988_v43 = vsel %vm14843_vm4, %v7986_v47, %v7987_v1  ;;  %v5790_v50 = vadd.f32 %v16690_v20, %v16579_v34  ;;  %v12464_v22 = vcombine.low %v8482_v21, %v8492_v33  ;;  %v5929_v51 = vmul.f32 %v16674_v42, %v5874_v9  ;;  %411 = vst [vmem:[#allocation3 + $0x9c] sm:$0x1] %v410_v55  ;;  %v16868_v4 = vpop.f32.mrb[142].mxu0  ;;  %v16870_v54 = vpop.f32.mrb[142].mxu1  ;;  %v14303_v60 = vld [vmem:[#allocation7 + $0x28] sm:$0xff]   ;;  %v14304_v55 = vld [vmem:[#allocation7 + $0x238] sm:$0xff]  }
 0x2b6   : > { %v5954_v24 = vadd.f32 %v16688_v58, %v5931_v0  ;;  %v12432_v13 = vcombine.low %v7985_v61, %v7988_v43  ;;  %v5895_v16 = vadd.f32 %v16777_v10, %v5798_v17  ;;  %v14297_v38 = vld [vmem:[#allocation3 + $0x60] sm:$0xff]   ;;  %v7525_v34 = vshrl.u32 %v7350_v37, 16  ;;  %v7352_v41 = vld [vmem:[#allocation3 + $0x5c] sm:$0x1]  ;;  %v16875_v3 = vpop.f32.mrb[143].mxu0  ;;  %13551 = vmatprep.subr.bf16.mxu1 %v14302_v63  ;;  %13890 = vmatpush3.bf16.msra.mxu0 %v14301_v29  ;;  %v16879_v17 = vpop.f32.mrb[143].mxu1 }
 0x2b7   : > { %v5887_v46 = vadd.f32 %v16786_v36, %v5790_v50  ;;  %v7528_v20 = vshll.u32 %v7350_v37, 16  ;;  %10096 = vmatprep.mubr.bf16.mxu1 %v12464_v22  ;;  %v5952_v21 = vadd.f32 %v16688_v58, %v5929_v51  ;;  %v7534_v56 = vshll.u32 %v7351_v26, 16  ;;  %13552 = vmatpush3.bf16.msra.mxu1 %v14303_v60  ;;  %v468_v51 = vld [vmem:[#allocation3 + $0xb0] sm:$0x1] }
 0x2b8   : > { %v5970_v1 = vmax.f32 %v5954_v24, 0.0  ;;  %9999 = vmatprep.mubr.bf16.mxu0 %v12432_v13  ;;  %v7538_v7 = vshrl.u32 %v7351_v26, 16  ;;  %v5934_v53 = vmul.f32 %v16674_v42, %v5895_v16  ;;  %10097 = vmatmul.mubr.bf16.gmra.mrb[200].mxu1 %v14297_v38  ;;  %v7527_v61 = vrot.slane %v7525_v34, 4 }
 0x2b9   : > { %v5932_v10 = vmul.f32 %v16674_v42, %v5887_v46  ;;  %v7530_v36 = vrot.slane %v7528_v20, 5  ;;  %v5968_v31 = vmax.f32 %v5952_v21, 0.0  ;;  %v7536_v0 = vrot.slane %v7534_v56, 5  ;;  %13891 = vmatprep.subr.bf16.mxu0 %v14304_v55 }
 0x2ba   : > { %v12715_v47 = vpack.c.bf16 %v5970_v1, %v5970_v1  ;;  %v7540_v9 = vrot.slane %v7538_v7, 4  ;;  %v5957_v37 = vadd.f32 %v16688_v58, %v5934_v53  ;;  %v7544_v43 = vshll.u32 %v7352_v41, 16  ;;  %13892 = vmatpush3.bf16.msra.mxu0 %v14304_v55  ;;  %v6213_v1 = vld [vmem:[#allocation3 + $0x98] sm:$0x1]  ;;  %v7865_v53 = vld [vmem:[#allocation3 + $0x60] sm:$0xe] }
 0x2bb   : > { %v5955_v26 = vadd.f32 %v16688_v58, %v5932_v10  ;;  %v7531_v33 = vor.u32 %v7530_v36, %v7527_v61  ;;  %v12713_v24 = vpack.c.bf16 %v5968_v31, %v5968_v31  ;;  %v469_v7 = vsel %vm16073_vm10, 0, %v468_v51  ;;  %v14305_v10 = vld [vmem:[#allocation7 + $0x70] sm:$0xff]   ;;  %v465_v51 = vld [vmem:[#allocation3 + $0xa4] sm:$0x1] }
 0x2bc   : > { %v6087_v50 = vshrl.u32 %v12715_v47, 16  ;;  %v6090_v22 = vshll.u32 %v12715_v47, 16  ;;  %v7541_v13 = vor.u32 %v7540_v9, %v7536_v0  ;;  %v5973_v63 = vmax.f32 %v5957_v37, 0.0  ;;  %v6206_v31 = vld [vmem:[#allocation3 + $0x8c] sm:$0x1]  ;;  %13553 = vmatprep.subr.bf16.mxu1 %v14305_v10 }
 0x2bd   : > { %v5971_v16 = vmax.f32 %v5955_v26, 0.0  ;;  %v7532_v38 = vrot.slane %v7531_v33, 4  ;;  %v7546_v46 = vrot.slane %v7544_v43, 5  ;;  %v6070_v60 = vshrl.u32 %v12713_v24, 16  ;;  %470 = vst [vmem:[#allocation3 + $0xb0] sm:$0x1] %v469_v7 }
 0x2be   : > { %v6089_v29 = vrot.slane %v6087_v50, 7  ;;  %v6073_v34 = vshll.u32 %v12713_v24, 16  ;;  %v7542_v20 = vrot.slane %v7541_v13, 4  ;;  %v12718_v21 = vpack.c.bf16 %v5973_v63, %v5973_v63  ;;  %v7866_v37 = vld [vmem:[#allocation3 + $0x64] sm:$0xf]  ;;  %v14306_v63 = vld [vmem:[#allocation7 + $0xc0] sm:$0xff]  }
 0x2bf   : > { %v12716_v56 = vpack.c.bf16 %v5971_v16, %v5971_v16  ;;  %v7537_v41 = vsel %vm14849_vm5, %v7532_v38, %v7536_v0  ;;  %v6072_v47 = vrot.slane %v6070_v60, 7  ;;  %v7867_v50 = vld [vmem:[#allocation3 + $0x68] sm:$0x1]  ;;  %v5801_v5 = vadd.f32 %v16829_v19, %v16615_v62  ;;  %13605 = vmatprep.subr.bf16.mxu0 %v14306_v63 }
 0x2c0   : > { %v6092_v61 = vor.u32 %v6090_v22, %v6089_v29  ;;  %v6094_v36 = vrot.slane %v6089_v29, 4  ;;  %v7547_v9 = vsel %vm14849_vm5, %v7542_v20, %v7546_v46  ;;  %v6113_v26 = vshrl.u32 %v12718_v21, 16  ;;  %v418_v29 = vld [vmem:[#allocation3 + $0xc0] sm:$0x1]  ;;  %v6216_v20 = vld [vmem:[#allocation3 + $0x9c] sm:$0xf] }
 0x2c1   : > { %v6116_v33 = vshll.u32 %v12718_v21, 16  ;;  %v6096_v43 = vshrl.u32 %v12716_v56, 16  ;;  %v6099_v55 = vshll.u32 %v12716_v56, 16  ;;  %v6075_v24 = vor.u32 %v6073_v34, %v6072_v47  ;;  %v6223_v34 = vld [vmem:[#allocation3 + $0xa8] sm:$0xf] }
 0x2c2   : > { %v6093_v0 = vsel %vm16191_vm14, %v6085_v32, %v6092_v61  ;;  %v6214_v22 = vsel %vm16066_vm8, %v6094_v36, %v6213_v1  ;;  %v6077_v13 = vrot.slane %v6072_v47, 4  ;;  %v16895_v16 = vrot.slane %v6113_v26, 7  ;;  %v415_v56 = vld [vmem:[#allocation3 + $0xb4] sm:$0x1]  ;;  %v14307_v36 = vld [vmem:[#allocation7 + $0x30] sm:$0xff]  }
 0x2c3   : > { %6212 = vst [vmem:[#allocation3 + $0x94] sm:$0xf] %v6093_v0  ;;  %6215 = vst [vmem:[#allocation3 + $0x98] sm:$0x1] %v6214_v22  ;;  %v16897_v38 = vrot.slane %v6096_v43, 7  ;;  %v12400_v46 = vcombine.low %v7537_v41, %v7547_v9  ;;  %v6076_v32 = vsel %vm16191_vm14, %v6068_v39, %v6075_v24  ;;  %v12417_v1 = vrot.slane %v7865_v53, 9  ;;  %13554 = vmatpush3.bf16.msra.mxu1 %v14307_v36 }
 0x2c4   : > { %v6207_v60 = vsel %vm16066_vm8, %v6077_v13, %v6206_v31  ;;  %v7991_v21 = vrot.slane %v7866_v37, 5  ;;  %6205 = vst [vmem:[#allocation3 + $0x88] sm:$0xf] %v6076_v32  ;;  %v6118_v41 = vor.u32 %v6116_v33, %v16895_v16  ;;  %v6119_v62 = vrot.slane %v16895_v16, 4  ;;  %v7353_v39 = vld [vmem:[#allocation3 + $0x60] sm:$0xf] }
 0x2c5   : > { %6208 = vst [vmem:[#allocation3 + $0x8c] sm:$0x1] %v6207_v60  ;;  %v6101_v27 = vor.u32 %v6099_v55, %v16897_v38  ;;  %v6102_v19 = vrot.slane %v16897_v38, 4  ;;  %10000 = vmatmul.mubr.bf16.gmra.mrb[200].mxu0 %v12400_v46  ;;  %v5898_v7 = vadd.f32 %v16801_v30, %v5801_v5  ;;  %v7994_v61 = vrot.slane %v7867_v50, 5  ;;  %v7354_v30 = vld [vmem:[#allocation3 + $0x64] sm:$0xf] }
 0x2c6   : > { %v7992_v53 = vsel %vm14843_vm4, %v12417_v1, %v7991_v21  ;;  %v7993_v10 = vrot.slane %v7991_v21, 4  ;;  %v6224_v47 = vsel %vm16184_vm13, %v6118_v41, %v6223_v34  ;;  %v16920_v9 = vadd.f32 %v16819_v52, %v16796_v8  ;;  %v8789_v46 = vld [vmem:[#allocation3 + $0x18] sm:$0xe]  ;;  %v14312_v32 = vld [vmem:[#allocation7 + $0x78] sm:$0xff]  }
 0x2c7   : > { %v6217_v31 = vsel %vm16184_vm13, %v6101_v27, %v6216_v20  ;;  %v466_v37 = vsel %vm16073_vm10, 0, %v465_v51  ;;  %6225 = vst [vmem:[#allocation3 + $0xa8] sm:$0xf] %v6224_v47  ;;  %v5935_v26 = vmul.f32 %v16674_v42, %v5898_v7  ;;  %v5793_v43 = vadd.f32 %v16738_v6, %v16588_v23  ;;  %v7355_v23 = vld [vmem:[#allocation3 + $0x68] sm:$0x1]  ;;  %13555 = vmatprep.subr.bf16.mxu1 %v14312_v32 }
 0x2c8   : > { %6218 = vst [vmem:[#allocation3 + $0x9c] sm:$0xf] %v6217_v31  ;;  %v7995_v33 = vsel %vm14843_vm4, %v7993_v10, %v7994_v61  ;;  %467 = vst [vmem:[#allocation3 + $0xa4] sm:$0x1] %v466_v37  ;;  %v419_v55 = vsel %vm16066_vm8, 0, %v418_v29  ;;  %v13249_v52 = vadd.f32 %v16842_v15, %v16831_v57  ;;  %v416_v50 = vsel %vm16066_vm8, 0, %v415_v56 }
 0x2c9   : > { %v12433_v8 = vcombine.low %v7992_v53, %v7995_v33  ;;  %420 = vst [vmem:[#allocation3 + $0xc0] sm:$0x1] %v419_v55  ;;  %v5806_v0 = vadd.f32 %v16856_v11, %v16631_v44  ;;  %v5958_v22 = vadd.f32 %v16688_v58, %v5935_v26  ;;  %v5890_v24 = vadd.f32 %v16825_v18, %v5793_v43  ;;  %v14314_v53 = vld [vmem:[#allocation7 + $0x38] sm:$0xff]   ;;  %v8791_v47 = vld [vmem:[#allocation3 + $0x20] sm:$0x1] }
 0x2ca   : > { %417 = vst [vmem:[#allocation3 + $0xb4] sm:$0x1] %v416_v50  ;;  %v7549_v6 = vshrl.u32 %v7353_v39, 16  ;;  %v7552_v13 = vshll.u32 %v7353_v39, 16  ;;  %v5814_v51 = vadd.f32 %v13249_v52, %v16654_v2  ;;  %v7558_v57 = vshll.u32 %v7354_v30, 16  ;;  %13556 = vmatpush3.bf16.msra.mxu1 %v14314_v53 }
 0x2cb   : > { %10007 = vmatprep.mubr.bf16.mxu0 %v12433_v8  ;;  %v5903_v63 = vadd.f32 %v16848_v14, %v5806_v0  ;;  %v7562_v15 = vshrl.u32 %v7354_v30, 16  ;;  %v5974_v5 = vmax.f32 %v5958_v22, 0.0  ;;  %v5933_v29 = vmul.f32 %v16674_v42, %v5890_v24  ;;  %v8790_v39 = vld [vmem:[#allocation3 + $0x1c] sm:$0xf]  ;;  %v6227_v8 = vld [vmem:[#allocation3 + $0xb0] sm:$0x1] }
 0x2cc   : > { %v7551_v44 = vrot.slane %v7549_v6, 4  ;;  %v7554_v11 = vrot.slane %v7552_v13, 5  ;;  %v5911_v18 = vadd.f32 %v16833_v12, %v5814_v51  ;;  %v7560_v34 = vrot.slane %v7558_v57, 5  ;;  %v474_v13 = vld [vmem:[#allocation3 + $0xc8] sm:$0x1] }
 0x2cd   : > { %v5936_v60 = vmul.f32 %v16674_v42, %v5903_v63  ;;  %v7564_v20 = vrot.slane %v7562_v15, 4  ;;  %v12719_v1 = vpack.c.bf16 %v5974_v5, %v5974_v5  ;;  %v5956_v2 = vadd.f32 %v16688_v58, %v5933_v29  ;;  %v471_v32 = vld [vmem:[#allocation3 + $0xbc] sm:$0x1] }
 0x2ce   : > { %v7555_v21 = vor.u32 %v7554_v11, %v7551_v44  ;;  %v7568_v14 = vshll.u32 %v7355_v23, 16  ;;  %v5938_v56 = vmul.f32 %v16674_v42, %v5911_v18  ;;  %v12474_v7 = vrot.slane %v8789_v46, 9 }
 0x2cf   : > { %v5959_v41 = vadd.f32 %v16688_v58, %v5936_v60  ;;  %v7565_v27 = vor.u32 %v7564_v20, %v7560_v34  ;;  %v6121_v10 = vshrl.u32 %v12719_v1, 16  ;;  %v6124_v12 = vshll.u32 %v12719_v1, 16  ;;  %v6220_v44 = vld [vmem:[#allocation3 + $0xa4] sm:$0x1]  ;;  %v8792_v1 = vld [vmem:[#allocation3 + $0x24] sm:$0xe] }
 0x2d0   : > { %v5972_v61 = vmax.f32 %v5956_v2, 0.0  ;;  %v7556_v36 = vrot.slane %v7555_v21, 4  ;;  %v5961_v31 = vadd.f32 %v16688_v58, %v5938_v56  ;;  %v7570_v26 = vrot.slane %v7568_v14, 5 }
 0x2d1   : > { %v5975_v37 = vmax.f32 %v5959_v41, 0.0  ;;  %v7566_v30 = vrot.slane %v7565_v27, 4  ;;  %v6123_v33 = vrot.slane %v6121_v10, 7  ;;  %v8887_v55 = vrot.slane %v8790_v39, 5  ;;  %v6230_v20 = vld [vmem:[#allocation3 + $0xb4] sm:$0xf] }
 0x2d2   : > { %v12717_v43 = vpack.c.bf16 %v5972_v61, %v5972_v61  ;;  %v7561_v42 = vsel %vm14849_vm5, %v7556_v36, %v7560_v34  ;;  %v5977_v52 = vmax.f32 %v5961_v31, 0.0  ;;  %v8890_v22 = vrot.slane %v8791_v47, 5  ;;  %v8794_v41 = vld [vmem:[#allocation3 + $0x2c] sm:$0x1]  ;;  %v8795_v27 = vld [vmem:[#allocation3 + $0x30] sm:$0xe] }
 0x2d3   : > { %v12720_v50 = vpack.c.bf16 %v5975_v37, %v5975_v37  ;;  %v7571_v0 = vsel %vm14849_vm5, %v7566_v30, %v7570_v26  ;;  %v6126_v24 = vor.u32 %v6124_v12, %v6123_v33  ;;  %v6128_v23 = vrot.slane %v6123_v33, 4  ;;  %v8796_v39 = vld [vmem:[#allocation3 + $0x34] sm:$0xf]  ;;  %v8298_v26 = vld [vmem:[#allocation3 + $0x6c] sm:$0xf] }
 0x2d4   : > { %v6104_v58 = vshrl.u32 %v12717_v43, 16  ;;  %v6107_v6 = vshll.u32 %v12717_v43, 16  ;;  %v12722_v51 = vpack.c.bf16 %v5977_v52, %v5977_v52  ;;  %v12401_v15 = vcombine.low %v7561_v42, %v7571_v0 }
 0x2d5   : > { %v6130_v63 = vshrl.u32 %v12720_v50, 16  ;;  %v6133_v57 = vshll.u32 %v12720_v50, 16  ;;  %v6127_v46 = vsel %vm16191_vm14, %v6119_v62, %v6126_v24  ;;  %v6228_v5 = vsel %vm16066_vm8, %v6128_v23, %v6227_v8  ;;  %v8793_v62 = vld [vmem:[#allocation3 + $0x28] sm:$0xf] }
 0x2d6   : > { %v6106_v29 = vrot.slane %v6104_v58, 7  ;;  %v8888_v11 = vsel %vm14843_vm4, %v12474_v7, %v8887_v55  ;;  %6226 = vst [vmem:[#allocation3 + $0xac] sm:$0xf] %v6127_v46  ;;  %6229 = vst [vmem:[#allocation3 + $0xb0] sm:$0x1] %v6228_v5  ;;  %v6147_v18 = vshrl.u32 %v12722_v51, 16  ;;  %10008 = vmatmul.mubr.bf16.gmra.mrb[204].mxu0 %v12401_v15  ;;  %v13252_v56 = vadd.f32 %v16875_v3, %v16868_v4 }
 0x2d7   : > { %v6150_v60 = vshll.u32 %v12722_v51, 16  ;;  %v16960_v34 = vrot.slane %v6130_v63, 7  ;;  %v8889_v16 = vrot.slane %v8887_v55, 4  ;;  %v475_v14 = vsel %vm16073_vm10, 0, %v474_v13  ;;  %v6237_v3 = vld [vmem:[#allocation3 + $0xc0] sm:$0xf] }
 0x2d8   : > { %v6109_v2 = vor.u32 %v6107_v6, %v6106_v29  ;;  %v6111_v21 = vrot.slane %v6106_v29, 4  ;;  %v16966_v7 = vrot.slane %v6147_v18, 7  ;;  %476 = vst [vmem:[#allocation3 + $0xc8] sm:$0x1] %v475_v14  ;;  %v5817_v47 = vadd.f32 %v13252_v56, %v16677_v45  ;;  %v8299_v55 = vld [vmem:[#allocation3 + $0x70] sm:$0xf] }
 0x2d9   : > { %v6135_v53 = vor.u32 %v6133_v57, %v16960_v34  ;;  %v6136_v10 = vrot.slane %v16960_v34, 4  ;;  %v8891_v12 = vsel %vm14843_vm4, %v8889_v16, %v8890_v22  ;;  %v472_v38 = vsel %vm16073_vm10, 0, %v471_v32  ;;  %v14390_v22 = vld [vmem:[%s17817_s3] ss:$0 sm:$0xff]  ;;  %v14320_v13 = vld [vmem:[#allocation7 + $0x140] sm:$0xff]  }
 0x2da   : > { %v6110_v61 = vsel %vm16191_vm14, %v6102_v19, %v6109_v2  ;;  %v6221_v4 = vsel %vm16066_vm8, %v6111_v21, %v6220_v44  ;;  %v12490_v36 = vcombine.low %v8888_v11, %v8891_v12  ;;  %v6152_v31 = vor.u32 %v6150_v60, %v16966_v7  ;;  %v8797_v19 = vld [vmem:[#allocation3 + $0x38] sm:$0x1]  ;;  %473 = vst [vmem:[#allocation3 + $0xbc] sm:$0x1] %v472_v38  ;;  %v14391_v51 = vld [vmem:[%s17818_s4] ss:$0 sm:$0xff] }
 0x2db   : > { %6219 = vst [vmem:[#allocation3 + $0xa0] sm:$0xf] %v6110_v61  ;;  %6222 = vst [vmem:[#allocation3 + $0xa4] sm:$0x1] %v6221_v4  ;;  %v6153_v37 = vrot.slane %v16966_v7, 4  ;;  %v6231_v30 = vsel %vm16184_vm13, %v6135_v53, %v6230_v20  ;;  %v5914_v33 = vadd.f32 %v16870_v54, %v5817_v47  ;;  %v5809_v45 = vadd.f32 %v16920_v9, %v16649_v35  ;;  %v14308_v15 = vld [vmem:[#allocation7 + $0x80] sm:$0xff]  }
 0x2dc   : > { %6232 = vst [vmem:[#allocation3 + $0xb4] sm:$0xf] %v6231_v30  ;;  %13893 = vmatprep.mubr.bf16.mxu0 %v12490_v36  ;;  %v12475_v43 = vrot.slane %v8792_v1, 9  ;;  %v8894_v42 = vrot.slane %v8793_v62, 5  ;;  %v6238_v8 = vsel %vm16184_vm13, %v6152_v31, %v6237_v3  ;;  %v8897_v52 = vrot.slane %v8794_v41, 5  ;;  %v14309_v32 = vld [vmem:[#allocation7 + $0xc8] sm:$0xff]   ;;  %13669 = vmatprep.subr.bf16.mxu1 %v14320_v13 }
 0x2dd   : > { %v12476_v50 = vrot.slane %v8795_v27, 9  ;;  %v8901_v0 = vrot.slane %v8796_v39, 5  ;;  %6239 = vst [vmem:[#allocation3 + $0xc0] sm:$0xf] %v6238_v8  ;;  %v5939_v24 = vmul.f32 %v14390_v22, %v5914_v33  ;;  %v5906_v54 = vadd.f32 %v16879_v17, %v5809_v45  ;;  %v8300_v46 = vld [vmem:[#allocation3 + $0x74] sm:$0x1] }
 0x2de   : > { %v8895_v35 = vsel %vm14843_vm4, %v12475_v43, %v8894_v42  ;;  %v8896_v9 = vrot.slane %v8894_v42, 4  ;;  %v8904_v58 = vrot.slane %v8797_v19, 5  ;;  %v8494_v6 = vshrl.u32 %v8298_v26, 16  ;;  %v8798_v29 = vld [vmem:[#allocation3 + $0x3c] sm:$0xe]  ;;  %v14310_v56 = vld [vmem:[#allocation7 + $0x88] sm:$0xff]  }
 0x2df   : > { %v8902_v23 = vsel %vm14843_vm4, %v12476_v50, %v8901_v0  ;;  %v8903_v40 = vrot.slane %v8901_v0, 4  ;;  %v5962_v63 = vadd.f32 %v14391_v51, %v5939_v24  ;;  %v5937_v57 = vmul.f32 %v14390_v22, %v5906_v54  ;;  %v8799_v20 = vld [vmem:[#allocation3 + $0x40] sm:$0xf]  ;;  %v8800_v21 = vld [vmem:[#allocation3 + $0x44] sm:$0x1]  ;;  %v14313_v12 = vld [vmem:[#allocation7 + $0xd0] sm:$0xff]  }
 0x2e0   : > { %v8898_v17 = vsel %vm14843_vm4, %v8896_v9, %v8897_v52  ;;  %v8497_v5 = vshll.u32 %v8298_v26, 16  ;;  %v8496_v18 = vrot.slane %v8494_v6, 4  ;;  %v8503_v60 = vshll.u32 %v8299_v55, 16  ;;  %v8801_v14 = vld [vmem:[#allocation3 + $0x48] sm:$0xe] }
 0x2e1   : > { %v12491_v44 = vcombine.low %v8895_v35, %v8898_v17  ;;  %v8905_v11 = vsel %vm14843_vm4, %v8903_v40, %v8904_v58  ;;  %v5978_v16 = vmax.f32 %v5962_v63, 0.0  ;;  %v5960_v1 = vadd.f32 %v14391_v51, %v5937_v57  ;;  %v8802_v47 = vld [vmem:[#allocation3 + $0x4c] sm:$0xf]  ;;  %v8803_v42 = vld [vmem:[#allocation3 + $0x50] sm:$0x1] }
 0x2e2   : > { %v12492_v62 = vcombine.low %v8902_v23, %v8905_v11  ;;  %v8499_v2 = vrot.slane %v8497_v5, 5  ;;  %v17005_v41 = vrot.slane %v8503_v60, 5  ;;  %v8507_v27 = vshrl.u32 %v8299_v55, 16  ;;  %v6412_v55 = vld [vmem:[#allocation3 + $0x60] sm:$0xf]  ;;  %v14315_v24 = vld [vmem:[#allocation7 + $0x90] sm:$0xff]  }
 0x2e3   : > { %13894 = vmatmul.mubr.bf16.vlgmr.msra.gmra.mrb[208].mxu0 %v12491_v44  ;;  %v8513_v39 = vshll.u32 %v8300_v46, 16  ;;  %v12477_v53 = vrot.slane %v8798_v29, 9  ;;  %v12723_v61 = vpack.c.bf16 %v5978_v16, %v5978_v16  ;;  %v5976_v4 = vmax.f32 %v5960_v1, 0.0  ;;  %v6241_v8 = vld [vmem:[#allocation3 + $0xc8] sm:$0x1]  ;;  %v14316_v40 = vld [vmem:[#allocation7 + $0xd8] sm:$0xff]  }
 0x2e4   : > { %13897 = vmatprep.mubr.bf16.mxu0 %v12492_v62  ;;  %13606 = vmatpush3.bf16.msra.mxu0 %v14308_v15  ;;  %v8500_v3 = vor.u32 %v8499_v2, %v8496_v18  ;;  %v8908_v36 = vrot.slane %v8799_v20, 5  ;;  %v8509_v31 = vrot.slane %v8507_v27, 4  ;;  %v8911_v38 = vrot.slane %v8800_v21, 5  ;;  %v6413_v63 = vld [vmem:[#allocation3 + $0x64] sm:$0xf] }
 0x2e5   : > { %13607 = vmatprep.subr.bf16.mxu0 %v14309_v32  ;;  %v8515_v30 = vrot.slane %v8513_v39, 5  ;;  %v12478_v19 = vrot.slane %v8801_v14, 9  ;;  %v6155_v26 = vshrl.u32 %v12723_v61, 16  ;;  %v6158_v33 = vshll.u32 %v12723_v61, 16  ;;  %v6414_v5 = vld [vmem:[#allocation3 + $0x68] sm:$0x1] }
 0x2e6   : > { %v12721_v45 = vpack.c.bf16 %v5976_v4, %v5976_v4  ;;  %v8501_v43 = vrot.slane %v8500_v3, 4  ;;  %v8510_v52 = vor.u32 %v8509_v31, %v17005_v41  ;;  %v8909_v50 = vsel %vm14843_vm4, %v12477_v53, %v8908_v36  ;;  %v8804_v29 = vld [vmem:[#allocation3 + $0x54] sm:$0xe]  ;;  %v6234_v44 = vld [vmem:[#allocation3 + $0xbc] sm:$0x1] }
 0x2e7   : > { %v8910_v0 = vrot.slane %v8908_v36, 4  ;;  %v8915_v22 = vrot.slane %v8802_v47, 5  ;;  %v6157_v54 = vrot.slane %v6155_v26, 7  ;;  %v8918_v32 = vrot.slane %v8803_v42, 5  ;;  %v8805_v20 = vld [vmem:[#allocation3 + $0x58] sm:$0xf] }
 0x2e8   : > { %v6138_v35 = vshrl.u32 %v12721_v45, 16  ;;  %v6141_v9 = vshll.u32 %v12721_v45, 16  ;;  %13608 = vmatpush3.bf16.msra.mxu0 %v14310_v56  ;;  %v8506_v23 = vsel %vm14849_vm5, %v8501_v43, %v17005_v41  ;;  %v8511_v58 = vrot.slane %v8510_v52, 4  ;;  %v8806_v16 = vld [vmem:[#allocation3 + $0x5c] sm:$0x1]  ;;  %v14311_v56 = vld [vmem:[#allocation3 + $0x6c] sm:$0xff]  }
 0x2e9   : > { %v8912_v6 = vsel %vm14843_vm4, %v8910_v0, %v8911_v38  ;;  %13609 = vmatprep.subr.bf16.mxu0 %v14313_v12  ;;  %v8916_v13 = vsel %vm14843_vm4, %v12478_v19, %v8915_v22  ;;  %v8917_v51 = vrot.slane %v8915_v22, 4  ;;  %v6160_v57 = vor.u32 %v6158_v33, %v6157_v54  ;;  %v8807_v1 = vld [vmem:[#allocation3 + $0x60] sm:$0xe]  ;;  %v14317_v41 = vld [vmem:[#allocation7 + $0x98] sm:$0xff]   ;;  %v8808_v27 = vld [vmem:[#allocation3 + $0x64] sm:$0xf] }
 0x2ea   : > { %v6162_v17 = vrot.slane %v6157_v54, 4  ;;  %v6140_v15 = vrot.slane %v6138_v35, 7  ;;  %v12493_v46 = vcombine.low %v8909_v50, %v8912_v6  ;;  %v8516_v11 = vsel %vm14849_vm5, %v8511_v58, %v8515_v30  ;;  %v8809_v61 = vld [vmem:[#allocation3 + $0x68] sm:$0x1]  ;;  %v14319_v31 = vld [vmem:[#allocation7 + $0xe0] sm:$0xff]   ;;  %v14323_v35 = vld [vmem:[#allocation7 + $0xe8] sm:$0xff]  }
 0x2eb   : > { %v6629_v18 = vshrl.u32 %v6412_v55, 16  ;;  %v6632_v60 = vshll.u32 %v6412_v55, 16  ;;  %v6161_v62 = vsel %vm16191_vm14, %v6153_v37, %v6160_v57  ;;  %v12465_v39 = vcombine.low %v8506_v23, %v8516_v11  ;;  %v6415_v37 = vld [vmem:[#allocation3 + $0x6c] sm:$0xf]  ;;  %v14321_v33 = vld [vmem:[#allocation7 + $0xa0] sm:$0xff]  }
 0x2ec   : > { %v6242_v2 = vsel %vm16066_vm8, %v6162_v17, %v6241_v8  ;;  %v6143_v21 = vor.u32 %v6141_v9, %v6140_v15  ;;  %v6145_v14 = vrot.slane %v6140_v15, 4  ;;  %13898 = vmatmul.mubr.bf16.gmra.mrb[212].mxu0 %v12493_v46  ;;  %6240 = vst [vmem:[#allocation3 + $0xc4] sm:$0xf] %v6161_v62  ;;  %v8919_v53 = vsel %vm14843_vm4, %v8917_v51, %v8918_v32  ;;  %v6416_v43 = vld [vmem:[#allocation3 + $0x70] sm:$0xf]  ;;  %v14324_v46 = vld [vmem:[#allocation7 + $0xa8] sm:$0xff]  }
 0x2ed   : > { %6243 = vst [vmem:[#allocation3 + $0xc8] sm:$0x1] %v6242_v2  ;;  %v6631_v12 = vrot.slane %v6629_v18, 4  ;;  %v6634_v7 = vrot.slane %v6632_v60, 5  ;;  %13610 = vmatpush3.bf16.msra.mxu0 %v14315_v24  ;;  %v12494_v36 = vcombine.low %v8916_v13, %v8919_v53  ;;  %v6638_v47 = vshll.u32 %v6413_v63, 16  ;;  %10104 = vmatprep.mubr.bf16.mxu1 %v12465_v39  ;;  %v14322_v62 = vld [vmem:[#allocation7 + $0x100] sm:$0xff]  }
 0x2ee   : > { %v6144_v4 = vsel %vm16191_vm14, %v6136_v10, %v6143_v21  ;;  %v6235_v3 = vsel %vm16066_vm8, %v6145_v14, %v6234_v44  ;;  %13611 = vmatprep.subr.bf16.mxu0 %v14316_v40  ;;  %v6642_v38 = vshrl.u32 %v6413_v63, 16  ;;  %v6648_v19 = vshll.u32 %v6414_v5, 16  ;;  %10105 = vmatmul.mubr.bf16.gmra.mrb[204].mxu1 %v14311_v56  ;;  %v6417_v50 = vld [vmem:[#allocation3 + $0x74] sm:$0x1]  ;;  %v8810_v9 = vld [vmem:[#allocation3 + $0x6c] sm:$0xe] }
 0x2ef   : > { %6233 = vst [vmem:[#allocation3 + $0xb8] sm:$0xf] %v6144_v4  ;;  %6236 = vst [vmem:[#allocation3 + $0xbc] sm:$0x1] %v6235_v3  ;;  %v6635_v30 = vor.u32 %v6634_v7, %v6631_v12  ;;  %v12479_v26 = vrot.slane %v8804_v29, 9  ;;  %13901 = vmatprep.mubr.bf16.mxu0 %v12494_v36  ;;  %v6640_v34 = vrot.slane %v6638_v47, 5 }
 0x2f0   : > { %v8922_v28 = vrot.slane %v8805_v20, 5  ;;  %v8925_v10 = vrot.slane %v8806_v16, 5  ;;  %v12480_v45 = vrot.slane %v8807_v1, 9  ;;  %v6644_v55 = vrot.slane %v6642_v38, 4  ;;  %v8811_v23 = vld [vmem:[#allocation3 + $0x70] sm:$0xf] }
 0x2f1   : > { %v6636_v42 = vrot.slane %v6635_v30, 4  ;;  %v6650_v8 = vrot.slane %v6648_v19, 5  ;;  %13612 = vmatpush3.bf16.msra.mxu0 %v14317_v41  ;;  %v8929_v52 = vrot.slane %v8808_v27, 5  ;;  %v8932_v24 = vrot.slane %v8809_v61, 5  ;;  %v8812_v51 = vld [vmem:[#allocation3 + $0x74] sm:$0x1] }
 0x2f2   : > { %v8923_v0 = vsel %vm14843_vm4, %v12479_v26, %v8922_v28  ;;  %v8924_v22 = vrot.slane %v8922_v28, 4  ;;  %13613 = vmatprep.subr.bf16.mxu0 %v14319_v31  ;;  %v6653_v54 = vshrl.u32 %v6415_v37, 16  ;;  %v6645_v58 = vor.u32 %v6644_v55, %v6640_v34  ;;  %v6418_v5 = vld [vmem:[#allocation3 + $0x78] sm:$0xf]  ;;  %v6419_v18 = vld [vmem:[#allocation3 + $0x7c] sm:$0xf] }
 0x2f3   : > { %v6641_v40 = vsel %vm14849_vm5, %v6636_v42, %v6640_v34  ;;  %v8930_v6 = vsel %vm14843_vm4, %v12480_v45, %v8929_v52  ;;  %v8931_v13 = vrot.slane %v8929_v52, 4  ;;  %v6656_v17 = vshll.u32 %v6415_v37, 16  ;;  %v14326_v2 = vld [vmem:[#allocation7 + $0xf0] sm:$0xff]   ;;  %v6420_v21 = vld [vmem:[#allocation3 + $0x80] sm:$0x1]  ;;  %v14331_v3 = vld [vmem:[#allocation7 + $0xf8] sm:$0xff]  }
 0x2f4   : > { %v8926_v63 = vsel %vm14843_vm4, %v8924_v22, %v8925_v10  ;;  %v6655_v57 = vrot.slane %v6653_v54, 4  ;;  %v6662_v15 = vshll.u32 %v6416_v43, 16  ;;  %v6646_v29 = vrot.slane %v6645_v58, 4  ;;  %v14318_v56 = vld [vmem:[#allocation3 + $0x60] sm:$0xff]   ;;  %v14328_v12 = vld [vmem:[#allocation7 + $0xb0] sm:$0xff]  }
 0x2f5   : > { %v12495_v44 = vcombine.low %v8923_v0, %v8926_v63  ;;  %v8933_v11 = vsel %vm14843_vm4, %v8931_v13, %v8932_v24  ;;  %v6666_v32 = vshrl.u32 %v6416_v43, 16  ;;  %13614 = vmatpush3.bf16.msra.mxu0 %v14321_v33  ;;  %v6658_v20 = vrot.slane %v6656_v17, 5  ;;  %v14327_v53 = vld [vmem:[#allocation7 + $0x148] sm:$0xff]   ;;  %v14332_v0 = vld [vmem:[#allocation7 + $0xb8] sm:$0xff]   ;;  %v14334_v24 = vld [vmem:[#allocation7 + $0x150] sm:$0xff]  }
 0x2f6   : > { %v12496_v60 = vcombine.low %v8930_v6, %v8933_v11  ;;  %v6664_v16 = vrot.slane %v6662_v15, 5  ;;  %v6672_v1 = vshll.u32 %v6417_v50, 16  ;;  %13615 = vmatprep.subr.bf16.mxu0 %v14323_v35  ;;  %v6651_v14 = vsel %vm14849_vm5, %v6646_v29, %v6650_v8  ;;  %v14330_v45 = vld [vmem:[#allocation7 + $0x108] sm:$0xff]   ;;  %v14329_v50 = vld [vmem:[#allocation3 + $0x6c] sm:$0xff]   ;;  %v6422_v15 = vld [vmem:[#allocation3 + $0x88] sm:$0xf] }
 0x2f7   : > { %13902 = vmatmul.mubr.bf16.gmra.mrb[216].mxu0 %v12495_v44  ;;  %v6668_v41 = vrot.slane %v6666_v32, 4  ;;  %v12481_v27 = vrot.slane %v8810_v9, 9  ;;  %v8936_v39 = vrot.slane %v8811_v23, 5  ;;  %v12338_v7 = vcombine.low %v6641_v40, %v6651_v14  ;;  %v6924_v43 = vld [vmem:[#allocation3 + $0x60] sm:$0xe]  ;;  %v14336_v44 = vld [vmem:[#allocation7 + $0x110] sm:$0xff]  }
 0x2f8   : > { %13905 = vmatprep.mubr.bf16.mxu0 %v12496_v60  ;;  %v6659_v61 = vor.u32 %v6658_v20, %v6655_v57  ;;  %v6674_v37 = vrot.slane %v6672_v1, 5  ;;  %v8939_v4 = vrot.slane %v8812_v51, 5  ;;  %v6677_v31 = vshrl.u32 %v6418_v5, 16  ;;  %v6925_v22 = vld [vmem:[#allocation3 + $0x64] sm:$0xf]  ;;  %v14325_v57 = vld [vmem:[#allocation3 + $0x6c] sm:$0xff]  }
 0x2f9   : > { %v6669_v36 = vor.u32 %v6668_v41, %v6664_v16  ;;  %13616 = vmatpush3.bf16.msra.mxu0 %v14324_v46  ;;  %v8938_v47 = vrot.slane %v8936_v39, 4  ;;  %11000 = vmatprep.mubr.bf16.mxu1 %v12338_v7  ;;  %v6680_v38 = vshll.u32 %v6418_v5, 16  ;;  %v6686_v19 = vshll.u32 %v6419_v18, 16  ;;  %v6926_v40 = vld [vmem:[#allocation3 + $0x68] sm:$0x1] }
 0x2fa   : > { %v6660_v30 = vrot.slane %v6659_v61, 4  ;;  %13617 = vmatprep.subr.bf16.mxu0 %v14326_v2  ;;  %v6690_v26 = vshrl.u32 %v6419_v18, 16  ;;  %11001 = vmatmul.mubr.bf16.vlgmr.msra.gmra.mrb[208].mxu1 %v14318_v56  ;;  %v6679_v28 = vrot.slane %v6677_v31, 4  ;;  %v6696_v10 = vshll.u32 %v6420_v21, 16  ;;  %v6421_v63 = vld [vmem:[#allocation3 + $0x84] sm:$0xf] }
 0x2fb   : > { %v6670_v33 = vrot.slane %v6669_v36, 4  ;;  %v8940_v34 = vsel %vm14843_vm4, %v8938_v47, %v8939_v4  ;;  %13670 = vmatpush3.bf16.msra.mxu1 %v14322_v62  ;;  %v8937_v55 = vsel %vm14843_vm4, %v12481_v27, %v8936_v39  ;;  %v6682_v8 = vrot.slane %v6680_v38, 5  ;;  %v6423_v46 = vld [vmem:[#allocation3 + $0x8c] sm:$0x1]  ;;  %v14335_v4 = vld [vmem:[#allocation3 + $0x78] sm:$0xff]  }
 0x2fc   : > { %v6665_v42 = vsel %vm14849_vm5, %v6660_v30, %v6664_v16  ;;  %v6688_v52 = vrot.slane %v6686_v19, 5  ;;  %v12497_v35 = vcombine.low %v8937_v55, %v8940_v34  ;;  %13671 = vmatprep.subr.bf16.mxu1 %v14327_v53  ;;  %v6692_v9 = vrot.slane %v6690_v26, 4  ;;  %v6928_v36 = vld [vmem:[#allocation3 + $0x70] sm:$0xf]  ;;  %v6929_v30 = vld [vmem:[#allocation3 + $0x74] sm:$0x1] }
 0x2fd   : > { %v6675_v54 = vsel %vm14849_vm5, %v6670_v33, %v6674_v37  ;;  %v6698_v23 = vrot.slane %v6696_v10, 5  ;;  %13618 = vmatpush3.bf16.msra.mxu0 %v14328_v12  ;;  %v6683_v6 = vor.u32 %v6682_v8, %v6679_v28  ;;  %v12354_v13 = vrot.slane %v6924_v43, 9  ;;  %v14338_v12 = vld [vmem:[#allocation7 + $0x158] sm:$0xff]   ;;  %v14341_v34 = vld [vmem:[#allocation7 + $0x1c0] sm:$0xff]  }
 0x2fe   : > { %v12339_v58 = vcombine.low %v6665_v42, %v6675_v54  ;;  %13619 = vmatprep.subr.bf16.mxu0 %v14331_v3  ;;  %v7054_v51 = vrot.slane %v6925_v22, 5  ;;  %v6693_v17 = vor.u32 %v6692_v9, %v6688_v52  ;;  %v6701_v5 = vshrl.u32 %v6421_v63, 16  ;;  %v6927_v3 = vld [vmem:[#allocation3 + $0x6c] sm:$0xe]  ;;  %v14340_v26 = vld [vmem:[#allocation7 + $0x118] sm:$0xff]   ;;  %v14333_v28 = vld [vmem:[#allocation3 + $0x78] sm:$0xff]  }
 0x2ff   : > { %13906 = vmatmul.mubr.bf16.gmra.mrb[220].mxu0 %v12497_v35  ;;  %v6704_v29 = vshll.u32 %v6421_v63, 16  ;;  %v6684_v11 = vrot.slane %v6683_v6, 4  ;;  %v7057_v18 = vrot.slane %v6926_v40, 5  ;;  %v6710_v60 = vshll.u32 %v6422_v15, 16  ;;  %13672 = vmatpush3.bf16.msra.mxu1 %v14330_v45  ;;  %v6424_v43 = vld [vmem:[#allocation3 + $0x90] sm:$0xf] }
 0x300   : > { %11008 = vmatprep.mubr.bf16.mxu1 %v12339_v58  ;;  %11097 = vmatprep.mubr.bf16.mxu0 %v14329_v50  ;;  %v7056_v32 = vrot.slane %v7054_v51, 4  ;;  %v6694_v20 = vrot.slane %v6693_v17, 4  ;;  %v6703_v16 = vrot.slane %v6701_v5, 4  ;;  %v6714_v62 = vshrl.u32 %v6422_v15, 16  ;;  %v6425_v42 = vld [vmem:[#allocation3 + $0x94] sm:$0xf] }
 0x301   : > { %13620 = vmatpush3.bf16.msra.mxu0 %v14332_v0  ;;  %v6706_v1 = vrot.slane %v6704_v29, 5  ;;  %v7055_v2 = vsel %vm14843_vm4, %v12354_v13, %v7054_v51  ;;  %13673 = vmatprep.subr.bf16.mxu1 %v14334_v24  ;;  %v6712_v14 = vrot.slane %v6710_v60, 5  ;;  %v6720_v56 = vshll.u32 %v6423_v46, 16  ;;  %v6426_v55 = vld [vmem:[#allocation3 + $0x98] sm:$0x1]  ;;  %v14339_v17 = vld [vmem:[#allocation3 + $0x84] sm:$0xff]  }
 0x302   : > { %v7058_v21 = vsel %vm14843_vm4, %v7056_v32, %v7057_v18  ;;  %11009 = vmatmul.mubr.bf16.gmra.mrb[212].mxu1 %v14325_v57  ;;  %v6689_v41 = vsel %vm14849_vm5, %v6684_v11, %v6688_v52  ;;  %v6699_v27 = vsel %vm14849_vm5, %v6694_v20, %v6698_v23  ;;  %v6716_v53 = vrot.slane %v6714_v62, 4  ;;  %13733 = vmatprep.subr.bf16.mxu0 %v14341_v34  ;;  %v14342_v35 = vld [vmem:[#allocation7 + $0x180] sm:$0xff]   ;;  %v6932_v11 = vld [vmem:[#allocation3 + $0x80] sm:$0x1]  ;;  %v14337_v18 = vld [vmem:[#allocation3 + $0x84] sm:$0xff]  }
 0x303   : > { %v6707_v39 = vor.u32 %v6706_v1, %v6703_v16  ;;  %v12340_v7 = vcombine.low %v6689_v41, %v6699_v27  ;;  %v12370_v61 = vcombine.low %v7055_v2, %v7058_v21  ;;  %v6722_v37 = vrot.slane %v6720_v56, 5  ;;  %13674 = vmatpush3.bf16.msra.mxu1 %v14336_v44  ;;  %v6930_v5 = vld [vmem:[#allocation3 + $0x78] sm:$0xe]  ;;  %v6931_v44 = vld [vmem:[#allocation3 + $0x7c] sm:$0xf] }
 0x304   : > { %v6717_v31 = vor.u32 %v6716_v53, %v6712_v14  ;;  %v12355_v38 = vrot.slane %v6927_v3, 9  ;;  %v7061_v19 = vrot.slane %v6928_v36, 5  ;;  %v7064_v33 = vrot.slane %v6929_v30, 5  ;;  %13675 = vmatprep.subr.bf16.mxu1 %v14338_v12  ;;  %v14344_v1 = vld [vmem:[#allocation7 + $0x160] sm:$0xff]   ;;  %v6428_v2 = vld [vmem:[#allocation3 + $0xa0] sm:$0xf] }
 0x305   : > { %v6708_v47 = vrot.slane %v6707_v39, 4  ;;  %11016 = vmatprep.mubr.bf16.mxu1 %v12340_v7  ;;  %v6725_v8 = vshrl.u32 %v6424_v43, 16  ;;  %v6728_v52 = vshll.u32 %v6424_v43, 16  ;;  %v6734_v50 = vshll.u32 %v6425_v42, 16  ;;  %v6427_v62 = vld [vmem:[#allocation3 + $0x9c] sm:$0xf] }
 0x306   : > { %v6718_v10 = vrot.slane %v6717_v31, 4  ;;  %v7063_v45 = vrot.slane %v7061_v19, 4  ;;  %v6738_v0 = vshrl.u32 %v6425_v42, 16  ;;  %v6744_v54 = vshll.u32 %v6426_v55, 16  ;;  %v6429_v41 = vld [vmem:[#allocation3 + $0xa4] sm:$0x1] }
 0x307   : > { %11098 = vmatmul.mubr.bf16.vlgmr.msra.gmra.mrb[224].mxu0 %v12370_v61  ;;  %v6713_v22 = vsel %vm14849_vm5, %v6708_v47, %v6712_v14  ;;  %13676 = vmatpush3.bf16.msra.mxu1 %v14340_v26  ;;  %v6727_v40 = vrot.slane %v6725_v8, 4  ;;  %v6730_v58 = vrot.slane %v6728_v52, 5  ;;  %v6736_v6 = vrot.slane %v6734_v50, 5  ;;  %v14345_v30 = vld [vmem:[#allocation3 + $0x90] sm:$0xff]   ;;  %v14347_v26 = vld [vmem:[#allocation7 + $0x1c8] sm:$0xff]   ;;  %v13285_v55 = vpop.f32.mrb[144].mxu0 }
 0x308   : > { %11105 = vmatprep.mubr.bf16.mxu0 %v14335_v4  ;;  %v6723_v24 = vsel %vm14849_vm5, %v6718_v10, %v6722_v37  ;;  %v7065_v23 = vsel %vm14843_vm4, %v7063_v45, %v7064_v33  ;;  %v6740_v13 = vrot.slane %v6738_v0, 4  ;;  %v6746_v51 = vrot.slane %v6744_v54, 5  ;;  %13734 = vmatpush3.bf16.msra.mxu0 %v14342_v35  ;;  %v13349_v10 = vpop.f32.mrb[144].mxu1  ;;  %v14343_v45 = vld [vmem:[#allocation3 + $0x90] sm:$0xff]   ;;  %v6933_v42 = vld [vmem:[#allocation3 + $0x84] sm:$0xe] }
 0x309   : > { %v12341_v9 = vcombine.low %v6713_v22, %v6723_v24  ;;  %v7062_v63 = vsel %vm14843_vm4, %v12355_v38, %v7061_v19  ;;  %v6731_v57 = vor.u32 %v6730_v58, %v6727_v40  ;;  %v12356_v32 = vrot.slane %v6930_v5, 9  ;;  %13677 = vmatprep.subr.bf16.mxu1 %v14344_v1  ;;  %v14346_v38 = vld [vmem:[#allocation7 + $0x120] sm:$0xff]   ;;  %13735 = vmatprep.subr.bf16.mxu0 %v14347_v26  ;;  %v6934_v50 = vld [vmem:[#allocation3 + $0x88] sm:$0xf]  ;;  %v6935_v0 = vld [vmem:[#allocation3 + $0x8c] sm:$0x1] }
 0x30a   : > { %11017 = vmatmul.mubr.bf16.gmra.mrb[216].mxu1 %v14333_v28  ;;  %v12371_v15 = vcombine.low %v7062_v63, %v7065_v23  ;;  %v6741_v46 = vor.u32 %v6740_v13, %v6736_v6  ;;  %v7068_v20 = vrot.slane %v6931_v44, 5  ;;  %v7071_v16 = vrot.slane %v6932_v11, 5  ;;  %v14348_v28 = vld [vmem:[#allocation7 + $0x188] sm:$0xff]   ;;  %v6430_v40 = vld [vmem:[#allocation3 + $0xa8] sm:$0xf] }
 0x30b   : > { %11024 = vmatprep.mubr.bf16.mxu1 %v12341_v9  ;;  %v6732_v29 = vrot.slane %v6731_v57, 4  ;;  %v6749_v27 = vshrl.u32 %v6427_v62, 16  ;;  %v6752_v53 = vshll.u32 %v6427_v62, 16  ;;  %v6758_v12 = vshll.u32 %v6428_v2, 16  ;;  %13678 = vmatpush3.bf16.msra.mxu1 %v14346_v38  ;;  %v14350_v35 = vld [vmem:[#allocation7 + $0x168] sm:$0xff]   ;;  %v14353_v62 = vld [vmem:[#allocation7 + $0x1d0] sm:$0xff]  }
 0x30c   : > { %v6742_v60 = vrot.slane %v6741_v46, 4  ;;  %v7070_v56 = vrot.slane %v7068_v20, 4  ;;  %v6762_v7 = vshrl.u32 %v6428_v2, 16  ;;  %v6768_v4 = vshll.u32 %v6429_v41, 16  ;;  %13736 = vmatpush3.bf16.msra.mxu0 %v14348_v28  ;;  %v6431_v58 = vld [vmem:[#allocation3 + $0xac] sm:$0xf]  ;;  %13679 = vmatprep.subr.bf16.mxu1 %v14350_v35 }
 0x30d   : > { %v6737_v21 = vsel %vm14849_vm5, %v6732_v29, %v6736_v6  ;;  %v6751_v37 = vrot.slane %v6749_v27, 4  ;;  %v7069_v3 = vsel %vm14843_vm4, %v12356_v32, %v7068_v20  ;;  %v6754_v36 = vrot.slane %v6752_v53, 5  ;;  %v14351_v11 = vld [vmem:[#allocation3 + $0x9c] sm:$0xff]   ;;  %13737 = vmatprep.subr.bf16.mxu0 %v14353_v62  ;;  %v6936_v27 = vld [vmem:[#allocation3 + $0x90] sm:$0xe]  ;;  %v13286_v53 = vpop.f32.mrb[145].mxu0 }
 0x30e   : > { %v6747_v14 = vsel %vm14849_vm5, %v6742_v60, %v6746_v51  ;;  %v7072_v61 = vsel %vm14843_vm4, %v7070_v56, %v7071_v16  ;;  %v6760_v47 = vrot.slane %v6758_v12, 5  ;;  %v6764_v31 = vrot.slane %v6762_v7, 4  ;;  %v6432_v51 = vld [vmem:[#allocation3 + $0xb0] sm:$0x1]  ;;  %v14352_v16 = vld [vmem:[#allocation7 + $0x128] sm:$0xff]   ;;  %v13350_v56 = vpop.f32.mrb[145].mxu1 }
 0x30f   : > { %11106 = vmatmul.mubr.bf16.gmra.mrb[228].mxu0 %v12371_v15  ;;  %v12342_v39 = vcombine.low %v6737_v21, %v6747_v14  ;;  %v12372_v19 = vcombine.low %v7069_v3, %v7072_v61  ;;  %v6755_v33 = vor.u32 %v6754_v36, %v6751_v37  ;;  %v6770_v43 = vrot.slane %v6768_v4, 5  ;;  %v14349_v1 = vld [vmem:[#allocation3 + $0x9c] sm:$0xff]   ;;  %13680 = vmatpush3.bf16.msra.mxu1 %v14352_v16  ;;  %v14354_v14 = vld [vmem:[#allocation7 + $0x190] sm:$0xff]   ;;  %v6937_v61 = vld [vmem:[#allocation3 + $0x94] sm:$0xf] }
 0x310   : > { %11113 = vmatprep.mubr.bf16.mxu0 %v14339_v17  ;;  %v6765_v34 = vor.u32 %v6764_v31, %v6760_v47  ;;  %v12357_v22 = vrot.slane %v6933_v42, 9  ;;  %v7075_v24 = vrot.slane %v6934_v50, 5  ;;  %v7078_v54 = vrot.slane %v6935_v0, 5  ;;  %13738 = vmatpush3.bf16.msra.mxu0 %v14354_v14  ;;  %v6938_v37 = vld [vmem:[#allocation3 + $0x98] sm:$0x1]  ;;  %v14356_v31 = vld [vmem:[#allocation7 + $0x170] sm:$0xff]  }
 0x311   : > { %v6756_v8 = vrot.slane %v6755_v33, 4  ;;  %v6773_v63 = vshrl.u32 %v6430_v40, 16  ;;  %v6776_v57 = vshll.u32 %v6430_v40, 16  ;;  %v6782_v17 = vshll.u32 %v6431_v58, 16  ;;  %v6434_v26 = vld [vmem:[#allocation3 + $0xb8] sm:$0xf]  ;;  %13681 = vmatprep.subr.bf16.mxu1 %v14356_v31 }
 0x312   : > { %11025 = vmatmul.mubr.bf16.gmra.mrb[220].mxu1 %v14337_v18  ;;  %v6766_v52 = vrot.slane %v6765_v34, 4  ;;  %v7077_v13 = vrot.slane %v7075_v24, 4  ;;  %v6786_v15 = vshrl.u32 %v6431_v58, 16  ;;  %v6792_v46 = vshll.u32 %v6432_v51, 16  ;;  %v14358_v40 = vld [vmem:[#allocation7 + $0x130] sm:$0xff]   ;;  %v14359_v58 = vld [vmem:[#allocation7 + $0x1d8] sm:$0xff]  }
 0x313   : > { %11032 = vmatprep.mubr.bf16.mxu1 %v12342_v39  ;;  %v6761_v9 = vsel %vm14849_vm5, %v6756_v8, %v6760_v47  ;;  %v7076_v5 = vsel %vm14843_vm4, %v12357_v22, %v7075_v24  ;;  %v6775_v44 = vrot.slane %v6773_v63, 4  ;;  %v6778_v18 = vrot.slane %v6776_v57, 5  ;;  %v14357_v24 = vld [vmem:[#allocation3 + $0xa8] sm:$0xff]   ;;  %13682 = vmatpush3.bf16.msra.mxu1 %v14358_v40  ;;  %v14360_v51 = vld [vmem:[#allocation7 + $0x198] sm:$0xff]   ;;  %v13352_v63 = vpop.f32.mrb[146].mxu1  ;;  %v14366_v31 = vld [vmem:[#allocation7 + $0x1a0] sm:$0xff]  }
 0x314   : > { %v6771_v23 = vsel %vm14849_vm5, %v6766_v52, %v6770_v43  ;;  %v7079_v29 = vsel %vm14843_vm4, %v7077_v13, %v7078_v54  ;;  %v6784_v60 = vrot.slane %v6782_v17, 5  ;;  %v6788_v20 = vrot.slane %v6786_v15, 4  ;;  %v14355_v52 = vld [vmem:[#allocation3 + $0xa8] sm:$0xff]   ;;  %v6939_v17 = vld [vmem:[#allocation3 + $0x9c] sm:$0xe]  ;;  %v17095_v15 = vpop.f32.mrb[146].mxu0  ;;  %13739 = vmatprep.subr.bf16.mxu0 %v14359_v58 }
 0x315   : > { %v12343_v6 = vcombine.low %v6761_v9, %v6771_v23  ;;  %v12373_v32 = vcombine.low %v7076_v5, %v7079_v29  ;;  %v6779_v2 = vor.u32 %v6778_v18, %v6775_v44  ;;  %v6794_v41 = vrot.slane %v6792_v46, 5  ;;  %v6940_v29 = vld [vmem:[#allocation3 + $0xa0] sm:$0xf]  ;;  %v6941_v44 = vld [vmem:[#allocation3 + $0xa4] sm:$0x1]  ;;  %13740 = vmatpush3.bf16.msra.mxu0 %v14360_v51  ;;  %v14362_v18 = vld [vmem:[#allocation7 + $0x178] sm:$0xff]  }
 0x316   : > { %v6789_v21 = vor.u32 %v6788_v20, %v6784_v60  ;;  %v13351_v39 = vadd.f32 %v13350_v56, %v13349_v10  ;;  %v13287_v4 = vadd.f32 %v13286_v53, %v13285_v55  ;;  %v12358_v3 = vrot.slane %v6936_v27, 9  ;;  %v6435_v10 = vld [vmem:[#allocation3 + $0xbc] sm:$0x1]  ;;  %13683 = vmatprep.subr.bf16.mxu1 %v14362_v18  ;;  %v14364_v14 = vld [vmem:[#allocation7 + $0x138] sm:$0xff]   ;;  %v7868_v56 = vld [vmem:[#allocation3 + $0x6c] sm:$0xe] }
 0x317   : > { %11114 = vmatmul.mubr.bf16.gmra.mrb[232].mxu0 %v12372_v19  ;;  %v6780_v12 = vrot.slane %v6779_v2, 4  ;;  %v7082_v36 = vrot.slane %v6937_v61, 5  ;;  %v7085_v47 = vrot.slane %v6938_v37, 5  ;;  %v6433_v19 = vld [vmem:[#allocation3 + $0xb4] sm:$0xf]  ;;  %v6806_v42 = vshll.u32 %v6434_v26, 16  ;;  %13684 = vmatpush3.bf16.msra.mxu1 %v14364_v14 }
 0x318   : > { %11121 = vmatprep.mubr.bf16.mxu0 %v14345_v30  ;;  %v6790_v7 = vrot.slane %v6789_v21, 4  ;;  %v17089_v33 = vadd.f32 %v13351_v39, %v13287_v4  ;;  %v6800_v43 = vshll.u32 %v6433_v19, 16  ;;  %v6810_v55 = vshrl.u32 %v6434_v26, 16  ;;  %v13353_v27 = vpop.f32.mrb[147].mxu1  ;;  %v14363_v53 = vld [vmem:[#allocation3 + $0xb4] sm:$0xff]  }
 0x319   : > { %v6785_v30 = vsel %vm14849_vm5, %v6780_v12, %v6784_v60  ;;  %v7084_v28 = vrot.slane %v7082_v36, 4  ;;  %v6816_v8 = vshll.u32 %v6435_v10, 16  ;;  %v7083_v50 = vsel %vm14843_vm4, %v12358_v3, %v7082_v36  ;;  %v7870_v12 = vld [vmem:[#allocation3 + $0x74] sm:$0x1]  ;;  %v14365_v36 = vld [vmem:[#allocation7 + $0x1e0] sm:$0xff]  }
 0x31a   : > { %11033 = vmatmul.mubr.bf16.gmra.mrb[224].mxu1 %v14343_v45  ;;  %v6795_v38 = vsel %vm14849_vm5, %v6790_v7, %v6794_v41  ;;  %v6797_v45 = vshrl.u32 %v6433_v19, 16  ;;  %v6802_v35 = vrot.slane %v6800_v43, 5  ;;  %v6808_v9 = vrot.slane %v6806_v42, 5  ;;  %v7869_v41 = vld [vmem:[#allocation3 + $0x70] sm:$0xf]  ;;  %13741 = vmatprep.subr.bf16.mxu0 %v14365_v36 }
 0x31b   : > { %11040 = vmatprep.mubr.bf16.mxu1 %v12343_v6  ;;  %v12344_v34 = vcombine.low %v6785_v30, %v6795_v38  ;;  %v7086_v0 = vsel %vm14843_vm4, %v7084_v28, %v7085_v47  ;;  %v6812_v23 = vrot.slane %v6810_v55, 4  ;;  %v6818_v57 = vrot.slane %v6816_v8, 5  ;;  %v6942_v30 = vld [vmem:[#allocation3 + $0xa8] sm:$0xe]  ;;  %v6943_v38 = vld [vmem:[#allocation3 + $0xac] sm:$0xf]  ;;  %13742 = vmatpush3.bf16.msra.mxu0 %v14366_v31 }
 0x31c   : > { %v6799_v22 = vrot.slane %v6797_v45, 4  ;;  %v12374_v54 = vcombine.low %v7083_v50, %v7086_v0  ;;  %v7092_v2 = vrot.slane %v6941_v44, 5  ;;  %v12418_v7 = vrot.slane %v7868_v56, 9  ;;  %v6944_v19 = vld [vmem:[#allocation3 + $0xb0] sm:$0x1] }
 0x31d   : > { %v6813_v13 = vor.u32 %v6812_v23, %v6808_v9  ;;  %v7998_v61 = vrot.slane %v7869_v41, 5  ;;  %v17105_v37 = vadd.f32 %v13353_v27, %v13352_v63  ;;  %v8001_v3 = vrot.slane %v7870_v12, 5  ;;  %v7356_v42 = vld [vmem:[#allocation3 + $0x6c] sm:$0xf]  ;;  %v7357_v55 = vld [vmem:[#allocation3 + $0x70] sm:$0xf] }
 0x31e   : > { %v6803_v6 = vor.u32 %v6802_v35, %v6799_v22  ;;  %v12360_v26 = vrot.slane %v6942_v30, 9  ;;  %v7096_v45 = vrot.slane %v6943_v38, 5  ;;  %v7099_v43 = vrot.slane %v6944_v19, 5  ;;  %v7873_v44 = vld [vmem:[#allocation3 + $0x80] sm:$0x1] }
 0x31f   : > { %11122 = vmatmul.mubr.bf16.gmra.mrb[236].mxu0 %v12373_v32  ;;  %v6814_v5 = vrot.slane %v6813_v13, 4  ;;  %v7089_v32 = vrot.slane %v6940_v29, 5  ;;  %v8000_v47 = vrot.slane %v7998_v61, 4  ;;  %v7999_v28 = vsel %vm14843_vm4, %v12418_v7, %v7998_v61  ;;  %v7872_v29 = vld [vmem:[#allocation3 + $0x7c] sm:$0xf] }
 0x320   : > { %11129 = vmatprep.mubr.bf16.mxu0 %v14351_v11  ;;  %v6804_v46 = vrot.slane %v6803_v6, 4  ;;  %v12359_v11 = vrot.slane %v6939_v17, 9  ;;  %v7573_v50 = vshrl.u32 %v7356_v42, 16  ;;  %v7576_v0 = vshll.u32 %v7356_v42, 16  ;;  %v14370_v6 = vld [vmem:[#allocation7 + $0x1a8] sm:$0xff]  }
 0x321   : > { %v6819_v20 = vsel %vm14849_vm5, %v6814_v5, %v6818_v57  ;;  %v7091_v62 = vrot.slane %v7089_v32, 4  ;;  %v8002_v10 = vsel %vm14843_vm4, %v8000_v47, %v8001_v3  ;;  %v7582_v22 = vshll.u32 %v7357_v55, 16  ;;  %v14368_v57 = vld [vmem:[#allocation3 + $0xc0] sm:$0xff]   ;;  %v7871_v5 = vld [vmem:[#allocation3 + $0x78] sm:$0xe] }
 0x322   : > { %11041 = vmatmul.mubr.bf16.gmra.mrb[228].mxu1 %v14349_v1  ;;  %v6809_v60 = vsel %vm14849_vm5, %v6804_v46, %v6808_v9  ;;  %v14361_v1 = vld [vmem:[#allocation3 + $0xb4] sm:$0xff]   ;;  %v7090_v21 = vsel %vm14843_vm4, %v12359_v11, %v7089_v32  ;;  %v12434_v8 = vcombine.low %v7999_v28, %v8002_v10  ;;  %v14369_v9 = vld [vmem:[#allocation7 + $0x1e8] sm:$0xff]   ;;  %v7575_v23 = vrot.slane %v7573_v50, 4  ;;  %v6947_v41 = vld [vmem:[#allocation3 + $0xbc] sm:$0x1]  ;;  %v13355_v50 = vpop.f32.mrb[148].mxu1 }
 0x323   : > { %11048 = vmatprep.mubr.bf16.mxu1 %v12344_v34  ;;  %v12345_v16 = vcombine.low %v6809_v60, %v6819_v20  ;;  %v7093_v39 = vsel %vm14843_vm4, %v7091_v62, %v7092_v2  ;;  %v17107_v34 = vld [vmem:[#allocation7 + $0x200] sm:$0xff]   ;;  %v7578_v40 = vrot.slane %v7576_v0, 5  ;;  %v7584_v58 = vrot.slane %v7582_v22, 5  ;;  %13743 = vmatprep.subr.bf16.mxu0 %v14369_v9  ;;  %v14371_v20 = vld [vmem:[#allocation7 + $0x1f0] sm:$0xff]   ;;  %v7361_v30 = vld [vmem:[#allocation3 + $0x80] sm:$0x1] }
 0x324   : > { %v12375_v4 = vcombine.low %v7090_v21, %v7093_v39  ;;  %13909 = vmatprep.subr.bf16.mxu1 %v17107_v34  ;;  %v7097_v13 = vsel %vm14843_vm4, %v12360_v26, %v7096_v45  ;;  %13744 = vmatpush3.bf16.msra.mxu0 %v14370_v6  ;;  %v12419_v18 = vrot.slane %v7871_v5, 9  ;;  %v8005_v60 = vrot.slane %v7872_v29, 5  ;;  %v6945_v21 = vld [vmem:[#allocation3 + $0xb4] sm:$0xe]  ;;  %v6946_v56 = vld [vmem:[#allocation3 + $0xb8] sm:$0xf] }
 0x325   : > { %v7579_v46 = vor.u32 %v7578_v40, %v7575_v23  ;;  %13745 = vmatprep.subr.bf16.mxu0 %v14371_v20  ;;  %v12361_v27 = vrot.slane %v6945_v21, 9  ;;  %v14372_v39 = vld [vmem:[#allocation7 + $0x208] sm:$0xff]   ;;  %v7103_v61 = vrot.slane %v6946_v56, 5  ;;  %v7359_v3 = vld [vmem:[#allocation3 + $0x78] sm:$0xf]  ;;  %v14374_v21 = vld [vmem:[#allocation7 + $0x1f8] sm:$0xff]  }
 0x326   : > { %v8007_v2 = vrot.slane %v8005_v60, 4  ;;  %v7360_v36 = vld [vmem:[#allocation3 + $0x7c] sm:$0xf]  ;;  %v8006_v31 = vsel %vm14843_vm4, %v12419_v18, %v8005_v60  ;;  %v7597_v38 = vshrl.u32 %v7359_v3, 16  ;;  %v7600_v19 = vshll.u32 %v7359_v3, 16  ;;  %v13356_v60 = vpop.f32.mrb[149].mxu1 }
 0x327   : > { %11130 = vmatmul.mubr.bf16.gmra.mrb[240].mxu0 %v12374_v54  ;;  %v7586_v54 = vshrl.u32 %v7357_v55, 16  ;;  %v7105_v28 = vrot.slane %v7103_v61, 4  ;;  %v7606_v10 = vshll.u32 %v7360_v36, 16  ;;  %v7104_v0 = vsel %vm14843_vm4, %v12361_v27, %v7103_v61  ;;  %v7876_v6 = vld [vmem:[#allocation3 + $0x8c] sm:$0x1] }
 0x328   : > { %11137 = vmatprep.mubr.bf16.mxu0 %v14357_v24  ;;  %v7098_v24 = vrot.slane %v7096_v45, 4  ;;  %v7610_v45 = vshrl.u32 %v7360_v36, 16  ;;  %v7599_v42 = vrot.slane %v7597_v38, 4  ;;  %v7602_v55 = vrot.slane %v7600_v19, 5 }
 0x329   : > { %v7588_v63 = vrot.slane %v7586_v54, 4 }
 0x32a   : > { %11049 = vmatmul.mubr.bf16.gmra.mrb[232].mxu1 %v14355_v52  ;;  %v7358_v52 = vld [vmem:[#allocation3 + $0x74] sm:$0x1]  ;;  %v7100_v51 = vsel %vm14843_vm4, %v7098_v24, %v7099_v43  ;;  %v13289_v43 = vpop.f32.mrb[147].mxu0  ;;  %v7608_v24 = vrot.slane %v7606_v10, 5  ;;  %v7612_v54 = vrot.slane %v7610_v45, 4  ;;  %v7603_v23 = vor.u32 %v7602_v55, %v7599_v42 }
 0x32b   : > { %11056 = vmatprep.mubr.bf16.mxu1 %v12345_v16  ;;  %v7592_v35 = vshll.u32 %v7358_v52, 16  ;;  %v12376_v17 = vcombine.low %v7097_v13, %v7100_v51  ;;  %v7589_v11 = vor.u32 %v7588_v63, %v7584_v58  ;;  %v7580_v16 = vrot.slane %v7579_v46, 4  ;;  %v8302_v46 = vld [vmem:[#allocation3 + $0x7c] sm:$0xf]  ;;  %v13291_v5 = vpop.f32.mrb[148].mxu0 }
 0x32c   : > { %v13290_v52 = vadd.f32 %v13289_v43, %v17095_v15  ;;  %v7613_v13 = vor.u32 %v7612_v54, %v7608_v24  ;;  %v8015_v63 = vrot.slane %v7876_v6, 5  ;;  %v7362_v10 = vld [vmem:[#allocation3 + $0x84] sm:$0xf]  ;;  %v7363_v45 = vld [vmem:[#allocation3 + $0x88] sm:$0xf] }
 0x32d   : > { %v7594_v32 = vrot.slane %v7592_v35, 5  ;;  %v7590_v62 = vrot.slane %v7589_v11, 4  ;;  %v7585_v14 = vsel %vm14849_vm5, %v7580_v16, %v7584_v58  ;;  %v7874_v35 = vld [vmem:[#allocation3 + $0x84] sm:$0xe]  ;;  %v7875_v58 = vld [vmem:[#allocation3 + $0x88] sm:$0xf] }
 0x32e   : > { %v12420_v15 = vrot.slane %v7874_v35, 9  ;;  %v8012_v51 = vrot.slane %v7875_v58, 5  ;;  %v7614_v29 = vrot.slane %v7613_v13, 4  ;;  %v7364_v43 = vld [vmem:[#allocation3 + $0x8c] sm:$0x1] }
 0x32f   : > { %11138 = vmatmul.mubr.bf16.gmra.mrb[244].mxu0 %v12375_v4  ;;  %v7595_v12 = vsel %vm14849_vm5, %v7590_v62, %v7594_v32  ;;  %v7106_v4 = vrot.slane %v6947_v41, 5  ;;  %v8303_v32 = vld [vmem:[#allocation3 + $0x80] sm:$0x1]  ;;  %v13292_v62 = vpop.f32.mrb[149].mxu0  ;;  %v7877_v13 = vld [vmem:[#allocation3 + $0x90] sm:$0xe] }
 0x330   : > { %11145 = vmatprep.mubr.bf16.mxu0 %v14363_v53  ;;  %v14373_v53 = vld [vmem:[#allocation7 + $0x1b0] sm:$0xff]   ;;  %v12402_v47 = vcombine.low %v7585_v14, %v7595_v12  ;;  %v8014_v11 = vrot.slane %v8012_v51, 4  ;;  %v8537_v27 = vshll.u32 %v8303_v32, 16  ;;  %v13294_v61 = vpop.f32.mrb[150].mxu0 }
 0x331   : > { %13746 = vmatpush3.bf16.msra.mxu0 %v14373_v53  ;;  %v7107_v22 = vsel %vm14843_vm4, %v7105_v28, %v7106_v4  ;;  %v13295_v38 = vpop.f32.mrb[151].mxu0 }
 0x332   : > { %11057 = vmatmul.mubr.bf16.gmra.mrb[236].mxu1 %v14361_v1  ;;  %v8008_v1 = vrot.slane %v7873_v44, 5  ;;  %v12377_v9 = vcombine.low %v7104_v0, %v7107_v22  ;;  %v8013_v44 = vsel %vm14843_vm4, %v12420_v15, %v8012_v51  ;;  %v8016_v56 = vsel %vm14843_vm4, %v8014_v11, %v8015_v63  ;;  %13747 = vmatprep.subr.bf16.mxu0 %v14374_v21  ;;  %v14377_v15 = vld [vmem:[#allocation7 + $0x210] sm:$0xff]  }
 0x333   : > { %11194 = vmatprep.mubr.bf16.mxu1 %v12434_v8  ;;  %v7616_v8 = vshll.u32 %v7361_v30, 16  ;;  %v8539_v36 = vrot.slane %v8537_v27, 5  ;;  %v14375_v30 = vld [vmem:[#allocation7 + $0x1b8] sm:$0xff]   ;;  %v13296_v28 = vadd.f32 %v13295_v38, %v13294_v61 }
 0x334   : > { %v8009_v7 = vsel %vm14843_vm4, %v8007_v2, %v8008_v1  ;;  %v8531_v1 = vshrl.u32 %v8302_v46, 16  ;;  %v13358_v2 = vpop.f32.mrb[150].mxu1 }
 0x335   : > { %v12435_v26 = vcombine.low %v8006_v31, %v8009_v7  ;;  %v7618_v40 = vrot.slane %v7616_v8, 5  ;;  %v13359_v4 = vpop.f32.mrb[151].mxu1  ;;  %v13293_v31 = vadd.f32 %v13292_v62, %v13291_v5  ;;  %13748 = vmatpush3.bf16.msra.mxu0 %v14375_v30  ;;  %v7621_v8 = vshrl.u32 %v7362_v10, 16  ;;  %v7878_v5 = vld [vmem:[#allocation3 + $0x94] sm:$0xf] }
 0x336   : > { %v8533_v3 = vrot.slane %v8531_v1, 4  ;;  %v13361_v51 = vpop.f32.mrb[152].mxu1  ;;  %v8306_v1 = vld [vmem:[#allocation3 + $0x8c] sm:$0x1] }
 0x337   : > { %11146 = vmatmul.mubr.bf16.gmra.mrb[248].mxu0 %v12376_v17  ;;  %v8301_v17 = vld [vmem:[#allocation3 + $0x78] sm:$0xf]  ;;  %v7619_v14 = vsel %vm14849_vm5, %v7614_v29, %v7618_v40  ;;  %v7623_v35 = vrot.slane %v7621_v8, 4 }
 0x338   : > { %11153 = vmatprep.mubr.bf16.mxu0 %v14368_v57  ;;  %v7604_v57 = vrot.slane %v7603_v23, 4  ;;  %v8518_v18 = vshrl.u32 %v8301_v17, 16  ;;  %v8521_v16 = vshll.u32 %v8301_v17, 16  ;;  %v7640_v23 = vshll.u32 %v7364_v43, 16  ;;  %v7879_v29 = vld [vmem:[#allocation3 + $0x98] sm:$0x1] }
 0x33a   : > { %11195 = vmatmul.mubr.bf16.vlgmr.msra.gmra.mrb[240].mxu1 %v12402_v47  ;;  %v7609_v20 = vsel %vm14849_vm5, %v7604_v57, %v7608_v24  ;;  %v8520_v41 = vrot.slane %v8518_v18, 4  ;;  %v8523_v12 = vrot.slane %v8521_v16, 5  ;;  %v13357_v47 = vadd.f32 %v13356_v60, %v13355_v50  ;;  %v8305_v16 = vld [vmem:[#allocation3 + $0x88] sm:$0xf] }
 0x33b   : > { %11202 = vmatprep.mubr.bf16.mxu1 %v12435_v26  ;;  %13910 = vmatpush3.bf16.msra.mxu1 %v17107_v34  ;;  %v17133_v34 = vadd.f32 %v17105_v37, %v13290_v52  ;;  %v8527_v37 = vshll.u32 %v8302_v46, 16  ;;  %v12403_v53 = vcombine.low %v7609_v20, %v7619_v14  ;;  %v13360_v26 = vadd.f32 %v13359_v4, %v13358_v2  ;;  %v14376_v46 = vld [vmem:[#allocation3 + $0x78] sm:$0xff]   ;;  %v8304_v20 = vld [vmem:[#allocation3 + $0x84] sm:$0xf] }
 0x33c   : > { %13911 = vmatprep.subr.bf16.mxu1 %v14372_v39  ;;  %v8524_v19 = vor.u32 %v8523_v12, %v8520_v41  ;;  %v17143_v55 = vadd.f32 %v13357_v47, %v13293_v31  ;;  %v7624_v52 = vshll.u32 %v7362_v10, 16  ;;  %v7630_v50 = vshll.u32 %v7363_v45, 16  ;;  %v14379_v47 = vld [vmem:[#allocation7 + $0x218] sm:$0xff]  }
 0x33d   : > { %v8529_v7 = vrot.slane %v8527_v37, 5  ;;  %v17145_v22 = vadd.f32 %v13360_v26, %v13296_v28  ;;  %v7634_v24 = vshrl.u32 %v7363_v45, 16  ;;  %v7642_v17 = vrot.slane %v7640_v23, 5  ;;  %v7365_v10 = vld [vmem:[#allocation3 + $0x90] sm:$0xf] }
 0x33e   : > { %v8525_v0 = vrot.slane %v8524_v19, 4  ;;  %v7632_v58 = vrot.slane %v7630_v50, 5  ;;  %v8019_v18 = vrot.slane %v7878_v5, 5  ;;  %v8022_v60 = vrot.slane %v7879_v29, 5  ;;  %v7367_v50 = vld [vmem:[#allocation3 + $0x98] sm:$0x1] }
 0x33f   : > { %11154 = vmatmul.mubr.bf16.gmra.mrb[252].mxu0 %v12377_v9  ;;  %13912 = vmatpush3.bf16.msra.mxu1 %v14372_v39  ;;  %v12436_v39 = vcombine.low %v8013_v44, %v8016_v56  ;;  %v8534_v42 = vor.u32 %v8533_v3, %v8529_v7  ;;  %v7626_v9 = vrot.slane %v7624_v52, 5  ;;  %v7636_v6 = vrot.slane %v7634_v24, 4 }
 0x340   : > { %v8530_v40 = vsel %vm14849_vm5, %v8525_v0, %v8529_v7  ;;  %v12421_v44 = vrot.slane %v7877_v13, 9  ;;  %13913 = vmatprep.subr.bf16.mxu1 %v14377_v15  ;;  %v8542_v62 = vshrl.u32 %v8304_v20, 16  ;;  %v8545_v2 = vshll.u32 %v8304_v20, 16  ;;  %v7366_v0 = vld [vmem:[#allocation3 + $0x94] sm:$0xf] }
 0x341   : > { %v8535_v54 = vrot.slane %v8534_v42, 4  ;;  %v7627_v57 = vor.u32 %v7626_v9, %v7623_v35  ;;  %v7637_v32 = vor.u32 %v7636_v6, %v7632_v58  ;;  %v8551_v21 = vshll.u32 %v8305_v16, 16 }
 0x342   : > { %11203 = vmatmul.mubr.bf16.gmra.mrb[244].mxu1 %v12403_v53  ;;  %v8020_v56 = vsel %vm14843_vm4, %v12421_v44, %v8019_v18  ;;  %v8021_v41 = vrot.slane %v8019_v18, 4  ;;  %v8555_v27 = vshrl.u32 %v8305_v16, 16  ;;  %v13297_v53 = vpop.f32.mrb[152].mxu0  ;;  %v8544_v7 = vrot.slane %v8542_v62, 4  ;;  %v7880_v18 = vld [vmem:[#allocation3 + $0x9c] sm:$0xe] }
 0x343   : > { %11210 = vmatprep.mubr.bf16.mxu1 %v12436_v39  ;;  %v8540_v63 = vsel %vm14849_vm5, %v8535_v54, %v8539_v36  ;;  %v7628_v37 = vrot.slane %v7627_v57, 4  ;;  %13914 = vmatpush3.bf16.msra.mxu1 %v14377_v15  ;;  %v7638_v14 = vrot.slane %v7637_v32, 4  ;;  %v13362_v39 = vpop.f32.mrb[153].mxu1  ;;  %v8547_v61 = vrot.slane %v8545_v2, 5  ;;  %v13298_v3 = vpop.f32.mrb[153].mxu0  ;;  %v14378_v62 = vld [vmem:[#allocation3 + $0x84] sm:$0xff]  }
 0x344   : > { %v12466_v11 = vcombine.low %v8530_v40, %v8540_v63  ;;  %v8553_v4 = vrot.slane %v8551_v21, 5  ;;  %v13364_v36 = vpop.f32.mrb[154].mxu1  ;;  %v8023_v30 = vsel %vm14843_vm4, %v8021_v41, %v8022_v60  ;;  %v8557_v38 = vrot.slane %v8555_v27, 4  ;;  %v13300_v26 = vpop.f32.mrb[154].mxu0  ;;  %13915 = vmatprep.subr.bf16.mxu1 %v14379_v47  ;;  %v7881_v60 = vld [vmem:[#allocation3 + $0xa0] sm:$0xf] }
 0x345   : > { %v7633_v12 = vsel %vm14849_vm5, %v7628_v37, %v7632_v58  ;;  %v7643_v31 = vsel %vm14849_vm5, %v7638_v14, %v7642_v17  ;;  %v8561_v19 = vshll.u32 %v8306_v1, 16  ;;  %v13365_v28 = vpop.f32.mrb[155].mxu1  ;;  %v12437_v43 = vcombine.low %v8020_v56, %v8023_v30  ;;  %v13301_v52 = vpop.f32.mrb[155].mxu0  ;;  %v7882_v2 = vld [vmem:[#allocation3 + $0xa4] sm:$0x1] }
 0x346   : > { %11291 = vmatprep.mubr.bf16.mxu0 %v12466_v11  ;;  %v12404_v45 = vcombine.low %v7633_v12, %v7643_v31  ;;  %v8548_v42 = vor.u32 %v8547_v61, %v8544_v7  ;;  %v13363_v8 = vadd.f32 %v13362_v39, %v13361_v51  ;;  %v17159_v24 = vpop.f32.mrb[156].mxu1  ;;  %v8558_v54 = vor.u32 %v8557_v38, %v8553_v4  ;;  %v17161_v40 = vpop.f32.mrb[156].mxu0  ;;  %v8308_v39 = vld [vmem:[#allocation3 + $0x94] sm:$0xf] }
 0x347   : > { %11292 = vmatmul.mubr.bf16.vlgmr.msra.gmra.mrb[0].mxu0 %v14376_v46  ;;  %v8563_v35 = vrot.slane %v8561_v19, 5  ;;  %v13299_v9 = vadd.f32 %v13298_v3, %v13297_v53  ;;  %v13366_v23 = vadd.f32 %v13365_v28, %v13364_v36  ;;  %13916 = vmatpush3.bf16.msra.mxu1 %v14379_v47  ;;  %v13302_v6 = vadd.f32 %v13301_v52, %v13300_v26  ;;  %v13368_v63 = vpop.f32.mrb[157].mxu1  ;;  %v13304_v5 = vpop.f32.mrb[157].mxu0  ;;  %v8307_v53 = vld [vmem:[#allocation3 + $0x90] sm:$0xf] }
 0x348   : > { %v8549_v58 = vrot.slane %v8548_v42, 4  ;;  %v7645_v15 = vshrl.u32 %v7365_v10, 16  ;;  %v7648_v13 = vshll.u32 %v7365_v10, 16  ;;  %v8559_v51 = vrot.slane %v8558_v54, 4  ;;  %v13370_v21 = vpop.f32.mrb[158].mxu1  ;;  %v13306_v36 = vpop.f32.mrb[158].mxu0 }
 0x349   : > { %v17163_v57 = vadd.f32 %v13363_v8, %v13299_v9  ;;  %v7654_v17 = vshll.u32 %v7366_v0, 16  ;;  %v7658_v46 = vshrl.u32 %v7366_v0, 16  ;;  %v17167_v44 = vadd.f32 %v13366_v23, %v13302_v6  ;;  %v13371_v19 = vpop.f32.mrb[159].mxu1  ;;  %v13307_v26 = vpop.f32.mrb[159].mxu0  ;;  %v7369_v54 = vld [vmem:[#allocation3 + $0xa0] sm:$0xf] }
 0x34a   : > { %11211 = vmatmul.mubr.bf16.gmra.mrb[248].mxu1 %v12404_v45  ;;  %v8554_v29 = vsel %vm14849_vm5, %v8549_v58, %v8553_v4  ;;  %v7647_v11 = vrot.slane %v7645_v15, 4  ;;  %v7650_v32 = vrot.slane %v7648_v13, 5  ;;  %v8564_v20 = vsel %vm14849_vm5, %v8559_v51, %v8563_v35  ;;  %v8309_v4 = vld [vmem:[#allocation3 + $0x98] sm:$0x1] }
 0x34b   : > { %11218 = vmatprep.mubr.bf16.mxu1 %v12437_v43  ;;  %v7656_v16 = vrot.slane %v7654_v17, 5  ;;  %v7660_v37 = vrot.slane %v7658_v46, 4  ;;  %v7664_v1 = vshll.u32 %v7367_v50, 16  ;;  %v12467_v14 = vcombine.low %v8554_v29, %v8564_v20  ;;  %v7368_v50 = vld [vmem:[#allocation3 + $0x9c] sm:$0xf] }
 0x34c   : > { %v7651_v56 = vor.u32 %v7650_v32, %v7647_v11  ;;  %v12422_v41 = vrot.slane %v7880_v18, 9  ;;  %v8026_v27 = vrot.slane %v7881_v60, 5  ;;  %v8029_v61 = vrot.slane %v7882_v2, 5  ;;  %v14381_v17 = vld [vmem:[#allocation7 + $0x220] sm:$0xff]   ;;  %v7370_v18 = vld [vmem:[#allocation3 + $0xa4] sm:$0x1] }
 0x34d   : > { %v7661_v12 = vor.u32 %v7660_v37, %v7656_v16  ;;  %v7666_v7 = vrot.slane %v7664_v1, 5  ;;  %v8566_v3 = vshrl.u32 %v8307_v53, 16  ;;  %11299 = vmatprep.mubr.bf16.mxu0 %v12467_v14  ;;  %v8569_v38 = vshll.u32 %v8307_v53, 16  ;;  %v7883_v60 = vld [vmem:[#allocation3 + $0xa8] sm:$0xe]  ;;  %13917 = vmatprep.subr.bf16.mxu1 %v14381_v17 }
 0x34e   : > { %v7652_v47 = vrot.slane %v7651_v56, 4  ;;  %v8027_v31 = vsel %vm14843_vm4, %v12422_v41, %v8026_v27  ;;  %v8028_v30 = vrot.slane %v8026_v27, 4  ;;  %v8575_v45 = vshll.u32 %v8308_v39, 16  ;;  %v7884_v20 = vld [vmem:[#allocation3 + $0xac] sm:$0xf]  ;;  %13918 = vmatpush3.bf16.msra.mxu1 %v14381_v17 }
 0x34f   : > { %v7662_v28 = vrot.slane %v7661_v12, 4  ;;  %11300 = vmatmul.mubr.bf16.gmra.mrb[4].mxu0 %v14378_v62  ;;  %v8568_v10 = vrot.slane %v8566_v3, 4  ;;  %v8579_v43 = vshrl.u32 %v8308_v39, 16  ;;  %v8571_v52 = vrot.slane %v8569_v38, 5  ;;  %v7885_v2 = vld [vmem:[#allocation3 + $0xb0] sm:$0x1] }
 0x350   : > { %v7657_v42 = vsel %vm14849_vm5, %v7652_v47, %v7656_v16  ;;  %v8030_v8 = vsel %vm14843_vm4, %v8028_v30, %v8029_v61  ;;  %v8585_v0 = vshll.u32 %v8309_v4, 16  ;;  %v8577_v23 = vrot.slane %v8575_v45, 5  ;;  %v13373_v39 = vpop.f32.mrb[160].mxu1  ;;  %v13309_v12 = vpop.f32.mrb[160].mxu0 }
 0x351   : > { %v7667_v35 = vsel %vm14849_vm5, %v7662_v28, %v7666_v7  ;;  %v12438_v9 = vcombine.low %v8027_v31, %v8030_v8  ;;  %v8581_v58 = vrot.slane %v8579_v43, 4  ;;  %v8572_v15 = vor.u32 %v8571_v52, %v8568_v10  ;;  %v13310_v47 = vpop.f32.mrb[161].mxu0  ;;  %v14383_v31 = vld [vmem:[#allocation7 + $0x228] sm:$0xff]   ;;  %v14380_v8 = vld [vmem:[#allocation3 + $0x90] sm:$0xff]  }
 0x352   : > { %v12405_v6 = vcombine.low %v7657_v42, %v7667_v35  ;;  %v8587_v13 = vrot.slane %v8585_v0, 5  ;;  %v13369_v51 = vadd.f32 %v13368_v63, %v17159_v24  ;;  %v13305_v29 = vadd.f32 %v13304_v5, %v17161_v40  ;;  %v8310_v40 = vld [vmem:[#allocation3 + $0x9c] sm:$0xf]  ;;  %v8311_v5 = vld [vmem:[#allocation3 + $0xa0] sm:$0xf]  ;;  %v13312_v45 = vpop.f32.mrb[162].mxu0  ;;  %13919 = vmatprep.subr.bf16.mxu1 %v14383_v31 }
 0x353   : > { %v8582_v46 = vor.u32 %v8581_v58, %v8577_v23  ;;  %v13372_v11 = vadd.f32 %v13371_v19, %v13370_v21  ;;  %v13308_v32 = vadd.f32 %v13307_v26, %v13306_v36  ;;  %v8573_v16 = vrot.slane %v8572_v15, 4  ;;  %v13374_v36 = vpop.f32.mrb[161].mxu1  ;;  %v8312_v28 = vld [vmem:[#allocation3 + $0xa4] sm:$0x1]  ;;  %13920 = vmatpush3.bf16.msra.mxu1 %v14383_v31 }
 0x354   : > { %11219 = vmatmul.mubr.bf16.gmra.mrb[252].mxu1 %v12405_v6  ;;  %v7669_v37 = vshrl.u32 %v7368_v50, 16  ;;  %v7672_v1 = vshll.u32 %v7368_v50, 16  ;;  %v7678_v62 = vshll.u32 %v7369_v54, 16  ;;  %v17181_v56 = vadd.f32 %v13369_v51, %v13305_v29  ;;  %v13376_v10 = vpop.f32.mrb[162].mxu1  ;;  %v7372_v29 = vld [vmem:[#allocation3 + $0xac] sm:$0xf] }
 0x355   : > { %11226 = vmatprep.mubr.bf16.mxu1 %v12438_v9  ;;  %v8583_v14 = vrot.slane %v8582_v46, 4  ;;  %v17183_v24 = vadd.f32 %v13372_v11, %v13308_v32  ;;  %v7682_v63 = vshrl.u32 %v7369_v54, 16  ;;  %v8578_v21 = vsel %vm14849_vm5, %v8573_v16, %v8577_v23  ;;  %v13377_v50 = vpop.f32.mrb[163].mxu1  ;;  %v13313_v54 = vpop.f32.mrb[163].mxu0  ;;  %v7371_v46 = vld [vmem:[#allocation3 + $0xa8] sm:$0xf] }
 0x356   : > { %v7671_v41 = vrot.slane %v7669_v37, 4  ;;  %v7674_v27 = vrot.slane %v7672_v1, 5  ;;  %v7680_v53 = vrot.slane %v7678_v62, 5  ;;  %v7688_v4 = vshll.u32 %v7370_v18, 16  ;;  %v17191_v6 = vpop.f32.mrb[164].mxu1  ;;  %v17199_v62 = vpop.f32.mrb[164].mxu0 }
 0x357   : > { %v8588_v7 = vsel %vm14849_vm5, %v8583_v14, %v8587_v13  ;;  %v7684_v61 = vrot.slane %v7682_v63, 4  ;;  %v12423_v3 = vrot.slane %v7883_v60, 9  ;;  %v8033_v19 = vrot.slane %v7884_v20, 5 }
 0x358   : > { %v12468_v30 = vcombine.low %v8578_v21, %v8588_v7  ;;  %v7675_v38 = vor.u32 %v7674_v27, %v7671_v41  ;;  %v8036_v26 = vrot.slane %v7885_v2, 5  ;;  %v7690_v42 = vrot.slane %v7688_v4, 5  ;;  %v17201_v21 = vpop.f32.mrb[165].mxu1  ;;  %v7887_v4 = vld [vmem:[#allocation3 + $0xb8] sm:$0xf] }
 0x359   : > { %v7685_v43 = vor.u32 %v7684_v61, %v7680_v53  ;;  %v8590_v52 = vshrl.u32 %v8310_v40, 16  ;;  %v8593_v0 = vshll.u32 %v8310_v40, 16  ;;  %v8034_v9 = vsel %vm14843_vm4, %v12423_v3, %v8033_v19  ;;  %v7886_v61 = vld [vmem:[#allocation3 + $0xb4] sm:$0xe]  ;;  %v17203_v3 = vpop.f32.mrb[165].mxu0 }
 0x35a   : > { %11307 = vmatprep.mubr.bf16.mxu0 %v12468_v30  ;;  %v7676_v35 = vrot.slane %v7675_v38, 4  ;;  %v8035_v23 = vrot.slane %v8033_v19, 4  ;;  %v8599_v58 = vshll.u32 %v8311_v5, 16  ;;  %v8603_v17 = vshrl.u32 %v8311_v5, 16  ;;  %v7373_v5 = vld [vmem:[#allocation3 + $0xb0] sm:$0x1] }
 0x35b   : > { %v7686_v15 = vrot.slane %v7685_v43, 4  ;;  %11308 = vmatmul.mubr.bf16.gmra.mrb[8].mxu0 %v14380_v8  ;;  %v8592_v13 = vrot.slane %v8590_v52, 4  ;;  %v8595_v51 = vrot.slane %v8593_v0, 5  ;;  %v8609_v60 = vshll.u32 %v8312_v28, 16 }
 0x35c   : > { %v7681_v11 = vsel %vm14849_vm5, %v7676_v35, %v7680_v53  ;;  %v8037_v32 = vsel %vm14843_vm4, %v8035_v23, %v8036_v26  ;;  %v8601_v18 = vrot.slane %v8599_v58, 5  ;;  %v8605_v1 = vrot.slane %v8603_v17, 4  ;;  %v7888_v26 = vld [vmem:[#allocation3 + $0xbc] sm:$0x1] }
 0x35d   : > { %v7691_v20 = vsel %vm14849_vm5, %v7686_v15, %v7690_v42  ;;  %v12439_v16 = vcombine.low %v8034_v9, %v8037_v32  ;;  %v8596_v37 = vor.u32 %v8595_v51, %v8592_v13  ;;  %v8611_v14 = vrot.slane %v8609_v60, 5  ;;  %v8314_v15 = vld [vmem:[#allocation3 + $0xac] sm:$0xf]  ;;  %v8315_v32 = vld [vmem:[#allocation3 + $0xb0] sm:$0x1] }
 0x35e   : > { %v12406_v2 = vcombine.low %v7681_v11, %v7691_v20  ;;  %v13375_v63 = vadd.f32 %v13374_v36, %v13373_v39  ;;  %v13311_v40 = vadd.f32 %v13310_v47, %v13309_v12  ;;  %v8606_v27 = vor.u32 %v8605_v1, %v8601_v18  ;;  %v13382_v39 = vpop.f32.mrb[166].mxu1 }
 0x35f   : > { %v8597_v41 = vrot.slane %v8596_v37, 4  ;;  %v13378_v53 = vadd.f32 %v13377_v50, %v13376_v10  ;;  %v13314_v7 = vadd.f32 %v13313_v54, %v13312_v45  ;;  %v7693_v30 = vshrl.u32 %v7371_v46, 16  ;;  %v8313_v10 = vld [vmem:[#allocation3 + $0xa8] sm:$0xf]  ;;  %v13318_v45 = vpop.f32.mrb[166].mxu0  ;;  %v13383_v43 = vpop.f32.mrb[167].mxu1 }
 0x360   : > { %11227 = vmatmul.mubr.bf16.gmra.mrb[0].mxu1 %v12406_v2  ;;  %v17205_v31 = vadd.f32 %v13375_v63, %v13311_v40  ;;  %v7696_v38 = vshll.u32 %v7371_v46, 16  ;;  %v7702_v19 = vshll.u32 %v7372_v29, 16  ;;  %v8607_v36 = vrot.slane %v8606_v27, 4  ;;  %v13319_v50 = vpop.f32.mrb[167].mxu0  ;;  %v14385_v54 = vld [vmem:[#allocation7 + $0x230] sm:$0xff]   ;;  %v17213_v13 = vpop.f32.mrb[168].mxu1 }
 0x361   : > { %11234 = vmatprep.mubr.bf16.mxu1 %v12439_v16  ;;  %v8602_v12 = vsel %vm14849_vm5, %v8597_v41, %v8601_v18  ;;  %v17209_v47 = vadd.f32 %v13378_v53, %v13314_v7  ;;  %v7706_v28 = vshrl.u32 %v7372_v29, 16  ;;  %v7695_v42 = vrot.slane %v7693_v30, 4  ;;  %v14382_v29 = vld [vmem:[#allocation3 + $0x9c] sm:$0xff]   ;;  %13921 = vmatprep.subr.bf16.mxu1 %v14385_v54  ;;  %v17219_v27 = vpop.f32.mrb[168].mxu0  ;;  %v7374_v30 = vld [vmem:[#allocation3 + $0xb4] sm:$0xf] }
 0x362   : > { %v7698_v8 = vrot.slane %v7696_v38, 5  ;;  %v7704_v52 = vrot.slane %v7702_v19, 5  ;;  %v7712_v0 = vshll.u32 %v7373_v5, 16  ;;  %v8612_v35 = vsel %vm14849_vm5, %v8607_v36, %v8611_v14  ;;  %13922 = vmatpush3.bf16.msra.mxu1 %v14385_v54  ;;  %v7375_v36 = vld [vmem:[#allocation3 + $0xb8] sm:$0xf] }
 0x363   : > { %v7708_v9 = vrot.slane %v7706_v28, 4  ;;  %v12424_v23 = vrot.slane %v7886_v61, 9  ;;  %v8040_v58 = vrot.slane %v7887_v4, 5  ;;  %v12469_v51 = vcombine.low %v8602_v12, %v8612_v35  ;;  %v7376_v28 = vld [vmem:[#allocation3 + $0xbc] sm:$0x1]  ;;  %v17229_v35 = vpop.f32.mrb[169].mxu1 }
 0x364   : > { %v7699_v17 = vor.u32 %v7698_v8, %v7695_v42  ;;  %v7714_v46 = vrot.slane %v7712_v0, 5  ;;  %v8043_v11 = vrot.slane %v7888_v26, 5  ;;  %v8614_v16 = vshrl.u32 %v8313_v10, 16  ;;  %v7889_v0 = vld [vmem:[#allocation3 + $0xc0] sm:$0xe] }
 0x365   : > { %v7709_v18 = vor.u32 %v7708_v9, %v7704_v52  ;;  %v8041_v60 = vsel %vm14843_vm4, %v12424_v23, %v8040_v58  ;;  %v8042_v20 = vrot.slane %v8040_v58, 4  ;;  %11315 = vmatprep.mubr.bf16.mxu0 %v12469_v51  ;;  %v8617_v1 = vshll.u32 %v8313_v10, 16  ;;  %v7890_v54 = vld [vmem:[#allocation3 + $0xc4] sm:$0xf]  ;;  %v17231_v9 = vpop.f32.mrb[169].mxu0 }
 0x366   : > { %v7700_v37 = vrot.slane %v7699_v17, 4  ;;  %v8623_v2 = vshll.u32 %v8314_v15, 16  ;;  %v8627_v14 = vshrl.u32 %v8314_v15, 16  ;;  %11316 = vmatmul.mubr.bf16.gmra.mrb[12].mxu0 %v14382_v29  ;;  %v8616_v5 = vrot.slane %v8614_v16, 4  ;;  %v7891_v17 = vld [vmem:[#allocation3 + $0xc8] sm:$0x1] }
 0x367   : > { %v7710_v63 = vrot.slane %v7709_v18, 4  ;;  %v8044_v40 = vsel %vm14843_vm4, %v8042_v20, %v8043_v11  ;;  %v8633_v41 = vshll.u32 %v8315_v32, 16  ;;  %v8619_v61 = vrot.slane %v8617_v1, 5  ;;  %v14387_v20 = vld [vmem:[#allocation7 + $0x238] sm:$0xff]  }
 0x368   : > { %v7705_v53 = vsel %vm14849_vm5, %v7700_v37, %v7704_v52  ;;  %v12440_v7 = vcombine.low %v8041_v60, %v8044_v40  ;;  %v8625_v4 = vrot.slane %v8623_v2, 5  ;;  %v8629_v19 = vrot.slane %v8627_v14, 4  ;;  %v8317_v60 = vld [vmem:[#allocation3 + $0xb8] sm:$0xf]  ;;  %v8318_v14 = vld [vmem:[#allocation3 + $0xbc] sm:$0x1]  ;;  %13923 = vmatprep.subr.bf16.mxu1 %v14387_v20 }
 0x369   : > { %v7715_v38 = vsel %vm14849_vm5, %v7710_v63, %v7714_v46  ;;  %v8635_v26 = vrot.slane %v8633_v41, 5  ;;  %v13381_v12 = vadd.f32 %v17201_v21, %v17191_v6  ;;  %v8620_v42 = vor.u32 %v8619_v61, %v8616_v5  ;;  %v17233_v6 = vpop.f32.mrb[170].mxu1  ;;  %v17235_v21 = vpop.f32.mrb[170].mxu0  ;;  %13924 = vmatpush3.bf16.msra.mxu1 %v14387_v20 }
 0x36a   : > { %v12407_v10 = vcombine.low %v7705_v53, %v7715_v38  ;;  %v13317_v8 = vadd.f32 %v17203_v3, %v17199_v62  ;;  %v13384_v52 = vadd.f32 %v13383_v43, %v13382_v39  ;;  %v8630_v23 = vor.u32 %v8629_v19, %v8625_v4  ;;  %v8316_v39 = vld [vmem:[#allocation3 + $0xb4] sm:$0xf]  ;;  %v13389_v43 = vpop.f32.mrb[171].mxu1  ;;  %v13325_v11 = vpop.f32.mrb[171].mxu0 }
 0x36b   : > { %v13320_v58 = vadd.f32 %v13319_v50, %v13318_v45  ;;  %v7717_v15 = vshrl.u32 %v7374_v30, 16  ;;  %v7720_v51 = vshll.u32 %v7374_v30, 16  ;;  %v8621_v46 = vrot.slane %v8620_v42, 4  ;;  %v17243_v63 = vpop.f32.mrb[172].mxu1 }
 0x36c   : > { %11235 = vmatmul.mubr.bf16.gmra.mrb[4].mxu1 %v12407_v10  ;;  %v17237_v29 = vadd.f32 %v13381_v12, %v13317_v8  ;;  %v7726_v62 = vshll.u32 %v7375_v36, 16  ;;  %v7730_v3 = vshrl.u32 %v7375_v36, 16  ;;  %v8631_v32 = vrot.slane %v8630_v23, 4  ;;  %v17249_v10 = vpop.f32.mrb[172].mxu0  ;;  %v17259_v20 = vpop.f32.mrb[173].mxu1 }
 0x36d   : > { %11242 = vmatprep.mubr.bf16.mxu1 %v12440_v7  ;;  %v17239_v18 = vadd.f32 %v13384_v52, %v13320_v58  ;;  %v7719_v45 = vrot.slane %v7717_v15, 4  ;;  %v7722_v50 = vrot.slane %v7720_v51, 5  ;;  %v8626_v16 = vsel %vm14849_vm5, %v8621_v46, %v8625_v4  ;;  %v14384_v4 = vld [vmem:[#allocation3 + $0xa8] sm:$0xff]  }
 0x36e   : > { %v7728_v37 = vrot.slane %v7726_v62, 5  ;;  %v7732_v1 = vrot.slane %v7730_v3, 4  ;;  %v7736_v2 = vshll.u32 %v7376_v28, 16  ;;  %v8636_v40 = vsel %vm14849_vm5, %v8631_v32, %v8635_v26  ;;  %v7377_v62 = vld [vmem:[#allocation3 + $0xc0] sm:$0xf] }
 0x36f   : > { %v7723_v5 = vor.u32 %v7722_v50, %v7719_v45  ;;  %v12425_v41 = vrot.slane %v7889_v0, 9  ;;  %v8047_v53 = vrot.slane %v7890_v54, 5  ;;  %v12470_v7 = vcombine.low %v8626_v16, %v8636_v40  ;;  %v7378_v3 = vld [vmem:[#allocation3 + $0xc4] sm:$0xf]  ;;  %v17261_v16 = vpop.f32.mrb[173].mxu0 }
 0x370   : > { %v7733_v61 = vor.u32 %v7732_v1, %v7728_v37  ;;  %v7738_v30 = vrot.slane %v7736_v2, 5  ;;  %v8050_v38 = vrot.slane %v7891_v17, 5  ;;  %v8638_v28 = vshrl.u32 %v8316_v39, 16  ;;  %v8319_v40 = vld [vmem:[#allocation3 + $0xc0] sm:$0xf] }
 0x371   : > { %v7724_v19 = vrot.slane %v7723_v5, 4  ;;  %v8048_v12 = vsel %vm14843_vm4, %v12425_v41, %v8047_v53  ;;  %v8049_v36 = vrot.slane %v8047_v53, 4  ;;  %11323 = vmatprep.mubr.bf16.mxu0 %v12470_v7  ;;  %v8641_v42 = vshll.u32 %v8316_v39, 16  ;;  %v17267_v5 = vpop.f32.mrb[174].mxu1  ;;  %v17269_v41 = vpop.f32.mrb[174].mxu0 }
 0x372   : > { %v7734_v26 = vrot.slane %v7733_v61, 4  ;;  %v8647_v8 = vshll.u32 %v8317_v60, 16  ;;  %v8651_v52 = vshrl.u32 %v8317_v60, 16  ;;  %11324 = vmatmul.mubr.bf16.gmra.mrb[16].mxu0 %v14384_v4  ;;  %v8640_v23 = vrot.slane %v8638_v28, 4  ;;  %v7379_v60 = vld [vmem:[#allocation3 + $0xc8] sm:$0x1] }
 0x373   : > { %v7729_v0 = vsel %vm14849_vm5, %v7724_v19, %v7728_v37  ;;  %v8051_v54 = vsel %vm14843_vm4, %v8049_v36, %v8050_v38  ;;  %v8657_v58 = vshll.u32 %v8318_v14, 16  ;;  %v8643_v17 = vrot.slane %v8641_v42, 5  ;;  %v17271_v61 = vpop.f32.mrb[175].mxu1 }
 0x374   : > { %v7739_v15 = vsel %vm14849_vm5, %v7734_v26, %v7738_v30  ;;  %v12441_v51 = vcombine.low %v8048_v12, %v8051_v54  ;;  %v8649_v46 = vrot.slane %v8647_v8, 5  ;;  %v8653_v32 = vrot.slane %v8651_v52, 4  ;;  %v17273_v30 = vpop.f32.mrb[175].mxu0  ;;  %v8321_v26 = vld [vmem:[#allocation3 + $0xc8] sm:$0x1]  ;;  %v17281_v8 = vpop.f32.mrb[176].mxu1 }
 0x375   : > { %v12408_v39 = vcombine.low %v7729_v0, %v7739_v15  ;;  %v8659_v45 = vrot.slane %v8657_v58, 5  ;;  %v13387_v50 = vadd.f32 %v17229_v35, %v17213_v13  ;;  %v8644_v37 = vor.u32 %v8643_v17, %v8640_v23  ;;  %v14386_v54 = vld [vmem:[#allocation3 + $0xb4] sm:$0xff]  }
 0x376   : > { %v13323_v1 = vadd.f32 %v17231_v9, %v17219_v27  ;;  %v13390_v2 = vadd.f32 %v13389_v43, %v17233_v6  ;;  %v13326_v14 = vadd.f32 %v13325_v11, %v17235_v21  ;;  %v8654_v13 = vor.u32 %v8653_v32, %v8649_v46  ;;  %v8320_v43 = vld [vmem:[#allocation3 + $0xc4] sm:$0xf]  ;;  %v8813_v15 = vld [vmem:[#allocation3 + $0x78] sm:$0xe]  ;;  %v17285_v32 = vpop.f32.mrb[176].mxu0 }
 0x377   : > { %11243 = vmatmul.mubr.bf16.gmra.mrb[8].mxu1 %v12408_v39  ;;  %v7741_v35 = vshrl.u32 %v7377_v62, 16  ;;  %v7744_v53 = vshll.u32 %v7377_v62, 16  ;;  %v7750_v7 = vshll.u32 %v7378_v3, 16  ;;  %v8645_v27 = vrot.slane %v8644_v37, 4 }
 0x378   : > { %11250 = vmatprep.mubr.bf16.mxu1 %v12441_v51  ;;  %v17275_v9 = vadd.f32 %v13387_v50, %v13323_v1  ;;  %v17277_v6 = vadd.f32 %v13390_v2, %v13326_v14  ;;  %v7754_v21 = vshrl.u32 %v7378_v3, 16  ;;  %v8655_v11 = vrot.slane %v8654_v13, 4  ;;  %v8814_v51 = vld [vmem:[#allocation3 + $0x7c] sm:$0xf]  ;;  %v17287_v50 = vpop.f32.mrb[177].mxu1 }
 0x379   : > { %v7743_v38 = vrot.slane %v7741_v35, 4  ;;  %v7746_v19 = vrot.slane %v7744_v53, 5  ;;  %v7752_v4 = vrot.slane %v7750_v7, 5  ;;  %v8650_v12 = vsel %vm14849_vm5, %v8645_v27, %v8649_v46  ;;  %v8815_v46 = vld [vmem:[#allocation3 + $0x80] sm:$0x1]  ;;  %v17291_v14 = vpop.f32.mrb[178].mxu1 }
 0x37a   : > { %17868 = vst [vmem:[#allocation14_spill] sm:$0xff] %v17277_v6  ;;  %v7756_v36 = vrot.slane %v7754_v21, 4  ;;  %v7760_v28 = vshll.u32 %v7379_v60, 16  ;;  %v8662_v42 = vshrl.u32 %v8319_v40, 16  ;;  %v8660_v52 = vsel %vm14849_vm5, %v8655_v11, %v8659_v45  ;;  %v17289_v45 = vpop.f32.mrb[177].mxu0  ;;  %v13481_v27 = vpop.f32.mrb[179].mxu1 }
 0x37b   : > { %v7747_v0 = vor.u32 %v7746_v19, %v7743_v38  ;;  %v8665_v23 = vshll.u32 %v8319_v40, 16  ;;  %v8671_v58 = vshll.u32 %v8320_v43, 16  ;;  %v12471_v17 = vcombine.low %v8650_v12, %v8660_v52  ;;  %v17293_v7 = vpop.f32.mrb[178].mxu0  ;;  %v17297_v12 = vpop.f32.mrb[180].mxu1  ;;  %v8816_v52 = vld [vmem:[#allocation3 + $0x84] sm:$0xe] }
 0x37c   : > { %v7757_v62 = vor.u32 %v7756_v36, %v7752_v4  ;;  %v7762_v3 = vrot.slane %v7760_v28, 5  ;;  %v8664_v39 = vrot.slane %v8662_v42, 4  ;;  %v8675_v2 = vshrl.u32 %v8320_v43, 16  ;;  %v13417_v43 = vpop.f32.mrb[179].mxu0 }
 0x37d   : > { %v7748_v60 = vrot.slane %v7747_v0, 4  ;;  %v8667_v37 = vrot.slane %v8665_v23, 5  ;;  %v8673_v1 = vrot.slane %v8671_v58, 5  ;;  %11331 = vmatprep.mubr.bf16.mxu0 %v12471_v17  ;;  %v8681_v13 = vshll.u32 %v8321_v26, 16 }
 0x37e   : > { %v7758_v40 = vrot.slane %v7757_v62, 4  ;;  %v12482_v35 = vrot.slane %v8813_v15, 9  ;;  %v8943_v53 = vrot.slane %v8814_v51, 5  ;;  %11332 = vmatmul.mubr.bf16.gmra.mrb[20].mxu0 %v14386_v54  ;;  %v8677_v38 = vrot.slane %v8675_v2, 4  ;;  %v8817_v54 = vld [vmem:[#allocation3 + $0x88] sm:$0xf] }
 0x37f   : > { %v7753_v21 = vsel %vm14849_vm5, %v7748_v60, %v7752_v4  ;;  %v8668_v11 = vor.u32 %v8667_v37, %v8664_v39  ;;  %v8946_v19 = vrot.slane %v8815_v46, 5  ;;  %v8683_v28 = vrot.slane %v8681_v13, 5  ;;  %v8818_v15 = vld [vmem:[#allocation3 + $0x8c] sm:$0x1]  ;;  %v17305_v51 = vpop.f32.mrb[180].mxu0 }
 0x380   : > { %v7763_v36 = vsel %vm14849_vm5, %v7758_v40, %v7762_v3  ;;  %v8944_v26 = vsel %vm14843_vm4, %v12482_v35, %v8943_v53  ;;  %v8945_v42 = vrot.slane %v8943_v53, 4  ;;  %v8678_v58 = vor.u32 %v8677_v38, %v8673_v1  ;;  %v8819_v46 = vld [vmem:[#allocation3 + $0x90] sm:$0xe]  ;;  %v8820_v60 = vld [vmem:[#allocation3 + $0x94] sm:$0xf]  ;;  %v17317_v53 = vpop.f32.mrb[181].mxu1 }
 0x381   : > { %v12409_v0 = vcombine.low %v7753_v21, %v7763_v36  ;;  %v8669_v23 = vrot.slane %v8668_v11, 4  ;;  %v13393_v4 = vadd.f32 %v17259_v20, %v17243_v63  ;;  %v13329_v62 = vadd.f32 %v17261_v16, %v17249_v10  ;;  %v8821_v37 = vld [vmem:[#allocation3 + $0x98] sm:$0x1]  ;;  %v421_v13 = vld [vmem:[#allocation3 + $0xcc] sm:$0x1]  ;;  %v17319_v10 = vpop.f32.mrb[181].mxu0 }
 0x382   : > { %v8947_v17 = vsel %vm14843_vm4, %v8945_v42, %v8946_v19  ;;  %v13396_v3 = vadd.f32 %v17271_v61, %v17267_v5  ;;  %v13332_v39 = vadd.f32 %v17273_v30, %v17269_v41  ;;  %v8679_v20 = vrot.slane %v8678_v58, 4  ;;  %v477_v35 = vld [vmem:[#allocation3 + $0xd4] sm:$0x1]  ;;  %v8323_v30 = vld [vmem:[#allocation3 + $0xd0] sm:$0xf]  ;;  %v17325_v21 = vpop.f32.mrb[182].mxu1 }
 0x383   : > { %11251 = vmatmul.mubr.bf16.gmra.mrb[12].mxu1 %v12409_v0  ;;  %v8674_v63 = vsel %vm14849_vm5, %v8669_v23, %v8673_v1  ;;  %v12498_v2 = vcombine.low %v8944_v26, %v8947_v17  ;;  %v12483_v40 = vrot.slane %v8816_v52, 9  ;;  %v17321_v16 = vadd.f32 %v13393_v4, %v13329_v62  ;;  %v17327_v11 = vpop.f32.mrb[182].mxu0  ;;  %v14388_v38 = vld [vmem:[#allocation3 + $0xc0] sm:$0xff]   ;;  %v13487_v42 = vpop.f32.mrb[183].mxu1 }
 0x384   : > { %v17323_v5 = vadd.f32 %v13396_v3, %v13332_v39  ;;  %v8950_v41 = vrot.slane %v8817_v54, 5  ;;  %v8953_v61 = vrot.slane %v8818_v15, 5  ;;  %v8684_v1 = vsel %vm14849_vm5, %v8679_v20, %v8683_v28  ;;  %v17331_v52 = vpop.f32.mrb[183].mxu0  ;;  %v8822_v54 = vld [vmem:[#allocation3 + $0x9c] sm:$0xe]  ;;  %v17339_v28 = vpop.f32.mrb[184].mxu1 }
 0x385   : > { %17869 = vst [vmem:[#allocation15_spill] sm:$0xff] %v17321_v16  ;;  %13925 = vmatprep.mubr.bf16.mxu1 %v12498_v2  ;;  %v12484_v19 = vrot.slane %v8819_v46, 9  ;;  %v8957_v36 = vrot.slane %v8820_v60, 5  ;;  %v8960_v26 = vrot.slane %v8821_v37, 5  ;;  %v12472_v0 = vcombine.low %v8674_v63, %v8684_v1  ;;  %v8823_v15 = vld [vmem:[#allocation3 + $0xa0] sm:$0xf] }
 0x386   : > { %17870 = vst [vmem:[#allocation16_spill] sm:$0xff] %v17323_v5  ;;  %v8951_v23 = vsel %vm14843_vm4, %v12483_v40, %v8950_v41  ;;  %v8952_v58 = vrot.slane %v8950_v41, 4  ;;  %v17337_v4 = vadd.f32 %v17287_v50, %v17281_v8  ;;  %v13415_v3 = vadd.f32 %v17289_v45, %v17285_v32  ;;  %v8824_v46 = vld [vmem:[#allocation3 + $0xa4] sm:$0x1]  ;;  %v8825_v60 = vld [vmem:[#allocation3 + $0xa8] sm:$0xe] }
 0x387   : > { %v8958_v17 = vsel %vm14843_vm4, %v12484_v19, %v8957_v36  ;;  %v8959_v62 = vrot.slane %v8957_v36, 4  ;;  %v17346_v39 = vadd.f32 %v13481_v27, %v17291_v14  ;;  %v17348_v37 = vpop.f32.mrb[184].mxu0  ;;  %11339 = vmatprep.mubr.bf16.mxu0 %v12472_v0  ;;  %v13418_v50 = vadd.f32 %v13417_v43, %v17293_v7  ;;  %v8826_v32 = vld [vmem:[#allocation3 + $0xac] sm:$0xf]  ;;  %v17357_v45 = vpop.f32.mrb[185].mxu1 }
 0x388   : > { %v8954_v8 = vsel %vm14843_vm4, %v8952_v58, %v8953_v61  ;;  %v422_v63 = vsel %vm16066_vm8, 0, %v421_v13  ;;  %v478_v20 = vsel %vm16073_vm10, 0, %v477_v35  ;;  %v17359_v14 = vpop.f32.mrb[185].mxu0  ;;  %11340 = vmatmul.mubr.bf16.gmra.mrb[24].mxu0 %v14388_v38  ;;  %v17364_v40 = vadd.f32 %v13415_v3, %v17089_v33  ;;  %v8827_v7 = vld [vmem:[#allocation3 + $0xb0] sm:$0x1]  ;;  %v17366_v43 = vpop.f32.mrb[186].mxu1 }
 0x389   : > { %17871 = vst [vmem:[#allocation17_spill] sm:$0xff] %v17346_v39  ;;  %v12499_v27 = vcombine.low %v8951_v23, %v8954_v8  ;;  %v8961_v2 = vsel %vm14843_vm4, %v8959_v62, %v8960_v26  ;;  %423 = vst [vmem:[#allocation3 + $0xcc] sm:$0x1] %v422_v63  ;;  %v8695_v25 = vshll.u32 %v8323_v30, 16  ;;  %v17368_v59 = vpop.f32.mrb[186].mxu0  ;;  %v17371_v35 = vadd.f32 %v13418_v50, %v17133_v34  ;;  %v17373_v19 = vpop.f32.mrb[187].mxu1 }
 0x38a   : > { %479 = vst [vmem:[#allocation3 + $0xd4] sm:$0x1] %v478_v20  ;;  %v12500_v13 = vcombine.low %v8958_v17, %v8961_v2  ;;  %v8699_v41 = vshrl.u32 %v8323_v30, 16  ;;  %v12485_v61 = vrot.slane %v8822_v54, 9  ;;  %v8828_v1 = vld [vmem:[#allocation3 + $0xb4] sm:$0xe]  ;;  %v17385_v62 = vadd.f32 %v17317_v53, %v17297_v12 }
 0x38b   : > { %17872 = vst [vmem:[#allocation19_spill] sm:$0xff] %v17371_v35  ;;  %v8829_v38 = vld [vmem:[#allocation3 + $0xb8] sm:$0xf]  ;;  %v17375_v33 = vpop.f32.mrb[187].mxu0  ;;  %13926 = vmatmul.mubr.bf16.vlgmr.msra.gmra.mrb[16].mxu1 %v12499_v27  ;;  %v17377_v36 = vrot.slane %v8695_v25, 5  ;;  %v8964_v26 = vrot.slane %v8823_v15, 5  ;;  %v17396_v50 = vadd.f32 %v13487_v42, %v17325_v21  ;;  %v13424_v25 = vadd.f32 %v17331_v52, %v17327_v11 }
 0x38c   : > { %v8967_v0 = vrot.slane %v8824_v46, 5  ;;  %v12486_v23 = vrot.slane %v8825_v60, 9  ;;  %v17379_v58 = vpop.f32.mrb[188].mxu1  ;;  %v17381_v17 = vpop.f32.mrb[188].mxu0  ;;  %13929 = vmatprep.mubr.bf16.mxu1 %v12500_v13  ;;  %v8701_v34 = vrot.slane %v8699_v41, 4  ;;  %v8971_v30 = vrot.slane %v8826_v32, 5 }
 0x38d   : > { %v8974_v54 = vrot.slane %v8827_v7, 5  ;;  %v17387_v3 = vpop.f32.mrb[189].mxu1  ;;  %v17389_v8 = vpop.f32.mrb[189].mxu0  ;;  %v8965_v15 = vsel %vm14843_vm4, %v12485_v61, %v8964_v26  ;;  %v8966_v46 = vrot.slane %v8964_v26, 4  ;;  %v13421_v60 = vadd.f32 %v17319_v10, %v17305_v51  ;;  %17873 = vst [vmem:[#allocation18_spill] sm:$0xff] %v17396_v50 }
 0x38e   : > { %v8830_v63 = vld [vmem:[#allocation3 + $0xbc] sm:$0x1]  ;;  %v8831_v20 = vld [vmem:[#allocation3 + $0xc0] sm:$0xe]  ;;  %v17398_v32 = vpop.f32.mrb[190].mxu1  ;;  %v17400_v12 = vpop.f32.mrb[190].mxu0  ;;  %v8702_v53 = vor.u32 %v8701_v34, %v17377_v36  ;;  %v8972_v27 = vsel %vm14843_vm4, %v12486_v23, %v8971_v30 }
 0x38f   : > { %v8973_v2 = vrot.slane %v8971_v30, 4  ;;  %v8832_v7 = vld [vmem:[#allocation3 + $0xc4] sm:$0xf]  ;;  %v17407_v51 = vpop.f32.mrb[191].mxu1  ;;  %v17409_v10 = vpop.f32.mrb[191].mxu0  ;;  %v8968_v21 = vsel %vm14843_vm4, %v8966_v46, %v8967_v0  ;;  %v17414_v42 = vadd.f32 %v13421_v60, %v17143_v55  ;;  %v12487_v13 = vrot.slane %v8828_v1, 9 }
 0x390   : > { %v8978_v41 = vrot.slane %v8829_v38, 5  ;;  %v8833_v61 = vld [vmem:[#allocation3 + $0xc8] sm:$0x1]  ;;  %v17416_v26 = vpop.f32.mrb[192].mxu1  ;;  %v17418_v23 = vpop.f32.mrb[192].mxu0  ;;  %v17420_v52 = vrot.slane %v8702_v53, 4  ;;  %v12501_v30 = vcombine.low %v8965_v15, %v8968_v21  ;;  %v17425_v0 = vadd.f32 %v13424_v25, %v17145_v22 }
 0x391   : > { %v8322_v34 = vld [vmem:[#allocation3 + $0xcc] sm:$0xf]  ;;  %v8324_v11 = vld [vmem:[#allocation3 + $0xd4] sm:$0x1]  ;;  %v8975_v5 = vsel %vm14843_vm4, %v8973_v2, %v8974_v54  ;;  %v17427_v60 = vpop.f32.mrb[193].mxu1  ;;  %v8981_v50 = vrot.slane %v8830_v63, 5  ;;  %v13427_v63 = vadd.f32 %v17359_v14, %v17348_v37  ;;  %v17449_v37 = vadd.f32 %v17373_v19, %v17366_v43 }
 0x392   : > { %v8686_v55 = vshrl.u32 %v8322_v34, 16  ;;  %v8689_v46 = vshll.u32 %v8322_v34, 16  ;;  %v8705_v1 = vshll.u32 %v8324_v11, 16  ;;  %v12502_v38 = vcombine.low %v8972_v27, %v8975_v5  ;;  %v8834_v16 = vld [vmem:[#allocation3 + $0xcc] sm:$0xe]  ;;  %v13438_v21 = vpop.f32.mrb[193].mxu0 }
 0x393   : > { %v8979_v39 = vsel %vm14843_vm4, %v12487_v13, %v8978_v41  ;;  %v8980_v35 = vrot.slane %v8978_v41, 4  ;;  %v12488_v53 = vrot.slane %v8831_v20, 9  ;;  %v8835_v15 = vld [vmem:[#allocation3 + $0xd0] sm:$0xf]  ;;  %13930 = vmatmul.mubr.bf16.gmra.mrb[20].mxu1 %v12501_v30  ;;  %v8985_v22 = vrot.slane %v8832_v7, 5  ;;  %v13504_v25 = vpop.f32.mrb[194].mxu1 }
 0x394   : > { %v8688_v6 = vrot.slane %v8686_v55, 4  ;;  %v8691_v54 = vrot.slane %v8689_v46, 5  ;;  %v8707_v2 = vrot.slane %v8705_v1, 5  ;;  %v13440_v34 = vpop.f32.mrb[194].mxu0  ;;  %13933 = vmatprep.mubr.bf16.mxu1 %v12502_v38  ;;  %v8988_v27 = vrot.slane %v8833_v61, 5  ;;  %v13505_v41 = vpop.f32.mrb[195].mxu1 }
 0x395   : > { %v8982_v5 = vsel %vm14843_vm4, %v8980_v35, %v8981_v50  ;;  %v17435_v13 = vadd.f32 %v17357_v45, %v17339_v28  ;;  %v8836_v20 = vld [vmem:[#allocation3 + $0xd4] sm:$0x1]  ;;  %v13441_v11 = vpop.f32.mrb[195].mxu0  ;;  %v8986_v35 = vsel %vm14843_vm4, %v12488_v53, %v8985_v22  ;;  %v13507_v50 = vpop.f32.mrb[196].mxu1  ;;  %v8987_v46 = vrot.slane %v8985_v22, 4 }
 0x396   : > { %v8692_v55 = vor.u32 %v8691_v54, %v8688_v6  ;;  %v8708_v7 = vsel %vm14849_vm5, %v17420_v52, %v8707_v2  ;;  %v12503_v30 = vcombine.low %v8979_v39, %v8982_v5  ;;  %v13443_v61 = vpop.f32.mrb[196].mxu0  ;;  %v17445_v28 = vadd.f32 %v13427_v63, %v17163_v57  ;;  %v13508_v45 = vpop.f32.mrb[197].mxu1 }
 0x397   : > { %v13430_v6 = vadd.f32 %v17375_v33, %v17368_v59  ;;  %v13444_v14 = vpop.f32.mrb[197].mxu0  ;;  %v12489_v39 = vrot.slane %v8834_v16, 9  ;;  %v8992_v1 = vrot.slane %v8835_v15, 5  ;;  %v8995_v38 = vrot.slane %v8836_v20, 5  ;;  %v13510_v53 = vpop.f32.mrb[198].mxu1  ;;  %v14389_v15 = vld [vmem:[#allocation3 + $0xcc] sm:$0xff]  }
 0x398   : > { %v8693_v52 = vrot.slane %v8692_v55, 4  ;;  %v13446_v54 = vpop.f32.mrb[198].mxu0  ;;  %v8989_v2 = vsel %vm14843_vm4, %v8987_v46, %v8988_v27  ;;  %v13497_v43 = vadd.f32 %v17387_v3, %v17379_v58  ;;  %v13433_v59 = vadd.f32 %v17389_v8, %v17381_v17  ;;  %v13511_v19 = vpop.f32.mrb[199].mxu1 }
 0x399   : > { %v17456_v57 = vadd.f32 %v13430_v6, %v17167_v44  ;;  %v13447_v33 = vpop.f32.mrb[199].mxu0  ;;  %v12504_v22 = vcombine.low %v8986_v35, %v8989_v2  ;;  %v8993_v5 = vsel %vm14843_vm4, %v12489_v39, %v8992_v1  ;;  %v8994_v27 = vrot.slane %v8992_v1, 4  ;;  %v13513_v44 = vpop.f32.mrb[200].mxu1 }
 0x39a   : > { %v8698_v16 = vsel %vm14849_vm5, %v8693_v52, %v17377_v36  ;;  %v13449_v63 = vpop.f32.mrb[200].mxu0  ;;  %v9978_v58 = vadd.f32 %v13433_v59, %v17181_v56  ;;  %v13500_v17 = vadd.f32 %v17407_v51, %v17398_v32  ;;  %v13436_v3 = vadd.f32 %v17409_v10, %v17400_v12  ;;  %v13514_v8 = vpop.f32.mrb[201].mxu1  ;;  %v17876_v59 = vld [vmem:[#allocation18_spill] sm:$0xff] }
 0x39b   : > { %v12473_v20 = vcombine.low %v8698_v16, %v8708_v7  ;;  %v13450_v49 = vpop.f32.mrb[201].mxu0  ;;  %13934 = vmatmul.mubr.bf16.gmra.mrb[24].mxu1 %v12503_v30  ;;  %v8996_v36 = vsel %vm14843_vm4, %v8994_v27, %v8995_v38  ;;  %v13503_v55 = vadd.f32 %v17427_v60, %v17416_v26  ;;  %v13439_v35 = vadd.f32 %v13438_v21, %v17418_v23  ;;  %v13516_v46 = vpop.f32.mrb[202].mxu1 }
 0x39c   : > { %v13506_v7 = vadd.f32 %v13505_v41, %v13504_v25  ;;  %v13452_v56 = vpop.f32.mrb[202].mxu0  ;;  %13937 = vmatprep.mubr.bf16.mxu1 %v12504_v22  ;;  %v12505_v32 = vcombine.low %v8993_v5, %v8996_v36  ;;  %v9981_v51 = vadd.f32 %v13436_v3, %v17183_v24  ;;  %v13442_v12 = vadd.f32 %v13441_v11, %v13440_v34  ;;  %v13517_v10 = vpop.f32.mrb[203].mxu1 }
 0x39d   : > { %11347 = vmatprep.mubr.bf16.mxu0 %v12473_v20  ;;  %v13453_v6 = vpop.f32.mrb[203].mxu0  ;;  %v9986_v48 = vadd.f32 %v13439_v35, %v17205_v31  ;;  %v13509_v30 = vadd.f32 %v13508_v45, %v13507_v50  ;;  %v13445_v52 = vadd.f32 %v13444_v14, %v13443_v61  ;;  %v13512_v39 = vadd.f32 %v13511_v19, %v13510_v53  ;;  %v17874_v45 = vld [vmem:[#allocation14_spill] sm:$0xff]  ;;  %v17875_v53 = vld [vmem:[#allocation15_spill] sm:$0xff] }
 0x39e   : > { %11348 = vmatmul.mubr.bf16.gmra.mrb[28].mxu0 %v14389_v15  ;;  %v9989_v23 = vadd.f32 %v13442_v12, %v17209_v47  ;;  %v13448_v60 = vadd.f32 %v13447_v33, %v13446_v54  ;;  %v13515_v21 = vadd.f32 %v13514_v8, %v13513_v44  ;;  %v13451_v25 = vadd.f32 %v13450_v49, %v13449_v63  ;;  %v17877_v33 = vld [vmem:[#allocation19_spill] sm:$0xff]  ;;  %v10258_v49 = vld [vmem:[%s14722_s15 + $0x10] sm:$0xff] }
 0x39f   : > { %v9994_v1 = vadd.f32 %v13445_v52, %v17237_v29  ;;  %v13518_v38 = vadd.f32 %v13517_v10, %v13516_v46  ;;  %v13454_v24 = vadd.f32 %v13453_v6, %v13452_v56  ;;  %v10059_v61 = vadd.f32 %v17385_v62, %v17414_v42  ;;  %v17879_v42 = vld [vmem:[#allocation16_spill] sm:$0xff]  ;;  %v17517_v44 = vld [vmem:[%s17820_s6] ss:$0 sm:$0xff] }
 0x3a0   : > { %v9997_v2 = vadd.f32 %v13448_v60, %v17239_v18  ;;  %v10002_v31 = vadd.f32 %v13451_v25, %v17275_v9  ;;  %v10051_v47 = vadd.f32 %v17337_v4, %v17364_v40  ;;  %v10062_v19 = vadd.f32 %v17876_v59, %v17425_v0  ;;  %v17878_v18 = vld [vmem:[#allocation17_spill] sm:$0xff]  ;;  %v17522_v63 = vld [vmem:[%s17821_s7] ss:$0 sm:$0xff] }
 0x3a1   : > { %v10005_v14 = vadd.f32 %v13454_v24, %v17874_v45  ;;  %v10054_v16 = vadd.f32 %v17878_v18, %v17877_v33  ;;  %v10075_v9 = vadd.f32 %v13497_v43, %v9978_v58  ;;  %v10067_v15 = vadd.f32 %v17435_v13, %v17445_v28  ;;  %v10257_v6 = vld [vmem:[%s14722_s15 + $0x8] sm:$0xff]  ;;  %v10263_v18 = vld [vmem:[%s14722_s15 + $0x38] sm:$0xff] }
 0x3a2   : > { %v10078_v62 = vadd.f32 %v13500_v17, %v9981_v51  ;;  %v10070_v40 = vadd.f32 %v17449_v37, %v17456_v57  ;;  %v17502_v22 = vadd.f32 %v13509_v30, %v9994_v1  ;;  %v17504_v5 = vadd.f32 %v13503_v55, %v9986_v48 }
 0x3a3   : > { %13938 = vmatmul.mubr.bf16.gmra.mrb[28].mxu1 %v12505_v32  ;;  %v17506_v0 = vadd.f32 %v13512_v39, %v9997_v2  ;;  %v17508_v27 = vadd.f32 %v13506_v7, %v9989_v23  ;;  %v17510_v43 = vadd.f32 %v13515_v21, %v10002_v31  ;;  %v17512_v13 = vadd.f32 %v13518_v38, %v10005_v14  ;;  %v10256_v7 = vld [vmem:[%s14722_s15] sm:$0xff]  ;;  %v10259_v32 = vld [vmem:[%s14722_s15 + $0x18] sm:$0xff] }
 0x3a9   : > { %v13455_v26 = vpop.f32.mrb[204].mxu0 }
 0x3aa   : > { %v13456_v41 = vpop.f32.mrb[205].mxu0 }
 0x3ab   : > { %v13457_v34 = vadd.f32 %v13456_v41, %v13455_v26  ;;  %v13458_v11 = vpop.f32.mrb[206].mxu0 }
 0x3ac   : > { %v13459_v50 = vpop.f32.mrb[207].mxu0 }
 0x3ad   : > { %v17489_v54 = vadd.f32 %v13457_v34, %v17875_v53  ;;  %v13460_v29 = vadd.f32 %v13459_v50, %v13458_v11  ;;  %v10262_v50 = vld [vmem:[%s14722_s15 + $0x30] sm:$0xff]  ;;  %v10260_v53 = vld [vmem:[%s14722_s15 + $0x20] sm:$0xff] }
 0x3af   : > { %v17498_v4 = vadd.f32 %v13460_v29, %v17879_v42  ;;  %v10261_v42 = vld [vmem:[%s14722_s15 + $0x28] sm:$0xff] }
 0x3b6   : > { %v13895_v28 = vpop.f32.mrb[208].mxu0 }
 0x3b7   : > { %v10156_v37 = vadd.f32 %v13895_v28, %v10059_v61  ;;  %v10147_v57 = vpop.f32.mrb[209].mxu0 }
 0x3b8   : > { %v10148_v20 = vadd.f32 %v10147_v57, %v10051_v47  ;;  %v13896_v58 = vpop.f32.mrb[210].mxu0 }
 0x3b9   : > { %v10219_v17 = vmul.f32 %v17517_v44, %v10156_v37  ;;  %v10159_v3 = vadd.f32 %v13896_v58, %v10062_v19  ;;  %v10150_v8 = vpop.f32.mrb[211].mxu0 }
 0x3ba   : > { %v10217_v36 = vmul.f32 %v17517_v44, %v10148_v20  ;;  %v10151_v55 = vadd.f32 %v10150_v8, %v10054_v16 }
 0x3bb   : > { %v10242_v35 = vadd.f32 %v17522_v63, %v10219_v17  ;;  %v10220_v46 = vmul.f32 %v17517_v44, %v10159_v3 }
 0x3bc   : > { %v10240_v56 = vadd.f32 %v17522_v63, %v10217_v36  ;;  %v10218_v51 = vmul.f32 %v17517_v44, %v10151_v55 }
 0x3bd   : > { %v10274_v12 = vadd.f32 %v10258_v49, %v10242_v35  ;;  %v10243_v10 = vadd.f32 %v17522_v63, %v10220_v46 }
 0x3be   : > { %v10272_v48 = vadd.f32 %v10256_v7, %v10240_v56  ;;  %v10241_v30 = vadd.f32 %v17522_v63, %v10218_v51  ;;  %v10266_v51 = vld [vmem:[%s14722_s15 + $0x50] sm:$0xff] }
 0x3bf   : > { %v10290_v52 = vmax.f32 %v10274_v12, 0.0  ;;  %v10275_v39 = vadd.f32 %v10259_v32, %v10243_v10  ;;  %v13899_v26 = vpop.f32.mrb[212].mxu0 }
 0x3c0   : > { %v10288_v23 = vmax.f32 %v10272_v48, 0.0  ;;  %v10273_v60 = vadd.f32 %v10257_v6, %v10241_v30  ;;  %v10172_v21 = vadd.f32 %v13899_v26, %v10075_v9  ;;  %v10163_v25 = vpop.f32.mrb[213].mxu0  ;;  %v10264_v48 = vld [vmem:[%s14722_s15 + $0x40] sm:$0xff]  ;;  %v10267_v26 = vld [vmem:[%s14722_s15 + $0x58] sm:$0xff] }
 0x3c1   : > { %10306 = vst [vmem:[%s17538_s19 + $0x10] sm:$0xff] %v10290_v52  ;;  %v10291_v41 = vmax.f32 %v10275_v39, 0.0  ;;  %v10164_v1 = vadd.f32 %v10163_v25, %v10067_v15  ;;  %v13900_v38 = vpop.f32.mrb[214].mxu0  ;;  %v13519_v31 = vpop.f32.mrb[204].mxu1  ;;  %v10265_v25 = vld [vmem:[%s14722_s15 + $0x48] sm:$0xff] }
 0x3c2   : > { %10304 = vst [vmem:[%s17538_s19] sm:$0xff] %v10288_v23  ;;  %v10289_v24 = vmax.f32 %v10273_v60, 0.0  ;;  %v10223_v34 = vmul.f32 %v17517_v44, %v10172_v21  ;;  %v10175_v11 = vadd.f32 %v13900_v38, %v10078_v62  ;;  %v10166_v2 = vpop.f32.mrb[215].mxu0  ;;  %v13520_v14 = vpop.f32.mrb[205].mxu1 }
 0x3c3   : > { %10307 = vst [vmem:[%s17538_s19 + $0x18] sm:$0xff] %v10291_v41  ;;  %v10221_v61 = vmul.f32 %v17517_v44, %v10164_v1  ;;  %v10167_v47 = vadd.f32 %v10166_v2, %v10070_v40  ;;  %v13521_v59 = vadd.f32 %v13520_v14, %v13519_v31  ;;  %v13522_v33 = vpop.f32.mrb[206].mxu1 }
 0x3c4   : > { %10305 = vst [vmem:[%s17538_s19 + $0x8] sm:$0xff] %v10289_v24  ;;  %v10246_v45 = vadd.f32 %v17522_v63, %v10223_v34  ;;  %v10224_v29 = vmul.f32 %v17517_v44, %v10175_v11  ;;  %v13523_v62 = vpop.f32.mrb[207].mxu1 }
 0x3c5   : > { %v10244_v19 = vadd.f32 %v17522_v63, %v10221_v61  ;;  %v10222_v16 = vmul.f32 %v17517_v44, %v10167_v47  ;;  %v13524_v28 = vadd.f32 %v13523_v62, %v13522_v33  ;;  %v10107_v57 = vadd.f32 %v13521_v59, %v17489_v54  ;;  %v10270_v33 = vld [vmem:[%s14722_s15 + $0x70] sm:$0xff] }
 0x3c6   : > { %v10278_v9 = vadd.f32 %v10262_v50, %v10246_v45  ;;  %v10247_v15 = vadd.f32 %v17522_v63, %v10224_v29 }
 0x3c7   : > { %v10276_v40 = vadd.f32 %v10260_v53, %v10244_v19  ;;  %v10245_v37 = vadd.f32 %v17522_v63, %v10222_v16  ;;  %v10110_v8 = vadd.f32 %v13524_v28, %v17498_v4 }
 0x3c8   : > { %v10294_v20 = vmax.f32 %v10278_v9, 0.0  ;;  %v10279_v58 = vadd.f32 %v10263_v18, %v10247_v15  ;;  %v10268_v15 = vld [vmem:[%s14722_s15 + $0x60] sm:$0xff] }
 0x3c9   : > { %v10292_v17 = vmax.f32 %v10276_v40, 0.0  ;;  %v10277_v3 = vadd.f32 %v10261_v42, %v10245_v37  ;;  %v10271_v37 = vld [vmem:[%s14722_s15 + $0x78] sm:$0xff] }
 0x3ca   : > { %10310 = vst [vmem:[%s17538_s19 + $0x30] sm:$0xff] %v10294_v20  ;;  %v10295_v49 = vmax.f32 %v10279_v58, 0.0  ;;  %v13903_v36 = vpop.f32.mrb[216].mxu0 }
 0x3cb   : > { %10308 = vst [vmem:[%s17538_s19 + $0x20] sm:$0xff] %v10292_v17  ;;  %v10293_v55 = vmax.f32 %v10277_v3, 0.0  ;;  %v10188_v35 = vadd.f32 %v13903_v36, %v17502_v22  ;;  %v10179_v7 = vpop.f32.mrb[217].mxu0 }
 0x3cc   : > { %10311 = vst [vmem:[%s17538_s19 + $0x38] sm:$0xff] %v10295_v49  ;;  %v10180_v54 = vadd.f32 %v10179_v7, %v17504_v5  ;;  %v13904_v46 = vpop.f32.mrb[218].mxu0 }
 0x3cd   : > { %10309 = vst [vmem:[%s17538_s19 + $0x28] sm:$0xff] %v10293_v55  ;;  %v10227_v56 = vmul.f32 %v17517_v44, %v10188_v35  ;;  %v10191_v32 = vadd.f32 %v13904_v46, %v17506_v0  ;;  %v10182_v4 = vpop.f32.mrb[219].mxu0  ;;  %v13557_v12 = vpop.f32.mrb[208].mxu1 }
 0x3ce   : > { %v10225_v10 = vmul.f32 %v17517_v44, %v10180_v54  ;;  %v10183_v6 = vadd.f32 %v10182_v4, %v17508_v27  ;;  %v13558_v30 = vpop.f32.mrb[209].mxu1 }
 0x3cf   : > { %v10250_v22 = vadd.f32 %v17522_v63, %v10227_v56  ;;  %v10228_v5 = vmul.f32 %v17517_v44, %v10191_v32  ;;  %v17573_v39 = vadd.f32 %v13558_v30, %v13557_v12  ;;  %v13560_v0 = vpop.f32.mrb[210].mxu1 }
 0x3d0   : > { %v10248_v52 = vadd.f32 %v17522_v63, %v10225_v10  ;;  %v10226_v23 = vmul.f32 %v17517_v44, %v10183_v6  ;;  %v13561_v27 = vpop.f32.mrb[211].mxu1 }
 0x3d1   : > { %v10282_v60 = vadd.f32 %v10266_v51, %v10250_v22  ;;  %v10251_v21 = vadd.f32 %v17522_v63, %v10228_v5  ;;  %v13562_v38 = vadd.f32 %v13561_v27, %v13560_v0 }
 0x3d2   : > { %v10280_v41 = vadd.f32 %v10264_v48, %v10248_v52  ;;  %v10249_v1 = vadd.f32 %v17522_v63, %v10226_v23  ;;  %v13907_v24 = vpop.f32.mrb[220].mxu0 }
 0x3d3   : > { %v10298_v34 = vmax.f32 %v10282_v60, 0.0  ;;  %v10283_v11 = vadd.f32 %v10267_v26, %v10251_v21  ;;  %v10204_v2 = vadd.f32 %v13907_v24, %v10107_v57  ;;  %v10195_v31 = vpop.f32.mrb[221].mxu0 }
 0x3d4   : > { %v10296_v50 = vmax.f32 %v10280_v41, 0.0  ;;  %v10281_v61 = vadd.f32 %v10265_v25, %v10249_v1  ;;  %v10196_v47 = vadd.f32 %v10195_v31, %v17510_v43  ;;  %v13908_v45 = vpop.f32.mrb[222].mxu0 }
 0x3d5   : > { %10314 = vst [vmem:[%s17538_s19 + $0x50] sm:$0xff] %v10298_v34  ;;  %v10299_v14 = vmax.f32 %v10283_v11, 0.0  ;;  %v10231_v53 = vmul.f32 %v17517_v44, %v10204_v2  ;;  %v10207_v29 = vadd.f32 %v13908_v45, %v10110_v8  ;;  %v10198_v59 = vpop.f32.mrb[223].mxu0  ;;  %v13563_v18 = vpop.f32.mrb[212].mxu1 }
 0x3d6   : > { %10312 = vst [vmem:[%s17538_s19 + $0x40] sm:$0xff] %v10296_v50  ;;  %v10297_v19 = vmax.f32 %v10281_v61, 0.0  ;;  %v10229_v16 = vmul.f32 %v17517_v44, %v10196_v47  ;;  %v10199_v9 = vadd.f32 %v10198_v59, %v17512_v13  ;;  %v13564_v62 = vpop.f32.mrb[213].mxu1  ;;  %v10269_v13 = vld [vmem:[%s14722_s15 + $0x68] sm:$0xff] }
 0x3d7   : > { %10315 = vst [vmem:[%s17538_s19 + $0x58] sm:$0xff] %v10299_v14  ;;  %v10254_v43 = vadd.f32 %v17522_v63, %v10231_v53  ;;  %v10232_v42 = vmul.f32 %v17517_v44, %v10207_v29  ;;  %v13565_v28 = vadd.f32 %v13564_v62, %v13563_v18  ;;  %v13566_v57 = vpop.f32.mrb[214].mxu1 }
 0x3d8   : > { %10313 = vst [vmem:[%s17538_s19 + $0x48] sm:$0xff] %v10297_v19  ;;  %v10252_v40 = vadd.f32 %v17522_v63, %v10229_v16  ;;  %v10230_v20 = vmul.f32 %v17517_v44, %v10199_v9  ;;  %v13567_v3 = vpop.f32.mrb[215].mxu1 }
 0x3d9   : > { %v10286_v58 = vadd.f32 %v10270_v33, %v10254_v43  ;;  %v10255_v17 = vadd.f32 %v17522_v63, %v10232_v42  ;;  %v13568_v36 = vadd.f32 %v13567_v3, %v13566_v57 }
 0x3da   : > { %v10284_v8 = vadd.f32 %v10268_v15, %v10252_v40  ;;  %v10253_v49 = vadd.f32 %v17522_v63, %v10230_v20  ;;  %v13621_v55 = vpop.f32.mrb[224].mxu0 }
 0x3db   : > { %v10302_v35 = vmax.f32 %v10286_v58, 0.0  ;;  %v10287_v7 = vadd.f32 %v10271_v37, %v10255_v17  ;;  %v13622_v54 = vpop.f32.mrb[225].mxu0 }
 0x3dc   : > { %v10300_v46 = vmax.f32 %v10284_v8, 0.0  ;;  %v10285_v56 = vadd.f32 %v10269_v13, %v10253_v49  ;;  %v13623_v32 = vadd.f32 %v13622_v54, %v13621_v55  ;;  %v13624_v4 = vpop.f32.mrb[226].mxu0 }
 0x3dd   : > { %10318 = vst [vmem:[%s17538_s19 + $0x70] sm:$0xff] %v10302_v35  ;;  %v10303_v51 = vmax.f32 %v10287_v7, 0.0  ;;  %v13625_v12 = vpop.f32.mrb[227].mxu0  ;;  %v13569_v6 = vpop.f32.mrb[216].mxu1 }
 0x3de   : > { %10316 = vst [vmem:[%s17538_s19 + $0x60] sm:$0xff] %v10300_v46  ;;  %v10301_v10 = vmax.f32 %v10285_v56, 0.0  ;;  %v17601_v22 = vadd.f32 %v13623_v32, %v17573_v39  ;;  %v13626_v48 = vadd.f32 %v13625_v12, %v13624_v4  ;;  %v13570_v30 = vpop.f32.mrb[217].mxu1 }
 0x3df   : > { %10319 = vst [vmem:[%s17538_s19 + $0x78] sm:$0xff] %v10303_v51  ;;  %v13571_v5 = vadd.f32 %v13570_v30, %v13569_v6  ;;  %v13572_v52 = vpop.f32.mrb[218].mxu1 }
 0x3e0   : > { %10317 = vst [vmem:[%s17538_s19 + $0x68] sm:$0xff] %v10301_v10  ;;  %v17605_v26 = vadd.f32 %v13626_v48, %v13562_v38  ;;  %v13573_v0 = vpop.f32.mrb[219].mxu1 }
 0x3e1   : > { %v13574_v23 = vadd.f32 %v13573_v0, %v13572_v52 }
 0x3e2   : > { %v13627_v60 = vpop.f32.mrb[228].mxu0 }
 0x3e3   : > { %v13628_v21 = vpop.f32.mrb[229].mxu0 }
 0x3e4   : > { %v13629_v25 = vadd.f32 %v13628_v21, %v13627_v60  ;;  %v13630_v27 = vpop.f32.mrb[230].mxu0 }
 0x3e5   : > { %v13631_v41 = vpop.f32.mrb[231].mxu0  ;;  %v13575_v1 = vpop.f32.mrb[220].mxu1 }
 0x3e6   : > { %v17607_v24 = vadd.f32 %v13629_v25, %v13565_v28  ;;  %v13632_v39 = vadd.f32 %v13631_v41, %v13630_v27  ;;  %v13576_v34 = vpop.f32.mrb[221].mxu1 }
 0x3e7   : > { %v13577_v11 = vadd.f32 %v13576_v34, %v13575_v1  ;;  %v13578_v2 = vpop.f32.mrb[222].mxu1 }
 0x3e8   : > { %v17609_v31 = vadd.f32 %v13632_v39, %v13568_v36  ;;  %v13579_v50 = vpop.f32.mrb[223].mxu1 }
 0x3e9   : > { %v13580_v61 = vadd.f32 %v13579_v50, %v13578_v2 }
 0x3ea   : > { %v13633_v38 = vpop.f32.mrb[232].mxu0 }
 0x3eb   : > { %v13634_v47 = vpop.f32.mrb[233].mxu0 }
 0x3ec   : > { %v13635_v45 = vadd.f32 %v13634_v47, %v13633_v38  ;;  %v13636_v14 = vpop.f32.mrb[234].mxu0 }
 0x3ed   : > { %v13637_v53 = vpop.f32.mrb[235].mxu0  ;;  %v13581_v29 = vpop.f32.mrb[224].mxu1 }
 0x3ee   : > { %v17611_v59 = vadd.f32 %v13635_v45, %v13571_v5  ;;  %v13638_v19 = vadd.f32 %v13637_v53, %v13636_v14  ;;  %v13582_v33 = vpop.f32.mrb[225].mxu1 }
 0x3ef   : > { %v13583_v18 = vadd.f32 %v13582_v33, %v13581_v29  ;;  %v13584_v16 = vpop.f32.mrb[226].mxu1 }
 0x3f0   : > { %v17613_v9 = vadd.f32 %v13638_v19, %v13574_v23  ;;  %v13585_v43 = vpop.f32.mrb[227].mxu1 }
 0x3f1   : > { %v13586_v15 = vadd.f32 %v13585_v43, %v13584_v16 }
 0x3f2   : > { %v13639_v62 = vpop.f32.mrb[236].mxu0 }
 0x3f3   : > { %v13640_v42 = vpop.f32.mrb[237].mxu0 }
 0x3f4   : > { %v13641_v40 = vadd.f32 %v13640_v42, %v13639_v62  ;;  %v13642_v28 = vpop.f32.mrb[238].mxu0 }
 0x3f5   : > { %v13587_v37 = vpop.f32.mrb[228].mxu1  ;;  %v13643_v57 = vpop.f32.mrb[239].mxu0 }
 0x3f6   : > { %v13588_v20 = vpop.f32.mrb[229].mxu1  ;;  %v17615_v58 = vadd.f32 %v13641_v40, %v13577_v11  ;;  %v13644_v17 = vadd.f32 %v13643_v57, %v13642_v28 }
 0x3f7   : > { %v13589_v13 = vadd.f32 %v13588_v20, %v13587_v37  ;;  %v13590_v3 = vpop.f32.mrb[230].mxu1 }
 0x3f8   : > { %v13591_v8 = vpop.f32.mrb[231].mxu1  ;;  %v17617_v49 = vadd.f32 %v13644_v17, %v13580_v61 }
 0x3f9   : > { %v13592_v36 = vadd.f32 %v13591_v8, %v13590_v3 }
 0x3fa   : > { %v13645_v55 = vpop.f32.mrb[240].mxu0 }
 0x3fb   : > { %v13646_v7 = vpop.f32.mrb[241].mxu0 }
 0x3fc   : > { %v13647_v46 = vadd.f32 %v13646_v7, %v13645_v55  ;;  %v13648_v56 = vpop.f32.mrb[242].mxu0 }
 0x3fd   : > { %v13593_v35 = vpop.f32.mrb[232].mxu1  ;;  %v13649_v51 = vpop.f32.mrb[243].mxu0 }
 0x3fe   : > { %v13594_v54 = vpop.f32.mrb[233].mxu1  ;;  %v17619_v12 = vadd.f32 %v13647_v46, %v13583_v18  ;;  %v13650_v6 = vadd.f32 %v13649_v51, %v13648_v56 }
 0x3ff   : > { %v13595_v32 = vadd.f32 %v13594_v54, %v13593_v35  ;;  %v13596_v4 = vpop.f32.mrb[234].mxu1 }
 0x400   : > { %v13597_v10 = vpop.f32.mrb[235].mxu1  ;;  %v17621_v30 = vadd.f32 %v13650_v6, %v13586_v15 }
 0x401   : > { %v13598_v48 = vadd.f32 %v13597_v10, %v13596_v4 }
 0x402   : > { %v13651_v52 = vpop.f32.mrb[244].mxu0 }
 0x403   : > { %v13652_v60 = vpop.f32.mrb[245].mxu0 }
 0x404   : > { %v13653_v25 = vadd.f32 %v13652_v60, %v13651_v52  ;;  %v13654_v27 = vpop.f32.mrb[246].mxu0 }
 0x405   : > { %v13599_v5 = vpop.f32.mrb[236].mxu1  ;;  %v13655_v39 = vpop.f32.mrb[247].mxu0 }
 0x406   : > { %v13600_v0 = vpop.f32.mrb[237].mxu1  ;;  %v17623_v34 = vadd.f32 %v13653_v25, %v13589_v13  ;;  %v13656_v11 = vadd.f32 %v13655_v39, %v13654_v27 }
 0x407   : > { %v13601_v23 = vadd.f32 %v13600_v0, %v13599_v5  ;;  %v13602_v21 = vpop.f32.mrb[238].mxu1 }
 0x408   : > { %v13603_v41 = vpop.f32.mrb[239].mxu1  ;;  %v17625_v2 = vadd.f32 %v13656_v11, %v13592_v36 }
 0x409   : > { %v13604_v1 = vadd.f32 %v13603_v41, %v13602_v21 }
 0x40a   : > { %v13657_v50 = vpop.f32.mrb[248].mxu0 }
 0x40b   : > { %v13658_v61 = vpop.f32.mrb[249].mxu0 }
 0x40c   : > { %v13659_v38 = vadd.f32 %v13658_v61, %v13657_v50  ;;  %v13660_v47 = vpop.f32.mrb[250].mxu0 }
 0x40d   : > { %v13661_v45 = vpop.f32.mrb[251].mxu0  ;;  %v13685_v29 = vpop.f32.mrb[240].mxu1 }
 0x40e   : > { %v17627_v14 = vadd.f32 %v13659_v38, %v13595_v32  ;;  %v13662_v53 = vadd.f32 %v13661_v45, %v13660_v47  ;;  %v13686_v33 = vpop.f32.mrb[241].mxu1 }
 0x40f   : > { %v13687_v18 = vadd.f32 %v13686_v33, %v13685_v29  ;;  %v13688_v16 = vpop.f32.mrb[242].mxu1 }
 0x410   : > { %v17629_v19 = vadd.f32 %v13662_v53, %v13598_v48  ;;  %v13689_v43 = vpop.f32.mrb[243].mxu1 }
 0x411   : > { %v11197_v15 = vadd.f32 %v13687_v18, %v17601_v22  ;;  %v13690_v62 = vadd.f32 %v13689_v43, %v13688_v16 }
 0x412   : > { %v13663_v42 = vpop.f32.mrb[252].mxu0 }
 0x413   : > { %v13664_v40 = vpop.f32.mrb[253].mxu0  ;;  %v11200_v28 = vadd.f32 %v13690_v62, %v17605_v26 }
 0x414   : > { %v13665_v37 = vadd.f32 %v13664_v40, %v13663_v42  ;;  %v13666_v57 = vpop.f32.mrb[254].mxu0 }
 0x415   : > { %v13667_v20 = vpop.f32.mrb[255].mxu0  ;;  %v13691_v3 = vpop.f32.mrb[244].mxu1 }
 0x416   : > { %v17633_v17 = vadd.f32 %v13665_v37, %v13601_v23  ;;  %v13668_v13 = vadd.f32 %v13667_v20, %v13666_v57  ;;  %v13692_v36 = vpop.f32.mrb[245].mxu1 }
 0x417   : > { %v13693_v55 = vadd.f32 %v13692_v36, %v13691_v3  ;;  %v13694_v35 = vpop.f32.mrb[246].mxu1 }
 0x418   : > { %v17635_v8 = vadd.f32 %v13668_v13, %v13604_v1  ;;  %v13695_v7 = vpop.f32.mrb[247].mxu1 }
 0x419   : > { %v11205_v22 = vadd.f32 %v13693_v55, %v17607_v24  ;;  %v13696_v54 = vadd.f32 %v13695_v7, %v13694_v35 }
 0x41a   : > { %v13749_v56 = vpop.f32.mrb[0].mxu0 }
 0x41b   : > { %v11208_v46 = vadd.f32 %v13696_v54, %v17609_v31  ;;  %v13750_v26 = vpop.f32.mrb[1].mxu0 }
 0x41c   : > { %v13751_v32 = vadd.f32 %v13750_v26, %v13749_v56  ;;  %v13752_v4 = vpop.f32.mrb[2].mxu0 }
 0x41d   : > { %v13753_v51 = vpop.f32.mrb[3].mxu0  ;;  %v13697_v10 = vpop.f32.mrb[248].mxu1 }
 0x41e   : > { %v13754_v6 = vadd.f32 %v13753_v51, %v13752_v4  ;;  %v17639_v48 = vadd.f32 %v13751_v32, %v11197_v15  ;;  %v13698_v5 = vpop.f32.mrb[249].mxu1 }
 0x41f   : > { %v13699_v52 = vadd.f32 %v13698_v5, %v13697_v10  ;;  %v13700_v0 = vpop.f32.mrb[250].mxu1 }
 0x420   : > { %v17641_v23 = vadd.f32 %v13754_v6, %v11200_v28  ;;  %v13701_v60 = vpop.f32.mrb[251].mxu1 }
 0x421   : > { %v11213_v24 = vadd.f32 %v13699_v52, %v17611_v59  ;;  %v13702_v21 = vadd.f32 %v13701_v60, %v13700_v0 }
 0x422   : > { %v13755_v25 = vpop.f32.mrb[4].mxu0 }
 0x423   : > { %v11216_v31 = vadd.f32 %v13702_v21, %v17613_v9  ;;  %v13756_v27 = vpop.f32.mrb[5].mxu0 }
 0x424   : > { %v13757_v41 = vadd.f32 %v13756_v27, %v13755_v25  ;;  %v13758_v1 = vpop.f32.mrb[6].mxu0 }
 0x425   : > { %v13759_v39 = vpop.f32.mrb[7].mxu0 }
 0x426   : > { %v13760_v11 = vadd.f32 %v13759_v39, %v13758_v1  ;;  %v17645_v50 = vadd.f32 %v13757_v41, %v11205_v22 }
 0x427   : > { %v13703_v61 = vpop.f32.mrb[252].mxu1 }
 0x428   : > { %v13704_v38 = vpop.f32.mrb[253].mxu1  ;;  %v17647_v47 = vadd.f32 %v13760_v11, %v11208_v46 }
 0x429   : > { %v13705_v45 = vadd.f32 %v13704_v38, %v13703_v61  ;;  %v13706_v53 = vpop.f32.mrb[254].mxu1 }
 0x42a   : > { %v13707_v29 = vpop.f32.mrb[255].mxu1 }
 0x42b   : > { %v11221_v59 = vadd.f32 %v13705_v45, %v17615_v58  ;;  %v13708_v33 = vadd.f32 %v13707_v29, %v13706_v53 }
 0x42d   : > { %v11224_v9 = vadd.f32 %v13708_v33, %v17617_v49 }
 0x42e   : > { %v13761_v18 = vpop.f32.mrb[8].mxu0 }
 0x42f   : > { %v13762_v16 = vpop.f32.mrb[9].mxu0 }
 0x430   : > { %v13763_v43 = vadd.f32 %v13762_v16, %v13761_v18  ;;  %v13764_v15 = vpop.f32.mrb[10].mxu0 }
 0x431   : > { %v13765_v62 = vpop.f32.mrb[11].mxu0 }
 0x432   : > { %v13766_v42 = vadd.f32 %v13765_v62, %v13764_v15  ;;  %v17651_v40 = vadd.f32 %v13763_v43, %v11213_v24 }
 0x433   : > { %v13709_v28 = vpop.f32.mrb[0].mxu1 }
 0x434   : > { %v13710_v37 = vpop.f32.mrb[1].mxu1  ;;  %v17653_v57 = vadd.f32 %v13766_v42, %v11216_v31 }
 0x435   : > { %v13711_v20 = vadd.f32 %v13710_v37, %v13709_v28  ;;  %v13712_v13 = vpop.f32.mrb[2].mxu1 }
 0x436   : > { %v13713_v3 = vpop.f32.mrb[3].mxu1 }
 0x437   : > { %v11229_v58 = vadd.f32 %v13711_v20, %v17619_v12  ;;  %v13714_v36 = vadd.f32 %v13713_v3, %v13712_v13 }
 0x439   : > { %v11232_v49 = vadd.f32 %v13714_v36, %v17621_v30  ;;  %v13767_v55 = vpop.f32.mrb[12].mxu0 }
 0x43a   : > { %v13768_v35 = vpop.f32.mrb[13].mxu0 }
 0x43b   : > { %v13769_v7 = vadd.f32 %v13768_v35, %v13767_v55  ;;  %v13770_v22 = vpop.f32.mrb[14].mxu0 }
 0x43c   : > { %v13771_v54 = vpop.f32.mrb[15].mxu0 }
 0x43d   : > { %v13772_v46 = vadd.f32 %v13771_v54, %v13770_v22  ;;  %v17657_v56 = vadd.f32 %v13769_v7, %v11221_v59 }
 0x43f   : > { %v13715_v26 = vpop.f32.mrb[4].mxu1  ;;  %v17659_v4 = vadd.f32 %v13772_v46, %v11224_v9 }
 0x440   : > { %v13716_v32 = vpop.f32.mrb[5].mxu1 }
 0x441   : > { %v13717_v51 = vadd.f32 %v13716_v32, %v13715_v26  ;;  %v13718_v10 = vpop.f32.mrb[6].mxu1  ;;  %v12656_v32 = vld [vmem:[%s14722_s15 + $0x90] sm:$0xff] }
 0x442   : > { %v13719_v6 = vpop.f32.mrb[7].mxu1 }
 0x443   : > { %v11237_v12 = vadd.f32 %v13717_v51, %v17623_v34  ;;  %v13720_v5 = vadd.f32 %v13719_v6, %v13718_v10 }
 0x445   : > { %v11240_v30 = vadd.f32 %v13720_v5, %v17625_v2  ;;  %v13773_v52 = vpop.f32.mrb[16].mxu0 }
 0x446   : > { %v13774_v0 = vpop.f32.mrb[17].mxu0 }
 0x447   : > { %v13775_v60 = vadd.f32 %v13774_v0, %v13773_v52  ;;  %v13776_v24 = vpop.f32.mrb[18].mxu0 }
 0x448   : > { %v13777_v21 = vpop.f32.mrb[19].mxu0 }
 0x449   : > { %v13778_v25 = vadd.f32 %v13777_v21, %v13776_v24  ;;  %v17663_v27 = vadd.f32 %v13775_v60, %v11229_v58  ;;  %v12655_v60 = vld [vmem:[%s14722_s15 + $0x88] sm:$0xff] }
 0x44a   : > { %v13721_v31 = vpop.f32.mrb[8].mxu1 }
 0x44b   : > { %v13722_v41 = vpop.f32.mrb[9].mxu1  ;;  %v17665_v11 = vadd.f32 %v13778_v25, %v11232_v49 }
 0x44c   : > { %v13723_v1 = vadd.f32 %v13722_v41, %v13721_v31  ;;  %v13724_v39 = vpop.f32.mrb[10].mxu1 }
 0x44d   : > { %v13725_v61 = vpop.f32.mrb[11].mxu1 }
 0x44e   : > { %v11245_v34 = vadd.f32 %v13723_v1, %v17627_v14  ;;  %v13726_v38 = vadd.f32 %v13725_v61, %v13724_v39 }
 0x450   : > { %v11248_v2 = vadd.f32 %v13726_v38, %v17629_v19 }
 0x451   : > { %v13779_v45 = vpop.f32.mrb[20].mxu0 }
 0x452   : > { %v13780_v53 = vpop.f32.mrb[21].mxu0 }
 0x453   : > { %v13781_v29 = vadd.f32 %v13780_v53, %v13779_v45  ;;  %v13782_v59 = vpop.f32.mrb[22].mxu0 }
 0x454   : > { %v13783_v33 = vpop.f32.mrb[23].mxu0 }
 0x455   : > { %v13784_v18 = vadd.f32 %v13783_v33, %v13782_v59  ;;  %v17669_v16 = vadd.f32 %v13781_v29, %v11237_v12  ;;  %v12660_v59 = vld [vmem:[%s14722_s15 + $0xb0] sm:$0xff] }
 0x456   : > { %v13727_v9 = vpop.f32.mrb[12].mxu1 }
 0x457   : > { %v13728_v43 = vpop.f32.mrb[13].mxu1  ;;  %v17671_v42 = vadd.f32 %v13784_v18, %v11240_v30  ;;  %v12657_v30 = vld [vmem:[%s14722_s15 + $0x98] sm:$0xff]  ;;  %v12658_v18 = vld [vmem:[%s14722_s15 + $0xa0] sm:$0xff] }
 0x458   : > { %v13729_v15 = vadd.f32 %v13728_v43, %v13727_v9  ;;  %v13730_v62 = vpop.f32.mrb[14].mxu1 }
 0x459   : > { %v13731_v28 = vpop.f32.mrb[15].mxu1 }
 0x45a   : > { %v17674_v14 = vadd.f32 %v13729_v15, %v17633_v17  ;;  %v13732_v37 = vadd.f32 %v13731_v28, %v13730_v62  ;;  %v12661_v62 = vld [vmem:[%s14722_s15 + $0xb8] sm:$0xff] }
 0x45b   : > { %v13785_v20 = vpop.f32.mrb[24].mxu0 }
 0x45c   : > { %v17677_v19 = vadd.f32 %v13732_v37, %v17635_v8  ;;  %v13786_v13 = vpop.f32.mrb[25].mxu0 }
 0x45d   : > { %v13787_v58 = vadd.f32 %v13786_v13, %v13785_v20  ;;  %v13788_v36 = vpop.f32.mrb[26].mxu0  ;;  %v12659_v20 = vld [vmem:[%s14722_s15 + $0xa8] sm:$0xff] }
 0x45e   : > { %v13927_v3 = vpop.f32.mrb[16].mxu1  ;;  %v13789_v35 = vpop.f32.mrb[27].mxu0 }
 0x45f   : > { %v11399_v49 = vadd.f32 %v13927_v3, %v17645_v50  ;;  %v11390_v55 = vpop.f32.mrb[17].mxu1  ;;  %v13790_v22 = vadd.f32 %v13789_v35, %v13788_v36  ;;  %v17681_v54 = vadd.f32 %v13787_v58, %v11245_v34 }
 0x460   : > { %v11391_v7 = vadd.f32 %v11390_v55, %v17639_v48  ;;  %v13928_v17 = vpop.f32.mrb[18].mxu1  ;;  %v12654_v48 = vld [vmem:[%s14722_s15 + $0x80] sm:$0xff] }
 0x461   : > { %v11462_v8 = vmul.f32 %v17517_v44, %v11399_v49  ;;  %v11402_v46 = vadd.f32 %v13928_v17, %v17647_v47  ;;  %v11393_v26 = vpop.f32.mrb[19].mxu1  ;;  %v17688_v10 = vadd.f32 %v13790_v22, %v11248_v2 }
 0x462   : > { %v11460_v51 = vmul.f32 %v17517_v44, %v11391_v7  ;;  %v11394_v50 = vadd.f32 %v11393_v26, %v17641_v23 }
 0x463   : > { %v11485_v6 = vadd.f32 %v17522_v63, %v11462_v8  ;;  %v11463_v12 = vmul.f32 %v17517_v44, %v11402_v46 }
 0x464   : > { %v11483_v5 = vadd.f32 %v17522_v63, %v11460_v51  ;;  %v11461_v52 = vmul.f32 %v17517_v44, %v11394_v50 }
 0x465   : > { %v11518_v47 = vadd.f32 %v12656_v32, %v11485_v6  ;;  %v11486_v0 = vadd.f32 %v17522_v63, %v11463_v12  ;;  %v12664_v12 = vld [vmem:[%s14722_s15 + $0xd0] sm:$0xff] }
 0x466   : > { %v11516_v24 = vadd.f32 %v12654_v48, %v11483_v5  ;;  %v11484_v23 = vadd.f32 %v17522_v63, %v11461_v52  ;;  %v13931_v21 = vpop.f32.mrb[20].mxu1 }
 0x467   : > { %v11534_v31 = vmax.f32 %v11518_v47, 0.0  ;;  %v11519_v25 = vadd.f32 %v12657_v30, %v11486_v0  ;;  %v11415_v41 = vadd.f32 %v13931_v21, %v17657_v56  ;;  %v11406_v1 = vpop.f32.mrb[21].mxu1  ;;  %v12662_v47 = vld [vmem:[%s14722_s15 + $0xc0] sm:$0xff] }
 0x468   : > { %v11532_v39 = vmax.f32 %v11516_v24, 0.0  ;;  %v11517_v61 = vadd.f32 %v12655_v60, %v11484_v23  ;;  %v11407_v34 = vadd.f32 %v11406_v1, %v17651_v40  ;;  %v13932_v38 = vpop.f32.mrb[22].mxu1  ;;  %v12665_v24 = vld [vmem:[%s14722_s15 + $0xd8] sm:$0xff] }
 0x469   : > { %12672 = vst [vmem:[%s17538_s19 + $0x90] sm:$0xff] %v11534_v31  ;;  %v11535_v2 = vmax.f32 %v11519_v25, 0.0  ;;  %v11466_v45 = vmul.f32 %v17517_v44, %v11415_v41  ;;  %v11418_v53 = vadd.f32 %v13932_v38, %v17659_v4  ;;  %v11409_v29 = vpop.f32.mrb[23].mxu1  ;;  %v12663_v25 = vld [vmem:[%s14722_s15 + $0xc8] sm:$0xff] }
 0x46a   : > { %12670 = vst [vmem:[%s17538_s19 + $0x80] sm:$0xff] %v11532_v39  ;;  %v11533_v56 = vmax.f32 %v11517_v61, 0.0  ;;  %v11464_v33 = vmul.f32 %v17517_v44, %v11407_v34  ;;  %v11410_v9 = vadd.f32 %v11409_v29, %v17653_v57 }
 0x46b   : > { %12673 = vst [vmem:[%s17538_s19 + $0x98] sm:$0xff] %v11535_v2  ;;  %v11489_v40 = vadd.f32 %v17522_v63, %v11466_v45  ;;  %v11467_v43 = vmul.f32 %v17517_v44, %v11418_v53 }
 0x46c   : > { %12671 = vst [vmem:[%s17538_s19 + $0x88] sm:$0xff] %v11533_v56  ;;  %v11487_v15 = vadd.f32 %v17522_v63, %v11464_v33  ;;  %v11465_v4 = vmul.f32 %v17517_v44, %v11410_v9 }
 0x46d   : > { %v11522_v28 = vadd.f32 %v12660_v59, %v11489_v40  ;;  %v11490_v37 = vadd.f32 %v17522_v63, %v11467_v43 }
 0x46e   : > { %v11520_v13 = vadd.f32 %v12658_v18, %v11487_v15  ;;  %v11488_v57 = vadd.f32 %v17522_v63, %v11465_v4  ;;  %v13935_v3 = vpop.f32.mrb[24].mxu1  ;;  %v12668_v18 = vld [vmem:[%s14722_s15 + $0xf0] sm:$0xff] }
 0x46f   : > { %v11538_v58 = vmax.f32 %v11522_v28, 0.0  ;;  %v11523_v36 = vadd.f32 %v12661_v62, %v11490_v37  ;;  %v11431_v49 = vadd.f32 %v13935_v3, %v17669_v16  ;;  %v11422_v55 = vpop.f32.mrb[25].mxu1  ;;  %v12666_v62 = vld [vmem:[%s14722_s15 + $0xe0] sm:$0xff]  ;;  %v12669_v37 = vld [vmem:[%s14722_s15 + $0xf8] sm:$0xff]  ;;  %v12667_v3 = vld [vmem:[%s14722_s15 + $0xe8] sm:$0xff]  ;;  %s14450_s15 = scalar_lea.vmem %s17767_s14, 4096 }
 0x470   : > { %v11536_v7 = vmax.f32 %v11520_v13, 0.0  ;;  %v11521_v17 = vadd.f32 %v12659_v20, %v11488_v57  ;;  %v11423_v22 = vadd.f32 %v11422_v55, %v17663_v27  ;;  %v13936_v8 = vpop.f32.mrb[26].mxu1  ;;  %p14451_p6 = scmp.ne.s32.totalorder %s17767_s14, %s14450_s15  ;;  %p14458_p3 = scmp.lt.s32.totalorder %s14456_s22, %s14450_s15 }
 0x471   : > { %v13791_v35 = vpop.f32.mrb[28].mxu0  ;;  %12676 = vst [vmem:[%s17538_s19 + $0xb0] sm:$0xff] %v11538_v58  ;;  %v11539_v26 = vmax.f32 %v11523_v36, 0.0  ;;  %v11470_v32 = vmul.f32 %v17517_v44, %v11431_v49  ;;  %v11434_v51 = vadd.f32 %v13936_v8, %v17671_v42  ;;  %v11425_v50 = vpop.f32.mrb[27].mxu1 }
 0x472   : > { %v13792_v46 = vpop.f32.mrb[29].mxu0  ;;  %12674 = vst [vmem:[%s17538_s19 + $0xa0] sm:$0xff] %v11536_v7  ;;  %v11537_v48 = vmax.f32 %v11521_v17, 0.0  ;;  %v11468_v27 = vmul.f32 %v17517_v44, %v11423_v22  ;;  %v11426_v5 = vadd.f32 %v11425_v50, %v17665_v11  ;;  %p14452_p8 = pnand %p14451_p6, %p14668_p12  ;;  %p14459_p7 = por %p14458_p3, %p14457_p13 }
 0x473   : > { %v13793_v16 = vadd.f32 %v13792_v46, %v13791_v35  ;;  %v13794_v6 = vpop.f32.mrb[30].mxu0  ;;  %12677 = vst [vmem:[%s17538_s19 + $0xb8] sm:$0xff] %v11539_v26  ;;  %v11493_v52 = vadd.f32 %v17522_v63, %v11470_v32  ;;  %v11471_v0 = vmul.f32 %v17517_v44, %v11434_v51 }
 0x474   : > { %v13795_v30 = vpop.f32.mrb[31].mxu0  ;;  %12675 = vst [vmem:[%s17538_s19 + $0xa8] sm:$0xff] %v11537_v48  ;;  %v11491_v60 = vadd.f32 %v17522_v63, %v11468_v27  ;;  %v11469_v23 = vmul.f32 %v17517_v44, %v11426_v5  ;;  %p14453_p10 = pneg %p14452_p8 }
 0x475   : > { %v13796_v42 = vadd.f32 %v13795_v30, %v13794_v6  ;;  %v11350_v21 = vadd.f32 %v13793_v16, %v17674_v14  ;;  %v11526_v31 = vadd.f32 %v12664_v12, %v11493_v52  ;;  %v11494_v11 = vadd.f32 %v17522_v63, %v11471_v0 }
 0x476   : > { %v11524_v41 = vadd.f32 %v12662_v47, %v11491_v60  ;;  %v11492_v1 = vadd.f32 %v17522_v63, %v11469_v23  ;;  %v13939_v39 = vpop.f32.mrb[28].mxu1  ;;  %p14460_p9 = pnand %p14459_p7, %p14453_p10 }
 0x477   : > { %v11353_v61 = vadd.f32 %v13796_v42, %v17677_v19  ;;  %v11542_v34 = vmax.f32 %v11526_v31, 0.0  ;;  %v11527_v38 = vadd.f32 %v12665_v24, %v11494_v11  ;;  %v11447_v2 = vadd.f32 %v13939_v39, %v11350_v21  ;;  %v11438_v45 = vpop.f32.mrb[29].mxu1 }
 0x478   : > { %v11540_v53 = vmax.f32 %v11524_v41, 0.0  ;;  %v11525_v14 = vadd.f32 %v12663_v25, %v11492_v1  ;;  %v11439_v29 = vadd.f32 %v11438_v45, %v17681_v54  ;;  %v13940_v56 = vpop.f32.mrb[30].mxu1 }
 0x479   : > { %12680 = vst [vmem:[%s17538_s19 + $0xd0] sm:$0xff] %v11542_v34  ;;  %v11543_v59 = vmax.f32 %v11527_v38, 0.0  ;;  %v11474_v33 = vmul.f32 %v17517_v44, %v11447_v2  ;;  %v11450_v9 = vadd.f32 %v13940_v56, %v11353_v61  ;;  %v11441_v19 = vpop.f32.mrb[31].mxu1 }
 0x47a   : > { %12678 = vst [vmem:[%s17538_s19 + $0xc0] sm:$0xff] %v11540_v53  ;;  %v11541_v40 = vmax.f32 %v11525_v14, 0.0  ;;  %v11472_v43 = vmul.f32 %v17517_v44, %v11439_v29  ;;  %v11442_v15 = vadd.f32 %v11441_v19, %v17688_v10 }
 0x47b   : > { %12681 = vst [vmem:[%s17538_s19 + $0xd8] sm:$0xff] %v11543_v59  ;;  %v11497_v54 = vadd.f32 %v17522_v63, %v11474_v33  ;;  %v11475_v4 = vmul.f32 %v17517_v44, %v11450_v9 }
 0x47c   : > { %12679 = vst [vmem:[%s17538_s19 + $0xc8] sm:$0xff] %v11541_v40  ;;  %v11495_v28 = vadd.f32 %v17522_v63, %v11472_v43  ;;  %v11473_v20 = vmul.f32 %v17517_v44, %v11442_v15 }
 0x47d   : > { %v11530_v13 = vadd.f32 %v12668_v18, %v11497_v54  ;;  %v11498_v57 = vadd.f32 %v17522_v63, %v11475_v4 }
 0x47e   : > { %v11528_v10 = vadd.f32 %v12666_v62, %v11495_v28  ;;  %v11496_v58 = vadd.f32 %v17522_v63, %v11473_v20 }
 0x47f   : > { %v11546_v36 = vmax.f32 %v11530_v13, 0.0  ;;  %v11531_v49 = vadd.f32 %v12669_v37, %v11498_v57 }
 0x480   : > { %v11544_v55 = vmax.f32 %v11528_v10, 0.0  ;;  %v11529_v35 = vadd.f32 %v12667_v3, %v11496_v58 }
 0x481   : > { %12684 = vst [vmem:[%s17538_s19 + $0xf0] sm:$0xff] %v11546_v36  ;;  %v11547_v44 = vmax.f32 %v11531_v49, 0.0 }
 0x482   : > { %12682 = vst [vmem:[%s17538_s19 + $0xe0] sm:$0xff] %v11544_v55  ;;  %v11545_v63 = vmax.f32 %v11529_v35, 0.0 }
 0x483   : > { %12685 = vst [vmem:[%s17538_s19 + $0xf8] sm:$0xff] %v11547_v44 }
 0x484   : > { %12683 = vst [vmem:[%s17538_s19 + $0xe8] sm:$0xff] %v11545_v63 }
 0x485   : > { %14463 = shalt.err (!%p14460_p9)
}
 0x486   : > { %s14464_s20 = scalar_lea.hbm %s17765_s11, 4096  ;;  %s14468_s19 = scalar_lea.hbm %s17822_s8, 8192 }
 0x487   : > { %p14465_p2 = scmp.ne.s32.totalorder %s17765_s11, %s14464_s20  ;;  %p14469_p11 = scmp.lt.u32.totalorder %s17765_s11, %s17822_s8 }
 0x488   : > { %p14470_p1 = scmp.lt.u32.totalorder %s14468_s19, %s14464_s20  ;;  %p14472_p6 = scmp.lt.u32.totalorder %s14464_s20, %s17765_s11 }
 0x489   : > { %p14466_p0 = pnand %p14465_p2, %p14668_p12 }
 0x48a   : > { %p14471_p4 = por %p14470_p1, %p14469_p11 }
 0x48b   : > { %p14467_p5 = pneg %p14466_p0 }
 0x48c   : > { %p14473_p8 = por %p14472_p6, %p14471_p4 }
 0x48e   : > { %p14474_p10 = pnand %p14473_p8, %p14467_p5 }
 0x490   : > { %14477 = shalt.err (!%p14474_p10)
}
 0x491   : > { %s14530_s17 = smov 128   ;;  %s14531_s15 = smov 8  }
 0x492   : > { %13948 = dma.vmem_to_hbm [thread:$0]  (%p14668_p12), %s17767_s14, 4096, %s17765_s11, %s11566_s9, %s14530_s17, %s14530_s17, %s14531_s15  }
 0x493 PF: > { %s11594_s13 = sand.u32 1, %s14508_s27   ;;  %p17880_p13 = scmp.ne.s32.totalorder %s17829_s12, 0 }
 0x494   : > { %p17881_p3 = scmp.ge.s32.totalorder %s14520_s30, 2  ;;  %s11595_s25 = scalar_lea.sflag [#allocation6], %s11594_s13 }
 0x496   : > { %p13959_p7 = pnand %p17881_p3, %p17880_p13 }
 0x498   : > { %14503 = dma.done.wait (!%p13959_p7), %s11595_s25, 4096  }
 0x499   : > { %14505 = vsyncadd (!%p13959_p7), %s11595_s25, 4294963200  ;;  %s17882_s30 = sld [smem:[#allocation13_spill]]  ;;  %s17883_s27 = smov %s14512_s28 }
 0x49a   : > { %s17884_s28 = smov %s14516_s29  ;;  %s17885_s29 = smov %s14664_s23 }
 0x49f   : > { %p22_p9 = scmp.ge.s32.totalorder %s17882_s30, 4  }
 0x4a1   :  { %24 = sbr.rel (!%p22_p9) target bundleno = 6 (0x6), region = 112 }
 0x4a8   :  { %11600 = vsyncpa [#allocation5], 1 }
 0x4a9   :  { %11602 = vsyncpa [#allocation5 + $0x1], 1 }
 0x4aa   :  { %11603 = vsyncpa [#allocation8], 1 }
 0x4ab   :  { %11604 = vsyncpa [#allocation6], 1 }
 0x4ac   :  { %11606 = vsyncpa [#allocation6 + $0x1], 1 }

</bundles_post_ra>
